<compile_context>
chip_gen: v7x
topology: tpu7x:2x2x1
jax: 0.10.0
libtpu: 0.0.40
codegen_flags: <defaults>
</compile_context>

<pallas_src>
import jax
import jax.numpy as jnp
from jax.experimental import pallas as pl
from jax.experimental.pallas import tpu as pltpu

LEAKY = 0.2
BN_EPS = 1e-5
LN_EPS = 1e-5
COUT_TILE = 128


# ----------------------------- Pallas kernels -----------------------------

def conv_bn_lrelu_kernel(p_ref, w_ref, g_ref, beta_ref, o_ref):
    # p_ref: (R, K) bf16 im2col patches, w_ref: (K, Tn) bf16 weight slab,
    # g_ref / beta_ref: (1, Tn) f32 BN affine params, o_ref: (R, Tn) bf16.
    # NOTE: the conv bias is intentionally omitted — a per-channel constant
    # added before training-mode BatchNorm is cancelled by the mean subtraction.
    acc = jnp.dot(p_ref[...], w_ref[...], preferred_element_type=jnp.float32)
    # BatchNorm2d (training mode): biased mean/var over (N, H, W) == rows.
    mean = jnp.mean(acc, axis=0, keepdims=True)
    var = jnp.mean((acc - mean) ** 2, axis=0, keepdims=True)
    y = (acc - mean) * jax.lax.rsqrt(var + BN_EPS)
    y = y * g_ref[...] + beta_ref[...]
    # LeakyReLU(0.2): max(y, 0.2*y) is exact for slope < 1 (one VALU op).
    o_ref[...] = jnp.maximum(y, LEAKY * y).astype(o_ref.dtype)


def conv_ln_kernel(p_ref, w_ref, b_ref, g_ref, beta_ref, o_ref):
    # Final conv (1x1 spatial output) + bias fused with LayerNorm(latent).
    y = jnp.dot(p_ref[...], w_ref[...], preferred_element_type=jnp.float32)
    y = y + b_ref[...]
    mean = jnp.mean(y, axis=-1, keepdims=True)
    var = jnp.mean((y - mean) ** 2, axis=-1, keepdims=True)
    o_ref[...] = (y - mean) * jax.lax.rsqrt(var + LN_EPS) * g_ref[...] + beta_ref[...]


# ----------------------------- pallas_call wrappers -----------------------------

def conv_bn_lrelu(patches, w2d, gamma, beta):
    """patches: (R, K) bf16, w2d: (K, Cout) bf16, gamma/beta: (1, Cout) f32."""
    r, k = patches.shape
    cout = w2d.shape[1]
    tn = min(COUT_TILE, cout)
    assert cout % tn == 0
    return pl.pallas_call(
        conv_bn_lrelu_kernel,
        out_shape=jax.ShapeDtypeStruct((r, cout), jnp.bfloat16),
        grid_spec=pltpu.PrefetchScalarGridSpec(
            num_scalar_prefetch=0,
            grid=(cout // tn,),
            in_specs=[
                pl.BlockSpec((r, k), lambda j: (0, 0)),   # patches stay resident
                pl.BlockSpec((k, tn), lambda j: (0, j)),  # weight column slab
                pl.BlockSpec((1, tn), lambda j: (0, j)),  # BN gamma
                pl.BlockSpec((1, tn), lambda j: (0, j)),  # BN beta
            ],
            out_specs=pl.BlockSpec((r, tn), lambda j: (0, j)),
        ),
        compiler_params=pltpu.CompilerParams(
            dimension_semantics=("parallel",)),
    )(patches, w2d, gamma, beta)


def conv_ln(patches, w2d, bias, ln_gamma, ln_beta):
    """Fused final conv + bias + LayerNorm.  Tiny operands -> single block."""
    b = patches.shape[0]
    latent = w2d.shape[1]
    vmem = pl.BlockSpec(memory_space=pltpu.MemorySpace.VMEM)
    return pl.pallas_call(
        conv_ln_kernel,
        out_shape=jax.ShapeDtypeStruct((b, latent), jnp.float32),
        in_specs=[vmem] * 5,
        out_specs=vmem,
    )(patches, w2d, bias, ln_gamma, ln_beta)


# ----------------------------- JAX glue -----------------------------

def im2col_nhwc(x, k, stride, pad):
    """x: (B, H, W, C) -> (B*OH*OW, k*k*C); feature columns ordered (kh, kw, C)."""
    if pad:
        x = jnp.pad(x, ((0, 0), (pad, pad), (pad, pad), (0, 0)))
    b, h, w, c = x.shape
    oh = (h - k) // stride + 1
    ow = (w - k) // stride + 1
    cols = []
    for kh in range(k):
        for kw in range(k):
            cols.append(
                x[:, kh:kh + stride * oh:stride, kw:kw + stride * ow:stride, :])
    p = jnp.concatenate(cols, axis=-1)            # (B, OH, OW, k*k*C)
    return p.reshape(b * oh * ow, k * k * c), oh, ow


def pack_weight(w):
    """(Cout, Cin, KH, KW) -> (KH*KW*Cin, Cout), matching im2col_nhwc columns."""
    cout = w.shape[0]
    return jnp.transpose(w, (2, 3, 1, 0)).reshape(-1, cout)


def spectral_normalize(w, key, n_iter=1):
    """One power iteration (as the SpectralNorm wrapper does per forward)."""
    cout = w.shape[0]
    w_mat = w.reshape(cout, -1)
    u = jax.random.normal(key, (cout,), dtype=w.dtype)
    u = u / (jnp.linalg.norm(u) + 1e-12)
    v = u
    for _ in range(n_iter):
        v = w_mat.T @ u
        v = v / (jnp.linalg.norm(v) + 1e-12)
        u = w_mat @ v
        u = u / (jnp.linalg.norm(u) + 1e-12)
    sigma = u @ (w_mat @ v)
    return w / sigma


def init_params(key, latent_size):
    """Deterministic synthetic parameters (shapes from Encoder_32.__init__)."""
    specs = [(3, 128), (128, 256), (256, 512), (512, latent_size)]
    params = {}
    keys = jax.random.split(key, 2 * len(specs))
    for i, (cin, cout) in enumerate(specs):
        wk, uk = keys[2 * i], keys[2 * i + 1]
        fan_in = cin * 4 * 4
        w = jax.random.normal(wk, (cout, cin, 4, 4), jnp.float32) * (2.0 / fan_in) ** 0.5
        w = spectral_normalize(w, uk)  # SpectralNorm wrapper
        b = jnp.zeros((cout,), jnp.float32)
        if i < 3:
            params[f"conv{i}"] = (w, b,
                                  jnp.ones((cout,), jnp.float32),   # BN gamma
                                  jnp.zeros((cout,), jnp.float32))  # BN beta
        else:
            params[f"conv{i}"] = (w, b)
    params["ln"] = (jnp.ones((latent_size,), jnp.float32),
                    jnp.zeros((latent_size,), jnp.float32))
    return params


def encoder_32_forward(x_nchw, params, latent_size):
    # TODO(synk): self.dropout is stored by the PyTorch module but never applied
    # in forward(), so it is intentionally omitted here.
    b = x_nchw.shape[0]
    out = jnp.transpose(x_nchw, (0, 2, 3, 1))  # single NCHW -> NHWC permute

    # conv[0..2]: SpectralNorm(Conv2d k=4 s=2 pad=0) + BatchNorm2d + LeakyReLU(0.2)
    for i in range(3):
        w, _bias, gamma, beta = params[f"conv{i}"]  # conv bias cancelled by BN
        p, oh, ow = im2col_nhwc(out, k=4, stride=2, pad=0)
        y = conv_bn_lrelu(p.astype(jnp.bfloat16),
                          pack_weight(w).astype(jnp.bfloat16),
                          gamma.reshape(1, -1),
                          beta.reshape(1, -1))
        out = y.reshape(b, oh, ow, -1)              # stays NHWC, no transpose

    # conv[3]: SpectralNorm(Conv2d k=4 s=1 pad=1) fused with view + LayerNorm
    w, bias = params["conv3"]
    p, _, _ = im2col_nhwc(out, k=4, stride=1, pad=1)     # -> (B, 4*4*512)
    ln_g, ln_b = params["ln"]
    z = conv_ln(p.astype(jnp.bfloat16),
                pack_weight(w).astype(jnp.bfloat16),
                bias.reshape(1, -1),
                ln_g.reshape(1, -1),
                ln_b.reshape(1, -1))
    return z.reshape(b, latent_size, 1, 1)


if __name__ == "__main__":
    latent_size = 32
    batch = 2
    key = jax.random.PRNGKey(0)
    k_x, k_p = jax.random.split(key)
    x = jax.random.normal(k_x, (batch, 3, 32, 32), jnp.float32)  # NCHW like PyTorch
    params = init_params(k_p, latent_size)

    fwd = jax.jit(encoder_32_forward, static_argnums=2)
    out = fwd(x, params, latent_size)
    out = jax.block_until_ready(out)
    assert out.shape == (batch, latent_size, 1, 1), out.shape
    assert jnp.all(jnp.isfinite(out))
    print("KERNEL_OK")
</pallas_src>

<mosaic_0001>
module attributes {stable_mosaic.version = 11 : i64} {
  func.func @conv_bn_lrelu_kernel(%arg0: i32, %arg1: memref<450x48xbf16, #tpu.memory_space<vmem>>, %arg2: memref<48x128xbf16, #tpu.memory_space<vmem>>, %arg3: memref<1x128xf32, #tpu.memory_space<vmem>>, %arg4: memref<1x128xf32, #tpu.memory_space<vmem>>, %arg5: memref<450x128xbf16, #tpu.memory_space<vmem>>) attributes {dimension_semantics = [#tpu.dimension_semantics<parallel>], iteration_bounds = array<i64: 1>, scalar_prefetch = 0 : i64, scratch_operands = 0 : i64, tpu.core_type = #tpu.core_type<tc>, window_params = [{pipeline_mode = #tpu.pipeline_mode<synchronous>, transform_indices = @transform_0, window_bounds = array<i64: 450, 48>}, {transform_indices = @transform_1, window_bounds = array<i64: 48, 128>}, {transform_indices = @transform_2, window_bounds = array<i64: 1, 128>}, {transform_indices = @transform_3, window_bounds = array<i64: 1, 128>}, {transform_indices = @transform_4, window_bounds = array<i64: 450, 128>}]} {
    %c0 = arith.constant 0 : index
    %c0_0 = arith.constant 0 : index
    %0 = vector.load %arg1[%c0, %c0_0] : memref<450x48xbf16, #tpu.memory_space<vmem>>, vector<450x48xbf16>
    %c0_1 = arith.constant 0 : index
    %c0_2 = arith.constant 0 : index
    %1 = vector.load %arg2[%c0_1, %c0_2] : memref<48x128xbf16, #tpu.memory_space<vmem>>, vector<48x128xbf16>
    %cst = arith.constant dense<0.000000e+00> : vector<450x128xf32>
    %2 = tpu.matmul %0, %1, %cst {dimension_numbers = #tpu.dot_dimension_numbers<[1], [0], [0], [1], [0, 0, 1, 1], [], []>} : vector<450x48xbf16>, vector<48x128xbf16>, vector<450x128xf32> -> vector<450x128xf32>
    %cst_3 = arith.constant dense<0.000000e+00> : vector<128xf32>
    %3 = vector.multi_reduction <add>, %2, %cst_3 [0] : vector<450x128xf32> to vector<128xf32>
    %4 = vector.shape_cast %3 : vector<128xf32> to vector<1x128xf32>
    %cst_4 = arith.constant 4.500000e+02 : f32
    %5 = vector.broadcast %cst_4 : f32 to vector<1x128xf32>
    %6 = arith.divf %4, %5 : vector<1x128xf32>
    %7 = vector.broadcast %6 : vector<1x128xf32> to vector<450x128xf32>
    %8 = arith.subf %2, %7 : vector<450x128xf32>
    %9 = arith.mulf %8, %8 : vector<450x128xf32>
    %cst_5 = arith.constant dense<0.000000e+00> : vector<128xf32>
    %10 = vector.multi_reduction <add>, %9, %cst_5 [0] : vector<450x128xf32> to vector<128xf32>
    %11 = vector.shape_cast %10 : vector<128xf32> to vector<1x128xf32>
    %cst_6 = arith.constant 4.500000e+02 : f32
    %12 = vector.broadcast %cst_6 : f32 to vector<1x128xf32>
    %13 = arith.divf %11, %12 : vector<1x128xf32>
    %14 = vector.broadcast %6 : vector<1x128xf32> to vector<450x128xf32>
    %15 = arith.subf %2, %14 : vector<450x128xf32>
    %cst_7 = arith.constant 9.99999974E-6 : f32
    %16 = vector.broadcast %cst_7 : f32 to vector<1x128xf32>
    %17 = arith.addf %13, %16 : vector<1x128xf32>
    %18 = math.rsqrt %17 : vector<1x128xf32>
    %19 = vector.broadcast %18 : vector<1x128xf32> to vector<450x128xf32>
    %20 = arith.mulf %15, %19 : vector<450x128xf32>
    %c0_8 = arith.constant 0 : index
    %c0_9 = arith.constant 0 : index
    %21 = vector.load %arg3[%c0_8, %c0_9] : memref<1x128xf32, #tpu.memory_space<vmem>>, vector<1x128xf32>
    %22 = vector.broadcast %21 : vector<1x128xf32> to vector<450x128xf32>
    %23 = arith.mulf %20, %22 : vector<450x128xf32>
    %c0_10 = arith.constant 0 : index
    %c0_11 = arith.constant 0 : index
    %24 = vector.load %arg4[%c0_10, %c0_11] : memref<1x128xf32, #tpu.memory_space<vmem>>, vector<1x128xf32>
    %25 = vector.broadcast %24 : vector<1x128xf32> to vector<450x128xf32>
    %26 = arith.addf %23, %25 : vector<450x128xf32>
    %cst_12 = arith.constant 2.000000e-01 : f32
    %27 = vector.broadcast %cst_12 : f32 to vector<450x128xf32>
    %28 = arith.mulf %27, %26 : vector<450x128xf32>
    %29 = arith.maximumf %26, %28 : vector<450x128xf32>
    %30 = arith.truncf %29 : vector<450x128xf32> to vector<450x128xbf16>
    %c0_13 = arith.constant 0 : index
    %c0_14 = arith.constant 0 : index
    %31 = vector.load %arg5[%c0_13, %c0_14] : memref<450x128xbf16, #tpu.memory_space<vmem>>, vector<450x128xbf16>
    tpu.vector_store %arg5[%c0_13, %c0_14], %30 {strides = array<i32>} : memref<450x128xbf16, #tpu.memory_space<vmem>>, vector<450x128xbf16>,
    return
  }
  func.func @transform_0(%arg0: i32) -> (i32, i32) {
    %c0_i32 = arith.constant 0 : i32
    %c0_i32_0 = arith.constant 0 : i32
    %c0_i32_1 = arith.constant 0 : i32
    return %c0_i32, %c0_i32_0 : i32, i32
  }
  func.func @transform_1(%arg0: i32) -> (i32, i32) {
    %c0_i32 = arith.constant 0 : i32
    %c0_i32_0 = arith.constant 0 : i32
    return %c0_i32, %arg0 : i32, i32
  }
  func.func @transform_2(%arg0: i32) -> (i32, i32) {
    %c0_i32 = arith.constant 0 : i32
    %c0_i32_0 = arith.constant 0 : i32
    return %c0_i32, %arg0 : i32, i32
  }
  func.func @transform_3(%arg0: i32) -> (i32, i32) {
    %c0_i32 = arith.constant 0 : i32
    %c0_i32_0 = arith.constant 0 : i32
    return %c0_i32, %arg0 : i32, i32
  }
  func.func @transform_4(%arg0: i32) -> (i32, i32) {
    %c0_i32 = arith.constant 0 : i32
    %c0_i32_0 = arith.constant 0 : i32
    return %c0_i32, %arg0 : i32, i32
  }
}

module attributes {stable_mosaic.version = 11 : i64} {
  func.func @conv_bn_lrelu_kernel(%arg0: i32, %arg1: memref<72x2048xbf16, #tpu.memory_space<vmem>>, %arg2: memref<2048x128xbf16, #tpu.memory_space<vmem>>, %arg3: memref<1x128xf32, #tpu.memory_space<vmem>>, %arg4: memref<1x128xf32, #tpu.memory_space<vmem>>, %arg5: memref<72x128xbf16, #tpu.memory_space<vmem>>) attributes {dimension_semantics = [#tpu.dimension_semantics<parallel>], iteration_bounds = array<i64: 2>, scalar_prefetch = 0 : i64, scratch_operands = 0 : i64, tpu.core_type = #tpu.core_type<tc>, window_params = [{pipeline_mode = #tpu.pipeline_mode<synchronous>, transform_indices = @transform_0, window_bounds = array<i64: 72, 2048>}, {transform_indices = @transform_1, window_bounds = array<i64: 2048, 128>}, {transform_indices = @transform_2, window_bounds = array<i64: 1, 128>}, {transform_indices = @transform_3, window_bounds = array<i64: 1, 128>}, {transform_indices = @transform_4, window_bounds = array<i64: 72, 128>}]} {
    %c0 = arith.constant 0 : index
    %c0_0 = arith.constant 0 : index
    %0 = vector.load %arg1[%c0, %c0_0] : memref<72x2048xbf16, #tpu.memory_space<vmem>>, vector<72x2048xbf16>
    %c0_1 = arith.constant 0 : index
    %c0_2 = arith.constant 0 : index
    %1 = vector.load %arg2[%c0_1, %c0_2] : memref<2048x128xbf16, #tpu.memory_space<vmem>>, vector<2048x128xbf16>
    %cst = arith.constant dense<0.000000e+00> : vector<72x128xf32>
    %2 = tpu.matmul %0, %1, %cst {dimension_numbers = #tpu.dot_dimension_numbers<[1], [0], [0], [1], [0, 0, 1, 1], [], []>} : vector<72x2048xbf16>, vector<2048x128xbf16>, vector<72x128xf32> -> vector<72x128xf32>
    %cst_3 = arith.constant dense<0.000000e+00> : vector<128xf32>
    %3 = vector.multi_reduction <add>, %2, %cst_3 [0] : vector<72x128xf32> to vector<128xf32>
    %4 = vector.shape_cast %3 : vector<128xf32> to vector<1x128xf32>
    %cst_4 = arith.constant 7.200000e+01 : f32
    %5 = vector.broadcast %cst_4 : f32 to vector<1x128xf32>
    %6 = arith.divf %4, %5 : vector<1x128xf32>
    %7 = vector.broadcast %6 : vector<1x128xf32> to vector<72x128xf32>
    %8 = arith.subf %2, %7 : vector<72x128xf32>
    %9 = arith.mulf %8, %8 : vector<72x128xf32>
    %cst_5 = arith.constant dense<0.000000e+00> : vector<128xf32>
    %10 = vector.multi_reduction <add>, %9, %cst_5 [0] : vector<72x128xf32> to vector<128xf32>
    %11 = vector.shape_cast %10 : vector<128xf32> to vector<1x128xf32>
    %cst_6 = arith.constant 7.200000e+01 : f32
    %12 = vector.broadcast %cst_6 : f32 to vector<1x128xf32>
    %13 = arith.divf %11, %12 : vector<1x128xf32>
    %14 = vector.broadcast %6 : vector<1x128xf32> to vector<72x128xf32>
    %15 = arith.subf %2, %14 : vector<72x128xf32>
    %cst_7 = arith.constant 9.99999974E-6 : f32
    %16 = vector.broadcast %cst_7 : f32 to vector<1x128xf32>
    %17 = arith.addf %13, %16 : vector<1x128xf32>
    %18 = math.rsqrt %17 : vector<1x128xf32>
    %19 = vector.broadcast %18 : vector<1x128xf32> to vector<72x128xf32>
    %20 = arith.mulf %15, %19 : vector<72x128xf32>
    %c0_8 = arith.constant 0 : index
    %c0_9 = arith.constant 0 : index
    %21 = vector.load %arg3[%c0_8, %c0_9] : memref<1x128xf32, #tpu.memory_space<vmem>>, vector<1x128xf32>
    %22 = vector.broadcast %21 : vector<1x128xf32> to vector<72x128xf32>
    %23 = arith.mulf %20, %22 : vector<72x128xf32>
    %c0_10 = arith.constant 0 : index
    %c0_11 = arith.constant 0 : index
    %24 = vector.load %arg4[%c0_10, %c0_11] : memref<1x128xf32, #tpu.memory_space<vmem>>, vector<1x128xf32>
    %25 = vector.broadcast %24 : vector<1x128xf32> to vector<72x128xf32>
    %26 = arith.addf %23, %25 : vector<72x128xf32>
    %cst_12 = arith.constant 2.000000e-01 : f32
    %27 = vector.broadcast %cst_12 : f32 to vector<72x128xf32>
    %28 = arith.mulf %27, %26 : vector<72x128xf32>
    %29 = arith.maximumf %26, %28 : vector<72x128xf32>
    %30 = arith.truncf %29 : vector<72x128xf32> to vector<72x128xbf16>
    %c0_13 = arith.constant 0 : index
    %c0_14 = arith.constant 0 : index
    %31 = vector.load %arg5[%c0_13, %c0_14] : memref<72x128xbf16, #tpu.memory_space<vmem>>, vector<72x128xbf16>
    tpu.vector_store %arg5[%c0_13, %c0_14], %30 {strides = array<i32>} : memref<72x128xbf16, #tpu.memory_space<vmem>>, vector<72x128xbf16>,
    return
  }
  func.func @transform_0(%arg0: i32) -> (i32, i32) {
    %c0_i32 = arith.constant 0 : i32
    %c0_i32_0 = arith.constant 0 : i32
    %c0_i32_1 = arith.constant 0 : i32
    return %c0_i32, %c0_i32_0 : i32, i32
  }
  func.func @transform_1(%arg0: i32) -> (i32, i32) {
    %c0_i32 = arith.constant 0 : i32
    %c0_i32_0 = arith.constant 0 : i32
    return %c0_i32, %arg0 : i32, i32
  }
  func.func @transform_2(%arg0: i32) -> (i32, i32) {
    %c0_i32 = arith.constant 0 : i32
    %c0_i32_0 = arith.constant 0 : i32
    return %c0_i32, %arg0 : i32, i32
  }
  func.func @transform_3(%arg0: i32) -> (i32, i32) {
    %c0_i32 = arith.constant 0 : i32
    %c0_i32_0 = arith.constant 0 : i32
    return %c0_i32, %arg0 : i32, i32
  }
  func.func @transform_4(%arg0: i32) -> (i32, i32) {
    %c0_i32 = arith.constant 0 : i32
    %c0_i32_0 = arith.constant 0 : i32
    return %c0_i32, %arg0 : i32, i32
  }
}

module attributes {stable_mosaic.version = 11 : i64} {
  func.func @conv_bn_lrelu_kernel(%arg0: i32, %arg1: memref<8x4096xbf16, #tpu.memory_space<vmem>>, %arg2: memref<4096x128xbf16, #tpu.memory_space<vmem>>, %arg3: memref<1x128xf32, #tpu.memory_space<vmem>>, %arg4: memref<1x128xf32, #tpu.memory_space<vmem>>, %arg5: memref<8x128xbf16, #tpu.memory_space<vmem>>) attributes {dimension_semantics = [#tpu.dimension_semantics<parallel>], iteration_bounds = array<i64: 4>, scalar_prefetch = 0 : i64, scratch_operands = 0 : i64, tpu.core_type = #tpu.core_type<tc>, window_params = [{pipeline_mode = #tpu.pipeline_mode<synchronous>, transform_indices = @transform_0, window_bounds = array<i64: 8, 4096>}, {transform_indices = @transform_1, window_bounds = array<i64: 4096, 128>}, {transform_indices = @transform_2, window_bounds = array<i64: 1, 128>}, {transform_indices = @transform_3, window_bounds = array<i64: 1, 128>}, {transform_indices = @transform_4, window_bounds = array<i64: 8, 128>}]} {
    %c0 = arith.constant 0 : index
    %c0_0 = arith.constant 0 : index
    %0 = vector.load %arg1[%c0, %c0_0] : memref<8x4096xbf16, #tpu.memory_space<vmem>>, vector<8x4096xbf16>
    %c0_1 = arith.constant 0 : index
    %c0_2 = arith.constant 0 : index
    %1 = vector.load %arg2[%c0_1, %c0_2] : memref<4096x128xbf16, #tpu.memory_space<vmem>>, vector<4096x128xbf16>
    %cst = arith.constant dense<0.000000e+00> : vector<8x128xf32>
    %2 = tpu.matmul %0, %1, %cst {dimension_numbers = #tpu.dot_dimension_numbers<[1], [0], [0], [1], [0, 0, 1, 1], [], []>} : vector<8x4096xbf16>, vector<4096x128xbf16>, vector<8x128xf32> -> vector<8x128xf32>
    %cst_3 = arith.constant dense<0.000000e+00> : vector<128xf32>
    %3 = vector.multi_reduction <add>, %2, %cst_3 [0] : vector<8x128xf32> to vector<128xf32>
    %4 = vector.shape_cast %3 : vector<128xf32> to vector<1x128xf32>
    %cst_4 = arith.constant 8.000000e+00 : f32
    %5 = vector.broadcast %cst_4 : f32 to vector<1x128xf32>
    %6 = arith.divf %4, %5 : vector<1x128xf32>
    %7 = vector.broadcast %6 : vector<1x128xf32> to vector<8x128xf32>
    %8 = arith.subf %2, %7 : vector<8x128xf32>
    %9 = arith.mulf %8, %8 : vector<8x128xf32>
    %cst_5 = arith.constant dense<0.000000e+00> : vector<128xf32>
    %10 = vector.multi_reduction <add>, %9, %cst_5 [0] : vector<8x128xf32> to vector<128xf32>
    %11 = vector.shape_cast %10 : vector<128xf32> to vector<1x128xf32>
    %cst_6 = arith.constant 8.000000e+00 : f32
    %12 = vector.broadcast %cst_6 : f32 to vector<1x128xf32>
    %13 = arith.divf %11, %12 : vector<1x128xf32>
    %14 = vector.broadcast %6 : vector<1x128xf32> to vector<8x128xf32>
    %15 = arith.subf %2, %14 : vector<8x128xf32>
    %cst_7 = arith.constant 9.99999974E-6 : f32
    %16 = vector.broadcast %cst_7 : f32 to vector<1x128xf32>
    %17 = arith.addf %13, %16 : vector<1x128xf32>
    %18 = math.rsqrt %17 : vector<1x128xf32>
    %19 = vector.broadcast %18 : vector<1x128xf32> to vector<8x128xf32>
    %20 = arith.mulf %15, %19 : vector<8x128xf32>
    %c0_8 = arith.constant 0 : index
    %c0_9 = arith.constant 0 : index
    %21 = vector.load %arg3[%c0_8, %c0_9] : memref<1x128xf32, #tpu.memory_space<vmem>>, vector<1x128xf32>
    %22 = vector.broadcast %21 : vector<1x128xf32> to vector<8x128xf32>
    %23 = arith.mulf %20, %22 : vector<8x128xf32>
    %c0_10 = arith.constant 0 : index
    %c0_11 = arith.constant 0 : index
    %24 = vector.load %arg4[%c0_10, %c0_11] : memref<1x128xf32, #tpu.memory_space<vmem>>, vector<1x128xf32>
    %25 = vector.broadcast %24 : vector<1x128xf32> to vector<8x128xf32>
    %26 = arith.addf %23, %25 : vector<8x128xf32>
    %cst_12 = arith.constant 2.000000e-01 : f32
    %27 = vector.broadcast %cst_12 : f32 to vector<8x128xf32>
    %28 = arith.mulf %27, %26 : vector<8x128xf32>
    %29 = arith.maximumf %26, %28 : vector<8x128xf32>
    %30 = arith.truncf %29 : vector<8x128xf32> to vector<8x128xbf16>
    %c0_13 = arith.constant 0 : index
    %c0_14 = arith.constant 0 : index
    %31 = vector.load %arg5[%c0_13, %c0_14] : memref<8x128xbf16, #tpu.memory_space<vmem>>, vector<8x128xbf16>
    tpu.vector_store %arg5[%c0_13, %c0_14], %30 {strides = array<i32>} : memref<8x128xbf16, #tpu.memory_space<vmem>>, vector<8x128xbf16>,
    return
  }
  func.func @transform_0(%arg0: i32) -> (i32, i32) {
    %c0_i32 = arith.constant 0 : i32
    %c0_i32_0 = arith.constant 0 : i32
    %c0_i32_1 = arith.constant 0 : i32
    return %c0_i32, %c0_i32_0 : i32, i32
  }
  func.func @transform_1(%arg0: i32) -> (i32, i32) {
    %c0_i32 = arith.constant 0 : i32
    %c0_i32_0 = arith.constant 0 : i32
    return %c0_i32, %arg0 : i32, i32
  }
  func.func @transform_2(%arg0: i32) -> (i32, i32) {
    %c0_i32 = arith.constant 0 : i32
    %c0_i32_0 = arith.constant 0 : i32
    return %c0_i32, %arg0 : i32, i32
  }
  func.func @transform_3(%arg0: i32) -> (i32, i32) {
    %c0_i32 = arith.constant 0 : i32
    %c0_i32_0 = arith.constant 0 : i32
    return %c0_i32, %arg0 : i32, i32
  }
  func.func @transform_4(%arg0: i32) -> (i32, i32) {
    %c0_i32 = arith.constant 0 : i32
    %c0_i32_0 = arith.constant 0 : i32
    return %c0_i32, %arg0 : i32, i32
  }
}

module attributes {stable_mosaic.version = 11 : i64} {
  func.func @conv_ln_kernel(%arg0: memref<2x8192xbf16, #tpu.memory_space<vmem>>, %arg1: memref<8192x32xbf16, #tpu.memory_space<vmem>>, %arg2: memref<1x32xf32, #tpu.memory_space<vmem>>, %arg3: memref<1x32xf32, #tpu.memory_space<vmem>>, %arg4: memref<1x32xf32, #tpu.memory_space<vmem>>, %arg5: memref<2x32xf32, #tpu.memory_space<vmem>>) attributes {dimension_semantics = [], scalar_prefetch = 0 : i64, scratch_operands = 0 : i64, tpu.core_type = #tpu.core_type<tc>} {
    %c0 = arith.constant 0 : index
    %c0_0 = arith.constant 0 : index
    %0 = vector.load %arg0[%c0, %c0_0] : memref<2x8192xbf16, #tpu.memory_space<vmem>>, vector<2x8192xbf16>
    %c0_1 = arith.constant 0 : index
    %c0_2 = arith.constant 0 : index
    %1 = vector.load %arg1[%c0_1, %c0_2] : memref<8192x32xbf16, #tpu.memory_space<vmem>>, vector<8192x32xbf16>
    %cst = arith.constant dense<0.000000e+00> : vector<2x32xf32>
    %2 = tpu.matmul %0, %1, %cst {dimension_numbers = #tpu.dot_dimension_numbers<[1], [0], [0], [1], [0, 0, 1, 1], [], []>} : vector<2x8192xbf16>, vector<8192x32xbf16>, vector<2x32xf32> -> vector<2x32xf32>
    %c0_3 = arith.constant 0 : index
    %c0_4 = arith.constant 0 : index
    %3 = vector.load %arg2[%c0_3, %c0_4] : memref<1x32xf32, #tpu.memory_space<vmem>>, vector<1x32xf32>
    %4 = vector.broadcast %3 : vector<1x32xf32> to vector<2x32xf32>
    %5 = arith.addf %2, %4 : vector<2x32xf32>
    %cst_5 = arith.constant dense<0.000000e+00> : vector<2xf32>
    %6 = vector.multi_reduction <add>, %5, %cst_5 [1] : vector<2x32xf32> to vector<2xf32>
    %7 = vector.shape_cast %6 : vector<2xf32> to vector<2x1xf32>
    %cst_6 = arith.constant 3.200000e+01 : f32
    %8 = vector.broadcast %cst_6 : f32 to vector<2x1xf32>
    %9 = arith.divf %7, %8 : vector<2x1xf32>
    %10 = vector.broadcast %9 : vector<2x1xf32> to vector<2x32xf32>
    %11 = arith.subf %5, %10 : vector<2x32xf32>
    %12 = arith.mulf %11, %11 : vector<2x32xf32>
    %cst_7 = arith.constant dense<0.000000e+00> : vector<2xf32>
    %13 = vector.multi_reduction <add>, %12, %cst_7 [1] : vector<2x32xf32> to vector<2xf32>
    %14 = vector.shape_cast %13 : vector<2xf32> to vector<2x1xf32>
    %cst_8 = arith.constant 3.200000e+01 : f32
    %15 = vector.broadcast %cst_8 : f32 to vector<2x1xf32>
    %16 = arith.divf %14, %15 : vector<2x1xf32>
    %17 = vector.broadcast %9 : vector<2x1xf32> to vector<2x32xf32>
    %18 = arith.subf %5, %17 : vector<2x32xf32>
    %cst_9 = arith.constant 9.99999974E-6 : f32
    %19 = vector.broadcast %cst_9 : f32 to vector<2x1xf32>
    %20 = arith.addf %16, %19 : vector<2x1xf32>
    %21 = math.rsqrt %20 : vector<2x1xf32>
    %22 = vector.broadcast %21 : vector<2x1xf32> to vector<2x32xf32>
    %23 = arith.mulf %18, %22 : vector<2x32xf32>
    %c0_10 = arith.constant 0 : index
    %c0_11 = arith.constant 0 : index
    %24 = vector.load %arg3[%c0_10, %c0_11] : memref<1x32xf32, #tpu.memory_space<vmem>>, vector<1x32xf32>
    %25 = vector.broadcast %24 : vector<1x32xf32> to vector<2x32xf32>
    %26 = arith.mulf %23, %25 : vector<2x32xf32>
    %c0_12 = arith.constant 0 : index
    %c0_13 = arith.constant 0 : index
    %27 = vector.load %arg4[%c0_12, %c0_13] : memref<1x32xf32, #tpu.memory_space<vmem>>, vector<1x32xf32>
    %28 = vector.broadcast %27 : vector<1x32xf32> to vector<2x32xf32>
    %29 = arith.addf %26, %28 : vector<2x32xf32>
    %c0_14 = arith.constant 0 : index
    %c0_15 = arith.constant 0 : index
    %30 = vector.load %arg5[%c0_14, %c0_15] : memref<2x32xf32, #tpu.memory_space<vmem>>, vector<2x32xf32>
    tpu.vector_store %arg5[%c0_14, %c0_15], %29 {strides = array<i32>} : memref<2x32xf32, #tpu.memory_space<vmem>>, vector<2x32xf32>,
    return
  }
}

</mosaic_0001>

<bundles_post_ra>
// kernel: encoder_32_forward.4
= control target key start
LH: loop header
LB: loop body
LE: loop exit
PB: predicated region body
PF: predicated region fallthrough
CT: control target
= control target key end

     0   :  { %v1969_v0 = vmov 0.0   ;;  %vm1970_vm0 = vmmov 0   ;;  %vm242_vm1 = vcmask 392192   ;;  %vm649_vm2 = vcmask 1041408   ;;  %s3349_s1 = inlined_call_operand.vmem [shape: bf16[48,128], index: 1, kind: input, shape index: {}]   ;;  %s3350_s0 = inlined_call_operand.vmem [shape: bf16[450,48], index: 0, kind: input, shape index: {}]   ;;  %s3351_s2 = inlined_call_operand.vmem [shape: f32[1,128], index: 2, kind: input, shape index: {}]   ;;  %s3352_s3 = inlined_call_operand.vmem [shape: f32[1,128], index: 3, kind: input, shape index: {}]   ;;  %s3353_s4 = inlined_call_operand.vmem [shape: bf16[450,128], index: 4, kind: output, shape index: {}]  }
   0x1   :  { %1805 = vmatprep.subr.bf16.mxu0 %v1969_v0  ;;  %v1935_v1 = vld [vmem:[%s3349_s1] sm:$0xff]   ;;  %1811 = vmatprep.mubr.msk.bf16.mxu0 %vm1970_vm0, %v1969_v0  ;;  %v1936_v2 = vld [vmem:[%s3349_s1 + $0x8] sm:$0xff]   ;;  %v1937_v3 = vld [vmem:[%s3349_s1 + $0x10] sm:$0xff]  }
   0x2   :  { %1927 = vmatprep.subr.bf16.mxu1 %v1969_v0  ;;  %1871 = vmatprep.mubr.msk.bf16.mxu1 %vm1970_vm0, %v1969_v0  ;;  %v1938_v4 = vld [vmem:[%s3350_s0] sm:$0xff]   ;;  %v1946_v5 = vld [vmem:[%s3350_s0 + $0x78] sm:$0xff]   ;;  %v1939_v6 = vld [vmem:[%s3350_s0 + $0x8] sm:$0xff]  }
   0x3   :  { %1806 = vmatpush3.bf16.msra.mxu0 %v1935_v1  ;;  %1930 = vmatpush3.bf16.msra.mxu1 %v1935_v1  ;;  %v1948_v7 = vld [vmem:[%s3350_s0 + $0x80] sm:$0xff]   ;;  %v1940_v8 = vld [vmem:[%s3350_s0 + $0x10] sm:$0xff]   ;;  %v1950_v9 = vld [vmem:[%s3350_s0 + $0x88] sm:$0xff]  }
   0x4   :  { %1807 = vmatprep.subr.bf16.mxu0 %v1969_v0  ;;  %1928 = vmatprep.subr.bf16.mxu1 %v1969_v0  ;;  %v1941_v10 = vld [vmem:[%s3350_s0 + $0x18] sm:$0xff]   ;;  %v1952_v11 = vld [vmem:[%s3350_s0 + $0x90] sm:$0xff]   ;;  %v1942_v12 = vld [vmem:[%s3350_s0 + $0x20] sm:$0xff]  }
   0x5   :  { %v1954_v13 = vld [vmem:[%s3350_s0 + $0x98] sm:$0xff]   ;;  %v1943_v14 = vld [vmem:[%s3350_s0 + $0x28] sm:$0xff]   ;;  %v1956_v15 = vld [vmem:[%s3350_s0 + $0xa0] sm:$0xff]  }
   0x6   :  { %v1944_v16 = vld [vmem:[%s3350_s0 + $0x30] sm:$0xff]   ;;  %v1958_v17 = vld [vmem:[%s3350_s0 + $0xa8] sm:$0xff]   ;;  %v1945_v18 = vld [vmem:[%s3350_s0 + $0x38] sm:$0xff]  }
   0x7   :  { %1808 = vmatpush3.bf16.msra.mxu0 %v1936_v2  ;;  %1931 = vmatpush3.bf16.msra.mxu1 %v1936_v2  ;;  %v1960_v19 = vld [vmem:[%s3350_s0 + $0xb0] sm:$0xff]   ;;  %v1947_v20 = vld [vmem:[%s3350_s0 + $0x40] sm:$0xff]   ;;  %v1961_v21 = vld [vmem:[%s3350_s0 + $0xb8] sm:$0xff]  }
   0x8   :  { %1809 = vmatprep.subr.bf16.mxu0 %v1969_v0  ;;  %1929 = vmatprep.subr.bf16.mxu1 %v1969_v0  ;;  %v1949_v22 = vld [vmem:[%s3350_s0 + $0x48] sm:$0xff]   ;;  %v1962_v23 = vld [vmem:[%s3350_s0 + $0xc0] sm:$0xff]   ;;  %v1951_v24 = vld [vmem:[%s3350_s0 + $0x50] sm:$0xff]  }
   0x9   :  { %v1963_v25 = vld [vmem:[%s3350_s0 + $0xc8] sm:$0xff]   ;;  %v1953_v26 = vld [vmem:[%s3350_s0 + $0x58] sm:$0xff]   ;;  %v1964_v27 = vld [vmem:[%s3350_s0 + $0xd0] sm:$0xff]  }
   0xa   :  { %v1955_v28 = vld [vmem:[%s3350_s0 + $0x60] sm:$0xff]   ;;  %v1965_v29 = vld [vmem:[%s3350_s0 + $0xd8] sm:$0xff]   ;;  %v1957_v30 = vld [vmem:[%s3350_s0 + $0x68] sm:$0xff]  }
   0xb   :  { %1810 = vmatpush3.bf16.msra.mxu0 %v1937_v3  ;;  %1932 = vmatpush3.bf16.msra.mxu1 %v1937_v3  ;;  %v1966_v31 = vld [vmem:[%s3350_s0 + $0xe0] ss:$0 sps:$4 sm:$0x11]   ;;  %v1959_v32 = vld [vmem:[%s3350_s0 + $0x70] sm:$0xff]  }
   0xe   :  { %1812 = vmatmul.mubr.msk.bf16.vlgmr.msra.gmra.mrb[0].mxu0 %vm242_vm1, %v1938_v4  ;;  %1872 = vmatmul.mubr.msk.bf16.vlgmr.msra.gmra.mrb[0].mxu1 %vm242_vm1, %v1946_v5 }
   0xf   :  { %1815 = vmatprep.mubr.msk.bf16.mxu0 %vm1970_vm0, %v1969_v0  ;;  %1875 = vmatprep.mubr.msk.bf16.mxu1 %vm1970_vm0, %v1969_v0 }
  0x16   :  { %1816 = vmatmul.mubr.msk.bf16.gmra.mrb[4].mxu0 %vm242_vm1, %v1939_v6  ;;  %1876 = vmatmul.mubr.msk.bf16.gmra.mrb[4].mxu1 %vm242_vm1, %v1948_v7 }
  0x17   :  { %1819 = vmatprep.mubr.msk.bf16.mxu0 %vm1970_vm0, %v1969_v0  ;;  %1879 = vmatprep.mubr.msk.bf16.mxu1 %vm1970_vm0, %v1969_v0 }
  0x1e   :  { %1820 = vmatmul.mubr.msk.bf16.gmra.mrb[8].mxu0 %vm242_vm1, %v1940_v8  ;;  %1880 = vmatmul.mubr.msk.bf16.gmra.mrb[8].mxu1 %vm242_vm1, %v1950_v9 }
  0x1f   :  { %1823 = vmatprep.mubr.msk.bf16.mxu0 %vm1970_vm0, %v1969_v0  ;;  %1883 = vmatprep.mubr.msk.bf16.mxu1 %vm1970_vm0, %v1969_v0 }
  0x26   :  { %1824 = vmatmul.mubr.msk.bf16.gmra.mrb[12].mxu0 %vm242_vm1, %v1941_v10  ;;  %1884 = vmatmul.mubr.msk.bf16.gmra.mrb[12].mxu1 %vm242_vm1, %v1952_v11 }
  0x27   :  { %1827 = vmatprep.mubr.msk.bf16.mxu0 %vm1970_vm0, %v1969_v0  ;;  %1887 = vmatprep.mubr.msk.bf16.mxu1 %vm1970_vm0, %v1969_v0 }
  0x2e   :  { %1828 = vmatmul.mubr.msk.bf16.gmra.mrb[16].mxu0 %vm242_vm1, %v1942_v12  ;;  %1888 = vmatmul.mubr.msk.bf16.gmra.mrb[16].mxu1 %vm242_vm1, %v1954_v13 }
  0x2f   :  { %1831 = vmatprep.mubr.msk.bf16.mxu0 %vm1970_vm0, %v1969_v0  ;;  %1891 = vmatprep.mubr.msk.bf16.mxu1 %vm1970_vm0, %v1969_v0 }
  0x36   :  { %1832 = vmatmul.mubr.msk.bf16.gmra.mrb[20].mxu0 %vm242_vm1, %v1943_v14  ;;  %1892 = vmatmul.mubr.msk.bf16.gmra.mrb[20].mxu1 %vm242_vm1, %v1956_v15 }
  0x37   :  { %1835 = vmatprep.mubr.msk.bf16.mxu0 %vm1970_vm0, %v1969_v0  ;;  %1895 = vmatprep.mubr.msk.bf16.mxu1 %vm1970_vm0, %v1969_v0 }
  0x3e   :  { %1836 = vmatmul.mubr.msk.bf16.gmra.mrb[24].mxu0 %vm242_vm1, %v1944_v16  ;;  %1896 = vmatmul.mubr.msk.bf16.gmra.mrb[24].mxu1 %vm242_vm1, %v1958_v17 }
  0x3f   :  { %1839 = vmatprep.mubr.msk.bf16.mxu0 %vm1970_vm0, %v1969_v0  ;;  %1899 = vmatprep.mubr.msk.bf16.mxu1 %vm1970_vm0, %v1969_v0 }
  0x46   :  { %1840 = vmatmul.mubr.msk.bf16.gmra.mrb[28].mxu0 %vm242_vm1, %v1945_v18  ;;  %1900 = vmatmul.mubr.msk.bf16.gmra.mrb[28].mxu1 %vm242_vm1, %v1960_v19 }
  0x47   :  { %1843 = vmatprep.mubr.msk.bf16.mxu0 %vm1970_vm0, %v1969_v0  ;;  %1903 = vmatprep.mubr.msk.bf16.mxu1 %vm1970_vm0, %v1969_v0 }
  0x4e   :  { %1844 = vmatmul.mubr.msk.bf16.gmra.mrb[32].mxu0 %vm242_vm1, %v1947_v20  ;;  %1904 = vmatmul.mubr.msk.bf16.gmra.mrb[32].mxu1 %vm242_vm1, %v1961_v21 }
  0x4f   :  { %1847 = vmatprep.mubr.msk.bf16.mxu0 %vm1970_vm0, %v1969_v0  ;;  %1907 = vmatprep.mubr.msk.bf16.mxu1 %vm1970_vm0, %v1969_v0 }
  0x56   :  { %1848 = vmatmul.mubr.msk.bf16.gmra.mrb[36].mxu0 %vm242_vm1, %v1949_v22  ;;  %1908 = vmatmul.mubr.msk.bf16.gmra.mrb[36].mxu1 %vm242_vm1, %v1962_v23 }
  0x57   :  { %1851 = vmatprep.mubr.msk.bf16.mxu0 %vm1970_vm0, %v1969_v0  ;;  %1911 = vmatprep.mubr.msk.bf16.mxu1 %vm1970_vm0, %v1969_v0 }
  0x5e   :  { %1852 = vmatmul.mubr.msk.bf16.gmra.mrb[40].mxu0 %vm242_vm1, %v1951_v24  ;;  %1912 = vmatmul.mubr.msk.bf16.gmra.mrb[40].mxu1 %vm242_vm1, %v1963_v25 }
  0x5f   :  { %1855 = vmatprep.mubr.msk.bf16.mxu0 %vm1970_vm0, %v1969_v0  ;;  %1915 = vmatprep.mubr.msk.bf16.mxu1 %vm1970_vm0, %v1969_v0 }
  0x66   :  { %1856 = vmatmul.mubr.msk.bf16.gmra.mrb[44].mxu0 %vm242_vm1, %v1953_v26  ;;  %1916 = vmatmul.mubr.msk.bf16.gmra.mrb[44].mxu1 %vm242_vm1, %v1964_v27 }
  0x67   :  { %1859 = vmatprep.mubr.msk.bf16.mxu0 %vm1970_vm0, %v1969_v0  ;;  %1919 = vmatprep.mubr.msk.bf16.mxu1 %vm1970_vm0, %v1969_v0 }
  0x6e   :  { %1860 = vmatmul.mubr.msk.bf16.gmra.mrb[48].mxu0 %vm242_vm1, %v1955_v28  ;;  %1920 = vmatmul.mubr.msk.bf16.gmra.mrb[48].mxu1 %vm242_vm1, %v1965_v29 }
  0x6f   :  { %1863 = vmatprep.mubr.msk.bf16.mxu0 %vm1970_vm0, %v1969_v0  ;;  %1923 = vmatprep.mubr.msk.bf16.mxu1 %vm1970_vm0, %v1969_v0 }
  0x76   :  { %1864 = vmatmul.mubr.msk.bf16.gmra.mrb[52].mxu0 %vm242_vm1, %v1957_v30  ;;  %1924 = vmatmul.mubr.msk.bf16.gmra.mrb[52].mxu1 %vm242_vm1, %v1966_v31 }
  0x77   :  { %1867 = vmatprep.mubr.msk.bf16.mxu0 %vm1970_vm0, %v1969_v0 }
  0x7e   :  { %1868 = vmatmul.mubr.msk.bf16.gmra.mrb[56].mxu0 %vm242_vm1, %v1959_v32 }
  0xe1   :  { %v2185_v33 = vpop.f32.mrb[0].mxu0  ;;  %v2187_v34 = vpop.f32.mrb[0].mxu1 }
  0xe2   :  { %v1813_v35 = vpop.f32.mrb[1].mxu0  ;;  %v1873_v36 = vpop.f32.mrb[1].mxu1 }
  0xe3   :  { %v2189_v37 = vpop.f32.mrb[2].mxu0  ;;  %v2191_v38 = vpop.f32.mrb[2].mxu1 }
  0xe4   :  { %v594_v39 = vadd.f32 %v2189_v37, %v2185_v33  ;;  %v1814_v40 = vpop.f32.mrb[3].mxu0  ;;  %v1874_v41 = vpop.f32.mrb[3].mxu1 }
  0xe9   :  { %v2195_v42 = vpop.f32.mrb[4].mxu0  ;;  %v2197_v43 = vpop.f32.mrb[4].mxu1 }
  0xea   :  { %v595_v44 = vadd.f32 %v594_v39, %v2195_v42  ;;  %v1817_v45 = vpop.f32.mrb[5].mxu0  ;;  %v1877_v46 = vpop.f32.mrb[5].mxu1 }
  0xeb   :  { %v2200_v47 = vpop.f32.mrb[6].mxu0  ;;  %v2202_v48 = vpop.f32.mrb[6].mxu1 }
  0xec   :  { %v596_v49 = vadd.f32 %v595_v44, %v2200_v47  ;;  %v1818_v50 = vpop.f32.mrb[7].mxu0  ;;  %v1878_v51 = vpop.f32.mrb[7].mxu1 }
  0xf1   :  { %v2205_v52 = vpop.f32.mrb[8].mxu0  ;;  %v2207_v53 = vpop.f32.mrb[8].mxu1 }
  0xf2   :  { %v597_v54 = vadd.f32 %v596_v49, %v2205_v52  ;;  %v1821_v55 = vpop.f32.mrb[9].mxu0  ;;  %v1881_v56 = vpop.f32.mrb[9].mxu1 }
  0xf3   :  { %v2210_v57 = vpop.f32.mrb[10].mxu0  ;;  %v2212_v58 = vpop.f32.mrb[10].mxu1 }
  0xf4   :  { %v598_v59 = vadd.f32 %v597_v54, %v2210_v57  ;;  %v1822_v60 = vpop.f32.mrb[11].mxu0  ;;  %v1882_v61 = vpop.f32.mrb[11].mxu1 }
  0xf9   :  { %v2215_v62 = vpop.f32.mrb[12].mxu0  ;;  %v2217_v63 = vpop.f32.mrb[12].mxu1 }
  0xfa   :  { %v599_v0 = vadd.f32 %v598_v59, %v2215_v62  ;;  %v1825_v1 = vpop.f32.mrb[13].mxu0  ;;  %v1885_v2 = vpop.f32.mrb[13].mxu1 }
  0xfb   :  { %v2220_v3 = vpop.f32.mrb[14].mxu0  ;;  %v2222_v4 = vpop.f32.mrb[14].mxu1 }
  0xfc   :  { %v600_v5 = vadd.f32 %v599_v0, %v2220_v3  ;;  %v1826_v6 = vpop.f32.mrb[15].mxu0  ;;  %v1886_v7 = vpop.f32.mrb[15].mxu1 }
 0x101   :  { %v2225_v8 = vpop.f32.mrb[16].mxu0  ;;  %v2227_v9 = vpop.f32.mrb[16].mxu1 }
 0x102   :  { %v601_v10 = vadd.f32 %v600_v5, %v2225_v8  ;;  %v1829_v11 = vpop.f32.mrb[17].mxu0  ;;  %v1889_v12 = vpop.f32.mrb[17].mxu1 }
 0x103   :  { %v2230_v13 = vpop.f32.mrb[18].mxu0  ;;  %v2232_v14 = vpop.f32.mrb[18].mxu1 }
 0x104   :  { %v602_v15 = vadd.f32 %v601_v10, %v2230_v13  ;;  %v1830_v16 = vpop.f32.mrb[19].mxu0  ;;  %v1890_v17 = vpop.f32.mrb[19].mxu1 }
 0x109   :  { %v2235_v18 = vpop.f32.mrb[20].mxu0  ;;  %v2237_v19 = vpop.f32.mrb[20].mxu1 }
 0x10a   :  { %v603_v20 = vadd.f32 %v602_v15, %v2235_v18  ;;  %v1833_v21 = vpop.f32.mrb[21].mxu0  ;;  %v1893_v22 = vpop.f32.mrb[21].mxu1 }
 0x10b   :  { %v2240_v23 = vpop.f32.mrb[22].mxu0  ;;  %v2242_v24 = vpop.f32.mrb[22].mxu1 }
 0x10c   :  { %v604_v25 = vadd.f32 %v603_v20, %v2240_v23  ;;  %v1834_v26 = vpop.f32.mrb[23].mxu0  ;;  %v1894_v27 = vpop.f32.mrb[23].mxu1 }
 0x111   :  { %v2245_v28 = vpop.f32.mrb[24].mxu0  ;;  %v2247_v29 = vpop.f32.mrb[24].mxu1 }
 0x112   :  { %v605_v30 = vadd.f32 %v604_v25, %v2245_v28  ;;  %v1837_v31 = vpop.f32.mrb[25].mxu0  ;;  %v1897_v32 = vpop.f32.mrb[25].mxu1 }
 0x113   :  { %v2250_v35 = vpop.f32.mrb[26].mxu0  ;;  %v2252_v36 = vpop.f32.mrb[26].mxu1 }
 0x114   :  { %v606_v39 = vadd.f32 %v605_v30, %v2250_v35  ;;  %v1838_v40 = vpop.f32.mrb[27].mxu0  ;;  %v1898_v41 = vpop.f32.mrb[27].mxu1 }
 0x119   :  { %v2255_v44 = vpop.f32.mrb[28].mxu0  ;;  %v2257_v45 = vpop.f32.mrb[28].mxu1 }
 0x11a   :  { %v607_v46 = vadd.f32 %v606_v39, %v2255_v44  ;;  %v1841_v49 = vpop.f32.mrb[29].mxu0  ;;  %v1901_v50 = vpop.f32.mrb[29].mxu1 }
 0x11b   :  { %v2260_v51 = vpop.f32.mrb[30].mxu0  ;;  %v2262_v54 = vpop.f32.mrb[30].mxu1 }
 0x11c   :  { %v608_v55 = vadd.f32 %v607_v46, %v2260_v51  ;;  %v1842_v56 = vpop.f32.mrb[31].mxu0  ;;  %v1902_v59 = vpop.f32.mrb[31].mxu1 }
 0x121   :  { %v2265_v60 = vpop.f32.mrb[32].mxu0  ;;  %v2267_v61 = vpop.f32.mrb[32].mxu1 }
 0x122   :  { %v609_v0 = vadd.f32 %v608_v55, %v2265_v60  ;;  %v1845_v1 = vpop.f32.mrb[33].mxu0  ;;  %v1905_v2 = vpop.f32.mrb[33].mxu1 }
 0x123   :  { %v2270_v5 = vpop.f32.mrb[34].mxu0  ;;  %v2272_v6 = vpop.f32.mrb[34].mxu1 }
 0x124   :  { %v610_v7 = vadd.f32 %v609_v0, %v2270_v5  ;;  %v1846_v10 = vpop.f32.mrb[35].mxu0  ;;  %v1906_v11 = vpop.f32.mrb[35].mxu1 }
 0x129   :  { %v2275_v12 = vpop.f32.mrb[36].mxu0  ;;  %v2277_v15 = vpop.f32.mrb[36].mxu1 }
 0x12a   :  { %v611_v16 = vadd.f32 %v610_v7, %v2275_v12  ;;  %v1849_v17 = vpop.f32.mrb[37].mxu0  ;;  %v1909_v20 = vpop.f32.mrb[37].mxu1 }
 0x12b   :  { %v2280_v21 = vpop.f32.mrb[38].mxu0  ;;  %v2282_v22 = vpop.f32.mrb[38].mxu1 }
 0x12c   :  { %3431 = vst [vmem:[#allocation2_spill] sm:$0xff] %v2282_v22  ;;  %v612_v25 = vadd.f32 %v611_v16, %v2280_v21  ;;  %v1850_v26 = vpop.f32.mrb[39].mxu0  ;;  %v1910_v27 = vpop.f32.mrb[39].mxu1 }
 0x131   :  { %v2285_v30 = vpop.f32.mrb[40].mxu0  ;;  %v2287_v31 = vpop.f32.mrb[40].mxu1 }
 0x132   :  { %3432 = vst [vmem:[#allocation3_spill] sm:$0xff] %v2287_v31  ;;  %v613_v32 = vadd.f32 %v612_v25, %v2285_v30  ;;  %v1853_v39 = vpop.f32.mrb[41].mxu0  ;;  %v1913_v40 = vpop.f32.mrb[41].mxu1 }
 0x133   :  { %v2290_v41 = vpop.f32.mrb[42].mxu0  ;;  %v2292_v46 = vpop.f32.mrb[42].mxu1 }
 0x134   :  { %3433 = vst [vmem:[#allocation4_spill] sm:$0xff] %v2290_v41  ;;  %v614_v49 = vadd.f32 %v613_v32, %v2290_v41  ;;  %v1854_v50 = vpop.f32.mrb[43].mxu0  ;;  %v1914_v55 = vpop.f32.mrb[43].mxu1 }
 0x139   :  { %v2295_v56 = vpop.f32.mrb[44].mxu0  ;;  %v2297_v59 = vpop.f32.mrb[44].mxu1 }
 0x13a   :  { %3434 = vst [vmem:[#allocation5_spill] sm:$0xff] %v2295_v56  ;;  %v615_v0 = vadd.f32 %v614_v49, %v2295_v56  ;;  %v1857_v1 = vpop.f32.mrb[45].mxu0  ;;  %v1917_v2 = vpop.f32.mrb[45].mxu1 }
 0x13b   :  { %v2300_v7 = vpop.f32.mrb[46].mxu0  ;;  %v2302_v10 = vpop.f32.mrb[46].mxu1 }
 0x13c   :  { %3435 = vst [vmem:[#allocation6_spill] sm:$0xff] %v2300_v7  ;;  %v616_v11 = vadd.f32 %v615_v0, %v2300_v7  ;;  %v1858_v16 = vpop.f32.mrb[47].mxu0  ;;  %v1918_v17 = vpop.f32.mrb[47].mxu1 }
 0x141   :  { %v2305_v20 = vpop.f32.mrb[48].mxu0  ;;  %v2307_v25 = vpop.f32.mrb[48].mxu1 }
 0x142   :  { %3436 = vst [vmem:[#allocation7_spill] sm:$0xff] %v2305_v20  ;;  %v617_v26 = vadd.f32 %v616_v11, %v2305_v20  ;;  %v1861_v27 = vpop.f32.mrb[49].mxu0  ;;  %v1921_v32 = vpop.f32.mrb[49].mxu1 }
 0x143   :  { %v2310_v39 = vpop.f32.mrb[50].mxu0  ;;  %v2312_v40 = vpop.f32.mrb[50].mxu1 }
 0x144   :  { %3437 = vst [vmem:[#allocation8_spill] sm:$0xff] %v2310_v39  ;;  %v618_v49 = vadd.f32 %v617_v26, %v2310_v39  ;;  %v1862_v50 = vpop.f32.mrb[51].mxu0  ;;  %v1922_v55 = vpop.f32.mrb[51].mxu1 }
 0x149   :  { %v2315_v1 = vpop.f32.mrb[52].mxu0  ;;  %v2317_v0 = vpop.f32.mrb[52].mxu1 }
 0x14a   :  { %3438 = vst [vmem:[#allocation9_spill] sm:$0xff] %v2317_v0  ;;  %v619_v2 = vadd.f32 %v618_v49, %v2315_v1  ;;  %v1865_v16 = vpop.f32.mrb[53].mxu0  ;;  %v1925_v17 = vpop.f32.mrb[53].mxu1 }
 0x14b   :  { %v2320_v7 = vpop.f32.mrb[54].mxu0  ;;  %v591_v11 = vpop.f32.mrb[54].mxu1 }
 0x14c   :  { %v620_v27 = vadd.f32 %v619_v2, %v2320_v7  ;;  %v1866_v32 = vpop.f32.mrb[55].mxu0  ;;  %v1926_v20 = vpop.f32.mrb[55].mxu1 }
 0x151   :  { %v2323_v56 = vpop.f32.mrb[56].mxu0 }
 0x152   :  { %v621_v26 = vadd.f32 %v620_v27, %v2323_v56  ;;  %v1869_v50 = vpop.f32.mrb[57].mxu0 }
 0x153   :  { %v2326_v55 = vpop.f32.mrb[58].mxu0 }
 0x154   :  { %v622_v39 = vadd.f32 %v621_v26, %v2326_v55  ;;  %v1870_v41 = vpop.f32.mrb[59].mxu0 }
 0x156   :  { %v623_v49 = vadd.f32 %v622_v39, %v2187_v34 }
 0x158   :  { %v624_v16 = vadd.f32 %v623_v49, %v2191_v38 }
 0x15a   :  { %v625_v17 = vadd.f32 %v624_v16, %v2197_v43 }
 0x15c   :  { %v626_v2 = vadd.f32 %v625_v17, %v2202_v48 }
 0x15e   :  { %v627_v20 = vadd.f32 %v626_v2, %v2207_v53 }
 0x160   :  { %v628_v11 = vadd.f32 %v627_v20, %v2212_v58 }
 0x162   :  { %v629_v27 = vadd.f32 %v628_v11, %v2217_v63 }
 0x164   :  { %v630_v32 = vadd.f32 %v629_v27, %v2222_v4 }
 0x166   :  { %v631_v50 = vadd.f32 %v630_v32, %v2227_v9 }
 0x168   :  { %v632_v41 = vadd.f32 %v631_v50, %v2232_v14 }
 0x16a   :  { %v633_v39 = vadd.f32 %v632_v41, %v2237_v19 }
 0x16c   :  { %v634_v26 = vadd.f32 %v633_v39, %v2242_v24 }
 0x16e   :  { %v635_v49 = vadd.f32 %v634_v26, %v2247_v29 }
 0x170   :  { %v636_v16 = vadd.f32 %v635_v49, %v2252_v36 }
 0x172   :  { %v637_v17 = vadd.f32 %v636_v16, %v2257_v45  ;;  %v650_v16 = vsel %vm649_vm2, %v2317_v0, 0.0 }
 0x174   :  { %v638_v2 = vadd.f32 %v637_v17, %v2262_v54 }
 0x176   :  { %v639_v20 = vadd.f32 %v638_v2, %v2267_v61 }
 0x178   :  { %v640_v11 = vadd.f32 %v639_v20, %v2272_v6 }
 0x17a   :  { %v641_v27 = vadd.f32 %v640_v11, %v2277_v15 }
 0x17c   :  { %v642_v32 = vadd.f32 %v641_v27, %v2282_v22 }
 0x17e   :  { %v643_v50 = vadd.f32 %v642_v32, %v2287_v31 }
 0x180   :  { %v644_v41 = vadd.f32 %v643_v50, %v2292_v46 }
 0x182   :  { %v645_v39 = vadd.f32 %v644_v41, %v2297_v59 }
 0x184   :  { %v646_v26 = vadd.f32 %v645_v39, %v2302_v10 }
 0x186   :  { %v647_v49 = vadd.f32 %v646_v26, %v2307_v25 }
 0x188   :  { %v648_v17 = vadd.f32 %v647_v49, %v2312_v40 }
 0x18a   :  { %v651_v2 = vadd.f32 %v650_v16, %v648_v17 }
 0x18c   :  { %v652_v20 = vrot.slane %v651_v2, 4 }
 0x18e   :  { %v653_v11 = vadd.f32 %v652_v20, %v651_v2 }
 0x190   :  { %v654_v27 = vrot.slane %v653_v11, 2 }
 0x192   :  { %v655_v22 = vadd.f32 %v654_v27, %v653_v11 }
 0x194   :  { %v656_v32 = vrot.slane %v655_v22, 1 }
 0x196   :  { %v657_v31 = vadd.f32 %v656_v32, %v655_v22 }
 0x198   :  { %v659_v50 = vmul.f32 0.0022222223, %v657_v31 }
 0x19a   :  { %v2358_v41 = vsub.f32 %v2185_v33, %v659_v50  ;;  %v2361_v39 = vsub.f32 %v2189_v37, %v659_v50  ;;  %v2364_v26 = vsub.f32 %v2195_v42, %v659_v50  ;;  %v2367_v0 = vsub.f32 %v2200_v47, %v659_v50 }
 0x19b   :  { %v2370_v49 = vsub.f32 %v2205_v52, %v659_v50  ;;  %v2373_v16 = vsub.f32 %v2210_v57, %v659_v50  ;;  %v2376_v22 = vsub.f32 %v2215_v62, %v659_v50  ;;  %v2379_v33 = vsub.f32 %v2220_v3, %v659_v50 }
 0x19c   :  { %3439 = vst [vmem:[#allocation10_spill] sm:$0xff] %v2358_v41  ;;  %3440 = vst [vmem:[#allocation11_spill] sm:$0xff] %v2361_v39  ;;  %v2382_v37 = vsub.f32 %v2225_v8, %v659_v50  ;;  %v2385_v42 = vsub.f32 %v2230_v13, %v659_v50  ;;  %v2388_v47 = vsub.f32 %v2235_v18, %v659_v50 }
 0x19d   :  { %3441 = vst [vmem:[#allocation12_spill] sm:$0xff] %v2364_v26  ;;  %v2391_v52 = vsub.f32 %v2240_v23, %v659_v50  ;;  %v2394_v57 = vsub.f32 %v2245_v28, %v659_v50  ;;  %v2397_v62 = vsub.f32 %v2250_v35, %v659_v50  ;;  %v2400_v3 = vsub.f32 %v2255_v44, %v659_v50  ;;  %v3442_v44 = vld [vmem:[#allocation4_spill] sm:$0xff] }
 0x19e   :  { %v2403_v8 = vsub.f32 %v2260_v51, %v659_v50  ;;  %v2406_v13 = vsub.f32 %v2265_v60, %v659_v50  ;;  %v2409_v18 = vsub.f32 %v2270_v5, %v659_v50  ;;  %v2412_v23 = vsub.f32 %v2275_v12, %v659_v50  ;;  %v3443_v51 = vld [vmem:[#allocation5_spill] sm:$0xff]  ;;  %v3444_v60 = vld [vmem:[#allocation6_spill] sm:$0xff]  ;;  %v3445_v5 = vld [vmem:[#allocation7_spill] sm:$0xff] }
 0x19f   :  { %v2415_v28 = vsub.f32 %v2280_v21, %v659_v50  ;;  %v2418_v35 = vsub.f32 %v2285_v30, %v659_v50  ;;  %v2421_v31 = vsub.f32 %v3442_v44, %v659_v50  ;;  %v2424_v17 = vsub.f32 %v3443_v51, %v659_v50  ;;  %v3446_v12 = vld [vmem:[#allocation8_spill] sm:$0xff] }
 0x1a0   :  { %v2427_v2 = vsub.f32 %v3444_v60, %v659_v50  ;;  %v2430_v20 = vsub.f32 %v3445_v5, %v659_v50  ;;  %v2433_v11 = vsub.f32 %v3446_v12, %v659_v50  ;;  %v2436_v21 = vsub.f32 %v2315_v1, %v659_v50 }
 0x1a1   :  { %v2439_v30 = vsub.f32 %v2320_v7, %v659_v50  ;;  %v2442_v27 = vsub.f32 %v2323_v56, %v659_v50  ;;  %v2445_v32 = vsub.f32 %v2326_v55, %v659_v50  ;;  %v2448_v44 = vsub.f32 %v2187_v34, %v659_v50 }
 0x1a2   :  { %v2451_v51 = vsub.f32 %v2191_v38, %v659_v50  ;;  %v2454_v60 = vsub.f32 %v2197_v43, %v659_v50  ;;  %v2457_v1 = vsub.f32 %v2202_v48, %v659_v50  ;;  %v2460_v7 = vsub.f32 %v2207_v53, %v659_v50 }
 0x1a3   :  { %v2463_v56 = vsub.f32 %v2212_v58, %v659_v50  ;;  %v2466_v55 = vsub.f32 %v2217_v63, %v659_v50  ;;  %v2469_v34 = vsub.f32 %v2222_v4, %v659_v50  ;;  %v2472_v38 = vsub.f32 %v2227_v9, %v659_v50 }
 0x1a4   :  { %v2475_v43 = vsub.f32 %v2232_v14, %v659_v50  ;;  %v2478_v48 = vsub.f32 %v2237_v19, %v659_v50  ;;  %v2481_v53 = vsub.f32 %v2242_v24, %v659_v50  ;;  %v2484_v58 = vsub.f32 %v2247_v29, %v659_v50  ;;  %v3451_v29 = vld [vmem:[#allocation2_spill] sm:$0xff] }
 0x1a5   :  { %v2487_v63 = vsub.f32 %v2252_v36, %v659_v50  ;;  %v2490_v4 = vsub.f32 %v2257_v45, %v659_v50  ;;  %v2493_v9 = vsub.f32 %v2262_v54, %v659_v50  ;;  %v2496_v14 = vsub.f32 %v2267_v61, %v659_v50  ;;  %v3453_v36 = vld [vmem:[#allocation3_spill] sm:$0xff] }
 0x1a6   :  { %3447 = vst [vmem:[#allocation4_spill] sm:$0xff] %v2484_v58  ;;  %v2499_v19 = vsub.f32 %v2272_v6, %v659_v50  ;;  %v2502_v24 = vsub.f32 %v2277_v15, %v659_v50  ;;  %v2505_v5 = vsub.f32 %v3451_v29, %v659_v50  ;;  %v2508_v12 = vsub.f32 %v3453_v36, %v659_v50  ;;  %v3460_v29 = vld [vmem:[#allocation9_spill] sm:$0xff] }
 0x1a7   :  { %3448 = vst [vmem:[#allocation5_spill] sm:$0xff] %v2496_v14  ;;  %v2511_v45 = vsub.f32 %v2292_v46, %v659_v50  ;;  %v2514_v54 = vsub.f32 %v2297_v59, %v659_v50  ;;  %v2517_v61 = vsub.f32 %v2302_v10, %v659_v50  ;;  %v2520_v6 = vsub.f32 %v2307_v25, %v659_v50 }
 0x1a8   :  { %3449 = vst [vmem:[#allocation6_spill] sm:$0xff] %v2499_v19  ;;  %3450 = vst [vmem:[#allocation7_spill] sm:$0xff] %v2502_v24  ;;  %v2523_v15 = vsub.f32 %v2312_v40, %v659_v50  ;;  %v717_v36 = vmul.f32 %v2358_v41, %v2358_v41  ;;  %v718_v46 = vmul.f32 %v2361_v39, %v2361_v39 }
 0x1a9   :  { %3452 = vst [vmem:[#allocation8_spill] sm:$0xff] %v2505_v5  ;;  %3454 = vst [vmem:[#allocation2_spill] sm:$0xff] %v2508_v12  ;;  %v2526_v5 = vsub.f32 %v3460_v29, %v659_v50  ;;  %v719_v59 = vmul.f32 %v2364_v26, %v2364_v26  ;;  %v720_v25 = vmul.f32 %v2367_v0, %v2367_v0 }
 0x1aa   :  { %3455 = vst [vmem:[#allocation3_spill] sm:$0xff] %v2511_v45  ;;  %3456 = vst [vmem:[#allocation13_spill] sm:$0xff] %v2514_v54  ;;  %v774_v10 = vadd.f32 %v718_v46, %v717_v36  ;;  %v721_v40 = vmul.f32 %v2370_v49, %v2370_v49  ;;  %v722_v50 = vmul.f32 %v2373_v16, %v2373_v16 }
 0x1ab   :  { %3457 = vst [vmem:[#allocation14_spill] sm:$0xff] %v2517_v61  ;;  %3458 = vst [vmem:[#allocation15_spill] sm:$0xff] %v2520_v6  ;;  %v723_v41 = vmul.f32 %v2376_v22, %v2376_v22  ;;  %v724_v26 = vmul.f32 %v2379_v33, %v2379_v33  ;;  %v725_v46 = vmul.f32 %v2382_v37, %v2382_v37 }
 0x1ac   :  { %3459 = vst [vmem:[#allocation16_spill] sm:$0xff] %v2523_v15  ;;  %3461 = vst [vmem:[#allocation9_spill] sm:$0xff] %v2526_v5  ;;  %v775_v6 = vadd.f32 %v774_v10, %v719_v59  ;;  %v726_v10 = vmul.f32 %v2385_v42, %v2385_v42 }
 0x1ae   :  { %v776_v15 = vadd.f32 %v775_v6, %v720_v25  ;;  %v727_v25 = vmul.f32 %v2388_v47, %v2388_v47 }
 0x1b0   :  { %v777_v29 = vadd.f32 %v776_v15, %v721_v40  ;;  %v728_v40 = vmul.f32 %v2391_v52, %v2391_v52 }
 0x1b2   :  { %v778_v39 = vadd.f32 %v777_v29, %v722_v50  ;;  %v729_v29 = vmul.f32 %v2394_v57, %v2394_v57 }
 0x1b4   :  { %v779_v36 = vadd.f32 %v778_v39, %v723_v41  ;;  %v730_v39 = vmul.f32 %v2397_v62, %v2397_v62 }
 0x1b6   :  { %v780_v59 = vadd.f32 %v779_v36, %v724_v26  ;;  %v731_v36 = vmul.f32 %v2400_v3, %v2400_v3 }
 0x1b8   :  { %v781_v6 = vadd.f32 %v780_v59, %v725_v46  ;;  %v732_v59 = vmul.f32 %v2403_v8, %v2403_v8 }
 0x1ba   :  { %v782_v15 = vadd.f32 %v781_v6, %v726_v10  ;;  %v733_v6 = vmul.f32 %v2406_v13, %v2406_v13 }
 0x1bc   :  { %v783_v50 = vadd.f32 %v782_v15, %v727_v25  ;;  %v734_v15 = vmul.f32 %v2409_v18, %v2409_v18 }
 0x1be   :  { %v784_v41 = vadd.f32 %v783_v50, %v728_v40  ;;  %v735_v50 = vmul.f32 %v2412_v23, %v2412_v23 }
 0x1c0   :  { %v785_v26 = vadd.f32 %v784_v41, %v729_v29  ;;  %v736_v41 = vmul.f32 %v2415_v28, %v2415_v28 }
 0x1c2   :  { %v786_v46 = vadd.f32 %v785_v26, %v730_v39  ;;  %v737_v26 = vmul.f32 %v2418_v35, %v2418_v35 }
 0x1c4   :  { %v787_v10 = vadd.f32 %v786_v46, %v731_v36  ;;  %v738_v46 = vmul.f32 %v2421_v31, %v2421_v31 }
 0x1c6   :  { %v788_v25 = vadd.f32 %v787_v10, %v732_v59  ;;  %v739_v10 = vmul.f32 %v2424_v17, %v2424_v17 }
 0x1c8   :  { %v789_v40 = vadd.f32 %v788_v25, %v733_v6  ;;  %v740_v25 = vmul.f32 %v2427_v2, %v2427_v2 }
 0x1ca   :  { %v790_v29 = vadd.f32 %v789_v40, %v734_v15  ;;  %v741_v40 = vmul.f32 %v2430_v20, %v2430_v20 }
 0x1cc   :  { %v791_v39 = vadd.f32 %v790_v29, %v735_v50  ;;  %v742_v29 = vmul.f32 %v2433_v11, %v2433_v11 }
 0x1ce   :  { %v792_v36 = vadd.f32 %v791_v39, %v736_v41  ;;  %v743_v39 = vmul.f32 %v2436_v21, %v2436_v21 }
 0x1d0   :  { %v793_v59 = vadd.f32 %v792_v36, %v737_v26  ;;  %v744_v36 = vmul.f32 %v2439_v30, %v2439_v30 }
 0x1d2   :  { %v794_v6 = vadd.f32 %v793_v59, %v738_v46  ;;  %v745_v59 = vmul.f32 %v2442_v27, %v2442_v27 }
 0x1d4   :  { %v795_v15 = vadd.f32 %v794_v6, %v739_v10  ;;  %v746_v6 = vmul.f32 %v2445_v32, %v2445_v32 }
 0x1d6   :  { %v796_v50 = vadd.f32 %v795_v15, %v740_v25  ;;  %v747_v15 = vmul.f32 %v2448_v44, %v2448_v44 }
 0x1d8   :  { %v797_v41 = vadd.f32 %v796_v50, %v741_v40  ;;  %v748_v50 = vmul.f32 %v2451_v51, %v2451_v51 }
 0x1da   :  { %v798_v26 = vadd.f32 %v797_v41, %v742_v29  ;;  %v749_v41 = vmul.f32 %v2454_v60, %v2454_v60 }
 0x1dc   :  { %v799_v46 = vadd.f32 %v798_v26, %v743_v39  ;;  %v750_v26 = vmul.f32 %v2457_v1, %v2457_v1 }
 0x1de   :  { %v800_v10 = vadd.f32 %v799_v46, %v744_v36  ;;  %v751_v46 = vmul.f32 %v2460_v7, %v2460_v7 }
 0x1e0   :  { %v801_v25 = vadd.f32 %v800_v10, %v745_v59  ;;  %v752_v10 = vmul.f32 %v2463_v56, %v2463_v56 }
 0x1e2   :  { %v802_v40 = vadd.f32 %v801_v25, %v746_v6  ;;  %v753_v25 = vmul.f32 %v2466_v55, %v2466_v55 }
 0x1e4   :  { %v803_v29 = vadd.f32 %v802_v40, %v747_v15  ;;  %v754_v40 = vmul.f32 %v2469_v34, %v2469_v34 }
 0x1e6   :  { %v804_v39 = vadd.f32 %v803_v29, %v748_v50  ;;  %v755_v29 = vmul.f32 %v2472_v38, %v2472_v38 }
 0x1e8   :  { %v805_v36 = vadd.f32 %v804_v39, %v749_v41  ;;  %v756_v39 = vmul.f32 %v2475_v43, %v2475_v43 }
 0x1ea   :  { %v806_v59 = vadd.f32 %v805_v36, %v750_v26  ;;  %v757_v36 = vmul.f32 %v2478_v48, %v2478_v48 }
 0x1ec   :  { %v807_v6 = vadd.f32 %v806_v59, %v751_v46  ;;  %v758_v59 = vmul.f32 %v2481_v53, %v2481_v53 }
 0x1ee   :  { %v808_v15 = vadd.f32 %v807_v6, %v752_v10  ;;  %v759_v6 = vmul.f32 %v2484_v58, %v2484_v58 }
 0x1f0   :  { %v809_v50 = vadd.f32 %v808_v15, %v753_v25  ;;  %v760_v15 = vmul.f32 %v2487_v63, %v2487_v63 }
 0x1f2   :  { %v810_v41 = vadd.f32 %v809_v50, %v754_v40  ;;  %v761_v50 = vmul.f32 %v2490_v4, %v2490_v4 }
 0x1f4   :  { %v811_v26 = vadd.f32 %v810_v41, %v755_v29  ;;  %v762_v41 = vmul.f32 %v2493_v9, %v2493_v9 }
 0x1f6   :  { %v812_v46 = vadd.f32 %v811_v26, %v756_v39  ;;  %v763_v26 = vmul.f32 %v2496_v14, %v2496_v14 }
 0x1f8   :  { %v813_v10 = vadd.f32 %v812_v46, %v757_v36  ;;  %v764_v46 = vmul.f32 %v2499_v19, %v2499_v19  ;;  %v3466_v19 = vld [vmem:[#allocation11_spill] sm:$0xff] }
 0x1fa   :  { %v814_v25 = vadd.f32 %v813_v10, %v758_v59  ;;  %v765_v10 = vmul.f32 %v2502_v24, %v2502_v24 }
 0x1fc   :  { %v815_v40 = vadd.f32 %v814_v25, %v759_v6  ;;  %v3462_v25 = vld [vmem:[#allocation8_spill] sm:$0xff] }
 0x1fd   :  { %v766_v58 = vmul.f32 %v3462_v25, %v3462_v25 }
 0x1fe   :  { %v816_v29 = vadd.f32 %v815_v40, %v760_v15  ;;  %v767_v40 = vmul.f32 %v2508_v12, %v2508_v12 }
 0x200   :  { %v817_v39 = vadd.f32 %v816_v29, %v761_v50  ;;  %v768_v29 = vmul.f32 %v2511_v45, %v2511_v45 }
 0x202   :  { %v818_v36 = vadd.f32 %v817_v39, %v762_v41  ;;  %v769_v39 = vmul.f32 %v2514_v54, %v2514_v54 }
 0x204   :  { %v819_v59 = vadd.f32 %v818_v36, %v763_v26  ;;  %v770_v36 = vmul.f32 %v2517_v61, %v2517_v61 }
 0x206   :  { %v820_v6 = vadd.f32 %v819_v59, %v764_v46  ;;  %v3463_v59 = vld [vmem:[#allocation15_spill] sm:$0xff] }
 0x207   :  { %v771_v25 = vmul.f32 %v3463_v59, %v3463_v59 }
 0x208   :  { %v821_v15 = vadd.f32 %v820_v6, %v765_v10  ;;  %v773_v6 = vmul.f32 %v2526_v5, %v2526_v5 }
 0x20a   :  { %v822_v50 = vadd.f32 %v821_v15, %v766_v58  ;;  %v3464_v58 = vld [vmem:[#allocation16_spill] sm:$0xff] }
 0x20b   :  { %v772_v15 = vmul.f32 %v3464_v58, %v3464_v58  ;;  %v3467_v58 = vld [vmem:[#allocation12_spill] sm:$0xff] }
 0x20c   :  { %v823_v41 = vadd.f32 %v822_v50, %v767_v40  ;;  %v829_v50 = vsel %vm649_vm2, %v773_v6, 0.0 }
 0x20e   :  { %v824_v26 = vadd.f32 %v823_v41, %v768_v29 }
 0x210   :  { %v825_v46 = vadd.f32 %v824_v26, %v769_v39 }
 0x212   :  { %v826_v10 = vadd.f32 %v825_v46, %v770_v36  ;;  %v3465_v46 = vld [vmem:[#allocation10_spill] sm:$0xff] }
 0x214   :  { %v827_v45 = vadd.f32 %v826_v10, %v771_v25 }
 0x216   :  { %v828_v40 = vadd.f32 %v827_v45, %v772_v15  ;;  %v3468_v15 = vld [vmem:[#allocation5_spill] sm:$0xff] }
 0x218   :  { %v830_v54 = vadd.f32 %v829_v50, %v828_v40  ;;  %v3469_v40 = vld [vmem:[#allocation6_spill] sm:$0xff] }
 0x21a   :  { %v831_v29 = vrot.slane %v830_v54, 4 }
 0x21c   :  { %v832_v41 = vadd.f32 %v831_v29, %v830_v54 }
 0x21e   :  { %v833_v12 = vrot.slane %v832_v41, 2 }
 0x220   :  { %v834_v61 = vadd.f32 %v833_v12, %v832_v41 }
 0x222   :  { %v835_v39 = vrot.slane %v834_v61, 1 }
 0x224   :  { %v836_v26 = vadd.f32 %v835_v39, %v834_v61 }
 0x226   :  { %v837_v24 = vmul.f32 0.0022222223, %v836_v26 }
 0x228   :  { %v838_v59 = vadd.f32 1e-05, %v837_v24 }
 0x22a   :  { %1967 = vrsqrt.f32 %v838_v59 }
 0x234   :  { %v1968_v36 = vpop.eup %1967 }
 0x235   :  { %v840_v5 = vmul.f32 %v1968_v36, %v3465_v46  ;;  %v841_v14 = vmul.f32 %v1968_v36, %v3466_v19  ;;  %v842_v25 = vmul.f32 %v1968_v36, %v3467_v58  ;;  %v843_v45 = vmul.f32 %v1968_v36, %v2367_v0  ;;  %v3477_v46 = vld [vmem:[#allocation15_spill] sm:$0xff] }
 0x236   :  { %v844_v10 = vmul.f32 %v1968_v36, %v2370_v49  ;;  %v845_v54 = vmul.f32 %v1968_v36, %v2373_v16  ;;  %v846_v12 = vmul.f32 %v1968_v36, %v2376_v22  ;;  %v847_v61 = vmul.f32 %v1968_v36, %v2379_v33 }
 0x237   :  { %v848_v24 = vmul.f32 %v1968_v36, %v2382_v37  ;;  %v849_v59 = vmul.f32 %v1968_v36, %v2385_v42  ;;  %v850_v6 = vmul.f32 %v1968_v36, %v2388_v47  ;;  %v851_v19 = vmul.f32 %v1968_v36, %v2391_v52 }
 0x238   :  { %v852_v58 = vmul.f32 %v1968_v36, %v2394_v57  ;;  %v853_v0 = vmul.f32 %v1968_v36, %v2397_v62  ;;  %v854_v49 = vmul.f32 %v1968_v36, %v2400_v3  ;;  %v855_v16 = vmul.f32 %v1968_v36, %v2403_v8 }
 0x239   :  { %v856_v22 = vmul.f32 %v1968_v36, %v2406_v13  ;;  %v857_v33 = vmul.f32 %v1968_v36, %v2409_v18  ;;  %v858_v37 = vmul.f32 %v1968_v36, %v2412_v23  ;;  %v859_v42 = vmul.f32 %v1968_v36, %v2415_v28 }
 0x23a   :  { %v860_v47 = vmul.f32 %v1968_v36, %v2418_v35  ;;  %v861_v52 = vmul.f32 %v1968_v36, %v2421_v31  ;;  %v862_v57 = vmul.f32 %v1968_v36, %v2424_v17  ;;  %v863_v62 = vmul.f32 %v1968_v36, %v2427_v2 }
 0x23b   :  { %v864_v3 = vmul.f32 %v1968_v36, %v2430_v20  ;;  %v865_v8 = vmul.f32 %v1968_v36, %v2433_v11  ;;  %v866_v13 = vmul.f32 %v1968_v36, %v2436_v21  ;;  %v867_v18 = vmul.f32 %v1968_v36, %v2439_v30 }
 0x23c   :  { %v868_v23 = vmul.f32 %v1968_v36, %v2442_v27  ;;  %v869_v28 = vmul.f32 %v1968_v36, %v2445_v32  ;;  %v870_v35 = vmul.f32 %v1968_v36, %v2448_v44  ;;  %v871_v31 = vmul.f32 %v1968_v36, %v2451_v51 }
 0x23d   :  { %v872_v17 = vmul.f32 %v1968_v36, %v2454_v60  ;;  %v873_v2 = vmul.f32 %v1968_v36, %v2457_v1  ;;  %v874_v20 = vmul.f32 %v1968_v36, %v2460_v7  ;;  %v875_v11 = vmul.f32 %v1968_v36, %v2463_v56 }
 0x23e   :  { %v876_v21 = vmul.f32 %v1968_v36, %v2466_v55  ;;  %v877_v30 = vmul.f32 %v1968_v36, %v2469_v34  ;;  %v878_v27 = vmul.f32 %v1968_v36, %v2472_v38  ;;  %v879_v32 = vmul.f32 %v1968_v36, %v2475_v43  ;;  %v2693_v34 = vld [vmem:[%s3351_s2] ss:$0 sm:$0xff]  ;;  %v3471_v38 = vld [vmem:[#allocation7_spill] sm:$0xff] }
 0x23f   :  { %v880_v44 = vmul.f32 %v1968_v36, %v2478_v48  ;;  %v881_v51 = vmul.f32 %v1968_v36, %v2481_v53  ;;  %v883_v60 = vmul.f32 %v1968_v36, %v2487_v63  ;;  %v884_v1 = vmul.f32 %v1968_v36, %v2490_v4  ;;  %3470 = vst [vmem:[#allocation10_spill] sm:$0xff] %v2693_v34  ;;  %v3472_v48 = vld [vmem:[#allocation8_spill] sm:$0xff]  ;;  %v3473_v53 = vld [vmem:[#allocation2_spill] sm:$0xff]  ;;  %v3474_v63 = vld [vmem:[#allocation3_spill] sm:$0xff] }
 0x240   :  { %v885_v7 = vmul.f32 %v1968_v36, %v2493_v9  ;;  %v886_v56 = vmul.f32 %v1968_v36, %v3468_v15  ;;  %v887_v55 = vmul.f32 %v1968_v36, %v3469_v40  ;;  %v888_v43 = vmul.f32 %v1968_v36, %v3471_v38  ;;  %v3475_v4 = vld [vmem:[#allocation13_spill] sm:$0xff]  ;;  %v3476_v9 = vld [vmem:[#allocation14_spill] sm:$0xff]  ;;  %v3478_v40 = vld [vmem:[#allocation16_spill] sm:$0xff] }
 0x241   :  { %v889_v50 = vmul.f32 %v1968_v36, %v3472_v48  ;;  %v890_v29 = vmul.f32 %v1968_v36, %v3473_v53  ;;  %v891_v41 = vmul.f32 %v1968_v36, %v3474_v63  ;;  %v892_v39 = vmul.f32 %v1968_v36, %v3475_v4  ;;  %v3479_v38 = vld [vmem:[#allocation4_spill] sm:$0xff]  ;;  %v3480_v53 = vld [vmem:[#allocation9_spill] sm:$0xff] }
 0x242   :  { %v893_v26 = vmul.f32 %v1968_v36, %v3476_v9  ;;  %v894_v15 = vmul.f32 %v1968_v36, %v3477_v46  ;;  %v895_v34 = vmul.f32 %v1968_v36, %v3478_v40  ;;  %v882_v48 = vmul.f32 %v1968_v36, %v3479_v38 }
 0x243   :  { %v896_v63 = vmul.f32 %v1968_v36, %v3480_v53 }
 0x246   :  { %v3481_v4 = vld [vmem:[#allocation10_spill] sm:$0xff] }
 0x247   :  { %v904_v9 = vmul.f32 %v3481_v4, %v840_v5  ;;  %v905_v46 = vmul.f32 %v3481_v4, %v841_v14  ;;  %v906_v40 = vmul.f32 %v3481_v4, %v842_v25  ;;  %v907_v38 = vmul.f32 %v3481_v4, %v843_v45 }
 0x248   :  { %v908_v36 = vmul.f32 %v3481_v4, %v844_v10  ;;  %v909_v53 = vmul.f32 %v3481_v4, %v845_v54  ;;  %v910_v5 = vmul.f32 %v3481_v4, %v846_v12  ;;  %v911_v14 = vmul.f32 %v3481_v4, %v847_v61 }
 0x249   :  { %v912_v25 = vmul.f32 %v3481_v4, %v848_v24  ;;  %v913_v45 = vmul.f32 %v3481_v4, %v849_v59  ;;  %v914_v10 = vmul.f32 %v3481_v4, %v850_v6  ;;  %v915_v54 = vmul.f32 %v3481_v4, %v851_v19 }
 0x24a   :  { %v916_v12 = vmul.f32 %v3481_v4, %v852_v58  ;;  %v917_v61 = vmul.f32 %v3481_v4, %v853_v0  ;;  %v918_v24 = vmul.f32 %v3481_v4, %v854_v49  ;;  %v919_v59 = vmul.f32 %v3481_v4, %v855_v16 }
 0x24b   :  { %v920_v6 = vmul.f32 %v3481_v4, %v856_v22  ;;  %v921_v19 = vmul.f32 %v3481_v4, %v857_v33  ;;  %v922_v58 = vmul.f32 %v3481_v4, %v858_v37  ;;  %v923_v0 = vmul.f32 %v3481_v4, %v859_v42 }
 0x24c   :  { %v924_v49 = vmul.f32 %v3481_v4, %v860_v47  ;;  %v925_v16 = vmul.f32 %v3481_v4, %v861_v52  ;;  %v926_v22 = vmul.f32 %v3481_v4, %v862_v57  ;;  %v927_v33 = vmul.f32 %v3481_v4, %v863_v62 }
 0x24d   :  { %v928_v37 = vmul.f32 %v3481_v4, %v864_v3  ;;  %v929_v42 = vmul.f32 %v3481_v4, %v865_v8  ;;  %v930_v47 = vmul.f32 %v3481_v4, %v866_v13  ;;  %v931_v52 = vmul.f32 %v3481_v4, %v867_v18 }
 0x24e   :  { %v932_v57 = vmul.f32 %v3481_v4, %v868_v23  ;;  %v933_v62 = vmul.f32 %v3481_v4, %v869_v28  ;;  %v934_v3 = vmul.f32 %v3481_v4, %v870_v35  ;;  %v935_v8 = vmul.f32 %v3481_v4, %v871_v31 }
 0x24f   :  { %v936_v13 = vmul.f32 %v3481_v4, %v872_v17  ;;  %v937_v18 = vmul.f32 %v3481_v4, %v873_v2  ;;  %v938_v23 = vmul.f32 %v3481_v4, %v874_v20  ;;  %v939_v28 = vmul.f32 %v3481_v4, %v875_v11 }
 0x250   :  { %v940_v35 = vmul.f32 %v3481_v4, %v876_v21  ;;  %v941_v31 = vmul.f32 %v3481_v4, %v877_v30  ;;  %v942_v17 = vmul.f32 %v3481_v4, %v878_v27  ;;  %v943_v2 = vmul.f32 %v3481_v4, %v879_v32 }
 0x251   :  { %v944_v20 = vmul.f32 %v3481_v4, %v880_v44  ;;  %v945_v11 = vmul.f32 %v3481_v4, %v881_v51  ;;  %v946_v21 = vmul.f32 %v3481_v4, %v882_v48  ;;  %v947_v30 = vmul.f32 %v3481_v4, %v883_v60  ;;  %v2754_v44 = vld [vmem:[%s3352_s3] ss:$0 sm:$0xff] }
 0x252   :  { %v948_v27 = vmul.f32 %v3481_v4, %v884_v1  ;;  %v949_v32 = vmul.f32 %v3481_v4, %v885_v7  ;;  %3482 = vst [vmem:[#allocation11_spill] sm:$0xff] %v2754_v44  ;;  %v950_v51 = vmul.f32 %v3481_v4, %v886_v56  ;;  %v951_v48 = vmul.f32 %v3481_v4, %v887_v55 }
 0x253   :  { %v952_v60 = vmul.f32 %v3481_v4, %v888_v43  ;;  %v953_v1 = vmul.f32 %v3481_v4, %v889_v50  ;;  %v954_v7 = vmul.f32 %v3481_v4, %v890_v29  ;;  %v955_v44 = vmul.f32 %v3481_v4, %v891_v41 }
 0x254   :  { %v956_v56 = vmul.f32 %v3481_v4, %v892_v39  ;;  %v957_v55 = vmul.f32 %v3481_v4, %v893_v26  ;;  %v958_v43 = vmul.f32 %v3481_v4, %v894_v15  ;;  %v959_v50 = vmul.f32 %v3481_v4, %v895_v34 }
 0x255   :  { %v960_v29 = vmul.f32 %v3481_v4, %v896_v63 }
 0x259   :  { %v3483_v41 = vld [vmem:[#allocation11_spill] sm:$0xff] }
 0x25a   :  { %v2768_v39 = vadd.f32 %v3483_v41, %v904_v9  ;;  %v2771_v26 = vadd.f32 %v3483_v41, %v905_v46  ;;  %v2774_v15 = vadd.f32 %v3483_v41, %v906_v40  ;;  %v2777_v34 = vadd.f32 %v3483_v41, %v907_v38 }
 0x25b   :  { %v2780_v4 = vadd.f32 %v3483_v41, %v908_v36  ;;  %v2783_v63 = vadd.f32 %v3483_v41, %v909_v53  ;;  %v2786_v9 = vadd.f32 %v3483_v41, %v910_v5  ;;  %v2792_v46 = vadd.f32 %v3483_v41, %v912_v25 }
 0x25c   :  { %3484 = vst [vmem:[#allocation12_spill] sm:$0xff] %v2768_v39  ;;  %3485 = vst [vmem:[#allocation5_spill] sm:$0xff] %v2771_v26  ;;  %v2789_v39 = vadd.f32 %v3483_v41, %v911_v14  ;;  %v2795_v40 = vadd.f32 %v3483_v41, %v913_v45  ;;  %v2798_v38 = vadd.f32 %v3483_v41, %v914_v10 }
 0x25d   :  { %3486 = vst [vmem:[#allocation6_spill] sm:$0xff] %v2774_v15  ;;  %3487 = vst [vmem:[#allocation7_spill] sm:$0xff] %v2777_v34  ;;  %v2801_v36 = vadd.f32 %v3483_v41, %v915_v54  ;;  %v2804_v53 = vadd.f32 %v3483_v41, %v916_v12  ;;  %v2807_v5 = vadd.f32 %v3483_v41, %v917_v61 }
 0x25e   :  { %3488 = vst [vmem:[#allocation8_spill] sm:$0xff] %v2780_v4  ;;  %3489 = vst [vmem:[#allocation2_spill] sm:$0xff] %v2783_v63  ;;  %v2810_v14 = vadd.f32 %v3483_v41, %v918_v24  ;;  %v2813_v25 = vadd.f32 %v3483_v41, %v919_v59  ;;  %v2816_v45 = vadd.f32 %v3483_v41, %v920_v6 }
 0x25f   :  { %3490 = vst [vmem:[#allocation3_spill] sm:$0xff] %v2786_v9  ;;  %3491 = vst [vmem:[#allocation13_spill] sm:$0xff] %v2789_v39  ;;  %v2819_v10 = vadd.f32 %v3483_v41, %v921_v19  ;;  %v2822_v54 = vadd.f32 %v3483_v41, %v922_v58  ;;  %v2825_v12 = vadd.f32 %v3483_v41, %v923_v0 }
 0x260   :  { %3492 = vst [vmem:[#allocation14_spill] sm:$0xff] %v2792_v46  ;;  %3493 = vst [vmem:[#allocation15_spill] sm:$0xff] %v2795_v40  ;;  %v2828_v61 = vadd.f32 %v3483_v41, %v924_v49  ;;  %v2831_v24 = vadd.f32 %v3483_v41, %v925_v16  ;;  %v2834_v59 = vadd.f32 %v3483_v41, %v926_v22 }
 0x261   :  { %3494 = vst [vmem:[#allocation16_spill] sm:$0xff] %v2798_v38  ;;  %3495 = vst [vmem:[#allocation4_spill] sm:$0xff] %v2801_v36  ;;  %v2837_v6 = vadd.f32 %v3483_v41, %v927_v33  ;;  %v2840_v19 = vadd.f32 %v3483_v41, %v928_v37  ;;  %v2843_v58 = vadd.f32 %v3483_v41, %v929_v42 }
 0x262   :  { %3496 = vst [vmem:[#allocation9_spill] sm:$0xff] %v2804_v53  ;;  %3497 = vst [vmem:[#allocation10_spill] sm:$0xff] %v2807_v5  ;;  %v2846_v0 = vadd.f32 %v3483_v41, %v930_v47  ;;  %v2849_v49 = vadd.f32 %v3483_v41, %v931_v52  ;;  %v2852_v16 = vadd.f32 %v3483_v41, %v932_v57 }
 0x263   :  { %3498 = vst [vmem:[#allocation11_spill] sm:$0xff] %v2813_v25  ;;  %3499 = vst [vmem:[#allocation17_spill] sm:$0xff] %v2822_v54  ;;  %v2855_v22 = vadd.f32 %v3483_v41, %v933_v62  ;;  %v2858_v33 = vadd.f32 %v3483_v41, %v934_v3  ;;  %v2861_v37 = vadd.f32 %v3483_v41, %v935_v8 }
 0x264   :  { %3500 = vst [vmem:[#allocation18_spill] sm:$0xff] %v2831_v24  ;;  %3501 = vst [vmem:[#allocation19_spill] sm:$0xff] %v2840_v19  ;;  %v2864_v42 = vadd.f32 %v3483_v41, %v936_v13  ;;  %v2867_v47 = vadd.f32 %v3483_v41, %v937_v18  ;;  %v2870_v52 = vadd.f32 %v3483_v41, %v938_v23 }
 0x265   :  { %3502 = vst [vmem:[#allocation20_spill] sm:$0xff] %v2849_v49  ;;  %3503 = vst [vmem:[#allocation21_spill] sm:$0xff] %v2858_v33  ;;  %v2873_v57 = vadd.f32 %v3483_v41, %v939_v28  ;;  %v2876_v62 = vadd.f32 %v3483_v41, %v940_v35  ;;  %v2879_v3 = vadd.f32 %v3483_v41, %v941_v31 }
 0x266   :  { %3504 = vst [vmem:[#allocation22_spill] sm:$0xff] %v2867_v47  ;;  %v2882_v8 = vadd.f32 %v3483_v41, %v942_v17  ;;  %v2885_v13 = vadd.f32 %v3483_v41, %v943_v2  ;;  %v2888_v18 = vadd.f32 %v3483_v41, %v944_v20  ;;  %v2891_v23 = vadd.f32 %v3483_v41, %v945_v11 }
 0x267   :  { %3505 = vst [vmem:[#allocation23_spill] sm:$0xff] %v2876_v62  ;;  %v2894_v28 = vadd.f32 %v3483_v41, %v946_v21  ;;  %v2897_v35 = vadd.f32 %v3483_v41, %v947_v30  ;;  %v2900_v31 = vadd.f32 %v3483_v41, %v948_v27  ;;  %v2903_v17 = vadd.f32 %v3483_v41, %v949_v32 }
 0x268   :  { %3506 = vst [vmem:[#allocation24_spill] sm:$0xff] %v2885_v13  ;;  %v2906_v2 = vadd.f32 %v3483_v41, %v950_v51  ;;  %v2909_v20 = vadd.f32 %v3483_v41, %v951_v48  ;;  %v2912_v11 = vadd.f32 %v3483_v41, %v952_v60  ;;  %v2915_v21 = vadd.f32 %v3483_v41, %v953_v1  ;;  %v3520_v1 = vld [vmem:[#allocation12_spill] sm:$0xff] }
 0x269   :  { %3507 = vst [vmem:[#allocation25_spill] sm:$0xff] %v2894_v28  ;;  %3508 = vst [vmem:[#allocation26_spill] sm:$0xff] %v2900_v31  ;;  %v2918_v30 = vadd.f32 %v3483_v41, %v954_v7  ;;  %v2921_v27 = vadd.f32 %v3483_v41, %v955_v44  ;;  %v2924_v32 = vadd.f32 %v3483_v41, %v956_v56  ;;  %v2942_v44 = vmul.f32 0.2, %v2771_v26 }
 0x26a   :  { %3509 = vst [vmem:[#allocation27_spill] sm:$0xff] %v2903_v17  ;;  %3510 = vst [vmem:[#allocation28_spill] sm:$0xff] %v2906_v2  ;;  %v2927_v51 = vadd.f32 %v3483_v41, %v957_v55  ;;  %v2930_v48 = vadd.f32 %v3483_v41, %v958_v43  ;;  %v2933_v60 = vadd.f32 %v3483_v41, %v959_v50  ;;  %v2945_v56 = vmul.f32 0.2, %v2774_v15 }
 0x26b   :  { %3511 = vst [vmem:[#allocation29_spill] sm:$0xff] %v2909_v20  ;;  %3512 = vst [vmem:[#allocation30_spill] sm:$0xff] %v2912_v11  ;;  %v2939_v7 = vadd.f32 %v3483_v41, %v960_v29  ;;  %v2948_v55 = vmul.f32 0.2, %v2777_v34  ;;  %v2951_v43 = vmul.f32 0.2, %v2780_v4 }
 0x26c   :  { %3513 = vst [vmem:[#allocation31_spill] sm:$0xff] %v2915_v21  ;;  %3514 = vst [vmem:[#allocation32_spill] sm:$0xff] %v2918_v30  ;;  %v2936_v21 = vmul.f32 0.2, %v3520_v1  ;;  %v2954_v50 = vmul.f32 0.2, %v2783_v63 }
 0x26d   :  { %3515 = vst [vmem:[#allocation33_spill] sm:$0xff] %v2921_v27  ;;  %3516 = vst [vmem:[#allocation34_spill] sm:$0xff] %v2924_v32  ;;  %v2962_v41 = vmul.f32 0.2, %v2789_v39  ;;  %v2973_v32 = vmul.f32 0.2, %v2798_v38 }
 0x26e   :  { %3517 = vst [vmem:[#allocation35_spill] sm:$0xff] %v2927_v51  ;;  %3518 = vst [vmem:[#allocation36_spill] sm:$0xff] %v2930_v48  ;;  %v2968_v48 = vmul.f32 0.2, %v2795_v40  ;;  %v2976_v27 = vmul.f32 0.2, %v2801_v36 }
 0x26f   :  { %3519 = vst [vmem:[#allocation37_spill] sm:$0xff] %v2933_v60  ;;  %3521 = vst [vmem:[#allocation38_spill] sm:$0xff] %v2936_v21  ;;  %v2957_v60 = vmul.f32 0.2, %v2786_v9  ;;  %v2979_v29 = vmul.f32 0.2, %v2804_v53 }
 0x270   :  { %3522 = vst [vmem:[#allocation39_spill] sm:$0xff] %v2939_v7  ;;  %3523 = vst [vmem:[#allocation40_spill] sm:$0xff] %v2942_v44  ;;  %v2965_v7 = vmul.f32 0.2, %v2792_v46  ;;  %v2984_v1 = vmul.f32 0.2, %v2807_v5 }
 0x271   :  { %3524 = vst [vmem:[#allocation41_spill] sm:$0xff] %v2945_v56  ;;  %3525 = vst [vmem:[#allocation42_spill] sm:$0xff] %v2948_v55  ;;  %v2987_v30 = vmul.f32 0.2, %v2810_v14  ;;  %v2990_v51 = vmul.f32 0.2, %v2813_v25 }
 0x272   :  { %3526 = vst [vmem:[#allocation43_spill] sm:$0xff] %v2951_v43  ;;  %3527 = vst [vmem:[#allocation44_spill] sm:$0xff] %v2954_v50  ;;  %v2995_v26 = vmul.f32 0.2, %v2816_v45  ;;  %v2998_v11 = vmul.f32 0.2, %v2819_v10 }
 0x273   :  { %3528 = vst [vmem:[#allocation45_spill] sm:$0xff] %v2957_v60  ;;  %3529 = vst [vmem:[#allocation46_spill] sm:$0xff] %v2962_v41  ;;  %v3001_v21 = vmul.f32 0.2, %v2822_v54  ;;  %v3006_v15 = vmul.f32 0.2, %v2825_v12 }
 0x274   :  { %3530 = vst [vmem:[#allocation47_spill] sm:$0xff] %v2965_v7  ;;  %3531 = vst [vmem:[#allocation48_spill] sm:$0xff] %v2968_v48  ;;  %v3009_v25 = vmul.f32 0.2, %v2828_v61  ;;  %v3012_v44 = vmul.f32 0.2, %v2831_v24 }
 0x275   :  { %3532 = vst [vmem:[#allocation49_spill] sm:$0xff] %v2973_v32  ;;  %3533 = vst [vmem:[#allocation50_spill] sm:$0xff] %v2976_v27  ;;  %v3017_v34 = vmul.f32 0.2, %v2834_v59  ;;  %v3020_v54 = vmul.f32 0.2, %v2837_v6 }
 0x276   :  { %3534 = vst [vmem:[#allocation51_spill] sm:$0xff] %v2979_v29  ;;  %3535 = vst [vmem:[#allocation52_spill] sm:$0xff] %v2984_v1  ;;  %v3023_v56 = vmul.f32 0.2, %v2840_v19  ;;  %v3028_v4 = vmul.f32 0.2, %v2843_v58  ;;  %v1096_v29 = vmax.f32 %v2810_v14, %v2987_v30  ;;  %v1098_v30 = vmax.f32 %v2816_v45, %v2995_v26 }
 0x277   :  { %v3031_v24 = vmul.f32 0.2, %v2846_v0  ;;  %v3034_v55 = vmul.f32 0.2, %v2849_v49  ;;  %v3039_v63 = vmul.f32 0.2, %v2852_v16  ;;  %v1104_v45 = vmax.f32 %v2834_v59, %v3017_v34 }
 0x278   :  { %v3042_v19 = vmul.f32 0.2, %v2855_v22  ;;  %v3045_v43 = vmul.f32 0.2, %v2858_v33  ;;  %v3050_v9 = vmul.f32 0.2, %v2861_v37 }
 0x279   :  { %v3053_v49 = vmul.f32 0.2, %v2864_v42  ;;  %v3056_v50 = vmul.f32 0.2, %v2867_v47  ;;  %v3061_v39 = vmul.f32 0.2, %v2870_v52 }
 0x27a   :  { %v3064_v33 = vmul.f32 0.2, %v2873_v57  ;;  %v3067_v60 = vmul.f32 0.2, %v2876_v62  ;;  %v3072_v46 = vmul.f32 0.2, %v2879_v3  ;;  %v1111_v34 = vmax.f32 %v2855_v22, %v3042_v19 }
 0x27b   :  { %v3075_v47 = vmul.f32 0.2, %v2882_v8  ;;  %v3078_v41 = vmul.f32 0.2, %v2885_v13  ;;  %v3083_v40 = vmul.f32 0.2, %v2888_v18 }
 0x27c   :  { %v3086_v62 = vmul.f32 0.2, %v2891_v23  ;;  %v3089_v7 = vmul.f32 0.2, %v2894_v28  ;;  %v3094_v38 = vmul.f32 0.2, %v2897_v35  ;;  %v1119_v22 = vmax.f32 %v2879_v3, %v3072_v46 }
 0x27d   :  { %v3097_v13 = vmul.f32 0.2, %v2900_v31  ;;  %v3100_v48 = vmul.f32 0.2, %v2903_v17  ;;  %v3105_v36 = vmul.f32 0.2, %v2906_v2 }
 0x27e   :  { %3536 = vst [vmem:[#allocation53_spill] sm:$0xff] %v3089_v7  ;;  %v3108_v28 = vmul.f32 0.2, %v2909_v20  ;;  %v3540_v7 = vld [vmem:[#allocation30_spill] sm:$0xff]  ;;  %v3542_v53 = vld [vmem:[#allocation31_spill] sm:$0xff]  ;;  %v3543_v17 = vld [vmem:[#allocation32_spill] sm:$0xff] }
 0x27f   :  { %3537 = vst [vmem:[#allocation54_spill] sm:$0xff] %v3097_v13  ;;  %3538 = vst [vmem:[#allocation55_spill] sm:$0xff] %v3100_v48  ;;  %v3111_v32 = vmul.f32 0.2, %v3540_v7  ;;  %v3116_v31 = vmul.f32 0.2, %v3542_v53 }
 0x280   :  { %3539 = vst [vmem:[#allocation56_spill] sm:$0xff] %v3108_v28  ;;  %v3119_v48 = vmul.f32 0.2, %v3543_v17  ;;  %v3545_v13 = vld [vmem:[#allocation33_spill] sm:$0xff]  ;;  %v3547_v1 = vld [vmem:[#allocation11_spill] sm:$0xff]  ;;  %v3548_v20 = vld [vmem:[#allocation34_spill] sm:$0xff] }
 0x281   :  { %3541 = vst [vmem:[#allocation57_spill] sm:$0xff] %v3111_v32  ;;  %v3122_v27 = vmul.f32 0.2, %v3545_v13  ;;  %v1097_v5 = vmax.f32 %v3547_v1, %v2990_v51  ;;  %v3127_v28 = vmul.f32 0.2, %v3548_v20  ;;  %v3549_v7 = vld [vmem:[#allocation35_spill] sm:$0xff]  ;;  %v1099_v51 = vmax.f32 %v2819_v10, %v2998_v11 }
 0x282   :  { %3544 = vst [vmem:[#allocation31_spill] sm:$0xff] %v3119_v48  ;;  %v3130_v32 = vmul.f32 0.2, %v3549_v7  ;;  %v3550_v2 = vld [vmem:[#allocation36_spill] sm:$0xff]  ;;  %v3552_v17 = vld [vmem:[#allocation37_spill] sm:$0xff]  ;;  %v3553_v13 = vld [vmem:[#allocation39_spill] sm:$0xff]  ;;  %v1101_v7 = vmax.f32 %v2825_v12, %v3006_v15  ;;  %v1108_v15 = vmax.f32 %v2846_v0, %v3031_v24  ;;  %v1116_v0 = vmax.f32 %v2870_v52, %v3061_v39 }
 0x283   :  { %3546 = vst [vmem:[#allocation58_spill] sm:$0xff] %v3122_v27  ;;  %v3133_v14 = vmul.f32 0.2, %v3550_v2  ;;  %v3138_v48 = vmul.f32 0.2, %v3552_v17  ;;  %v3554_v1 = vld [vmem:[#allocation17_spill] sm:$0xff]  ;;  %v1102_v2 = vmax.f32 %v2828_v61, %v3009_v25  ;;  %v1110_v61 = vmax.f32 %v2852_v16, %v3039_v63 }
 0x284   :  { %v1081_v27 = vmul.f32 0.2, %v3553_v13  ;;  %v1100_v20 = vmax.f32 %v3554_v1, %v3001_v21  ;;  %v1105_v13 = vmax.f32 %v2837_v6, %v3020_v54  ;;  %v3556_v10 = vld [vmem:[#allocation19_spill] sm:$0xff]  ;;  %v1107_v21 = vmax.f32 %v2843_v58, %v3028_v4  ;;  %v3557_v25 = vld [vmem:[#allocation20_spill] sm:$0xff]  ;;  %v3558_v54 = vld [vmem:[#allocation21_spill] sm:$0xff] }
 0x285   :  { %3551 = vst [vmem:[#allocation11_spill] sm:$0xff] %v3133_v14  ;;  %v3555_v14 = vld [vmem:[#allocation18_spill] sm:$0xff]  ;;  %v1106_v11 = vmax.f32 %v3556_v10, %v3023_v56  ;;  %v1109_v12 = vmax.f32 %v3557_v25, %v3034_v55  ;;  %v1112_v59 = vmax.f32 %v3558_v54, %v3045_v43  ;;  %v1113_v6 = vmax.f32 %v2861_v37, %v3050_v9  ;;  %v3560_v19 = vld [vmem:[#allocation23_spill] sm:$0xff]  ;;  %v3562_v52 = vld [vmem:[#allocation53_spill] sm:$0xff] }
 0x286   :  { %v1103_v26 = vmax.f32 %v3555_v14, %v3012_v44  ;;  %v1114_v4 = vmax.f32 %v2864_v42, %v3053_v49  ;;  %v3559_v24 = vld [vmem:[#allocation22_spill] sm:$0xff]  ;;  %v1117_v63 = vmax.f32 %v2873_v57, %v3064_v33  ;;  %v1118_v16 = vmax.f32 %v3560_v19, %v3067_v60  ;;  %v3561_v49 = vld [vmem:[#allocation24_spill] sm:$0xff]  ;;  %v3563_v33 = vld [vmem:[#allocation25_spill] sm:$0xff] }
 0x287   :  { %v1115_v58 = vmax.f32 %v3559_v24, %v3056_v50  ;;  %v1120_v9 = vmax.f32 %v2882_v8, %v3075_v47  ;;  %v1121_v37 = vmax.f32 %v3561_v49, %v3078_v41  ;;  %v1122_v42 = vmax.f32 %v2888_v18, %v3083_v40  ;;  %v3564_v44 = vld [vmem:[#allocation54_spill] sm:$0xff]  ;;  %v3566_v56 = vld [vmem:[#allocation55_spill] sm:$0xff]  ;;  %v3568_v55 = vld [vmem:[#allocation28_spill] sm:$0xff] }
 0x288   :  { %v1123_v39 = vmax.f32 %v2891_v23, %v3086_v62  ;;  %v1124_v57 = vmax.f32 %v3563_v33, %v3562_v52  ;;  %v1125_v60 = vmax.f32 %v2897_v35, %v3094_v38  ;;  %v3565_v46 = vld [vmem:[#allocation26_spill] sm:$0xff]  ;;  %v3567_v47 = vld [vmem:[#allocation27_spill] sm:$0xff]  ;;  %v1128_v43 = vmax.f32 %v3568_v55, %v3105_v36  ;;  %v3569_v50 = vld [vmem:[#allocation56_spill] sm:$0xff] }
 0x289   :  { %v1126_v3 = vmax.f32 %v3565_v46, %v3564_v44  ;;  %v1127_v8 = vmax.f32 %v3567_v47, %v3566_v56  ;;  %v3570_v40 = vld [vmem:[#allocation29_spill] sm:$0xff]  ;;  %v3572_v62 = vld [vmem:[#allocation30_spill] sm:$0xff]  ;;  %v1131_v14 = vmax.f32 %v3542_v53, %v3116_v31  ;;  %v3573_v1 = vld [vmem:[#allocation31_spill] sm:$0xff]  ;;  %v1137_v46 = vmax.f32 %v3552_v17, %v3138_v48 }
 0x28a   :  { %v1129_v18 = vmax.f32 %v3570_v40, %v3569_v50  ;;  %v3571_v41 = vld [vmem:[#allocation57_spill] sm:$0xff]  ;;  %v3574_v38 = vld [vmem:[#allocation32_spill] sm:$0xff]  ;;  %v3575_v10 = vld [vmem:[#allocation58_spill] sm:$0xff] }
 0x28b   :  { %v1130_v23 = vmax.f32 %v3572_v62, %v3571_v41  ;;  %v1132_v35 = vmax.f32 %v3574_v38, %v3573_v1  ;;  %v3576_v25 = vld [vmem:[#allocation33_spill] sm:$0xff]  ;;  %v3577_v24 = vld [vmem:[#allocation34_spill] sm:$0xff]  ;;  %v3578_v36 = vld [vmem:[#allocation35_spill] sm:$0xff] }
 0x28c   :  { %v1133_v54 = vmax.f32 %v3576_v25, %v3575_v10  ;;  %v1134_v19 = vmax.f32 %v3577_v24, %v3127_v28  ;;  %v1135_v49 = vmax.f32 %v3578_v36, %v3130_v32  ;;  %v3579_v52 = vld [vmem:[#allocation11_spill] sm:$0xff]  ;;  %v3580_v33 = vld [vmem:[#allocation36_spill] sm:$0xff]  ;;  %v3583_v47 = vld [vmem:[#allocation38_spill] sm:$0xff] }
 0x28d   :  { %v1136_v44 = vmax.f32 %v3580_v33, %v3579_v52  ;;  %v3581_v56 = vld [vmem:[#allocation39_spill] sm:$0xff]  ;;  %v3582_v31 = vld [vmem:[#allocation12_spill] sm:$0xff]  ;;  %v3585_v50 = vld [vmem:[#allocation5_spill] sm:$0xff] }
 0x28e   :  { %v1138_v53 = vmax.f32 %v3581_v56, %v1081_v27  ;;  %v3584_v55 = vmax.f32 %v3582_v31, %v3583_v47  ;;  %v3586_v40 = vld [vmem:[#allocation40_spill] sm:$0xff]  ;;  %v3588_v1 = vld [vmem:[#allocation6_spill] sm:$0xff]  ;;  %v3589_v28 = vld [vmem:[#allocation41_spill] sm:$0xff] }
 0x28f   :  { %v3587_v41 = vmax.f32 %v3585_v50, %v3586_v40  ;;  %v3590_v38 = vmax.f32 %v3588_v1, %v3589_v28  ;;  %v3591_v10 = vld [vmem:[#allocation7_spill] sm:$0xff]  ;;  %v3592_v32 = vld [vmem:[#allocation42_spill] sm:$0xff]  ;;  %v3594_v36 = vld [vmem:[#allocation8_spill] sm:$0xff] }
 0x290   :  { %v3593_v25 = vmax.f32 %v3591_v10, %v3592_v32  ;;  %v3595_v52 = vld [vmem:[#allocation43_spill] sm:$0xff]  ;;  %v3597_v17 = vld [vmem:[#allocation2_spill] sm:$0xff]  ;;  %v3598_v48 = vld [vmem:[#allocation44_spill] sm:$0xff] }
 0x291   :  { %v1609_v62 = vpack.c.bf16 %v3587_v41, %v3584_v55  ;;  %v3596_v33 = vmax.f32 %v3594_v36, %v3595_v52  ;;  %v3599_v27 = vmax.f32 %v3597_v17, %v3598_v48  ;;  %v3600_v31 = vld [vmem:[#allocation3_spill] sm:$0xff]  ;;  %v3601_v47 = vld [vmem:[#allocation45_spill] sm:$0xff]  ;;  %v3604_v41 = vld [vmem:[#allocation46_spill] sm:$0xff] }
 0x292   :  { %v1614_v24 = vpack.c.bf16 %v3593_v25, %v3590_v38  ;;  %v3602_v40 = vmax.f32 %v3600_v31, %v3601_v47  ;;  %v3603_v50 = vld [vmem:[#allocation13_spill] sm:$0xff]  ;;  %v3606_v28 = vld [vmem:[#allocation14_spill] sm:$0xff]  ;;  %v3607_v10 = vld [vmem:[#allocation47_spill] sm:$0xff] }
 0x293   :  { %v1619_v56 = vpack.c.bf16 %v3599_v27, %v3596_v33  ;;  %v3605_v55 = vmax.f32 %v3603_v50, %v3604_v41  ;;  %v3608_v32 = vmax.f32 %v3606_v28, %v3607_v10  ;;  %v3609_v25 = vld [vmem:[#allocation15_spill] sm:$0xff]  ;;  %v3610_v38 = vld [vmem:[#allocation48_spill] sm:$0xff]  ;;  %v3613_v48 = vld [vmem:[#allocation49_spill] sm:$0xff]  ;;  %v1605_v50 = vpack.c.bf16 %v1138_v53, %v1138_v53  ;;  %1610 = vst [vmem:[%s3353_s4] sm:$0xff] %v1609_v62  }
 0x294   :  { %v3611_v36 = vmax.f32 %v3609_v25, %v3610_v38  ;;  %v3612_v17 = vld [vmem:[#allocation16_spill] sm:$0xff]  ;;  %v3616_v31 = vld [vmem:[#allocation50_spill] sm:$0xff]  ;;  %1746 = vst [vmem:[%s3353_s4 + $0x8] sm:$0xff] %v1614_v24   ;;  %v1654_v53 = vpack.c.bf16 %v1101_v7, %v1100_v20  ;;  %v1659_v62 = vpack.c.bf16 %v1103_v26, %v1102_v2  ;;  %v1684_v24 = vpack.c.bf16 %v1113_v6, %v1112_v59 }
 0x295   :  { %v1624_v1 = vpack.c.bf16 %v3605_v55, %v3602_v40  ;;  %v3614_v27 = vmax.f32 %v3612_v17, %v3613_v48  ;;  %v3615_v33 = vld [vmem:[#allocation4_spill] sm:$0xff]  ;;  %v3618_v40 = vld [vmem:[#allocation9_spill] sm:$0xff]  ;;  %v3619_v55 = vld [vmem:[#allocation51_spill] sm:$0xff]  ;;  %v1649_v17 = vpack.c.bf16 %v1099_v51, %v1098_v30  ;;  %1747 = vst [vmem:[%s3353_s4 + $0x10] sm:$0xff] %v1619_v56   ;;  %v1674_v30 = vpack.c.bf16 %v1109_v12, %v1108_v15 }
 0x296   :  { %v1629_v52 = vpack.c.bf16 %v3611_v36, %v3608_v32  ;;  %v3617_v47 = vmax.f32 %v3615_v33, %v3616_v31  ;;  %v3620_v28 = vmax.f32 %v3618_v40, %v3619_v55  ;;  %v3621_v10 = vld [vmem:[#allocation10_spill] sm:$0xff]  ;;  %v3622_v32 = vld [vmem:[#allocation52_spill] sm:$0xff]  ;;  %v1644_v36 = vpack.c.bf16 %v1097_v5, %v1096_v29  ;;  %1424 = vst [vmem:[%s3353_s4 + $0xe0] sm:$0x1] %v1605_v50 }
 0x297   :  { %v3623_v25 = vmax.f32 %v3621_v10, %v3622_v32  ;;  %1748 = vst [vmem:[%s3353_s4 + $0x18] sm:$0xff] %v1624_v1   ;;  %v1664_v5 = vpack.c.bf16 %v1105_v13, %v1104_v45  ;;  %v1669_v29 = vpack.c.bf16 %v1107_v21, %v1106_v11  ;;  %1753 = vst [vmem:[%s3353_s4 + $0x40] sm:$0xff] %v1649_v17  }
 0x298   :  { %v1634_v41 = vpack.c.bf16 %v3617_v47, %v3614_v27  ;;  %1749 = vst [vmem:[%s3353_s4 + $0x20] sm:$0xff] %v1629_v52   ;;  %1752 = vst [vmem:[%s3353_s4 + $0x38] sm:$0xff] %v1644_v36   ;;  %v1679_v51 = vpack.c.bf16 %v1111_v34, %v1110_v61  ;;  %v1689_v56 = vpack.c.bf16 %v1115_v58, %v1114_v4 }
 0x299   :  { %v1639_v38 = vpack.c.bf16 %v3623_v25, %v3620_v28  ;;  %1754 = vst [vmem:[%s3353_s4 + $0x48] sm:$0xff] %v1654_v53   ;;  %1755 = vst [vmem:[%s3353_s4 + $0x50] sm:$0xff] %v1659_v62   ;;  %v1694_v13 = vpack.c.bf16 %v1117_v63, %v1116_v0  ;;  %v1699_v2 = vpack.c.bf16 %v1119_v22, %v1118_v16 }
 0x29a   :  { %1750 = vst [vmem:[%s3353_s4 + $0x28] sm:$0xff] %v1634_v41   ;;  %1756 = vst [vmem:[%s3353_s4 + $0x58] sm:$0xff] %v1664_v5   ;;  %v1704_v20 = vpack.c.bf16 %v1121_v37, %v1120_v9  ;;  %v1709_v7 = vpack.c.bf16 %v1123_v39, %v1122_v42  ;;  %v1714_v26 = vpack.c.bf16 %v1125_v60, %v1124_v57 }
 0x29b   :  { %1751 = vst [vmem:[%s3353_s4 + $0x30] sm:$0xff] %v1639_v38   ;;  %1757 = vst [vmem:[%s3353_s4 + $0x60] sm:$0xff] %v1669_v29   ;;  %v1719_v45 = vpack.c.bf16 %v1127_v8, %v1126_v3  ;;  %v1724_v11 = vpack.c.bf16 %v1129_v18, %v1128_v43  ;;  %v1729_v21 = vpack.c.bf16 %v1131_v14, %v1130_v23 }
 0x29c   :  { %1758 = vst [vmem:[%s3353_s4 + $0x68] sm:$0xff] %v1674_v30   ;;  %1759 = vst [vmem:[%s3353_s4 + $0x70] sm:$0xff] %v1679_v51   ;;  %v1734_v15 = vpack.c.bf16 %v1133_v54, %v1132_v35  ;;  %v1739_v12 = vpack.c.bf16 %v1135_v49, %v1134_v19  ;;  %v1744_v61 = vpack.c.bf16 %v1137_v46, %v1136_v44 }
 0x29d   :  { %1760 = vst [vmem:[%s3353_s4 + $0x78] sm:$0xff] %v1684_v24   ;;  %1761 = vst [vmem:[%s3353_s4 + $0x80] sm:$0xff] %v1689_v56  }
 0x29e   :  { %1762 = vst [vmem:[%s3353_s4 + $0x88] sm:$0xff] %v1694_v13   ;;  %1763 = vst [vmem:[%s3353_s4 + $0x90] sm:$0xff] %v1699_v2  }
 0x29f   :  { %1764 = vst [vmem:[%s3353_s4 + $0x98] sm:$0xff] %v1704_v20   ;;  %1765 = vst [vmem:[%s3353_s4 + $0xa0] sm:$0xff] %v1709_v7  }
 0x2a0   :  { %1766 = vst [vmem:[%s3353_s4 + $0xa8] sm:$0xff] %v1714_v26   ;;  %1767 = vst [vmem:[%s3353_s4 + $0xb0] sm:$0xff] %v1719_v45  }
 0x2a1   :  { %1768 = vst [vmem:[%s3353_s4 + $0xb8] sm:$0xff] %v1724_v11   ;;  %1769 = vst [vmem:[%s3353_s4 + $0xc0] sm:$0xff] %v1729_v21  }
 0x2a2   :  { %1770 = vst [vmem:[%s3353_s4 + $0xc8] sm:$0xff] %v1734_v15   ;;  %1771 = vst [vmem:[%s3353_s4 + $0xd0] sm:$0xff] %v1739_v12  }
 0x2a3   :  { %1772 = vst [vmem:[%s3353_s4 + $0xd8] sm:$0xff] %v1744_v61  }

// kernel: encoder_32_forward.5
= control target key start
LH: loop header
LB: loop body
LE: loop exit
PB: predicated region body
PF: predicated region fallthrough
CT: control target
= control target key end

     0   :  { %s4490_s15 = smov 0   ;;  %s4492_s16 = smov 0   ;;  %s5533_s0 = inlined_call_operand.vmem [shape: bf16[72,2048], index: 0, kind: input, shape index: {}]   ;;  %s5534_s1 = inlined_call_operand.vmem [shape: bf16[2048,256], index: 1, kind: input, shape index: {}]   ;;  %s5535_s2 = inlined_call_operand.vmem [shape: f32[1,256], index: 2, kind: input, shape index: {}]   ;;  %s5536_s3 = inlined_call_operand.vmem [shape: f32[1,256], index: 3, kind: input, shape index: {}]   ;;  %s5537_s4 = inlined_call_operand.vmem [shape: bf16[72,256], index: 4, kind: output, shape index: {}]  }
   0x1   :  { %s4494_s17 = smov 0  }
   0x2 LB: > { %s4506_s18 = sadd.s32 4294967295, %s4463_s17   ;;  %s4509_s19 = sadd.s32 1, %s4463_s17   ;;  %s4463_s17 = sphi %s4494_s17, %s5541_s17   ;;  %s4459_s16 = sphi %s4492_s16, %s5540_s16   ;;  %s4455_s15 = sphi %s4490_s15, %s5539_s15  }
   0x3   : > { %s39_s20 = ssub.s32 %s4463_s17, %s4509_s19  ;;  %s42_s21 = sadd.s32 1, %s4459_s16 }
   0x4   : > { %p40_p0 = scmp.eq.s32.totalorder %s39_s20, 0  ;;  %p49_p1 = scmp.ne.s32.totalorder %s4459_s16, %s4455_s15 }
   0x5   : > { %p50_p2 = scmp.eq.s32.totalorder %s4463_s17, 0  ;;  %p131_p3 = scmp.eq.s32.totalorder %s4506_s18, 1 }
   0x6   : > { %s4519_s22 = scalar_select %p40_p0, %s4459_s16, %s42_s21  }
   0x7   : > { %p51_p4 = por %p50_p2, %p49_p1  ;;  %p4521_p5 = por %p131_p3, %p49_p1 }
   0x8   : > { %p3643_p6 = scmp.ge.s32.totalorder %s4463_s17, 2 }
   0xa   : > { %156 = sbr.rel (%p3643_p6) target bundleno = 191 (0xbf), region = 20 }
  0x11   : > { %159 = sbr.rel (!%p51_p4) target bundleno = 191 (0xbf), region = 24  ;;  %s161_s24 = sand.u32 (%p51_p4), 1, %s4459_s16  }
  0x12   : > { %s3645_s25 = sshll.u32 (%p51_p4), %s4463_s17, 2  ;;  %s3644_s26 = sshll.u32 (%p51_p4), %s161_s24, 10 }
  0x13   : > { %s4531_s29 = scalar_lea.vmem (%p51_p4), %s5534_s1, %s3645_s25  ;;  %s4535_s30 = scalar_lea.vmem (%p51_p4), [#allocation2], %s3644_s26 }
  0x14   : > { %v181_v0 = vld [vmem:[%s4531_s29] sm:$0xf] (%p51_p4)  ;;  %v183_v1 = vld [vmem:[%s4531_s29 + $0x8] sm:$0xf] (%p51_p4)  ;;  %v185_v2 = vld [vmem:[%s4531_s29 + $0x10] sm:$0xf] (%p51_p4) }
  0x15   : > { %182 = vst [vmem:[%s4535_s30] sm:$0xf] (%p51_p4), %v181_v0  ;;  %184 = vst [vmem:[%s4535_s30 + $0x4] sm:$0xf] (%p51_p4), %v183_v1  ;;  %v187_v3 = vld [vmem:[%s4531_s29 + $0x18] sm:$0xf] (%p51_p4) }
  0x16   : > { %v189_v4 = vld [vmem:[%s4531_s29 + $0x20] sm:$0xf] (%p51_p4)  ;;  %186 = vst [vmem:[%s4535_s30 + $0x8] sm:$0xf] (%p51_p4), %v185_v2  ;;  %188 = vst [vmem:[%s4535_s30 + $0xc] sm:$0xf] (%p51_p4), %v187_v3 }
  0x17   : > { %190 = vst [vmem:[%s4535_s30 + $0x10] sm:$0xf] (%p51_p4), %v189_v4  ;;  %v191_v5 = vld [vmem:[%s4531_s29 + $0x28] sm:$0xf] (%p51_p4)  ;;  %v193_v6 = vld [vmem:[%s4531_s29 + $0x30] sm:$0xf] (%p51_p4) }
  0x18   : > { %v195_v7 = vld [vmem:[%s4531_s29 + $0x38] sm:$0xf]  ;;  %192 = vst [vmem:[%s4535_s30 + $0x14] sm:$0xf] %v191_v5  ;;  %194 = vst [vmem:[%s4535_s30 + $0x18] sm:$0xf] %v193_v6 }
  0x19   : > { %196 = vst [vmem:[%s4535_s30 + $0x1c] sm:$0xf] %v195_v7  ;;  %v197_v8 = vld [vmem:[%s4531_s29 + $0x40] sm:$0xf]  ;;  %v199_v9 = vld [vmem:[%s4531_s29 + $0x48] sm:$0xf] }
  0x1a   : > { %v201_v10 = vld [vmem:[%s4531_s29 + $0x50] sm:$0xf]  ;;  %198 = vst [vmem:[%s4535_s30 + $0x20] sm:$0xf] %v197_v8  ;;  %200 = vst [vmem:[%s4535_s30 + $0x24] sm:$0xf] %v199_v9 }
  0x1b   : > { %202 = vst [vmem:[%s4535_s30 + $0x28] sm:$0xf] %v201_v10  ;;  %v203_v11 = vld [vmem:[%s4531_s29 + $0x58] sm:$0xf]  ;;  %v205_v12 = vld [vmem:[%s4531_s29 + $0x60] sm:$0xf] }
  0x1c   : > { %v207_v13 = vld [vmem:[%s4531_s29 + $0x68] sm:$0xf]  ;;  %204 = vst [vmem:[%s4535_s30 + $0x2c] sm:$0xf] %v203_v11  ;;  %206 = vst [vmem:[%s4535_s30 + $0x30] sm:$0xf] %v205_v12 }
  0x1d   : > { %208 = vst [vmem:[%s4535_s30 + $0x34] sm:$0xf] %v207_v13  ;;  %v209_v14 = vld [vmem:[%s4531_s29 + $0x70] sm:$0xf]  ;;  %v211_v15 = vld [vmem:[%s4531_s29 + $0x78] sm:$0xf] }
  0x1e   : > { %v213_v16 = vld [vmem:[%s4531_s29 + $0x80] sm:$0xf]  ;;  %210 = vst [vmem:[%s4535_s30 + $0x38] sm:$0xf] %v209_v14  ;;  %212 = vst [vmem:[%s4535_s30 + $0x3c] sm:$0xf] %v211_v15 }
  0x1f   : > { %214 = vst [vmem:[%s4535_s30 + $0x40] sm:$0xf] %v213_v16  ;;  %v215_v17 = vld [vmem:[%s4531_s29 + $0x88] sm:$0xf]  ;;  %v217_v18 = vld [vmem:[%s4531_s29 + $0x90] sm:$0xf] }
  0x20   : > { %v219_v19 = vld [vmem:[%s4531_s29 + $0x98] sm:$0xf]  ;;  %216 = vst [vmem:[%s4535_s30 + $0x44] sm:$0xf] %v215_v17  ;;  %218 = vst [vmem:[%s4535_s30 + $0x48] sm:$0xf] %v217_v18 }
  0x21   : > { %220 = vst [vmem:[%s4535_s30 + $0x4c] sm:$0xf] %v219_v19  ;;  %v221_v20 = vld [vmem:[%s4531_s29 + $0xa0] sm:$0xf]  ;;  %v223_v21 = vld [vmem:[%s4531_s29 + $0xa8] sm:$0xf] }
  0x22   : > { %v225_v22 = vld [vmem:[%s4531_s29 + $0xb0] sm:$0xf]  ;;  %222 = vst [vmem:[%s4535_s30 + $0x50] sm:$0xf] %v221_v20  ;;  %224 = vst [vmem:[%s4535_s30 + $0x54] sm:$0xf] %v223_v21 }
  0x23   : > { %226 = vst [vmem:[%s4535_s30 + $0x58] sm:$0xf] %v225_v22  ;;  %v227_v23 = vld [vmem:[%s4531_s29 + $0xb8] sm:$0xf]  ;;  %v229_v24 = vld [vmem:[%s4531_s29 + $0xc0] sm:$0xf] }
  0x24   : > { %v231_v25 = vld [vmem:[%s4531_s29 + $0xc8] sm:$0xf]  ;;  %228 = vst [vmem:[%s4535_s30 + $0x5c] sm:$0xf] %v227_v23  ;;  %230 = vst [vmem:[%s4535_s30 + $0x60] sm:$0xf] %v229_v24 }
  0x25   : > { %232 = vst [vmem:[%s4535_s30 + $0x64] sm:$0xf] %v231_v25  ;;  %v233_v26 = vld [vmem:[%s4531_s29 + $0xd0] sm:$0xf]  ;;  %v235_v27 = vld [vmem:[%s4531_s29 + $0xd8] sm:$0xf] }
  0x26   : > { %v237_v28 = vld [vmem:[%s4531_s29 + $0xe0] sm:$0xf]  ;;  %234 = vst [vmem:[%s4535_s30 + $0x68] sm:$0xf] %v233_v26  ;;  %236 = vst [vmem:[%s4535_s30 + $0x6c] sm:$0xf] %v235_v27 }
  0x27   : > { %238 = vst [vmem:[%s4535_s30 + $0x70] sm:$0xf] %v237_v28  ;;  %v239_v29 = vld [vmem:[%s4531_s29 + $0xe8] sm:$0xf]  ;;  %v241_v30 = vld [vmem:[%s4531_s29 + $0xf0] sm:$0xf] }
  0x28   : > { %v243_v31 = vld [vmem:[%s4531_s29 + $0xf8] sm:$0xf]  ;;  %240 = vst [vmem:[%s4535_s30 + $0x74] sm:$0xf] %v239_v29  ;;  %242 = vst [vmem:[%s4535_s30 + $0x78] sm:$0xf] %v241_v30 }
  0x29   : > { %244 = vst [vmem:[%s4535_s30 + $0x7c] sm:$0xf] %v243_v31  ;;  %v245_v32 = vld [vmem:[%s4531_s29 + $0x100] sm:$0xf]  ;;  %v247_v33 = vld [vmem:[%s4531_s29 + $0x108] sm:$0xf] }
  0x2a   : > { %v249_v34 = vld [vmem:[%s4531_s29 + $0x110] sm:$0xf]  ;;  %246 = vst [vmem:[%s4535_s30 + $0x80] sm:$0xf] %v245_v32  ;;  %248 = vst [vmem:[%s4535_s30 + $0x84] sm:$0xf] %v247_v33 }
  0x2b   : > { %250 = vst [vmem:[%s4535_s30 + $0x88] sm:$0xf] %v249_v34  ;;  %v251_v35 = vld [vmem:[%s4531_s29 + $0x118] sm:$0xf]  ;;  %v253_v36 = vld [vmem:[%s4531_s29 + $0x120] sm:$0xf] }
  0x2c   : > { %v255_v37 = vld [vmem:[%s4531_s29 + $0x128] sm:$0xf]  ;;  %252 = vst [vmem:[%s4535_s30 + $0x8c] sm:$0xf] %v251_v35  ;;  %254 = vst [vmem:[%s4535_s30 + $0x90] sm:$0xf] %v253_v36 }
  0x2d   : > { %256 = vst [vmem:[%s4535_s30 + $0x94] sm:$0xf] %v255_v37  ;;  %v257_v38 = vld [vmem:[%s4531_s29 + $0x130] sm:$0xf]  ;;  %v259_v39 = vld [vmem:[%s4531_s29 + $0x138] sm:$0xf] }
  0x2e   : > { %v261_v40 = vld [vmem:[%s4531_s29 + $0x140] sm:$0xf]  ;;  %258 = vst [vmem:[%s4535_s30 + $0x98] sm:$0xf] %v257_v38  ;;  %260 = vst [vmem:[%s4535_s30 + $0x9c] sm:$0xf] %v259_v39 }
  0x2f   : > { %262 = vst [vmem:[%s4535_s30 + $0xa0] sm:$0xf] %v261_v40  ;;  %v263_v41 = vld [vmem:[%s4531_s29 + $0x148] sm:$0xf]  ;;  %v265_v42 = vld [vmem:[%s4531_s29 + $0x150] sm:$0xf] }
  0x30   : > { %v267_v43 = vld [vmem:[%s4531_s29 + $0x158] sm:$0xf]  ;;  %264 = vst [vmem:[%s4535_s30 + $0xa4] sm:$0xf] %v263_v41  ;;  %266 = vst [vmem:[%s4535_s30 + $0xa8] sm:$0xf] %v265_v42 }
  0x31   : > { %268 = vst [vmem:[%s4535_s30 + $0xac] sm:$0xf] %v267_v43  ;;  %v269_v44 = vld [vmem:[%s4531_s29 + $0x160] sm:$0xf]  ;;  %v271_v45 = vld [vmem:[%s4531_s29 + $0x168] sm:$0xf] }
  0x32   : > { %v273_v46 = vld [vmem:[%s4531_s29 + $0x170] sm:$0xf]  ;;  %270 = vst [vmem:[%s4535_s30 + $0xb0] sm:$0xf] %v269_v44  ;;  %272 = vst [vmem:[%s4535_s30 + $0xb4] sm:$0xf] %v271_v45 }
  0x33   : > { %274 = vst [vmem:[%s4535_s30 + $0xb8] sm:$0xf] %v273_v46  ;;  %v275_v47 = vld [vmem:[%s4531_s29 + $0x178] sm:$0xf]  ;;  %v277_v48 = vld [vmem:[%s4531_s29 + $0x180] sm:$0xf] }
  0x34   : > { %v279_v49 = vld [vmem:[%s4531_s29 + $0x188] sm:$0xf]  ;;  %276 = vst [vmem:[%s4535_s30 + $0xbc] sm:$0xf] %v275_v47  ;;  %278 = vst [vmem:[%s4535_s30 + $0xc0] sm:$0xf] %v277_v48 }
  0x35   : > { %280 = vst [vmem:[%s4535_s30 + $0xc4] sm:$0xf] %v279_v49  ;;  %v281_v50 = vld [vmem:[%s4531_s29 + $0x190] sm:$0xf]  ;;  %v283_v51 = vld [vmem:[%s4531_s29 + $0x198] sm:$0xf] }
  0x36   : > { %v285_v52 = vld [vmem:[%s4531_s29 + $0x1a0] sm:$0xf]  ;;  %282 = vst [vmem:[%s4535_s30 + $0xc8] sm:$0xf] %v281_v50  ;;  %284 = vst [vmem:[%s4535_s30 + $0xcc] sm:$0xf] %v283_v51 }
  0x37   : > { %286 = vst [vmem:[%s4535_s30 + $0xd0] sm:$0xf] %v285_v52  ;;  %v287_v53 = vld [vmem:[%s4531_s29 + $0x1a8] sm:$0xf]  ;;  %v289_v54 = vld [vmem:[%s4531_s29 + $0x1b0] sm:$0xf] }
  0x38   : > { %v291_v55 = vld [vmem:[%s4531_s29 + $0x1b8] sm:$0xf]  ;;  %288 = vst [vmem:[%s4535_s30 + $0xd4] sm:$0xf] %v287_v53  ;;  %290 = vst [vmem:[%s4535_s30 + $0xd8] sm:$0xf] %v289_v54 }
  0x39   : > { %292 = vst [vmem:[%s4535_s30 + $0xdc] sm:$0xf] %v291_v55  ;;  %v293_v56 = vld [vmem:[%s4531_s29 + $0x1c0] sm:$0xf]  ;;  %v295_v57 = vld [vmem:[%s4531_s29 + $0x1c8] sm:$0xf] }
  0x3a   : > { %v297_v58 = vld [vmem:[%s4531_s29 + $0x1d0] sm:$0xf]  ;;  %294 = vst [vmem:[%s4535_s30 + $0xe0] sm:$0xf] %v293_v56  ;;  %296 = vst [vmem:[%s4535_s30 + $0xe4] sm:$0xf] %v295_v57 }
  0x3b   : > { %298 = vst [vmem:[%s4535_s30 + $0xe8] sm:$0xf] %v297_v58  ;;  %v299_v59 = vld [vmem:[%s4531_s29 + $0x1d8] sm:$0xf]  ;;  %v301_v60 = vld [vmem:[%s4531_s29 + $0x1e0] sm:$0xf] }
  0x3c   : > { %v303_v61 = vld [vmem:[%s4531_s29 + $0x1e8] sm:$0xf]  ;;  %300 = vst [vmem:[%s4535_s30 + $0xec] sm:$0xf] %v299_v59  ;;  %302 = vst [vmem:[%s4535_s30 + $0xf0] sm:$0xf] %v301_v60 }
  0x3d   : > { %304 = vst [vmem:[%s4535_s30 + $0xf4] sm:$0xf] %v303_v61  ;;  %v305_v62 = vld [vmem:[%s4531_s29 + $0x1f0] sm:$0xf]  ;;  %v307_v63 = vld [vmem:[%s4531_s29 + $0x1f8] sm:$0xf] }
  0x3e   : > { %v309_v0 = vld [vmem:[%s4531_s29 + $0x200] sm:$0xf]  ;;  %306 = vst [vmem:[%s4535_s30 + $0xf8] sm:$0xf] %v305_v62  ;;  %308 = vst [vmem:[%s4535_s30 + $0xfc] sm:$0xf] %v307_v63 }
  0x3f   : > { %310 = vst [vmem:[%s4535_s30 + $0x100] sm:$0xf] %v309_v0  ;;  %v311_v1 = vld [vmem:[%s4531_s29 + $0x208] sm:$0xf]  ;;  %v313_v2 = vld [vmem:[%s4531_s29 + $0x210] sm:$0xf] }
  0x40   : > { %v315_v3 = vld [vmem:[%s4531_s29 + $0x218] sm:$0xf]  ;;  %312 = vst [vmem:[%s4535_s30 + $0x104] sm:$0xf] %v311_v1  ;;  %314 = vst [vmem:[%s4535_s30 + $0x108] sm:$0xf] %v313_v2 }
  0x41   : > { %316 = vst [vmem:[%s4535_s30 + $0x10c] sm:$0xf] %v315_v3  ;;  %v317_v4 = vld [vmem:[%s4531_s29 + $0x220] sm:$0xf]  ;;  %v319_v5 = vld [vmem:[%s4531_s29 + $0x228] sm:$0xf] }
  0x42   : > { %v321_v6 = vld [vmem:[%s4531_s29 + $0x230] sm:$0xf]  ;;  %318 = vst [vmem:[%s4535_s30 + $0x110] sm:$0xf] %v317_v4  ;;  %320 = vst [vmem:[%s4535_s30 + $0x114] sm:$0xf] %v319_v5 }
  0x43   : > { %322 = vst [vmem:[%s4535_s30 + $0x118] sm:$0xf] %v321_v6  ;;  %v323_v7 = vld [vmem:[%s4531_s29 + $0x238] sm:$0xf]  ;;  %v325_v8 = vld [vmem:[%s4531_s29 + $0x240] sm:$0xf] }
  0x44   : > { %v327_v9 = vld [vmem:[%s4531_s29 + $0x248] sm:$0xf]  ;;  %324 = vst [vmem:[%s4535_s30 + $0x11c] sm:$0xf] %v323_v7  ;;  %326 = vst [vmem:[%s4535_s30 + $0x120] sm:$0xf] %v325_v8 }
  0x45   : > { %328 = vst [vmem:[%s4535_s30 + $0x124] sm:$0xf] %v327_v9  ;;  %v329_v10 = vld [vmem:[%s4531_s29 + $0x250] sm:$0xf]  ;;  %v331_v11 = vld [vmem:[%s4531_s29 + $0x258] sm:$0xf] }
  0x46   : > { %v333_v12 = vld [vmem:[%s4531_s29 + $0x260] sm:$0xf]  ;;  %330 = vst [vmem:[%s4535_s30 + $0x128] sm:$0xf] %v329_v10  ;;  %332 = vst [vmem:[%s4535_s30 + $0x12c] sm:$0xf] %v331_v11 }
  0x47   : > { %334 = vst [vmem:[%s4535_s30 + $0x130] sm:$0xf] %v333_v12  ;;  %v335_v13 = vld [vmem:[%s4531_s29 + $0x268] sm:$0xf]  ;;  %v337_v14 = vld [vmem:[%s4531_s29 + $0x270] sm:$0xf] }
  0x48   : > { %v339_v15 = vld [vmem:[%s4531_s29 + $0x278] sm:$0xf]  ;;  %336 = vst [vmem:[%s4535_s30 + $0x134] sm:$0xf] %v335_v13  ;;  %338 = vst [vmem:[%s4535_s30 + $0x138] sm:$0xf] %v337_v14 }
  0x49   : > { %340 = vst [vmem:[%s4535_s30 + $0x13c] sm:$0xf] %v339_v15  ;;  %v341_v16 = vld [vmem:[%s4531_s29 + $0x280] sm:$0xf]  ;;  %v343_v17 = vld [vmem:[%s4531_s29 + $0x288] sm:$0xf] }
  0x4a   : > { %v345_v18 = vld [vmem:[%s4531_s29 + $0x290] sm:$0xf]  ;;  %342 = vst [vmem:[%s4535_s30 + $0x140] sm:$0xf] %v341_v16  ;;  %344 = vst [vmem:[%s4535_s30 + $0x144] sm:$0xf] %v343_v17 }
  0x4b   : > { %346 = vst [vmem:[%s4535_s30 + $0x148] sm:$0xf] %v345_v18  ;;  %v347_v19 = vld [vmem:[%s4531_s29 + $0x298] sm:$0xf]  ;;  %v349_v20 = vld [vmem:[%s4531_s29 + $0x2a0] sm:$0xf] }
  0x4c   : > { %v351_v21 = vld [vmem:[%s4531_s29 + $0x2a8] sm:$0xf]  ;;  %348 = vst [vmem:[%s4535_s30 + $0x14c] sm:$0xf] %v347_v19  ;;  %350 = vst [vmem:[%s4535_s30 + $0x150] sm:$0xf] %v349_v20 }
  0x4d   : > { %352 = vst [vmem:[%s4535_s30 + $0x154] sm:$0xf] %v351_v21  ;;  %v353_v22 = vld [vmem:[%s4531_s29 + $0x2b0] sm:$0xf]  ;;  %v355_v23 = vld [vmem:[%s4531_s29 + $0x2b8] sm:$0xf] }
  0x4e   : > { %v357_v24 = vld [vmem:[%s4531_s29 + $0x2c0] sm:$0xf]  ;;  %354 = vst [vmem:[%s4535_s30 + $0x158] sm:$0xf] %v353_v22  ;;  %356 = vst [vmem:[%s4535_s30 + $0x15c] sm:$0xf] %v355_v23 }
  0x4f   : > { %358 = vst [vmem:[%s4535_s30 + $0x160] sm:$0xf] %v357_v24  ;;  %v359_v25 = vld [vmem:[%s4531_s29 + $0x2c8] sm:$0xf]  ;;  %v361_v26 = vld [vmem:[%s4531_s29 + $0x2d0] sm:$0xf] }
  0x50   : > { %v363_v27 = vld [vmem:[%s4531_s29 + $0x2d8] sm:$0xf]  ;;  %360 = vst [vmem:[%s4535_s30 + $0x164] sm:$0xf] %v359_v25  ;;  %362 = vst [vmem:[%s4535_s30 + $0x168] sm:$0xf] %v361_v26 }
  0x51   : > { %364 = vst [vmem:[%s4535_s30 + $0x16c] sm:$0xf] %v363_v27  ;;  %v365_v28 = vld [vmem:[%s4531_s29 + $0x2e0] sm:$0xf]  ;;  %v367_v29 = vld [vmem:[%s4531_s29 + $0x2e8] sm:$0xf] }
  0x52   : > { %v369_v30 = vld [vmem:[%s4531_s29 + $0x2f0] sm:$0xf]  ;;  %366 = vst [vmem:[%s4535_s30 + $0x170] sm:$0xf] %v365_v28  ;;  %368 = vst [vmem:[%s4535_s30 + $0x174] sm:$0xf] %v367_v29 }
  0x53   : > { %370 = vst [vmem:[%s4535_s30 + $0x178] sm:$0xf] %v369_v30  ;;  %v371_v31 = vld [vmem:[%s4531_s29 + $0x2f8] sm:$0xf]  ;;  %v373_v32 = vld [vmem:[%s4531_s29 + $0x300] sm:$0xf] }
  0x54   : > { %v375_v33 = vld [vmem:[%s4531_s29 + $0x308] sm:$0xf]  ;;  %372 = vst [vmem:[%s4535_s30 + $0x17c] sm:$0xf] %v371_v31  ;;  %374 = vst [vmem:[%s4535_s30 + $0x180] sm:$0xf] %v373_v32 }
  0x55   : > { %376 = vst [vmem:[%s4535_s30 + $0x184] sm:$0xf] %v375_v33  ;;  %v377_v34 = vld [vmem:[%s4531_s29 + $0x310] sm:$0xf]  ;;  %v379_v35 = vld [vmem:[%s4531_s29 + $0x318] sm:$0xf] }
  0x56   : > { %v381_v36 = vld [vmem:[%s4531_s29 + $0x320] sm:$0xf]  ;;  %378 = vst [vmem:[%s4535_s30 + $0x188] sm:$0xf] %v377_v34  ;;  %380 = vst [vmem:[%s4535_s30 + $0x18c] sm:$0xf] %v379_v35 }
  0x57   : > { %382 = vst [vmem:[%s4535_s30 + $0x190] sm:$0xf] %v381_v36  ;;  %v383_v37 = vld [vmem:[%s4531_s29 + $0x328] sm:$0xf]  ;;  %v385_v38 = vld [vmem:[%s4531_s29 + $0x330] sm:$0xf] }
  0x58   : > { %v387_v39 = vld [vmem:[%s4531_s29 + $0x338] sm:$0xf]  ;;  %384 = vst [vmem:[%s4535_s30 + $0x194] sm:$0xf] %v383_v37  ;;  %386 = vst [vmem:[%s4535_s30 + $0x198] sm:$0xf] %v385_v38 }
  0x59   : > { %388 = vst [vmem:[%s4535_s30 + $0x19c] sm:$0xf] %v387_v39  ;;  %v389_v40 = vld [vmem:[%s4531_s29 + $0x340] sm:$0xf]  ;;  %v391_v41 = vld [vmem:[%s4531_s29 + $0x348] sm:$0xf] }
  0x5a   : > { %v393_v42 = vld [vmem:[%s4531_s29 + $0x350] sm:$0xf]  ;;  %390 = vst [vmem:[%s4535_s30 + $0x1a0] sm:$0xf] %v389_v40  ;;  %392 = vst [vmem:[%s4535_s30 + $0x1a4] sm:$0xf] %v391_v41 }
  0x5b   : > { %394 = vst [vmem:[%s4535_s30 + $0x1a8] sm:$0xf] %v393_v42  ;;  %v395_v43 = vld [vmem:[%s4531_s29 + $0x358] sm:$0xf]  ;;  %v397_v44 = vld [vmem:[%s4531_s29 + $0x360] sm:$0xf] }
  0x5c   : > { %v399_v45 = vld [vmem:[%s4531_s29 + $0x368] sm:$0xf]  ;;  %396 = vst [vmem:[%s4535_s30 + $0x1ac] sm:$0xf] %v395_v43  ;;  %398 = vst [vmem:[%s4535_s30 + $0x1b0] sm:$0xf] %v397_v44 }
  0x5d   : > { %400 = vst [vmem:[%s4535_s30 + $0x1b4] sm:$0xf] %v399_v45  ;;  %v401_v46 = vld [vmem:[%s4531_s29 + $0x370] sm:$0xf]  ;;  %v403_v47 = vld [vmem:[%s4531_s29 + $0x378] sm:$0xf] }
  0x5e   : > { %v405_v48 = vld [vmem:[%s4531_s29 + $0x380] sm:$0xf]  ;;  %402 = vst [vmem:[%s4535_s30 + $0x1b8] sm:$0xf] %v401_v46  ;;  %404 = vst [vmem:[%s4535_s30 + $0x1bc] sm:$0xf] %v403_v47 }
  0x5f   : > { %406 = vst [vmem:[%s4535_s30 + $0x1c0] sm:$0xf] %v405_v48  ;;  %v407_v49 = vld [vmem:[%s4531_s29 + $0x388] sm:$0xf]  ;;  %v409_v50 = vld [vmem:[%s4531_s29 + $0x390] sm:$0xf] }
  0x60   : > { %v411_v51 = vld [vmem:[%s4531_s29 + $0x398] sm:$0xf]  ;;  %408 = vst [vmem:[%s4535_s30 + $0x1c4] sm:$0xf] %v407_v49  ;;  %410 = vst [vmem:[%s4535_s30 + $0x1c8] sm:$0xf] %v409_v50 }
  0x61   : > { %412 = vst [vmem:[%s4535_s30 + $0x1cc] sm:$0xf] %v411_v51  ;;  %v413_v52 = vld [vmem:[%s4531_s29 + $0x3a0] sm:$0xf]  ;;  %v415_v53 = vld [vmem:[%s4531_s29 + $0x3a8] sm:$0xf] }
  0x62   : > { %v417_v54 = vld [vmem:[%s4531_s29 + $0x3b0] sm:$0xf]  ;;  %414 = vst [vmem:[%s4535_s30 + $0x1d0] sm:$0xf] %v413_v52  ;;  %416 = vst [vmem:[%s4535_s30 + $0x1d4] sm:$0xf] %v415_v53 }
  0x63   : > { %418 = vst [vmem:[%s4535_s30 + $0x1d8] sm:$0xf] %v417_v54  ;;  %v419_v55 = vld [vmem:[%s4531_s29 + $0x3b8] sm:$0xf]  ;;  %v421_v56 = vld [vmem:[%s4531_s29 + $0x3c0] sm:$0xf] }
  0x64   : > { %v423_v57 = vld [vmem:[%s4531_s29 + $0x3c8] sm:$0xf]  ;;  %420 = vst [vmem:[%s4535_s30 + $0x1dc] sm:$0xf] %v419_v55  ;;  %422 = vst [vmem:[%s4535_s30 + $0x1e0] sm:$0xf] %v421_v56 }
  0x65   : > { %424 = vst [vmem:[%s4535_s30 + $0x1e4] sm:$0xf] %v423_v57  ;;  %v425_v58 = vld [vmem:[%s4531_s29 + $0x3d0] sm:$0xf]  ;;  %v427_v59 = vld [vmem:[%s4531_s29 + $0x3d8] sm:$0xf] }
  0x66   : > { %v429_v60 = vld [vmem:[%s4531_s29 + $0x3e0] sm:$0xf]  ;;  %426 = vst [vmem:[%s4535_s30 + $0x1e8] sm:$0xf] %v425_v58  ;;  %428 = vst [vmem:[%s4535_s30 + $0x1ec] sm:$0xf] %v427_v59 }
  0x67   : > { %430 = vst [vmem:[%s4535_s30 + $0x1f0] sm:$0xf] %v429_v60  ;;  %v431_v61 = vld [vmem:[%s4531_s29 + $0x3e8] sm:$0xf]  ;;  %v433_v62 = vld [vmem:[%s4531_s29 + $0x3f0] sm:$0xf] }
  0x68   : > { %v435_v63 = vld [vmem:[%s4531_s29 + $0x3f8] sm:$0xf]  ;;  %432 = vst [vmem:[%s4535_s30 + $0x1f4] sm:$0xf] %v431_v61  ;;  %434 = vst [vmem:[%s4535_s30 + $0x1f8] sm:$0xf] %v433_v62 }
  0x69   : > { %436 = vst [vmem:[%s4535_s30 + $0x1fc] sm:$0xf] %v435_v63  ;;  %v437_v0 = vld [vmem:[%s4531_s29 + $0x400] sm:$0xf]  ;;  %v439_v1 = vld [vmem:[%s4531_s29 + $0x408] sm:$0xf] }
  0x6a   : > { %v441_v2 = vld [vmem:[%s4531_s29 + $0x410] sm:$0xf]  ;;  %438 = vst [vmem:[%s4535_s30 + $0x200] sm:$0xf] %v437_v0  ;;  %440 = vst [vmem:[%s4535_s30 + $0x204] sm:$0xf] %v439_v1 }
  0x6b   : > { %442 = vst [vmem:[%s4535_s30 + $0x208] sm:$0xf] %v441_v2  ;;  %v443_v3 = vld [vmem:[%s4531_s29 + $0x418] sm:$0xf]  ;;  %v445_v4 = vld [vmem:[%s4531_s29 + $0x420] sm:$0xf] }
  0x6c   : > { %v447_v5 = vld [vmem:[%s4531_s29 + $0x428] sm:$0xf]  ;;  %444 = vst [vmem:[%s4535_s30 + $0x20c] sm:$0xf] %v443_v3  ;;  %446 = vst [vmem:[%s4535_s30 + $0x210] sm:$0xf] %v445_v4 }
  0x6d   : > { %448 = vst [vmem:[%s4535_s30 + $0x214] sm:$0xf] %v447_v5  ;;  %v449_v6 = vld [vmem:[%s4531_s29 + $0x430] sm:$0xf]  ;;  %v451_v7 = vld [vmem:[%s4531_s29 + $0x438] sm:$0xf] }
  0x6e   : > { %v453_v8 = vld [vmem:[%s4531_s29 + $0x440] sm:$0xf]  ;;  %450 = vst [vmem:[%s4535_s30 + $0x218] sm:$0xf] %v449_v6  ;;  %452 = vst [vmem:[%s4535_s30 + $0x21c] sm:$0xf] %v451_v7 }
  0x6f   : > { %454 = vst [vmem:[%s4535_s30 + $0x220] sm:$0xf] %v453_v8  ;;  %v455_v9 = vld [vmem:[%s4531_s29 + $0x448] sm:$0xf]  ;;  %v457_v10 = vld [vmem:[%s4531_s29 + $0x450] sm:$0xf] }
  0x70   : > { %v459_v11 = vld [vmem:[%s4531_s29 + $0x458] sm:$0xf]  ;;  %456 = vst [vmem:[%s4535_s30 + $0x224] sm:$0xf] %v455_v9  ;;  %458 = vst [vmem:[%s4535_s30 + $0x228] sm:$0xf] %v457_v10 }
  0x71   : > { %460 = vst [vmem:[%s4535_s30 + $0x22c] sm:$0xf] %v459_v11  ;;  %v461_v12 = vld [vmem:[%s4531_s29 + $0x460] sm:$0xf]  ;;  %v463_v13 = vld [vmem:[%s4531_s29 + $0x468] sm:$0xf] }
  0x72   : > { %v465_v14 = vld [vmem:[%s4531_s29 + $0x470] sm:$0xf]  ;;  %462 = vst [vmem:[%s4535_s30 + $0x230] sm:$0xf] %v461_v12  ;;  %464 = vst [vmem:[%s4535_s30 + $0x234] sm:$0xf] %v463_v13 }
  0x73   : > { %466 = vst [vmem:[%s4535_s30 + $0x238] sm:$0xf] %v465_v14  ;;  %v467_v15 = vld [vmem:[%s4531_s29 + $0x478] sm:$0xf]  ;;  %v469_v16 = vld [vmem:[%s4531_s29 + $0x480] sm:$0xf] }
  0x74   : > { %v471_v17 = vld [vmem:[%s4531_s29 + $0x488] sm:$0xf]  ;;  %468 = vst [vmem:[%s4535_s30 + $0x23c] sm:$0xf] %v467_v15  ;;  %470 = vst [vmem:[%s4535_s30 + $0x240] sm:$0xf] %v469_v16 }
  0x75   : > { %472 = vst [vmem:[%s4535_s30 + $0x244] sm:$0xf] %v471_v17  ;;  %v473_v18 = vld [vmem:[%s4531_s29 + $0x490] sm:$0xf]  ;;  %v475_v19 = vld [vmem:[%s4531_s29 + $0x498] sm:$0xf] }
  0x76   : > { %v477_v20 = vld [vmem:[%s4531_s29 + $0x4a0] sm:$0xf]  ;;  %474 = vst [vmem:[%s4535_s30 + $0x248] sm:$0xf] %v473_v18  ;;  %476 = vst [vmem:[%s4535_s30 + $0x24c] sm:$0xf] %v475_v19 }
  0x77   : > { %478 = vst [vmem:[%s4535_s30 + $0x250] sm:$0xf] %v477_v20  ;;  %v479_v21 = vld [vmem:[%s4531_s29 + $0x4a8] sm:$0xf]  ;;  %v481_v22 = vld [vmem:[%s4531_s29 + $0x4b0] sm:$0xf] }
  0x78   : > { %v483_v23 = vld [vmem:[%s4531_s29 + $0x4b8] sm:$0xf]  ;;  %480 = vst [vmem:[%s4535_s30 + $0x254] sm:$0xf] %v479_v21  ;;  %482 = vst [vmem:[%s4535_s30 + $0x258] sm:$0xf] %v481_v22 }
  0x79   : > { %484 = vst [vmem:[%s4535_s30 + $0x25c] sm:$0xf] %v483_v23  ;;  %v485_v24 = vld [vmem:[%s4531_s29 + $0x4c0] sm:$0xf]  ;;  %v487_v25 = vld [vmem:[%s4531_s29 + $0x4c8] sm:$0xf] }
  0x7a   : > { %v489_v26 = vld [vmem:[%s4531_s29 + $0x4d0] sm:$0xf]  ;;  %486 = vst [vmem:[%s4535_s30 + $0x260] sm:$0xf] %v485_v24  ;;  %488 = vst [vmem:[%s4535_s30 + $0x264] sm:$0xf] %v487_v25 }
  0x7b   : > { %490 = vst [vmem:[%s4535_s30 + $0x268] sm:$0xf] %v489_v26  ;;  %v491_v27 = vld [vmem:[%s4531_s29 + $0x4d8] sm:$0xf]  ;;  %v493_v28 = vld [vmem:[%s4531_s29 + $0x4e0] sm:$0xf] }
  0x7c   : > { %v495_v29 = vld [vmem:[%s4531_s29 + $0x4e8] sm:$0xf]  ;;  %492 = vst [vmem:[%s4535_s30 + $0x26c] sm:$0xf] %v491_v27  ;;  %494 = vst [vmem:[%s4535_s30 + $0x270] sm:$0xf] %v493_v28 }
  0x7d   : > { %496 = vst [vmem:[%s4535_s30 + $0x274] sm:$0xf] %v495_v29  ;;  %v497_v30 = vld [vmem:[%s4531_s29 + $0x4f0] sm:$0xf]  ;;  %v499_v31 = vld [vmem:[%s4531_s29 + $0x4f8] sm:$0xf] }
  0x7e   : > { %v501_v32 = vld [vmem:[%s4531_s29 + $0x500] sm:$0xf]  ;;  %498 = vst [vmem:[%s4535_s30 + $0x278] sm:$0xf] %v497_v30  ;;  %500 = vst [vmem:[%s4535_s30 + $0x27c] sm:$0xf] %v499_v31 }
  0x7f   : > { %502 = vst [vmem:[%s4535_s30 + $0x280] sm:$0xf] %v501_v32  ;;  %v503_v33 = vld [vmem:[%s4531_s29 + $0x508] sm:$0xf]  ;;  %v505_v34 = vld [vmem:[%s4531_s29 + $0x510] sm:$0xf] }
  0x80   : > { %v507_v35 = vld [vmem:[%s4531_s29 + $0x518] sm:$0xf]  ;;  %504 = vst [vmem:[%s4535_s30 + $0x284] sm:$0xf] %v503_v33  ;;  %506 = vst [vmem:[%s4535_s30 + $0x288] sm:$0xf] %v505_v34 }
  0x81   : > { %508 = vst [vmem:[%s4535_s30 + $0x28c] sm:$0xf] %v507_v35  ;;  %v509_v36 = vld [vmem:[%s4531_s29 + $0x520] sm:$0xf]  ;;  %v511_v37 = vld [vmem:[%s4531_s29 + $0x528] sm:$0xf] }
  0x82   : > { %v513_v38 = vld [vmem:[%s4531_s29 + $0x530] sm:$0xf]  ;;  %510 = vst [vmem:[%s4535_s30 + $0x290] sm:$0xf] %v509_v36  ;;  %512 = vst [vmem:[%s4535_s30 + $0x294] sm:$0xf] %v511_v37 }
  0x83   : > { %514 = vst [vmem:[%s4535_s30 + $0x298] sm:$0xf] %v513_v38  ;;  %v515_v39 = vld [vmem:[%s4531_s29 + $0x538] sm:$0xf]  ;;  %v517_v40 = vld [vmem:[%s4531_s29 + $0x540] sm:$0xf] }
  0x84   : > { %v519_v41 = vld [vmem:[%s4531_s29 + $0x548] sm:$0xf]  ;;  %516 = vst [vmem:[%s4535_s30 + $0x29c] sm:$0xf] %v515_v39  ;;  %518 = vst [vmem:[%s4535_s30 + $0x2a0] sm:$0xf] %v517_v40 }
  0x85   : > { %520 = vst [vmem:[%s4535_s30 + $0x2a4] sm:$0xf] %v519_v41  ;;  %v521_v42 = vld [vmem:[%s4531_s29 + $0x550] sm:$0xf]  ;;  %v523_v43 = vld [vmem:[%s4531_s29 + $0x558] sm:$0xf] }
  0x86   : > { %v525_v44 = vld [vmem:[%s4531_s29 + $0x560] sm:$0xf]  ;;  %522 = vst [vmem:[%s4535_s30 + $0x2a8] sm:$0xf] %v521_v42  ;;  %524 = vst [vmem:[%s4535_s30 + $0x2ac] sm:$0xf] %v523_v43 }
  0x87   : > { %526 = vst [vmem:[%s4535_s30 + $0x2b0] sm:$0xf] %v525_v44  ;;  %v527_v45 = vld [vmem:[%s4531_s29 + $0x568] sm:$0xf]  ;;  %v529_v46 = vld [vmem:[%s4531_s29 + $0x570] sm:$0xf] }
  0x88   : > { %v531_v47 = vld [vmem:[%s4531_s29 + $0x578] sm:$0xf]  ;;  %528 = vst [vmem:[%s4535_s30 + $0x2b4] sm:$0xf] %v527_v45  ;;  %530 = vst [vmem:[%s4535_s30 + $0x2b8] sm:$0xf] %v529_v46 }
  0x89   : > { %532 = vst [vmem:[%s4535_s30 + $0x2bc] sm:$0xf] %v531_v47  ;;  %v533_v48 = vld [vmem:[%s4531_s29 + $0x580] sm:$0xf]  ;;  %v535_v49 = vld [vmem:[%s4531_s29 + $0x588] sm:$0xf] }
  0x8a   : > { %v537_v50 = vld [vmem:[%s4531_s29 + $0x590] sm:$0xf]  ;;  %534 = vst [vmem:[%s4535_s30 + $0x2c0] sm:$0xf] %v533_v48  ;;  %536 = vst [vmem:[%s4535_s30 + $0x2c4] sm:$0xf] %v535_v49 }
  0x8b   : > { %538 = vst [vmem:[%s4535_s30 + $0x2c8] sm:$0xf] %v537_v50  ;;  %v539_v51 = vld [vmem:[%s4531_s29 + $0x598] sm:$0xf]  ;;  %v541_v52 = vld [vmem:[%s4531_s29 + $0x5a0] sm:$0xf] }
  0x8c   : > { %v543_v53 = vld [vmem:[%s4531_s29 + $0x5a8] sm:$0xf]  ;;  %540 = vst [vmem:[%s4535_s30 + $0x2cc] sm:$0xf] %v539_v51  ;;  %542 = vst [vmem:[%s4535_s30 + $0x2d0] sm:$0xf] %v541_v52 }
  0x8d   : > { %544 = vst [vmem:[%s4535_s30 + $0x2d4] sm:$0xf] %v543_v53  ;;  %v545_v54 = vld [vmem:[%s4531_s29 + $0x5b0] sm:$0xf]  ;;  %v547_v55 = vld [vmem:[%s4531_s29 + $0x5b8] sm:$0xf] }
  0x8e   : > { %v549_v56 = vld [vmem:[%s4531_s29 + $0x5c0] sm:$0xf]  ;;  %546 = vst [vmem:[%s4535_s30 + $0x2d8] sm:$0xf] %v545_v54  ;;  %548 = vst [vmem:[%s4535_s30 + $0x2dc] sm:$0xf] %v547_v55 }
  0x8f   : > { %550 = vst [vmem:[%s4535_s30 + $0x2e0] sm:$0xf] %v549_v56  ;;  %v551_v57 = vld [vmem:[%s4531_s29 + $0x5c8] sm:$0xf]  ;;  %v553_v58 = vld [vmem:[%s4531_s29 + $0x5d0] sm:$0xf] }
  0x90   : > { %v555_v59 = vld [vmem:[%s4531_s29 + $0x5d8] sm:$0xf]  ;;  %552 = vst [vmem:[%s4535_s30 + $0x2e4] sm:$0xf] %v551_v57  ;;  %554 = vst [vmem:[%s4535_s30 + $0x2e8] sm:$0xf] %v553_v58 }
  0x91   : > { %556 = vst [vmem:[%s4535_s30 + $0x2ec] sm:$0xf] %v555_v59  ;;  %v557_v60 = vld [vmem:[%s4531_s29 + $0x5e0] sm:$0xf]  ;;  %v559_v61 = vld [vmem:[%s4531_s29 + $0x5e8] sm:$0xf] }
  0x92   : > { %v561_v62 = vld [vmem:[%s4531_s29 + $0x5f0] sm:$0xf]  ;;  %558 = vst [vmem:[%s4535_s30 + $0x2f0] sm:$0xf] %v557_v60  ;;  %560 = vst [vmem:[%s4535_s30 + $0x2f4] sm:$0xf] %v559_v61 }
  0x93   : > { %562 = vst [vmem:[%s4535_s30 + $0x2f8] sm:$0xf] %v561_v62  ;;  %v563_v63 = vld [vmem:[%s4531_s29 + $0x5f8] sm:$0xf]  ;;  %v565_v0 = vld [vmem:[%s4531_s29 + $0x600] sm:$0xf] }
  0x94   : > { %v567_v1 = vld [vmem:[%s4531_s29 + $0x608] sm:$0xf]  ;;  %564 = vst [vmem:[%s4535_s30 + $0x2fc] sm:$0xf] %v563_v63  ;;  %566 = vst [vmem:[%s4535_s30 + $0x300] sm:$0xf] %v565_v0 }
  0x95   : > { %568 = vst [vmem:[%s4535_s30 + $0x304] sm:$0xf] %v567_v1  ;;  %v569_v2 = vld [vmem:[%s4531_s29 + $0x610] sm:$0xf]  ;;  %v571_v3 = vld [vmem:[%s4531_s29 + $0x618] sm:$0xf] }
  0x96   : > { %v573_v4 = vld [vmem:[%s4531_s29 + $0x620] sm:$0xf]  ;;  %570 = vst [vmem:[%s4535_s30 + $0x308] sm:$0xf] %v569_v2  ;;  %572 = vst [vmem:[%s4535_s30 + $0x30c] sm:$0xf] %v571_v3 }
  0x97   : > { %574 = vst [vmem:[%s4535_s30 + $0x310] sm:$0xf] %v573_v4  ;;  %v575_v5 = vld [vmem:[%s4531_s29 + $0x628] sm:$0xf]  ;;  %v577_v6 = vld [vmem:[%s4531_s29 + $0x630] sm:$0xf] }
  0x98   : > { %v579_v7 = vld [vmem:[%s4531_s29 + $0x638] sm:$0xf]  ;;  %576 = vst [vmem:[%s4535_s30 + $0x314] sm:$0xf] %v575_v5  ;;  %578 = vst [vmem:[%s4535_s30 + $0x318] sm:$0xf] %v577_v6 }
  0x99   : > { %580 = vst [vmem:[%s4535_s30 + $0x31c] sm:$0xf] %v579_v7  ;;  %v581_v8 = vld [vmem:[%s4531_s29 + $0x640] sm:$0xf]  ;;  %v583_v9 = vld [vmem:[%s4531_s29 + $0x648] sm:$0xf] }
  0x9a   : > { %v585_v10 = vld [vmem:[%s4531_s29 + $0x650] sm:$0xf]  ;;  %582 = vst [vmem:[%s4535_s30 + $0x320] sm:$0xf] %v581_v8  ;;  %584 = vst [vmem:[%s4535_s30 + $0x324] sm:$0xf] %v583_v9 }
  0x9b   : > { %586 = vst [vmem:[%s4535_s30 + $0x328] sm:$0xf] %v585_v10  ;;  %v587_v11 = vld [vmem:[%s4531_s29 + $0x658] sm:$0xf]  ;;  %v589_v12 = vld [vmem:[%s4531_s29 + $0x660] sm:$0xf] }
  0x9c   : > { %v591_v13 = vld [vmem:[%s4531_s29 + $0x668] sm:$0xf]  ;;  %588 = vst [vmem:[%s4535_s30 + $0x32c] sm:$0xf] %v587_v11  ;;  %590 = vst [vmem:[%s4535_s30 + $0x330] sm:$0xf] %v589_v12 }
  0x9d   : > { %592 = vst [vmem:[%s4535_s30 + $0x334] sm:$0xf] %v591_v13  ;;  %v593_v14 = vld [vmem:[%s4531_s29 + $0x670] sm:$0xf]  ;;  %v595_v15 = vld [vmem:[%s4531_s29 + $0x678] sm:$0xf] }
  0x9e   : > { %v597_v16 = vld [vmem:[%s4531_s29 + $0x680] sm:$0xf]  ;;  %594 = vst [vmem:[%s4535_s30 + $0x338] sm:$0xf] %v593_v14  ;;  %596 = vst [vmem:[%s4535_s30 + $0x33c] sm:$0xf] %v595_v15 }
  0x9f   : > { %598 = vst [vmem:[%s4535_s30 + $0x340] sm:$0xf] %v597_v16  ;;  %v599_v17 = vld [vmem:[%s4531_s29 + $0x688] sm:$0xf]  ;;  %v601_v18 = vld [vmem:[%s4531_s29 + $0x690] sm:$0xf] }
  0xa0   : > { %v603_v19 = vld [vmem:[%s4531_s29 + $0x698] sm:$0xf]  ;;  %600 = vst [vmem:[%s4535_s30 + $0x344] sm:$0xf] %v599_v17  ;;  %602 = vst [vmem:[%s4535_s30 + $0x348] sm:$0xf] %v601_v18 }
  0xa1   : > { %604 = vst [vmem:[%s4535_s30 + $0x34c] sm:$0xf] %v603_v19  ;;  %v605_v20 = vld [vmem:[%s4531_s29 + $0x6a0] sm:$0xf]  ;;  %v607_v21 = vld [vmem:[%s4531_s29 + $0x6a8] sm:$0xf] }
  0xa2   : > { %v609_v22 = vld [vmem:[%s4531_s29 + $0x6b0] sm:$0xf]  ;;  %606 = vst [vmem:[%s4535_s30 + $0x350] sm:$0xf] %v605_v20  ;;  %608 = vst [vmem:[%s4535_s30 + $0x354] sm:$0xf] %v607_v21 }
  0xa3   : > { %610 = vst [vmem:[%s4535_s30 + $0x358] sm:$0xf] %v609_v22  ;;  %v611_v23 = vld [vmem:[%s4531_s29 + $0x6b8] sm:$0xf]  ;;  %v613_v24 = vld [vmem:[%s4531_s29 + $0x6c0] sm:$0xf] }
  0xa4   : > { %v615_v25 = vld [vmem:[%s4531_s29 + $0x6c8] sm:$0xf]  ;;  %612 = vst [vmem:[%s4535_s30 + $0x35c] sm:$0xf] %v611_v23  ;;  %614 = vst [vmem:[%s4535_s30 + $0x360] sm:$0xf] %v613_v24 }
  0xa5   : > { %616 = vst [vmem:[%s4535_s30 + $0x364] sm:$0xf] %v615_v25  ;;  %v617_v26 = vld [vmem:[%s4531_s29 + $0x6d0] sm:$0xf]  ;;  %v619_v27 = vld [vmem:[%s4531_s29 + $0x6d8] sm:$0xf] }
  0xa6   : > { %v621_v28 = vld [vmem:[%s4531_s29 + $0x6e0] sm:$0xf]  ;;  %618 = vst [vmem:[%s4535_s30 + $0x368] sm:$0xf] %v617_v26  ;;  %620 = vst [vmem:[%s4535_s30 + $0x36c] sm:$0xf] %v619_v27 }
  0xa7   : > { %622 = vst [vmem:[%s4535_s30 + $0x370] sm:$0xf] %v621_v28  ;;  %v623_v29 = vld [vmem:[%s4531_s29 + $0x6e8] sm:$0xf]  ;;  %v625_v30 = vld [vmem:[%s4531_s29 + $0x6f0] sm:$0xf] }
  0xa8   : > { %v627_v31 = vld [vmem:[%s4531_s29 + $0x6f8] sm:$0xf]  ;;  %624 = vst [vmem:[%s4535_s30 + $0x374] sm:$0xf] %v623_v29  ;;  %626 = vst [vmem:[%s4535_s30 + $0x378] sm:$0xf] %v625_v30 }
  0xa9   : > { %628 = vst [vmem:[%s4535_s30 + $0x37c] sm:$0xf] %v627_v31  ;;  %v629_v32 = vld [vmem:[%s4531_s29 + $0x700] sm:$0xf]  ;;  %v631_v33 = vld [vmem:[%s4531_s29 + $0x708] sm:$0xf] }
  0xaa   : > { %v633_v34 = vld [vmem:[%s4531_s29 + $0x710] sm:$0xf]  ;;  %630 = vst [vmem:[%s4535_s30 + $0x380] sm:$0xf] %v629_v32  ;;  %632 = vst [vmem:[%s4535_s30 + $0x384] sm:$0xf] %v631_v33 }
  0xab   : > { %634 = vst [vmem:[%s4535_s30 + $0x388] sm:$0xf] %v633_v34  ;;  %v635_v35 = vld [vmem:[%s4531_s29 + $0x718] sm:$0xf]  ;;  %v637_v36 = vld [vmem:[%s4531_s29 + $0x720] sm:$0xf] }
  0xac   : > { %v639_v37 = vld [vmem:[%s4531_s29 + $0x728] sm:$0xf]  ;;  %636 = vst [vmem:[%s4535_s30 + $0x38c] sm:$0xf] %v635_v35  ;;  %638 = vst [vmem:[%s4535_s30 + $0x390] sm:$0xf] %v637_v36 }
  0xad   : > { %640 = vst [vmem:[%s4535_s30 + $0x394] sm:$0xf] %v639_v37  ;;  %v641_v38 = vld [vmem:[%s4531_s29 + $0x730] sm:$0xf]  ;;  %v643_v39 = vld [vmem:[%s4531_s29 + $0x738] sm:$0xf] }
  0xae   : > { %v645_v40 = vld [vmem:[%s4531_s29 + $0x740] sm:$0xf]  ;;  %642 = vst [vmem:[%s4535_s30 + $0x398] sm:$0xf] %v641_v38  ;;  %644 = vst [vmem:[%s4535_s30 + $0x39c] sm:$0xf] %v643_v39 }
  0xaf   : > { %646 = vst [vmem:[%s4535_s30 + $0x3a0] sm:$0xf] %v645_v40  ;;  %v647_v41 = vld [vmem:[%s4531_s29 + $0x748] sm:$0xf]  ;;  %v649_v42 = vld [vmem:[%s4531_s29 + $0x750] sm:$0xf] }
  0xb0   : > { %v651_v43 = vld [vmem:[%s4531_s29 + $0x758] sm:$0xf]  ;;  %648 = vst [vmem:[%s4535_s30 + $0x3a4] sm:$0xf] %v647_v41  ;;  %650 = vst [vmem:[%s4535_s30 + $0x3a8] sm:$0xf] %v649_v42 }
  0xb1   : > { %652 = vst [vmem:[%s4535_s30 + $0x3ac] sm:$0xf] %v651_v43  ;;  %v653_v44 = vld [vmem:[%s4531_s29 + $0x760] sm:$0xf]  ;;  %v655_v45 = vld [vmem:[%s4531_s29 + $0x768] sm:$0xf] }
  0xb2   : > { %v657_v46 = vld [vmem:[%s4531_s29 + $0x770] sm:$0xf]  ;;  %654 = vst [vmem:[%s4535_s30 + $0x3b0] sm:$0xf] %v653_v44  ;;  %656 = vst [vmem:[%s4535_s30 + $0x3b4] sm:$0xf] %v655_v45 }
  0xb3   : > { %658 = vst [vmem:[%s4535_s30 + $0x3b8] sm:$0xf] %v657_v46  ;;  %v659_v47 = vld [vmem:[%s4531_s29 + $0x778] sm:$0xf]  ;;  %v661_v48 = vld [vmem:[%s4531_s29 + $0x780] sm:$0xf] }
  0xb4   : > { %v663_v49 = vld [vmem:[%s4531_s29 + $0x788] sm:$0xf]  ;;  %660 = vst [vmem:[%s4535_s30 + $0x3bc] sm:$0xf] %v659_v47  ;;  %662 = vst [vmem:[%s4535_s30 + $0x3c0] sm:$0xf] %v661_v48 }
  0xb5   : > { %664 = vst [vmem:[%s4535_s30 + $0x3c4] sm:$0xf] %v663_v49  ;;  %v665_v50 = vld [vmem:[%s4531_s29 + $0x790] sm:$0xf]  ;;  %v667_v51 = vld [vmem:[%s4531_s29 + $0x798] sm:$0xf] }
  0xb6   : > { %v669_v52 = vld [vmem:[%s4531_s29 + $0x7a0] sm:$0xf]  ;;  %666 = vst [vmem:[%s4535_s30 + $0x3c8] sm:$0xf] %v665_v50  ;;  %668 = vst [vmem:[%s4535_s30 + $0x3cc] sm:$0xf] %v667_v51 }
  0xb7   : > { %670 = vst [vmem:[%s4535_s30 + $0x3d0] sm:$0xf] %v669_v52  ;;  %v671_v53 = vld [vmem:[%s4531_s29 + $0x7a8] sm:$0xf]  ;;  %v673_v54 = vld [vmem:[%s4531_s29 + $0x7b0] sm:$0xf] }
  0xb8   : > { %v675_v55 = vld [vmem:[%s4531_s29 + $0x7b8] sm:$0xf]  ;;  %672 = vst [vmem:[%s4535_s30 + $0x3d4] sm:$0xf] %v671_v53  ;;  %674 = vst [vmem:[%s4535_s30 + $0x3d8] sm:$0xf] %v673_v54 }
  0xb9   : > { %676 = vst [vmem:[%s4535_s30 + $0x3dc] sm:$0xf] %v675_v55  ;;  %v677_v56 = vld [vmem:[%s4531_s29 + $0x7c0] sm:$0xf]  ;;  %v679_v57 = vld [vmem:[%s4531_s29 + $0x7c8] sm:$0xf] }
  0xba   : > { %v681_v58 = vld [vmem:[%s4531_s29 + $0x7d0] sm:$0xf]  ;;  %678 = vst [vmem:[%s4535_s30 + $0x3e0] sm:$0xf] %v677_v56  ;;  %680 = vst [vmem:[%s4535_s30 + $0x3e4] sm:$0xf] %v679_v57 }
  0xbb   : > { %682 = vst [vmem:[%s4535_s30 + $0x3e8] sm:$0xf] %v681_v58  ;;  %v683_v59 = vld [vmem:[%s4531_s29 + $0x7d8] sm:$0xf]  ;;  %v685_v60 = vld [vmem:[%s4531_s29 + $0x7e0] sm:$0xf] }
  0xbc   : > { %v687_v61 = vld [vmem:[%s4531_s29 + $0x7e8] sm:$0xf]  ;;  %684 = vst [vmem:[%s4535_s30 + $0x3ec] sm:$0xf] %v683_v59  ;;  %686 = vst [vmem:[%s4535_s30 + $0x3f0] sm:$0xf] %v685_v60 }
  0xbd   : > { %688 = vst [vmem:[%s4535_s30 + $0x3f4] sm:$0xf] %v687_v61  ;;  %v689_v62 = vld [vmem:[%s4531_s29 + $0x7f0] sm:$0xf]  ;;  %v691_v63 = vld [vmem:[%s4531_s29 + $0x7f8] sm:$0xf] }
  0xbe   : > { %690 = vst [vmem:[%s4535_s30 + $0x3f8] sm:$0xf] %v689_v62  ;;  %692 = vst [vmem:[%s4535_s30 + $0x3fc] sm:$0xf] %v691_v63 }
  0xbf PF: > { %p3646_p7 = scmp.ge.s32.totalorder %s4463_s17, 1  ;;  %p1238_p8 = scmp.lt.s32.totalorder %s4463_s17, 3 }
  0xc1   : > { %p1239_p9 = pnand %p3646_p7, %p1238_p8 }
  0xc2   : > { %s1245_s5 = sand.u32 (!%p1239_p9), 1, %s4455_s15   ;;  %v5053_v0 = vld [vmem:[%s5533_s0] sm:$0xff] (!%p1239_p9)  ;;  %v5063_v2 = vld [vmem:[%s5533_s0 + $0x8] sm:$0xff] (!%p1239_p9)  ;;  %p1275_p10 = scmp.lt.s32.totalorder (!%p1239_p9), %s4506_s18, 1 }
  0xc3   : > { %1242 = sbr.rel (%p1239_p9) target bundleno = 692 (0x2b4), region = 73  ;;  %v5058_v1 = vld [vmem:[%s5533_s0 + $0x40] sm:$0xff] (!%p1239_p9)  ;;  %s3647_s12 = sshll.u32 (!%p1239_p9), %s1245_s5, 10  ;;  %v5072_v4 = vld [vmem:[%s5533_s0 + $0x48] sm:$0xff] (!%p1239_p9) }
  0xc4   : > { %v3649_v3 = vcombine.high (!%p1239_p9), %v5053_v0, %v5058_v1  ;;  %v3651_v5 = vcombine.high (!%p1239_p9), %v5063_v2, %v5072_v4  ;;  %s5076_s17 = scalar_lea.vmem (!%p1239_p9), [#allocation2], %s3647_s12  ;;  %v1298_v35 = vld [vmem:[%s5533_s0 + $0x80] sm:$0xff] (!%p1239_p9)  ;;  %v1299_v39 = vld [vmem:[%s5533_s0 + $0x88] sm:$0xff] (!%p1239_p9)  ;;  %v3648_v42 = vcombine.low (!%p1239_p9), %v5053_v0, %v5058_v1  ;;  %v3650_v43 = vcombine.low (!%p1239_p9), %v5063_v2, %v5072_v4  ;;  %s4270_s12 = smul.u32 (!%p1239_p9), 36, %s1245_s5 }
  0xc5   : > { %v4295_v6 = vld [vmem:[%s5076_s17 + $0x40] sm:$0xff] (!%p1239_p9)   ;;  %v4299_v10 = vld [vmem:[%s5076_s17 + $0x48] sm:$0xff] (!%p1239_p9)   ;;  %v4303_v14 = vld [vmem:[%s5076_s17 + $0x50] sm:$0xff] (!%p1239_p9)  }
  0xc6   : > { %2786 = vmatprep.mubr.bf16.mxu0 (!%p1239_p9), %v3649_v3  ;;  %v4296_v7 = vld [vmem:[%s5076_s17 + $0xc0] sm:$0xff] (!%p1239_p9)   ;;  %2858 = vmatprep.mubr.bf16.mxu1 (!%p1239_p9), %v3651_v5  ;;  %v4300_v11 = vld [vmem:[%s5076_s17 + $0xc8] sm:$0xff] (!%p1239_p9)   ;;  %v4304_v15 = vld [vmem:[%s5076_s17 + $0xd0] sm:$0xff] (!%p1239_p9)   ;;  %s1274_s15 = scalar_lea.vmem (!%p1239_p9), [#allocation3], %s4270_s12 }
  0xc7   : > { %3902 = vmatprep.subr.bf16.mxu0 (!%p1239_p9), %v4295_v6  ;;  %v4297_v8 = vld [vmem:[%s5076_s17] sm:$0xff] (!%p1239_p9)   ;;  %3948 = vmatprep.subr.bf16.mxu1 (!%p1239_p9), %v4296_v7  ;;  %v4301_v12 = vld [vmem:[%s5076_s17 + $0x8] sm:$0xff] (!%p1239_p9)   ;;  %v4305_v16 = vld [vmem:[%s5076_s17 + $0x10] sm:$0xff] (!%p1239_p9)  }
  0xc8   : > { %v4298_v9 = vld [vmem:[%s5076_s17 + $0x80] sm:$0xff] (!%p1239_p9)   ;;  %3903 = vmatpush3.bf16.msra.mxu0 (!%p1239_p9), %v4297_v8  ;;  %v4302_v13 = vld [vmem:[%s5076_s17 + $0x88] sm:$0xff] (!%p1239_p9)   ;;  %v4306_v17 = vld [vmem:[%s5076_s17 + $0x90] sm:$0xff] (!%p1239_p9)  }
  0xc9   : > { %3949 = vmatpush3.bf16.msra.mxu1 (!%p1239_p9), %v4298_v9  ;;  %3904 = vmatprep.subr.bf16.mxu0 (!%p1239_p9), %v4299_v10  ;;  %v4307_v18 = vld [vmem:[%s5076_s17 + $0x58] sm:$0xff] (!%p1239_p9)   ;;  %v4311_v22 = vld [vmem:[%s5076_s17 + $0x60] sm:$0xff] (!%p1239_p9)   ;;  %v4315_v26 = vld [vmem:[%s5076_s17 + $0x68] sm:$0xff] (!%p1239_p9)  }
  0xca   : > { %3950 = vmatprep.subr.bf16.mxu1 %v4300_v11  ;;  %v4308_v19 = vld [vmem:[%s5076_s17 + $0xd8] sm:$0xff]   ;;  %v4312_v23 = vld [vmem:[%s5076_s17 + $0xe0] sm:$0xff]   ;;  %v4316_v27 = vld [vmem:[%s5076_s17 + $0xe8] sm:$0xff]   ;;  %s1276_s30 = scalar_select %p1275_p10, %s4506_s18, 1 }
  0xcb   : > { %v4309_v20 = vld [vmem:[%s5076_s17 + $0x18] sm:$0xff]   ;;  %v4313_v24 = vld [vmem:[%s5076_s17 + $0x20] sm:$0xff]   ;;  %v4317_v28 = vld [vmem:[%s5076_s17 + $0x28] sm:$0xff]   ;;  %s3867_s5 = sshll.u32 (%p4521_p5), %s4506_s18, 2 }
  0xcc   : > { %3905 = vmatpush3.bf16.msra.mxu0 %v4301_v12  ;;  %v4310_v21 = vld [vmem:[%s5076_s17 + $0x98] sm:$0xff]   ;;  %v4314_v25 = vld [vmem:[%s5076_s17 + $0xa0] sm:$0xff]   ;;  %v4318_v29 = vld [vmem:[%s5076_s17 + $0xa8] sm:$0xff]   ;;  %s1277_s8 = scalar_lea.vmem %s5535_s2, %s1276_s30  ;;  %s1280_s11 = scalar_lea.vmem %s5536_s3, %s1276_s30 }
  0xcd   : > { %3951 = vmatpush3.bf16.msra.mxu1 %v4302_v13  ;;  %3906 = vmatprep.subr.bf16.mxu0 %v4303_v14  ;;  %v4319_v30 = vld [vmem:[%s5076_s17 + $0x70] sm:$0xff]   ;;  %v4323_v34 = vld [vmem:[%s5076_s17 + $0x78] sm:$0xff]   ;;  %v1306_v36 = vld [vmem:[%s5533_s0 + $0xc0] sm:$0xff] }
  0xce   : > { %3952 = vmatprep.subr.bf16.mxu1 %v4304_v15  ;;  %v4320_v31 = vld [vmem:[%s5076_s17 + $0xf0] sm:$0xff]   ;;  %v4324_v37 = vld [vmem:[%s5076_s17 + $0xf8] sm:$0xff]   ;;  %v1307_v40 = vld [vmem:[%s5533_s0 + $0xc8] sm:$0xff]  ;;  %v3665_v46 = vcombine.high %v1298_v35, %v1306_v36  ;;  %v3664_v53 = vcombine.low %v1298_v35, %v1306_v36 }
  0xcf   : > { %v4321_v32 = vld [vmem:[%s5076_s17 + $0x30] sm:$0xff]   ;;  %v4325_v38 = vld [vmem:[%s5076_s17 + $0x38] sm:$0xff]   ;;  %v4327_v44 = vld [vmem:[%s5076_s17 + $0x140] sm:$0xff]   ;;  %v3667_v49 = vcombine.high %v1299_v39, %v1307_v40  ;;  %v3666_v55 = vcombine.low %v1299_v39, %v1307_v40 }
  0xd0   : > { %3907 = vmatpush3.bf16.msra.mxu0 %v4305_v16  ;;  %v4322_v33 = vld [vmem:[%s5076_s17 + $0xb0] sm:$0xff]   ;;  %v4326_v41 = vld [vmem:[%s5076_s17 + $0xb8] sm:$0xff]   ;;  %v4328_v45 = vld [vmem:[%s5076_s17 + $0x100] sm:$0xff]  }
  0xd1   : > { %3953 = vmatpush3.bf16.msra.mxu1 %v4306_v17  ;;  %3908 = vmatprep.subr.bf16.mxu0 %v4307_v18  ;;  %v4329_v47 = vld [vmem:[%s5076_s17 + $0x1c0] sm:$0xff]   ;;  %v4331_v50 = vld [vmem:[%s5076_s17 + $0x148] sm:$0xff]   ;;  %v4335_v56 = vld [vmem:[%s5076_s17 + $0x150] sm:$0xff]  }
  0xd2   : > { %3954 = vmatprep.subr.bf16.mxu1 %v4308_v19  ;;  %v4330_v48 = vld [vmem:[%s5076_s17 + $0x180] sm:$0xff]   ;;  %v4332_v51 = vld [vmem:[%s5076_s17 + $0x108] sm:$0xff]   ;;  %v4336_v58 = vld [vmem:[%s5076_s17 + $0x110] sm:$0xff]  }
  0xd3   : > { %v4333_v52 = vld [vmem:[%s5076_s17 + $0x1c8] sm:$0xff]   ;;  %v1314_v57 = vld [vmem:[%s5533_s0 + $0x100] sm:$0xff]  ;;  %v4337_v59 = vld [vmem:[%s5076_s17 + $0x1d0] sm:$0xff]  }
  0xd4   : > { %3909 = vmatpush3.bf16.msra.mxu0 %v4309_v20  ;;  %v4334_v54 = vld [vmem:[%s5076_s17 + $0x188] sm:$0xff]   ;;  %v4338_v60 = vld [vmem:[%s5076_s17 + $0x190] sm:$0xff]   ;;  %v1322_v61 = vld [vmem:[%s5533_s0 + $0x140] sm:$0xff] }
  0xd5   : > { %3955 = vmatpush3.bf16.msra.mxu1 %v4310_v21  ;;  %3910 = vmatprep.subr.bf16.mxu0 %v4311_v22  ;;  %v1315_v62 = vld [vmem:[%s5533_s0 + $0x108] sm:$0xff]  ;;  %v3681_v0 = vcombine.high %v1314_v57, %v1322_v61  ;;  %v4339_v2 = vld [vmem:[%s5076_s17 + $0x158] sm:$0xff]   ;;  %v3680_v4 = vcombine.low %v1314_v57, %v1322_v61  ;;  %v4343_v8 = vld [vmem:[%s5076_s17 + $0x160] sm:$0xff]  }
  0xd6   : > { %3956 = vmatprep.subr.bf16.mxu1 %v4312_v23  ;;  %v1323_v63 = vld [vmem:[%s5533_s0 + $0x148] sm:$0xff]  ;;  %v4340_v3 = vld [vmem:[%s5076_s17 + $0x118] sm:$0xff]   ;;  %v4344_v9 = vld [vmem:[%s5076_s17 + $0x120] sm:$0xff]  }
  0xd7   : > { %v3683_v1 = vcombine.high %v1315_v62, %v1323_v63  ;;  %v4341_v5 = vld [vmem:[%s5076_s17 + $0x1d8] sm:$0xff]   ;;  %v3682_v6 = vcombine.low %v1315_v62, %v1323_v63  ;;  %v4345_v10 = vld [vmem:[%s5076_s17 + $0x1e0] sm:$0xff]   ;;  %v1331_v13 = vld [vmem:[%s5533_s0 + $0x188] sm:$0xff] }
  0xd8   : > { %3911 = vmatpush3.bf16.msra.mxu0 %v4313_v24  ;;  %v4342_v7 = vld [vmem:[%s5076_s17 + $0x198] sm:$0xff]   ;;  %v1330_v11 = vld [vmem:[%s5533_s0 + $0x180] sm:$0xff]  ;;  %v1339_v15 = vld [vmem:[%s5533_s0 + $0x1c8] sm:$0xff] }
  0xd9   : > { %3957 = vmatpush3.bf16.msra.mxu1 %v4314_v25  ;;  %3912 = vmatprep.subr.bf16.mxu0 %v4315_v26  ;;  %v1338_v12 = vld [vmem:[%s5533_s0 + $0x1c0] sm:$0xff]  ;;  %v3699_v16 = vcombine.high %v1331_v13, %v1339_v15  ;;  %v4347_v19 = vld [vmem:[%s5076_s17 + $0x168] sm:$0xff]   ;;  %v3698_v20 = vcombine.low %v1331_v13, %v1339_v15  ;;  %v4351_v24 = vld [vmem:[%s5076_s17 + $0x170] sm:$0xff]  }
  0xda   : > { %3958 = vmatprep.subr.bf16.mxu1 %v4316_v27  ;;  %v3697_v14 = vcombine.high %v1330_v11, %v1338_v12  ;;  %v4346_v17 = vld [vmem:[%s5076_s17 + $0x1a0] sm:$0xff]   ;;  %v3696_v18 = vcombine.low %v1330_v11, %v1338_v12  ;;  %v4348_v21 = vld [vmem:[%s5076_s17 + $0x128] sm:$0xff]   ;;  %v4360_v35 = vld [vmem:[%s5076_s17 + $0x138] sm:$0xff]  }
  0xdb   : > { %v4349_v22 = vld [vmem:[%s5076_s17 + $0x1e8] sm:$0xff]   ;;  %v1346_v25 = vld [vmem:[%s5533_s0 + $0x200] sm:$0xff]  ;;  %v4361_v36 = vld [vmem:[%s5076_s17 + $0x1f8] sm:$0xff]  }
  0xdc   : > { %3913 = vmatpush3.bf16.msra.mxu0 %v4317_v28  ;;  %v4350_v23 = vld [vmem:[%s5076_s17 + $0x1a8] sm:$0xff]   ;;  %v3713_v27 = vcombine.high %v1346_v25, %v1346_v25  ;;  %v1292_v39 = vld [vmem:[%s5533_s0 + $0x50] sm:$0xff]  ;;  %v1285_v40 = vld [vmem:[%s5533_s0 + $0x18] sm:$0xff] }
  0xdd   : > { %3959 = vmatpush3.bf16.msra.mxu1 %v4318_v29  ;;  %3914 = vmatprep.subr.bf16.mxu0 %v4319_v30  ;;  %v1347_v26 = vld [vmem:[%s5533_s0 + $0x208] sm:$0xff]  ;;  %v4354_v29 = vld [vmem:[%s5076_s17 + $0x130] sm:$0xff]   ;;  %v4378_v11 = vld [vmem:[%s5076_s17 + $0x298] sm:$0xff]  }
  0xde   : > { %3960 = vmatprep.subr.bf16.mxu1 %v4320_v31  ;;  %v3715_v28 = vcombine.high %v1347_v26, %v1347_v26  ;;  %v4357_v30 = vld [vmem:[%s5076_s17 + $0x1f0] sm:$0xff]   ;;  %v4379_v13 = vld [vmem:[%s5076_s17 + $0x260] sm:$0xff]  }
  0xdf   : > { %v4358_v31 = vld [vmem:[%s5076_s17 + $0x1b0] sm:$0xff]   ;;  %v4380_v15 = vld [vmem:[%s5076_s17 + $0x220] sm:$0xff]  }
  0xe0   : > { %3915 = vmatpush3.bf16.msra.mxu0 %v4321_v32  ;;  %v3712_v32 = vcombine.low %v1346_v25, %v1346_v25  ;;  %v4372_v62 = vld [vmem:[%s5076_s17 + $0x210] sm:$0xff]   ;;  %v4384_v25 = vld [vmem:[%s5076_s17 + $0x228] sm:$0xff]  }
  0xe1   : > { %3961 = vmatpush3.bf16.msra.mxu1 %v4322_v33  ;;  %3916 = vmatprep.subr.bf16.mxu0 %v4323_v34  ;;  %v4359_v33 = vld [vmem:[%s5076_s17 + $0x178] sm:$0xff]   ;;  %v3714_v34 = vcombine.low %v1347_v26, %v1347_v26 }
  0xe2   : > { %3962 = vmatprep.subr.bf16.mxu1 %v4324_v37  ;;  %v4362_v37 = vld [vmem:[%s5076_s17 + $0x1b8] sm:$0xff]  }
  0xe4   : > { %3917 = vmatpush3.bf16.msra.mxu0 %v4325_v38  ;;  %v1284_v38 = vld [vmem:[%s5533_s0 + $0x10] sm:$0xff] }
  0xe5   : > { %3963 = vmatpush3.bf16.msra.mxu1 %v4326_v41  ;;  %3994 = vmatprep.subr.bf16.mxu0 %v4327_v44  ;;  %v3653_v41 = vcombine.high %v1284_v38, %v1292_v39  ;;  %v4363_v44 = vld [vmem:[%s5076_s17 + $0x240] sm:$0xff]  }
  0xe6   : > { %4040 = vmatprep.subr.bf16.mxu1 %v4329_v47  ;;  %v4365_v47 = vld [vmem:[%s5076_s17 + $0x2c0] sm:$0xff]  }
  0xe7   : > { %2787 = vmatmul.mubr.bf16.vlgmr.msra.gmra.mrb[0].mxu0 %v3648_v42  ;;  %v1293_v42 = vld [vmem:[%s5533_s0 + $0x58] sm:$0xff] }
  0xe8   : > { %2859 = vmatmul.mubr.bf16.vlgmr.msra.gmra.mrb[0].mxu1 %v3650_v43  ;;  %3995 = vmatpush3.bf16.msra.mxu0 %v4328_v45  ;;  %v3655_v43 = vcombine.high %v1285_v40, %v1293_v42  ;;  %v4364_v45 = vld [vmem:[%s5076_s17 + $0x200] sm:$0xff]  }
  0xe9   : > { %2794 = vmatprep.mubr.bf16.mxu0 %v3665_v46  ;;  %4041 = vmatpush3.bf16.msra.mxu1 %v4330_v48  ;;  %v3652_v46 = vcombine.low %v1284_v38, %v1292_v39  ;;  %v3654_v48 = vcombine.low %v1285_v40, %v1293_v42  ;;  %v4395_v38 = vld [vmem:[%s5076_s17 + $0x278] sm:$0xff]  }
  0xea   : > { %3996 = vmatprep.subr.bf16.mxu0 %v4331_v50  ;;  %2866 = vmatprep.mubr.bf16.mxu1 %v3667_v49  ;;  %v4366_v49 = vld [vmem:[%s5076_s17 + $0x280] sm:$0xff]   ;;  %v4367_v50 = vld [vmem:[%s5076_s17 + $0x248] sm:$0xff]   ;;  %v4396_v39 = vld [vmem:[%s5076_s17 + $0x238] sm:$0xff]  }
  0xeb   : > { %4042 = vmatprep.subr.bf16.mxu1 %v4333_v52  ;;  %v1300_v52 = vld [vmem:[%s5533_s0 + $0x90] sm:$0xff] }
  0xec   : > { %3997 = vmatpush3.bf16.msra.mxu0 %v4332_v51  ;;  %v4368_v51 = vld [vmem:[%s5076_s17 + $0x208] sm:$0xff]  }
  0xed   : > { %4043 = vmatpush3.bf16.msra.mxu1 %v4334_v54  ;;  %3998 = vmatprep.subr.bf16.mxu0 %v4335_v56  ;;  %v1309_v56 = vld [vmem:[%s5533_s0 + $0xd8] sm:$0xff] }
  0xee   : > { %4044 = vmatprep.subr.bf16.mxu1 %v4337_v59  ;;  %v4370_v59 = vld [vmem:[%s5076_s17 + $0x288] sm:$0xff]  }
  0xef   : > { %2795 = vmatmul.mubr.bf16.gmra.mrb[4].mxu0 %v3664_v53  ;;  %v1308_v53 = vld [vmem:[%s5533_s0 + $0xd0] sm:$0xff] }
  0xf0   : > { %2867 = vmatmul.mubr.bf16.gmra.mrb[4].mxu1 %v3666_v55  ;;  %3999 = vmatpush3.bf16.msra.mxu0 %v4336_v58  ;;  %v3669_v54 = vcombine.high %v1300_v52, %v1308_v53  ;;  %v1301_v55 = vld [vmem:[%s5533_s0 + $0x98] sm:$0xff]  ;;  %v4369_v58 = vld [vmem:[%s5076_s17 + $0x2c8] sm:$0xff]   ;;  %v3668_v61 = vcombine.low %v1300_v52, %v1308_v53  ;;  %v4400_v52 = vld [vmem:[%s5076_s17 + $0x300] sm:$0xff]  }
  0xf1   : > { %4045 = vmatpush3.bf16.msra.mxu1 %v4338_v60  ;;  %2802 = vmatprep.mubr.bf16.mxu0 %v3681_v0  ;;  %v3671_v57 = vcombine.high %v1301_v55, %v1309_v56  ;;  %v4371_v60 = vld [vmem:[%s5076_s17 + $0x250] sm:$0xff]   ;;  %v3670_v63 = vcombine.low %v1301_v55, %v1309_v56  ;;  %v4403_v56 = vld [vmem:[%s5076_s17 + $0x348] sm:$0xff]  }
  0xf2   : > { %2874 = vmatprep.mubr.bf16.mxu1 %v3683_v1  ;;  %4000 = vmatprep.subr.bf16.mxu0 %v4339_v2  ;;  %v4373_v0 = vld [vmem:[%s5076_s17 + $0x2d0] sm:$0xff]  }
  0xf3   : > { %4046 = vmatprep.subr.bf16.mxu1 %v4341_v5  ;;  %v4374_v1 = vld [vmem:[%s5076_s17 + $0x290] sm:$0xff]   ;;  %v1325_v5 = vld [vmem:[%s5533_s0 + $0x158] sm:$0xff] }
  0xf4   : > { %4001 = vmatpush3.bf16.msra.mxu0 %v4340_v3  ;;  %v1316_v2 = vld [vmem:[%s5533_s0 + $0x110] sm:$0xff] }
  0xf5   : > { %4047 = vmatpush3.bf16.msra.mxu1 %v4342_v7  ;;  %4002 = vmatprep.subr.bf16.mxu0 %v4343_v8  ;;  %v1324_v3 = vld [vmem:[%s5533_s0 + $0x150] sm:$0xff]  ;;  %v4375_v8 = vld [vmem:[%s5076_s17 + $0x258] sm:$0xff]  }
  0xf6   : > { %4048 = vmatprep.subr.bf16.mxu1 %v4345_v10  ;;  %v4377_v10 = vld [vmem:[%s5076_s17 + $0x2d8] sm:$0xff]   ;;  %v3684_v12 = vcombine.low %v1316_v2, %v1324_v3 }
  0xf7   : > { %2803 = vmatmul.mubr.bf16.gmra.mrb[8].mxu0 %v3680_v4  ;;  %v1317_v4 = vld [vmem:[%s5533_s0 + $0x118] sm:$0xff] }
  0xf8   : > { %2875 = vmatmul.mubr.bf16.gmra.mrb[8].mxu1 %v3682_v6  ;;  %4003 = vmatpush3.bf16.msra.mxu0 %v4344_v9  ;;  %v3685_v6 = vcombine.high %v1316_v2, %v1324_v3  ;;  %v3687_v7 = vcombine.high %v1317_v4, %v1325_v5  ;;  %v4376_v9 = vld [vmem:[%s5076_s17 + $0x218] sm:$0xff]   ;;  %v4407_v2 = vld [vmem:[%s5076_s17 + $0x350] sm:$0xff]  }
  0xf9   : > { %2810 = vmatprep.mubr.bf16.mxu0 %v3697_v14  ;;  %2882 = vmatprep.mubr.bf16.mxu1 %v3699_v16  ;;  %v3686_v14 = vcombine.low %v1317_v4, %v1325_v5  ;;  %v4381_v16 = vld [vmem:[%s5076_s17 + $0x2e0] sm:$0xff]   ;;  %v4408_v3 = vld [vmem:[%s5076_s17 + $0x310] sm:$0xff]  }
  0xfa   : > { %4049 = vmatpush3.bf16.msra.mxu1 %v4346_v17  ;;  %4004 = vmatprep.subr.bf16.mxu0 %v4347_v19  ;;  %v1332_v17 = vld [vmem:[%s5533_s0 + $0x190] sm:$0xff]  ;;  %v1333_v19 = vld [vmem:[%s5533_s0 + $0x198] sm:$0xff] }
  0xfb   : > { %4050 = vmatprep.subr.bf16.mxu1 %v4349_v22  ;;  %v4409_v4 = vld [vmem:[%s5076_s17 + $0x3d0] sm:$0xff]  }
  0xfc   : > { %4005 = vmatpush3.bf16.msra.mxu0 %v4348_v21  ;;  %v1341_v21 = vld [vmem:[%s5533_s0 + $0x1d8] sm:$0xff] }
  0xfd   : > { %4006 = vmatprep.subr.bf16.mxu0 %v4351_v24  ;;  %v3703_v22 = vcombine.high %v1333_v19, %v1341_v21  ;;  %v4383_v24 = vld [vmem:[%s5076_s17 + $0x268] sm:$0xff]  }
  0xfe   : > { %4051 = vmatpush3.bf16.msra.mxu1 %v4350_v23  ;;  %v4382_v23 = vld [vmem:[%s5076_s17 + $0x2a0] sm:$0xff]  }
  0xff   : > { %2811 = vmatmul.mubr.bf16.gmra.mrb[12].mxu0 %v3696_v18  ;;  %4052 = vmatprep.subr.bf16.mxu1 %v4357_v30  ;;  %v1340_v18 = vld [vmem:[%s5533_s0 + $0x1d0] sm:$0xff] }
 0x100   : > { %2883 = vmatmul.mubr.bf16.gmra.mrb[12].mxu1 %v3698_v20  ;;  %2818 = vmatprep.mubr.bf16.mxu0 %v3713_v27  ;;  %v3701_v20 = vcombine.high %v1332_v17, %v1340_v18  ;;  %v3700_v26 = vcombine.low %v1332_v17, %v1340_v18  ;;  %v4385_v27 = vld [vmem:[%s5076_s17 + $0x2e8] sm:$0xff]   ;;  %v4387_v30 = vld [vmem:[%s5076_s17 + $0x270] sm:$0xff]   ;;  %v4414_v17 = vld [vmem:[%s5076_s17 + $0x398] sm:$0xff]  }
 0x101   : > { %2890 = vmatprep.mubr.bf16.mxu1 %v3715_v28  ;;  %4007 = vmatpush3.bf16.msra.mxu0 %v4354_v29  ;;  %v3702_v28 = vcombine.low %v1333_v19, %v1341_v21  ;;  %v4386_v29 = vld [vmem:[%s5076_s17 + $0x2a8] sm:$0xff]   ;;  %v4415_v18 = vld [vmem:[%s5076_s17 + $0x360] sm:$0xff]  }
 0x102   : > { %4053 = vmatpush3.bf16.msra.mxu1 %v4358_v31  ;;  %4008 = vmatprep.subr.bf16.mxu0 %v4359_v33  ;;  %v1348_v31 = vld [vmem:[%s5533_s0 + $0x210] sm:$0xff]  ;;  %v4416_v19 = vld [vmem:[%s5076_s17 + $0x320] sm:$0xff]  }
 0x103   : > { %4054 = vmatprep.subr.bf16.mxu1 %v4361_v36  ;;  %v3717_v33 = vcombine.high %v1348_v31, %v1348_v31  ;;  %v4393_v36 = vld [vmem:[%s5076_s17 + $0x2f0] sm:$0xff]   ;;  %v3716_v40 = vcombine.low %v1348_v31, %v1348_v31  ;;  %v4417_v21 = vld [vmem:[%s5076_s17 + $0x3e0] sm:$0xff]   ;;  %v4420_v31 = vld [vmem:[%s5076_s17 + $0x328] sm:$0xff]  }
 0x105   : > { %4009 = vmatpush3.bf16.msra.mxu0 %v4360_v35  ;;  %v4390_v35 = vld [vmem:[%s5076_s17 + $0x230] sm:$0xff]  }
 0x106   : > { %4055 = vmatpush3.bf16.msra.mxu1 %v4362_v37  ;;  %4086 = vmatprep.subr.bf16.mxu0 %v4363_v44  ;;  %v4394_v37 = vld [vmem:[%s5076_s17 + $0x2b0] sm:$0xff]   ;;  %v1286_v44 = vld [vmem:[%s5533_s0 + $0x20] sm:$0xff] }
 0x107   : > { %2819 = vmatmul.mubr.bf16.gmra.mrb[16].mxu0 %v3712_v32  ;;  %4132 = vmatprep.subr.bf16.mxu1 %v4365_v47  ;;  %v1349_v32 = vld [vmem:[%s5533_s0 + $0x218] sm:$0xff] }
 0x108   : > { %2891 = vmatmul.mubr.bf16.gmra.mrb[16].mxu1 %v3714_v34  ;;  %2930 = vmatprep.mubr.bf16.mxu0 %v3653_v41  ;;  %v3719_v34 = vcombine.high %v1349_v32, %v1349_v32  ;;  %v4397_v41 = vld [vmem:[%s5076_s17 + $0x2f8] sm:$0xff]   ;;  %v3718_v42 = vcombine.low %v1349_v32, %v1349_v32  ;;  %v4421_v32 = vld [vmem:[%s5076_s17 + $0x3e8] sm:$0xff]  }
 0x109   : > { %3002 = vmatprep.mubr.bf16.mxu1 %v3655_v43  ;;  %v4398_v43 = vld [vmem:[%s5076_s17 + $0x2b8] sm:$0xff]  }
 0x10f   : > { %2931 = vmatmul.mubr.bf16.vlgmr.msra.gmra.mrb[20].mxu0 %v3652_v46  ;;  %v1287_v46 = vld [vmem:[%s5533_s0 + $0x28] sm:$0xff] }
 0x110   : > { %3003 = vmatmul.mubr.bf16.vlgmr.msra.gmra.mrb[20].mxu1 %v3654_v48  ;;  %4087 = vmatpush3.bf16.msra.mxu0 %v4364_v45  ;;  %v1294_v45 = vld [vmem:[%s5533_s0 + $0x60] sm:$0xff]  ;;  %v1295_v48 = vld [vmem:[%s5533_s0 + $0x68] sm:$0xff] }
 0x111   : > { %4133 = vmatpush3.bf16.msra.mxu1 %v4366_v49  ;;  %4088 = vmatprep.subr.bf16.mxu0 %v4367_v50  ;;  %v3657_v47 = vcombine.high %v1286_v44, %v1294_v45  ;;  %v3659_v49 = vcombine.high %v1287_v46, %v1295_v48  ;;  %v4399_v50 = vld [vmem:[%s5076_s17 + $0x340] sm:$0xff]   ;;  %v3656_v53 = vcombine.low %v1286_v44, %v1294_v45  ;;  %v4431_v44 = vld [vmem:[%s5076_s17 + $0x378] sm:$0xff]  }
 0x112   : > { %2938 = vmatprep.mubr.bf16.mxu0 %v3669_v54  ;;  %3010 = vmatprep.mubr.bf16.mxu1 %v3671_v57  ;;  %v4402_v54 = vld [vmem:[%s5076_s17 + $0x380] sm:$0xff]   ;;  %v3658_v55 = vcombine.low %v1287_v46, %v1295_v48  ;;  %v4432_v45 = vld [vmem:[%s5076_s17 + $0x338] sm:$0xff]  }
 0x113   : > { %4134 = vmatprep.subr.bf16.mxu1 %v4369_v58  ;;  %v1302_v57 = vld [vmem:[%s5533_s0 + $0xa0] sm:$0xff]  ;;  %v4433_v46 = vld [vmem:[%s5076_s17 + $0x3f8] sm:$0xff]  }
 0x114   : > { %4089 = vmatpush3.bf16.msra.mxu0 %v4368_v51  ;;  %v4401_v51 = vld [vmem:[%s5076_s17 + $0x3c0] sm:$0xff]  }
 0x115   : > { %4135 = vmatpush3.bf16.msra.mxu1 %v4370_v59  ;;  %4090 = vmatprep.subr.bf16.mxu0 %v4371_v60  ;;  %v1310_v58 = vld [vmem:[%s5533_s0 + $0xe0] sm:$0xff]  ;;  %v1303_v59 = vld [vmem:[%s5533_s0 + $0xa8] sm:$0xff] }
 0x116   : > { %4136 = vmatprep.subr.bf16.mxu1 %v4373_v0  ;;  %v1311_v60 = vld [vmem:[%s5533_s0 + $0xe8] sm:$0xff]  ;;  %v3672_v5 = vcombine.low %v1302_v57, %v1310_v58 }
 0x117   : > { %2939 = vmatmul.mubr.bf16.gmra.mrb[24].mxu0 %v3668_v61  ;;  %v4404_v61 = vld [vmem:[%s5076_s17 + $0x308] sm:$0xff]  }
 0x118   : > { %3011 = vmatmul.mubr.bf16.gmra.mrb[24].mxu1 %v3670_v63  ;;  %4091 = vmatpush3.bf16.msra.mxu0 %v4372_v62  ;;  %v3673_v62 = vcombine.high %v1302_v57, %v1310_v58  ;;  %v3675_v63 = vcombine.high %v1303_v59, %v1311_v60  ;;  %v4405_v0 = vld [vmem:[%s5076_s17 + $0x3c8] sm:$0xff]   ;;  %v1312_v57 = vld [vmem:[%s5533_s0 + $0xf0] sm:$0xff]  ;;  %v1305_v58 = vld [vmem:[%s5533_s0 + $0xb8] sm:$0xff] }
 0x119   : > { %4137 = vmatpush3.bf16.msra.mxu1 %v4374_v1  ;;  %2946 = vmatprep.mubr.bf16.mxu0 %v3685_v6  ;;  %v4406_v1 = vld [vmem:[%s5076_s17 + $0x388] sm:$0xff]   ;;  %v4410_v6 = vld [vmem:[%s5076_s17 + $0x390] sm:$0xff]  }
 0x11a   : > { %3018 = vmatprep.mubr.bf16.mxu1 %v3687_v7  ;;  %4092 = vmatprep.subr.bf16.mxu0 %v4375_v8  ;;  %v1318_v7 = vld [vmem:[%s5533_s0 + $0x120] sm:$0xff]  ;;  %v3674_v8 = vcombine.low %v1303_v59, %v1311_v60  ;;  %v1313_v59 = vld [vmem:[%s5533_s0 + $0xf8] sm:$0xff] }
 0x11b   : > { %4138 = vmatprep.subr.bf16.mxu1 %v4377_v10  ;;  %v1319_v10 = vld [vmem:[%s5533_s0 + $0x128] sm:$0xff] }
 0x11c   : > { %4093 = vmatpush3.bf16.msra.mxu0 %v4376_v9  ;;  %v1326_v9 = vld [vmem:[%s5533_s0 + $0x160] sm:$0xff] }
 0x11d   : > { %4139 = vmatpush3.bf16.msra.mxu1 %v4378_v11  ;;  %4094 = vmatprep.subr.bf16.mxu0 %v4379_v13  ;;  %v1327_v11 = vld [vmem:[%s5533_s0 + $0x168] sm:$0xff]  ;;  %v4411_v13 = vld [vmem:[%s5076_s17 + $0x358] sm:$0xff]  }
 0x11e   : > { %4140 = vmatprep.subr.bf16.mxu1 %v4381_v16  ;;  %v4413_v16 = vld [vmem:[%s5076_s17 + $0x3d8] sm:$0xff]  }
 0x11f   : > { %2947 = vmatmul.mubr.bf16.gmra.mrb[28].mxu0 %v3684_v12  ;;  %v3689_v12 = vcombine.high %v1318_v7, %v1326_v9 }
 0x120   : > { %3019 = vmatmul.mubr.bf16.gmra.mrb[28].mxu1 %v3686_v14  ;;  %4095 = vmatpush3.bf16.msra.mxu0 %v4380_v15  ;;  %v3691_v14 = vcombine.high %v1319_v10, %v1327_v11  ;;  %v4412_v15 = vld [vmem:[%s5076_s17 + $0x318] sm:$0xff]  }
 0x121   : > { %2954 = vmatprep.mubr.bf16.mxu0 %v3701_v20  ;;  %3026 = vmatprep.mubr.bf16.mxu1 %v3703_v22  ;;  %v3688_v20 = vcombine.low %v1318_v7, %v1326_v9  ;;  %v3690_v22 = vcombine.low %v1319_v10, %v1327_v11  ;;  %v1344_v9 = vld [vmem:[%s5533_s0 + $0x1f0] sm:$0xff]  ;;  %v1337_v10 = vld [vmem:[%s5533_s0 + $0x1b8] sm:$0xff] }
 0x122   : > { %4141 = vmatpush3.bf16.msra.mxu1 %v4382_v23  ;;  %4096 = vmatprep.subr.bf16.mxu0 %v4383_v24  ;;  %v1334_v23 = vld [vmem:[%s5533_s0 + $0x1a0] sm:$0xff]  ;;  %v1345_v11 = vld [vmem:[%s5533_s0 + $0x1f8] sm:$0xff] }
 0x123   : > { %4142 = vmatprep.subr.bf16.mxu1 %v4385_v27  ;;  %v1342_v24 = vld [vmem:[%s5533_s0 + $0x1e0] sm:$0xff]  ;;  %v1343_v27 = vld [vmem:[%s5533_s0 + $0x1e8] sm:$0xff] }
 0x124   : > { %4097 = vmatpush3.bf16.msra.mxu0 %v4384_v25  ;;  %v1335_v25 = vld [vmem:[%s5533_s0 + $0x1a8] sm:$0xff] }
 0x125   : > { %4098 = vmatprep.subr.bf16.mxu0 %v4387_v30  ;;  %v4419_v30 = vld [vmem:[%s5076_s17 + $0x368] sm:$0xff]  }
 0x126   : > { %4143 = vmatpush3.bf16.msra.mxu1 %v4386_v29  ;;  %v4418_v29 = vld [vmem:[%s5076_s17 + $0x3a0] sm:$0xff]  }
 0x127   : > { %2955 = vmatmul.mubr.bf16.gmra.mrb[32].mxu0 %v3700_v26  ;;  %4144 = vmatprep.subr.bf16.mxu1 %v4393_v36  ;;  %v3705_v26 = vcombine.high %v1334_v23, %v1342_v24  ;;  %v1350_v36 = vld [vmem:[%s5533_s0 + $0x220] sm:$0xff] }
 0x128   : > { %3027 = vmatmul.mubr.bf16.gmra.mrb[32].mxu1 %v3702_v28  ;;  %2962 = vmatprep.mubr.bf16.mxu0 %v3717_v33  ;;  %v3707_v28 = vcombine.high %v1335_v25, %v1343_v27  ;;  %v4422_v33 = vld [vmem:[%s5076_s17 + $0x3a8] sm:$0xff]   ;;  %v3720_v48 = vcombine.low %v1350_v36, %v1350_v36 }
 0x129   : > { %3034 = vmatprep.mubr.bf16.mxu1 %v3719_v34  ;;  %4099 = vmatpush3.bf16.msra.mxu0 %v4390_v35  ;;  %v3704_v34 = vcombine.low %v1334_v23, %v1342_v24  ;;  %v4423_v35 = vld [vmem:[%s5076_s17 + $0x370] sm:$0xff]  }
 0x12a   : > { %4145 = vmatpush3.bf16.msra.mxu1 %v4394_v37  ;;  %4100 = vmatprep.subr.bf16.mxu0 %v4395_v38  ;;  %v1351_v37 = vld [vmem:[%s5533_s0 + $0x228] sm:$0xff]  ;;  %v3706_v38 = vcombine.low %v1335_v25, %v1343_v27 }
 0x12b   : > { %4146 = vmatprep.subr.bf16.mxu1 %v4397_v41  ;;  %v3723_v41 = vcombine.high %v1351_v37, %v1351_v37 }
 0x12d   : > { %4101 = vmatpush3.bf16.msra.mxu0 %v4396_v39  ;;  %v3721_v39 = vcombine.high %v1350_v36, %v1350_v36 }
 0x12e   : > { %4147 = vmatpush3.bf16.msra.mxu1 %v4398_v43  ;;  %4178 = vmatprep.subr.bf16.mxu0 %v4399_v50  ;;  %v4430_v43 = vld [vmem:[%s5076_s17 + $0x3b0] sm:$0xff]  }
 0x12f   : > { %2963 = vmatmul.mubr.bf16.gmra.mrb[36].mxu0 %v3716_v40  ;;  %4224 = vmatprep.subr.bf16.mxu1 %v4401_v51  ;;  %v4426_v40 = vld [vmem:[%s5076_s17 + $0x330] sm:$0xff]   ;;  %v1289_v51 = vld [vmem:[%s5533_s0 + $0x38] sm:$0xff] }
 0x130   : > { %3035 = vmatmul.mubr.bf16.gmra.mrb[36].mxu1 %v3718_v42  ;;  %3074 = vmatprep.mubr.bf16.mxu0 %v3657_v47  ;;  %v4429_v42 = vld [vmem:[%s5076_s17 + $0x3f0] sm:$0xff]   ;;  %v4434_v47 = vld [vmem:[%s5076_s17 + $0x3b8] sm:$0xff]   ;;  %s3494_s17 = scalar_lea.vmem (%p4521_p5), %s5537_s4, %s3867_s5 }
 0x131   : > { %3146 = vmatprep.mubr.bf16.mxu1 %v3659_v49  ;;  %v1288_v49 = vld [vmem:[%s5533_s0 + $0x30] sm:$0xff] }
 0x132   : > { %v1296_v50 = vld [vmem:[%s5533_s0 + $0x70] sm:$0xff] }
 0x133   : > { %v3660_v60 = vcombine.low %v1288_v49, %v1296_v50 }
 0x137   : > { %3075 = vmatmul.mubr.bf16.vlgmr.msra.gmra.mrb[40].mxu0 %v3656_v53  ;;  %v3661_v53 = vcombine.high %v1288_v49, %v1296_v50 }
 0x138   : > { %3147 = vmatmul.mubr.bf16.vlgmr.msra.gmra.mrb[40].mxu1 %v3658_v55  ;;  %4179 = vmatpush3.bf16.msra.mxu0 %v4400_v52  ;;  %v3722_v52 = vcombine.low %v1351_v37, %v1351_v37 }
 0x139   : > { %4225 = vmatpush3.bf16.msra.mxu1 %v4402_v54  ;;  %4180 = vmatprep.subr.bf16.mxu0 %v4403_v56  ;;  %v1297_v54 = vld [vmem:[%s5533_s0 + $0x78] sm:$0xff]  ;;  %v1304_v56 = vld [vmem:[%s5533_s0 + $0xb0] sm:$0xff] }
 0x13a   : > { %3082 = vmatprep.mubr.bf16.mxu0 %v3673_v62  ;;  %3154 = vmatprep.mubr.bf16.mxu1 %v3675_v63  ;;  %v3663_v55 = vcombine.high %v1289_v51, %v1297_v54  ;;  %v3677_v62 = vcombine.high %v1304_v56, %v1312_v57  ;;  %v3679_v63 = vcombine.high %v1305_v58, %v1313_v59 }
 0x13b   : > { %4226 = vmatprep.subr.bf16.mxu1 %v4405_v0  ;;  %v1320_v0 = vld [vmem:[%s5533_s0 + $0x130] sm:$0xff] }
 0x13c   : > { %4181 = vmatpush3.bf16.msra.mxu0 %v4404_v61  ;;  %v3662_v61 = vcombine.low %v1289_v51, %v1297_v54 }
 0x13d   : > { %4227 = vmatpush3.bf16.msra.mxu1 %v4406_v1  ;;  %4182 = vmatprep.subr.bf16.mxu0 %v4407_v2  ;;  %v1328_v1 = vld [vmem:[%s5533_s0 + $0x170] sm:$0xff]  ;;  %v1321_v2 = vld [vmem:[%s5533_s0 + $0x138] sm:$0xff] }
 0x13e   : > { %4228 = vmatprep.subr.bf16.mxu1 %v4409_v4  ;;  %v3676_v4 = vcombine.low %v1304_v56, %v1312_v57 }
 0x13f   : > { %3083 = vmatmul.mubr.bf16.gmra.mrb[44].mxu0 %v3672_v5  ;;  %v3678_v5 = vcombine.low %v1305_v58, %v1313_v59 }
 0x140   : > { %3155 = vmatmul.mubr.bf16.gmra.mrb[44].mxu1 %v3674_v8  ;;  %4183 = vmatpush3.bf16.msra.mxu0 %v4408_v3  ;;  %v1329_v3 = vld [vmem:[%s5533_s0 + $0x178] sm:$0xff]  ;;  %v1336_v8 = vld [vmem:[%s5533_s0 + $0x1b0] sm:$0xff] }
 0x141   : > { %4229 = vmatpush3.bf16.msra.mxu1 %v4410_v6  ;;  %3090 = vmatprep.mubr.bf16.mxu0 %v3689_v12  ;;  %v3693_v6 = vcombine.high %v1320_v0, %v1328_v1  ;;  %v3695_v7 = vcombine.high %v1321_v2, %v1329_v3  ;;  %v3692_v12 = vcombine.low %v1320_v0, %v1328_v1 }
 0x142   : > { %3162 = vmatprep.mubr.bf16.mxu1 %v3691_v14  ;;  %4184 = vmatprep.subr.bf16.mxu0 %v4411_v13  ;;  %v3694_v13 = vcombine.low %v1321_v2, %v1329_v3  ;;  %v3709_v14 = vcombine.high %v1336_v8, %v1344_v9 }
 0x143   : > { %4230 = vmatprep.subr.bf16.mxu1 %v4413_v16  ;;  %v1352_v16 = vld [vmem:[%s5533_s0 + $0x230] sm:$0xff] }
 0x144   : > { %4185 = vmatpush3.bf16.msra.mxu0 %v4412_v15  ;;  %v3711_v15 = vcombine.high %v1337_v10, %v1345_v11 }
 0x145   : > { %4231 = vmatpush3.bf16.msra.mxu1 %v4414_v17  ;;  %4186 = vmatprep.subr.bf16.mxu0 %v4415_v18  ;;  %v1353_v17 = vld [vmem:[%s5533_s0 + $0x238] sm:$0xff]  ;;  %v3708_v18 = vcombine.low %v1336_v8, %v1344_v9 }
 0x146   : > { %4232 = vmatprep.subr.bf16.mxu1 %v4417_v21  ;;  %v3727_v21 = vcombine.high %v1353_v17, %v1353_v17  ;;  %v3726_v23 = vcombine.low %v1353_v17, %v1353_v17 }
 0x147   : > { %3091 = vmatmul.mubr.bf16.gmra.mrb[48].mxu0 %v3688_v20  ;;  %v3725_v20 = vcombine.high %v1352_v16, %v1352_v16 }
 0x148   : > { %3163 = vmatmul.mubr.bf16.gmra.mrb[48].mxu1 %v3690_v22  ;;  %4187 = vmatpush3.bf16.msra.mxu0 %v4416_v19  ;;  %v3710_v19 = vcombine.low %v1337_v10, %v1345_v11  ;;  %v3724_v22 = vcombine.low %v1352_v16, %v1352_v16 }
 0x149   : > { %3098 = vmatprep.mubr.bf16.mxu0 %v3705_v26  ;;  %3170 = vmatprep.mubr.bf16.mxu1 %v3707_v28 }
 0x14a   : > { %4233 = vmatpush3.bf16.msra.mxu1 %v4418_v29  ;;  %4188 = vmatprep.subr.bf16.mxu0 %v4419_v30 }
 0x14b   : > { %4234 = vmatprep.subr.bf16.mxu1 %v4421_v32 }
 0x14c   : > { %4189 = vmatpush3.bf16.msra.mxu0 %v4420_v31 }
 0x14d   : > { %4190 = vmatprep.subr.bf16.mxu0 %v4423_v35 }
 0x14e   : > { %4235 = vmatpush3.bf16.msra.mxu1 %v4422_v33 }
 0x14f   : > { %3099 = vmatmul.mubr.bf16.gmra.mrb[52].mxu0 %v3704_v34  ;;  %4236 = vmatprep.subr.bf16.mxu1 %v4429_v42 }
 0x150   : > { %3171 = vmatmul.mubr.bf16.gmra.mrb[52].mxu1 %v3706_v38  ;;  %3106 = vmatprep.mubr.bf16.mxu0 %v3721_v39 }
 0x151   : > { %3178 = vmatprep.mubr.bf16.mxu1 %v3723_v41  ;;  %4191 = vmatpush3.bf16.msra.mxu0 %v4426_v40 }
 0x152   : > { %4237 = vmatpush3.bf16.msra.mxu1 %v4430_v43  ;;  %4192 = vmatprep.subr.bf16.mxu0 %v4431_v44 }
 0x153   : > { %4238 = vmatprep.subr.bf16.mxu1 %v4433_v46 }
 0x155   : > { %4193 = vmatpush3.bf16.msra.mxu0 %v4432_v45 }
 0x156   : > { %4239 = vmatpush3.bf16.msra.mxu1 %v4434_v47 }
 0x157   : > { %3107 = vmatmul.mubr.bf16.gmra.mrb[56].mxu0 %v3720_v48 }
 0x158   : > { %3179 = vmatmul.mubr.bf16.gmra.mrb[56].mxu1 %v3722_v52  ;;  %3218 = vmatprep.mubr.bf16.mxu0 %v3661_v53 }
 0x159   : > { %3290 = vmatprep.mubr.bf16.mxu1 %v3663_v55 }
 0x15f   : > { %3219 = vmatmul.mubr.bf16.vlgmr.msra.gmra.mrb[60].mxu0 %v3660_v60 }
 0x160   : > { %3291 = vmatmul.mubr.bf16.vlgmr.msra.gmra.mrb[60].mxu1 %v3662_v61  ;;  %3226 = vmatprep.mubr.bf16.mxu0 %v3677_v62 }
 0x161   : > { %3298 = vmatprep.mubr.bf16.mxu1 %v3679_v63 }
 0x167   : > { %3227 = vmatmul.mubr.bf16.gmra.mrb[64].mxu0 %v3676_v4 }
 0x168   : > { %3299 = vmatmul.mubr.bf16.gmra.mrb[64].mxu1 %v3678_v5  ;;  %3234 = vmatprep.mubr.bf16.mxu0 %v3693_v6 }
 0x169   : > { %3306 = vmatprep.mubr.bf16.mxu1 %v3695_v7 }
 0x16f   : > { %3235 = vmatmul.mubr.bf16.gmra.mrb[68].mxu0 %v3692_v12 }
 0x170   : > { %3307 = vmatmul.mubr.bf16.gmra.mrb[68].mxu1 %v3694_v13  ;;  %3242 = vmatprep.mubr.bf16.mxu0 %v3709_v14 }
 0x171   : > { %3314 = vmatprep.mubr.bf16.mxu1 %v3711_v15 }
 0x177   : > { %3243 = vmatmul.mubr.bf16.gmra.mrb[72].mxu0 %v3708_v18 }
 0x178   : > { %3315 = vmatmul.mubr.bf16.gmra.mrb[72].mxu1 %v3710_v19  ;;  %3250 = vmatprep.mubr.bf16.mxu0 %v3725_v20 }
 0x179   : > { %3322 = vmatprep.mubr.bf16.mxu1 %v3727_v21 }
 0x17f   : > { %3251 = vmatmul.mubr.bf16.gmra.mrb[76].mxu0 %v3724_v22 }
 0x180   : > { %3323 = vmatmul.mubr.bf16.gmra.mrb[76].mxu1 %v3726_v23 }
 0x1ba   : > { %v3918_v24 = vpop.f32.mrb[0].mxu0 }
 0x1bb   : > { %v3964_v25 = vpop.f32.mrb[0].mxu1  ;;  %v3919_v26 = vpop.f32.mrb[1].mxu0 }
 0x1bc   : > { %v3920_v27 = vadd.f32 %v3919_v26, %v3918_v24  ;;  %v3965_v28 = vpop.f32.mrb[1].mxu1  ;;  %v3921_v29 = vpop.f32.mrb[2].mxu0 }
 0x1bd   : > { %v3966_v30 = vadd.f32 %v3965_v28, %v3964_v25  ;;  %v3967_v31 = vpop.f32.mrb[2].mxu1  ;;  %v3922_v32 = vpop.f32.mrb[3].mxu0 }
 0x1be   : > { %v3923_v33 = vadd.f32 %v3922_v32, %v3921_v29  ;;  %v3968_v34 = vpop.f32.mrb[3].mxu1 }
 0x1bf   : > { %v5414_v35 = vadd.f32 %v3966_v30, %v3920_v27  ;;  %v3969_v36 = vadd.f32 %v3968_v34, %v3967_v31 }
 0x1c1   : > { %v5416_v37 = vadd.f32 %v3969_v36, %v3923_v33 }
 0x1c2   : > { %v3924_v38 = vpop.f32.mrb[4].mxu0 }
 0x1c3   : > { %v3970_v39 = vpop.f32.mrb[4].mxu1  ;;  %v3925_v40 = vpop.f32.mrb[5].mxu0 }
 0x1c4   : > { %v3926_v41 = vadd.f32 %v3925_v40, %v3924_v38  ;;  %v3971_v42 = vpop.f32.mrb[5].mxu1  ;;  %v3927_v43 = vpop.f32.mrb[6].mxu0 }
 0x1c5   : > { %v3972_v44 = vadd.f32 %v3971_v42, %v3970_v39  ;;  %v3973_v45 = vpop.f32.mrb[6].mxu1  ;;  %v3928_v46 = vpop.f32.mrb[7].mxu0 }
 0x1c6   : > { %v3929_v47 = vadd.f32 %v3928_v46, %v3927_v43  ;;  %v3974_v48 = vpop.f32.mrb[7].mxu1 }
 0x1c7   : > { %v5418_v49 = vadd.f32 %v3972_v44, %v3926_v41  ;;  %v3975_v50 = vadd.f32 %v3974_v48, %v3973_v45 }
 0x1c9   : > { %v5420_v51 = vadd.f32 %v3975_v50, %v3929_v47 }
 0x1ca   : > { %v3930_v52 = vpop.f32.mrb[8].mxu0 }
 0x1cb   : > { %v3976_v53 = vpop.f32.mrb[8].mxu1  ;;  %v3931_v54 = vpop.f32.mrb[9].mxu0 }
 0x1cc   : > { %v3932_v55 = vadd.f32 %v3931_v54, %v3930_v52  ;;  %v3977_v56 = vpop.f32.mrb[9].mxu1  ;;  %v3933_v57 = vpop.f32.mrb[10].mxu0 }
 0x1cd   : > { %v3978_v58 = vadd.f32 %v3977_v56, %v3976_v53  ;;  %v3979_v59 = vpop.f32.mrb[10].mxu1  ;;  %v3934_v60 = vpop.f32.mrb[11].mxu0 }
 0x1ce   : > { %v3935_v61 = vadd.f32 %v3934_v60, %v3933_v57  ;;  %v3980_v62 = vpop.f32.mrb[11].mxu1 }
 0x1cf   : > { %v5422_v63 = vadd.f32 %v3978_v58, %v3932_v55  ;;  %v3981_v0 = vadd.f32 %v3980_v62, %v3979_v59 }
 0x1d1   : > { %v5424_v1 = vadd.f32 %v3981_v0, %v3935_v61 }
 0x1d2   : > { %v3936_v2 = vpop.f32.mrb[12].mxu0 }
 0x1d3   : > { %v3982_v3 = vpop.f32.mrb[12].mxu1  ;;  %v3937_v4 = vpop.f32.mrb[13].mxu0 }
 0x1d4   : > { %v3938_v5 = vadd.f32 %v3937_v4, %v3936_v2  ;;  %v3983_v6 = vpop.f32.mrb[13].mxu1  ;;  %v3939_v7 = vpop.f32.mrb[14].mxu0 }
 0x1d5   : > { %v3984_v8 = vadd.f32 %v3983_v6, %v3982_v3  ;;  %v3985_v9 = vpop.f32.mrb[14].mxu1  ;;  %v3940_v10 = vpop.f32.mrb[15].mxu0 }
 0x1d6   : > { %v3941_v11 = vadd.f32 %v3940_v10, %v3939_v7  ;;  %v3986_v12 = vpop.f32.mrb[15].mxu1 }
 0x1d7   : > { %v5426_v13 = vadd.f32 %v3984_v8, %v3938_v5  ;;  %v3987_v14 = vadd.f32 %v3986_v12, %v3985_v9 }
 0x1d9   : > { %v5428_v15 = vadd.f32 %v3987_v14, %v3941_v11 }
 0x1da   : > { %v3942_v16 = vpop.f32.mrb[16].mxu0 }
 0x1db   : > { %v3988_v17 = vpop.f32.mrb[16].mxu1  ;;  %v3943_v18 = vpop.f32.mrb[17].mxu0 }
 0x1dc   : > { %v3944_v19 = vadd.f32 %v3943_v18, %v3942_v16  ;;  %v3989_v20 = vpop.f32.mrb[17].mxu1  ;;  %v3945_v21 = vpop.f32.mrb[18].mxu0 }
 0x1dd   : > { %v3990_v22 = vadd.f32 %v3989_v20, %v3988_v17  ;;  %v3991_v23 = vpop.f32.mrb[18].mxu1  ;;  %v3946_v24 = vpop.f32.mrb[19].mxu0 }
 0x1de   : > { %v3992_v25 = vpop.f32.mrb[19].mxu1 }
 0x1df   : > { %v5430_v26 = vadd.f32 %v3990_v22, %v3944_v19 }
 0x1e2   : > { %v4010_v27 = vpop.f32.mrb[20].mxu0 }
 0x1e3   : > { %v4056_v28 = vpop.f32.mrb[20].mxu1  ;;  %v4011_v29 = vpop.f32.mrb[21].mxu0 }
 0x1e4   : > { %v4012_v30 = vadd.f32 %v4011_v29, %v4010_v27  ;;  %v4057_v31 = vpop.f32.mrb[21].mxu1  ;;  %v4013_v32 = vpop.f32.mrb[22].mxu0 }
 0x1e5   : > { %v4058_v33 = vadd.f32 %v4057_v31, %v4056_v28  ;;  %v4059_v34 = vpop.f32.mrb[22].mxu1  ;;  %v4014_v36 = vpop.f32.mrb[23].mxu0 }
 0x1e6   : > { %v2933_v38 = vadd.f32 %v4012_v30, %v5414_v35  ;;  %v4015_v39 = vadd.f32 %v4014_v36, %v4013_v32  ;;  %v4060_v40 = vpop.f32.mrb[23].mxu1 }
 0x1e7   : > { %v4061_v41 = vadd.f32 %v4060_v40, %v4059_v34 }
 0x1e8   : > { %v5433_v42 = vadd.f32 %v4058_v33, %v2933_v38  ;;  %v2936_v43 = vadd.f32 %v4015_v39, %v5416_v37 }
 0x1ea   : > { %v5436_v44 = vadd.f32 %v4061_v41, %v2936_v43  ;;  %v4016_v45 = vpop.f32.mrb[24].mxu0 }
 0x1eb   : > { %v4062_v46 = vpop.f32.mrb[24].mxu1  ;;  %v4017_v47 = vpop.f32.mrb[25].mxu0 }
 0x1ec   : > { %v4018_v48 = vadd.f32 %v4017_v47, %v4016_v45  ;;  %v4063_v50 = vpop.f32.mrb[25].mxu1  ;;  %v4019_v52 = vpop.f32.mrb[26].mxu0 }
 0x1ed   : > { %v4064_v53 = vadd.f32 %v4063_v50, %v4062_v46  ;;  %v4065_v54 = vpop.f32.mrb[26].mxu1  ;;  %v4020_v55 = vpop.f32.mrb[27].mxu0 }
 0x1ee   : > { %v2941_v35 = vadd.f32 %v4018_v48, %v5418_v49  ;;  %v4021_v56 = vadd.f32 %v4020_v55, %v4019_v52  ;;  %v4066_v57 = vpop.f32.mrb[27].mxu1 }
 0x1ef   : > { %v4067_v58 = vadd.f32 %v4066_v57, %v4065_v54 }
 0x1f0   : > { %v5439_v59 = vadd.f32 %v4064_v53, %v2941_v35  ;;  %v2944_v37 = vadd.f32 %v4021_v56, %v5420_v51 }
 0x1f2   : > { %v5442_v60 = vadd.f32 %v4067_v58, %v2944_v37  ;;  %v4022_v61 = vpop.f32.mrb[28].mxu0 }
 0x1f3   : > { %v4068_v62 = vpop.f32.mrb[28].mxu1  ;;  %v4023_v0 = vpop.f32.mrb[29].mxu0 }
 0x1f4   : > { %v4024_v2 = vadd.f32 %v4023_v0, %v4022_v61  ;;  %v4069_v3 = vpop.f32.mrb[29].mxu1  ;;  %v4025_v4 = vpop.f32.mrb[30].mxu0 }
 0x1f5   : > { %v4070_v5 = vadd.f32 %v4069_v3, %v4068_v62  ;;  %v4071_v6 = vpop.f32.mrb[30].mxu1  ;;  %v4026_v7 = vpop.f32.mrb[31].mxu0 }
 0x1f6   : > { %v2949_v49 = vadd.f32 %v4024_v2, %v5422_v63  ;;  %v4027_v8 = vadd.f32 %v4026_v7, %v4025_v4  ;;  %v4072_v9 = vpop.f32.mrb[31].mxu1 }
 0x1f7   : > { %v4073_v10 = vadd.f32 %v4072_v9, %v4071_v6 }
 0x1f8   : > { %v5445_v11 = vadd.f32 %v4070_v5, %v2949_v49  ;;  %v2952_v51 = vadd.f32 %v4027_v8, %v5424_v1 }
 0x1fa   : > { %v5448_v12 = vadd.f32 %v4073_v10, %v2952_v51  ;;  %v4028_v14 = vpop.f32.mrb[32].mxu0 }
 0x1fb   : > { %v4074_v16 = vpop.f32.mrb[32].mxu1  ;;  %v4029_v17 = vpop.f32.mrb[33].mxu0 }
 0x1fc   : > { %v4030_v18 = vadd.f32 %v4029_v17, %v4028_v14  ;;  %v4075_v19 = vpop.f32.mrb[33].mxu1  ;;  %v4031_v20 = vpop.f32.mrb[34].mxu0 }
 0x1fd   : > { %v4076_v21 = vadd.f32 %v4075_v19, %v4074_v16  ;;  %v4077_v22 = vpop.f32.mrb[34].mxu1  ;;  %v4032_v23 = vpop.f32.mrb[35].mxu0 }
 0x1fe   : > { %v2957_v63 = vadd.f32 %v4030_v18, %v5426_v13  ;;  %v4033_v24 = vadd.f32 %v4032_v23, %v4031_v20  ;;  %v4078_v25 = vpop.f32.mrb[35].mxu1 }
 0x1ff   : > { %v4079_v27 = vadd.f32 %v4078_v25, %v4077_v22 }
 0x200   : > { %v5451_v28 = vadd.f32 %v4076_v21, %v2957_v63  ;;  %v2960_v1 = vadd.f32 %v4033_v24, %v5428_v15 }
 0x202   : > { %v5454_v29 = vadd.f32 %v4079_v27, %v2960_v1  ;;  %v4034_v30 = vpop.f32.mrb[36].mxu0 }
 0x203   : > { %v4080_v31 = vpop.f32.mrb[36].mxu1  ;;  %v4035_v32 = vpop.f32.mrb[37].mxu0 }
 0x204   : > { %v4036_v33 = vadd.f32 %v4035_v32, %v4034_v30  ;;  %v4081_v34 = vpop.f32.mrb[37].mxu1  ;;  %v4037_v36 = vpop.f32.mrb[38].mxu0 }
 0x205   : > { %v4082_v38 = vadd.f32 %v4081_v34, %v4080_v31  ;;  %v4083_v39 = vpop.f32.mrb[38].mxu1  ;;  %v4038_v40 = vpop.f32.mrb[39].mxu0 }
 0x206   : > { %v2965_v13 = vadd.f32 %v4036_v33, %v5430_v26  ;;  %v4084_v41 = vpop.f32.mrb[39].mxu1 }
 0x208   : > { %v5457_v43 = vadd.f32 %v4082_v38, %v2965_v13 }
 0x20a   : > { %v4102_v45 = vpop.f32.mrb[40].mxu0 }
 0x20b   : > { %v4148_v46 = vpop.f32.mrb[40].mxu1  ;;  %v4103_v47 = vpop.f32.mrb[41].mxu0 }
 0x20c   : > { %v4104_v15 = vadd.f32 %v4103_v47, %v4102_v45  ;;  %v4149_v48 = vpop.f32.mrb[41].mxu1  ;;  %v4105_v50 = vpop.f32.mrb[42].mxu0 }
 0x20d   : > { %v4150_v52 = vadd.f32 %v4149_v48, %v4148_v46  ;;  %v4151_v53 = vpop.f32.mrb[42].mxu1  ;;  %v4106_v54 = vpop.f32.mrb[43].mxu0 }
 0x20e   : > { %v3077_v55 = vadd.f32 %v4104_v15, %v5433_v42  ;;  %v4107_v35 = vadd.f32 %v4106_v54, %v4105_v50  ;;  %v4152_v56 = vpop.f32.mrb[43].mxu1 }
 0x20f   : > { %v4153_v57 = vadd.f32 %v4152_v56, %v4151_v53 }
 0x210   : > { %v5460_v58 = vadd.f32 %v4150_v52, %v3077_v55  ;;  %v3080_v26 = vadd.f32 %v4107_v35, %v5436_v44 }
 0x212   : > { %v5463_v37 = vadd.f32 %v4153_v57, %v3080_v26  ;;  %v4108_v61 = vpop.f32.mrb[44].mxu0 }
 0x213   : > { %v4154_v62 = vpop.f32.mrb[44].mxu1  ;;  %v4109_v0 = vpop.f32.mrb[45].mxu0 }
 0x214   : > { %v4110_v2 = vadd.f32 %v4109_v0, %v4108_v61  ;;  %v4155_v3 = vpop.f32.mrb[45].mxu1  ;;  %v4111_v4 = vpop.f32.mrb[46].mxu0 }
 0x215   : > { %v4156_v5 = vadd.f32 %v4155_v3, %v4154_v62  ;;  %v4157_v6 = vpop.f32.mrb[46].mxu1  ;;  %v4112_v7 = vpop.f32.mrb[47].mxu0 }
 0x216   : > { %v3085_v42 = vadd.f32 %v4110_v2, %v5439_v59  ;;  %v4113_v49 = vadd.f32 %v4112_v7, %v4111_v4  ;;  %v4158_v8 = vpop.f32.mrb[47].mxu1 }
 0x217   : > { %v4159_v9 = vadd.f32 %v4158_v8, %v4157_v6 }
 0x218   : > { %v5466_v10 = vadd.f32 %v4156_v5, %v3085_v42  ;;  %v3088_v44 = vadd.f32 %v4113_v49, %v5442_v60 }
 0x21a   : > { %v5469_v51 = vadd.f32 %v4159_v9, %v3088_v44  ;;  %v4114_v14 = vpop.f32.mrb[48].mxu0 }
 0x21b   : > { %v4160_v16 = vpop.f32.mrb[48].mxu1  ;;  %v4115_v17 = vpop.f32.mrb[49].mxu0 }
 0x21c   : > { %v4116_v18 = vadd.f32 %v4115_v17, %v4114_v14  ;;  %v4161_v19 = vpop.f32.mrb[49].mxu1  ;;  %v4117_v20 = vpop.f32.mrb[50].mxu0 }
 0x21d   : > { %v4162_v21 = vadd.f32 %v4161_v19, %v4160_v16  ;;  %v4163_v22 = vpop.f32.mrb[50].mxu1  ;;  %v4118_v23 = vpop.f32.mrb[51].mxu0 }
 0x21e   : > { %v3093_v59 = vadd.f32 %v4116_v18, %v5445_v11  ;;  %v4119_v63 = vadd.f32 %v4118_v23, %v4117_v20  ;;  %v4164_v24 = vpop.f32.mrb[51].mxu1 }
 0x21f   : > { %v4165_v25 = vadd.f32 %v4164_v24, %v4163_v22 }
 0x220   : > { %v5472_v27 = vadd.f32 %v4162_v21, %v3093_v59  ;;  %v3096_v60 = vadd.f32 %v4119_v63, %v5448_v12 }
 0x222   : > { %v5475_v1 = vadd.f32 %v4165_v25, %v3096_v60  ;;  %v4120_v30 = vpop.f32.mrb[52].mxu0 }
 0x223   : > { %v4166_v31 = vpop.f32.mrb[52].mxu1  ;;  %v4121_v32 = vpop.f32.mrb[53].mxu0 }
 0x224   : > { %v4122_v33 = vadd.f32 %v4121_v32, %v4120_v30  ;;  %v4167_v34 = vpop.f32.mrb[53].mxu1  ;;  %v4123_v36 = vpop.f32.mrb[54].mxu0 }
 0x225   : > { %v4168_v38 = vadd.f32 %v4167_v34, %v4166_v31  ;;  %v4169_v39 = vpop.f32.mrb[54].mxu1  ;;  %v4124_v40 = vpop.f32.mrb[55].mxu0 }
 0x226   : > { %v3101_v11 = vadd.f32 %v4122_v33, %v5451_v28  ;;  %v4125_v13 = vadd.f32 %v4124_v40, %v4123_v36  ;;  %v4170_v41 = vpop.f32.mrb[55].mxu1 }
 0x227   : > { %v4171_v45 = vadd.f32 %v4170_v41, %v4169_v39 }
 0x228   : > { %v5478_v46 = vadd.f32 %v4168_v38, %v3101_v11  ;;  %v3104_v12 = vadd.f32 %v4125_v13, %v5454_v29 }
 0x22a   : > { %v5481_v47 = vadd.f32 %v4171_v45, %v3104_v12  ;;  %v4126_v15 = vpop.f32.mrb[56].mxu0 }
 0x22b   : > { %v4172_v48 = vpop.f32.mrb[56].mxu1  ;;  %v4127_v50 = vpop.f32.mrb[57].mxu0 }
 0x22c   : > { %v4128_v52 = vadd.f32 %v4127_v50, %v4126_v15  ;;  %v4173_v53 = vpop.f32.mrb[57].mxu1  ;;  %v4129_v54 = vpop.f32.mrb[58].mxu0 }
 0x22d   : > { %v4174_v55 = vadd.f32 %v4173_v53, %v4172_v48  ;;  %v4175_v35 = vpop.f32.mrb[58].mxu1  ;;  %v4130_v56 = vpop.f32.mrb[59].mxu0 }
 0x22e   : > { %v3109_v28 = vadd.f32 %v4128_v52, %v5457_v43  ;;  %v4176_v57 = vpop.f32.mrb[59].mxu1 }
 0x230   : > { %v5484_v26 = vadd.f32 %v4174_v55, %v3109_v28 }
 0x232   : > { %v4194_v61 = vpop.f32.mrb[60].mxu0 }
 0x233   : > { %v4240_v62 = vpop.f32.mrb[60].mxu1  ;;  %v4195_v0 = vpop.f32.mrb[61].mxu0 }
 0x234   : > { %v4196_v29 = vadd.f32 %v4195_v0, %v4194_v61  ;;  %v4241_v2 = vpop.f32.mrb[61].mxu1  ;;  %v4197_v3 = vpop.f32.mrb[62].mxu0 }
 0x235   : > { %v4242_v4 = vadd.f32 %v4241_v2, %v4240_v62  ;;  %v4243_v5 = vpop.f32.mrb[62].mxu1  ;;  %v4198_v6 = vpop.f32.mrb[63].mxu0 }
 0x236   : > { %v3221_v7 = vadd.f32 %v4196_v29, %v5460_v58  ;;  %v4199_v42 = vadd.f32 %v4198_v6, %v4197_v3  ;;  %v4244_v49 = vpop.f32.mrb[63].mxu1 }
 0x237   : > { %v4245_v8 = vadd.f32 %v4244_v49, %v4243_v5 }
 0x238   : > { %v5487_v9 = vadd.f32 %v4242_v4, %v3221_v7  ;;  %v3224_v43 = vadd.f32 %v4199_v42, %v5463_v37 }
 0x23a   : > { %v5490_v44 = vadd.f32 %v4245_v8, %v3224_v43  ;;  %v4200_v14 = vpop.f32.mrb[64].mxu0 }
 0x23b   : > { %v4246_v16 = vpop.f32.mrb[64].mxu1  ;;  %v4201_v17 = vpop.f32.mrb[65].mxu0 }
 0x23c   : > { %v3330_v18 = vadd.f32 %v5490_v44, %v5487_v9  ;;  %v4202_v19 = vadd.f32 %v4201_v17, %v4200_v14  ;;  %v4247_v20 = vpop.f32.mrb[65].mxu1  ;;  %v4203_v21 = vpop.f32.mrb[66].mxu0 }
 0x23d   : > { %v4248_v22 = vadd.f32 %v4247_v20, %v4246_v16  ;;  %v4249_v58 = vpop.f32.mrb[66].mxu1  ;;  %v4204_v23 = vpop.f32.mrb[67].mxu0 }
 0x23e   : > { %v3229_v59 = vadd.f32 %v4202_v19, %v5466_v10  ;;  %v4205_v63 = vadd.f32 %v4204_v23, %v4203_v21  ;;  %v4250_v24 = vpop.f32.mrb[67].mxu1 }
 0x23f   : > { %v4251_v25 = vadd.f32 %v4250_v24, %v4249_v58 }
 0x240   : > { %v5495_v37 = vadd.f32 %v4248_v22, %v3229_v59  ;;  %v3232_v60 = vadd.f32 %v4205_v63, %v5469_v51 }
 0x242   : > { %v3331_v30 = vadd.f32 %v3330_v18, %v5495_v37  ;;  %v3304_v31 = vadd.f32 %v4251_v25, %v3232_v60  ;;  %v4206_v32 = vpop.f32.mrb[68].mxu0 }
 0x243   : > { %v4252_v33 = vpop.f32.mrb[68].mxu1  ;;  %v4207_v34 = vpop.f32.mrb[69].mxu0 }
 0x244   : > { %v3332_v36 = vadd.f32 %v3331_v30, %v3304_v31  ;;  %v4208_v38 = vadd.f32 %v4207_v34, %v4206_v32  ;;  %v4253_v39 = vpop.f32.mrb[69].mxu1  ;;  %v4209_v40 = vpop.f32.mrb[70].mxu0 }
 0x245   : > { %v4254_v11 = vadd.f32 %v4253_v39, %v4252_v33  ;;  %v4255_v13 = vpop.f32.mrb[70].mxu1  ;;  %v4210_v10 = vpop.f32.mrb[71].mxu0 }
 0x246   : > { %v3237_v41 = vadd.f32 %v4208_v38, %v5472_v27  ;;  %v4211_v45 = vadd.f32 %v4210_v10, %v4209_v40  ;;  %v4256_v12 = vpop.f32.mrb[71].mxu1 }
 0x247   : > { %v4257_v15 = vadd.f32 %v4256_v12, %v4255_v13 }
 0x248   : > { %v3309_v48 = vadd.f32 %v4254_v11, %v3237_v41  ;;  %v3240_v51 = vadd.f32 %v4211_v45, %v5475_v1 }
 0x24a   : > { %v3333_v50 = vadd.f32 %v3332_v36, %v3309_v48  ;;  %v3312_v52 = vadd.f32 %v4257_v15, %v3240_v51  ;;  %v4212_v53 = vpop.f32.mrb[72].mxu0 }
 0x24b   : > { %v4258_v54 = vpop.f32.mrb[72].mxu1  ;;  %v4213_v55 = vpop.f32.mrb[73].mxu0 }
 0x24c   : > { %v3334_v35 = vadd.f32 %v3333_v50, %v3312_v52  ;;  %v4214_v56 = vadd.f32 %v4213_v55, %v4212_v53  ;;  %v4259_v28 = vpop.f32.mrb[73].mxu1  ;;  %v4215_v57 = vpop.f32.mrb[74].mxu0 }
 0x24d   : > { %v4260_v61 = vadd.f32 %v4259_v28, %v4258_v54  ;;  %v4261_v62 = vpop.f32.mrb[74].mxu1  ;;  %v4216_v0 = vpop.f32.mrb[75].mxu0 }
 0x24e   : > { %v3245_v27 = vadd.f32 %v4214_v56, %v5478_v46  ;;  %v4217_v29 = vadd.f32 %v4216_v0, %v4215_v57  ;;  %v4262_v2 = vpop.f32.mrb[75].mxu1 }
 0x24f   : > { %v4263_v3 = vadd.f32 %v4262_v2, %v4261_v62 }
 0x250   : > { %v3317_v4 = vadd.f32 %v4260_v61, %v3245_v27  ;;  %v3248_v1 = vadd.f32 %v4217_v29, %v5481_v47  ;;  %v3856_v27 = vld [vmem:[%s1277_s8] ss:$0 sm:$0xff] }
 0x252   : > { %v3335_v5 = vadd.f32 %v3334_v35, %v3317_v4  ;;  %v3320_v6 = vadd.f32 %v4263_v3, %v3248_v1  ;;  %v4218_v7 = vpop.f32.mrb[76].mxu0 }
 0x253   : > { %v4264_v42 = vpop.f32.mrb[76].mxu1  ;;  %v4219_v49 = vpop.f32.mrb[77].mxu0 }
 0x254   : > { %v3336_v8 = vadd.f32 %v3335_v5, %v3320_v6  ;;  %v4220_v43 = vadd.f32 %v4219_v49, %v4218_v7  ;;  %v4265_v14 = vpop.f32.mrb[77].mxu1  ;;  %v4221_v16 = vpop.f32.mrb[78].mxu0 }
 0x255   : > { %v4266_v17 = vadd.f32 %v4265_v14, %v4264_v42  ;;  %v4267_v18 = vpop.f32.mrb[78].mxu1  ;;  %v4222_v19 = vpop.f32.mrb[79].mxu0  ;;  %v3857_v42 = vld [vmem:[%s1280_s11] ss:$0 sm:$0xff] }
 0x256   : > { %v3253_v46 = vadd.f32 %v4220_v43, %v5484_v26  ;;  %v4268_v20 = vpop.f32.mrb[79].mxu1 }
 0x258   : > { %v3325_v21 = vadd.f32 %v4266_v17, %v3253_v46 }
 0x25a   : > { %v3337_v22 = vadd.f32 %v3336_v8, %v3325_v21 }
 0x25c   : > { %v3338_v58 = vrot.slane %v3337_v22, 4 }
 0x25e   : > { %v3339_v23 = vadd.f32 %v3338_v58, %v3337_v22 }
 0x260   : > { %v3340_v47 = vrot.slane %v3339_v23, 2 }
 0x262   : > { %v3341_v59 = vadd.f32 %v3340_v47, %v3339_v23 }
 0x264   : > { %v3342_v63 = vrot.slane %v3341_v59, 1 }
 0x266   : > { %v3343_v24 = vadd.f32 %v3342_v63, %v3341_v59 }
 0x268   : > { %v3345_v25 = vmul.f32 0.013888889, %v3343_v24 }
 0x26a   : > { %v3346_v60 = vsub.f32 %v5487_v9, %v3345_v25  ;;  %v3347_v30 = vsub.f32 %v5490_v44, %v3345_v25  ;;  %v3348_v32 = vsub.f32 %v5495_v37, %v3345_v25  ;;  %v3349_v33 = vsub.f32 %v3304_v31, %v3345_v25 }
 0x26b   : > { %v3350_v34 = vsub.f32 %v3309_v48, %v3345_v25  ;;  %v3351_v36 = vsub.f32 %v3312_v52, %v3345_v25  ;;  %v3352_v26 = vsub.f32 %v3317_v4, %v3345_v25  ;;  %v3353_v38 = vsub.f32 %v3320_v6, %v3345_v25 }
 0x26c   : > { %v3354_v39 = vsub.f32 %v3325_v21, %v3345_v25  ;;  %v3355_v40 = vmul.f32 %v3346_v60, %v3346_v60  ;;  %v3356_v11 = vmul.f32 %v3347_v30, %v3347_v30  ;;  %v3357_v13 = vmul.f32 %v3348_v32, %v3348_v32 }
 0x26d   : > { %v3358_v41 = vmul.f32 %v3349_v33, %v3349_v33  ;;  %v3359_v12 = vmul.f32 %v3350_v34, %v3350_v34  ;;  %v3360_v51 = vmul.f32 %v3351_v36, %v3351_v36  ;;  %v3361_v44 = vmul.f32 %v3352_v26, %v3352_v26 }
 0x26e   : > { %v3364_v10 = vadd.f32 %v3356_v11, %v3355_v40  ;;  %v3362_v37 = vmul.f32 %v3353_v38, %v3353_v38  ;;  %v3363_v48 = vmul.f32 %v3354_v39, %v3354_v39 }
 0x270   : > { %v3365_v45 = vadd.f32 %v3364_v10, %v3357_v13 }
 0x272   : > { %v3366_v15 = vadd.f32 %v3365_v45, %v3358_v41 }
 0x274   : > { %v3367_v9 = vadd.f32 %v3366_v15, %v3359_v12 }
 0x276   : > { %v3368_v50 = vadd.f32 %v3367_v9, %v3360_v51 }
 0x278   : > { %v3369_v31 = vadd.f32 %v3368_v50, %v3361_v44 }
 0x27a   : > { %v3370_v52 = vadd.f32 %v3369_v31, %v3362_v37 }
 0x27c   : > { %v3371_v53 = vadd.f32 %v3370_v52, %v3363_v48 }
 0x27e   : > { %v3372_v54 = vrot.slane %v3371_v53, 4 }
 0x280   : > { %v3373_v55 = vadd.f32 %v3372_v54, %v3371_v53 }
 0x282   : > { %v3374_v35 = vrot.slane %v3373_v55, 2 }
 0x284   : > { %v3375_v56 = vadd.f32 %v3374_v35, %v3373_v55 }
 0x286   : > { %v3376_v28 = vrot.slane %v3375_v56, 1 }
 0x288   : > { %v3377_v57 = vadd.f32 %v3376_v28, %v3375_v56 }
 0x28a   : > { %v3378_v61 = vmul.f32 0.013888889, %v3377_v57 }
 0x28c   : > { %v3379_v62 = vadd.f32 1e-05, %v3378_v61 }
 0x28e   : > { %4439 = vrsqrt.f32 %v3379_v62 }
 0x298   : > { %v4440_v0 = vpop.eup %4439 }
 0x299   : > { %v3381_v29 = vmul.f32 %v4440_v0, %v3346_v60  ;;  %v3382_v2 = vmul.f32 %v4440_v0, %v3347_v30  ;;  %v3383_v3 = vmul.f32 %v4440_v0, %v3348_v32  ;;  %v3384_v4 = vmul.f32 %v4440_v0, %v3349_v33 }
 0x29a   : > { %v3385_v1 = vmul.f32 %v4440_v0, %v3350_v34  ;;  %v3386_v5 = vmul.f32 %v4440_v0, %v3351_v36  ;;  %v3387_v6 = vmul.f32 %v4440_v0, %v3352_v26  ;;  %v3388_v7 = vmul.f32 %v4440_v0, %v3353_v38 }
 0x29b   : > { %v3389_v49 = vmul.f32 %v4440_v0, %v3354_v39  ;;  %v3397_v8 = vmul.f32 %v3856_v27, %v3381_v29  ;;  %v3398_v43 = vmul.f32 %v3856_v27, %v3382_v2  ;;  %v3399_v14 = vmul.f32 %v3856_v27, %v3383_v3 }
 0x29c   : > { %v3400_v16 = vmul.f32 %v3856_v27, %v3384_v4  ;;  %v3401_v17 = vmul.f32 %v3856_v27, %v3385_v1  ;;  %v3402_v18 = vmul.f32 %v3856_v27, %v3386_v5  ;;  %v3403_v19 = vmul.f32 %v3856_v27, %v3387_v6 }
 0x29d   : > { %v3404_v46 = vmul.f32 %v3856_v27, %v3388_v7  ;;  %v3405_v20 = vmul.f32 %v3856_v27, %v3389_v49  ;;  %v3413_v21 = vadd.f32 %v3857_v42, %v3397_v8  ;;  %v3414_v22 = vadd.f32 %v3857_v42, %v3398_v43 }
 0x29e   : > { %v3415_v58 = vadd.f32 %v3857_v42, %v3399_v14  ;;  %v3416_v23 = vadd.f32 %v3857_v42, %v3400_v16  ;;  %v3417_v47 = vadd.f32 %v3857_v42, %v3401_v17  ;;  %v3418_v59 = vadd.f32 %v3857_v42, %v3402_v18 }
 0x29f   : > { %v3419_v63 = vadd.f32 %v3857_v42, %v3403_v19  ;;  %v3420_v24 = vadd.f32 %v3857_v42, %v3404_v46  ;;  %v3421_v25 = vadd.f32 %v3857_v42, %v3405_v20  ;;  %v3422_v60 = vmul.f32 0.2, %v3413_v21 }
 0x2a0   : > { %v3423_v30 = vmul.f32 0.2, %v3414_v22  ;;  %v3424_v32 = vmul.f32 0.2, %v3415_v58  ;;  %v3425_v33 = vmul.f32 0.2, %v3416_v23 }
 0x2a1   : > { %v3426_v34 = vmul.f32 0.2, %v3417_v47  ;;  %v3427_v36 = vmul.f32 0.2, %v3418_v59  ;;  %v3428_v26 = vmul.f32 0.2, %v3419_v63  ;;  %v3431_v38 = vmax.f32 %v3413_v21, %v3422_v60 }
 0x2a2   : > { %v3429_v39 = vmul.f32 0.2, %v3420_v24  ;;  %v3430_v40 = vmul.f32 0.2, %v3421_v25  ;;  %v3432_v11 = vmax.f32 %v3414_v22, %v3423_v30  ;;  %v3433_v13 = vmax.f32 %v3415_v58, %v3424_v32  ;;  %3492 = sbr.rel (!%p4521_p5) target bundleno = 692 (0x2b4), region = 81 }
 0x2a3   : > { %v3434_v10 = vmax.f32 %v3416_v23, %v3425_v33  ;;  %v3435_v41 = vmax.f32 %v3417_v47, %v3426_v34  ;;  %v3436_v45 = vmax.f32 %v3418_v59, %v3427_v36  ;;  %v3437_v12 = vmax.f32 %v3419_v63, %v3428_v26 }
 0x2a4   : > { %v3438_v15 = vmax.f32 %v3420_v24, %v3429_v39  ;;  %v3439_v51 = vmax.f32 %v3421_v25, %v3430_v40  ;;  %v3882_v9 = vpack.c.bf16 %v3432_v11, %v3431_v38 }
 0x2a5   : > { %v3887_v44 = vpack.c.bf16 %v3434_v10, %v3433_v13  ;;  %v3892_v50 = vpack.c.bf16 %v3436_v45, %v3435_v41 }
 0x2a6   : > { %v3878_v37 = vpack.c.bf16 %v3439_v51, %v3439_v51  ;;  %3883 = vst [vmem:[%s1274_s15] sm:$0xff] %v3882_v9   ;;  %v3897_v31 = vpack.c.bf16 %v3438_v15, %v3437_v12 }
 0x2a7   : > { %3899 = vst [vmem:[%s1274_s15 + $0x8] sm:$0xff] %v3887_v44   ;;  %3900 = vst [vmem:[%s1274_s15 + $0x10] sm:$0xff] %v3892_v50  }
 0x2a8   : > { %3901 = vst [vmem:[%s1274_s15 + $0x18] sm:$0xff] %v3897_v31   ;;  %3485 = vst [vmem:[%s1274_s15 + $0x20] sm:$0xf] %v3878_v37 }
 0x2ad   : > { %v3510_v48 = vld [vmem:[%s1274_s15] sm:$0xf]  ;;  %v3512_v52 = vld [vmem:[%s1274_s15 + $0x4] sm:$0xf] }
 0x2ae   : > { %v3514_v53 = vld [vmem:[%s1274_s15 + $0x8] sm:$0xf]  ;;  %v3516_v54 = vld [vmem:[%s1274_s15 + $0xc] sm:$0xf]  ;;  %v3518_v55 = vld [vmem:[%s1274_s15 + $0x10] sm:$0xf] }
 0x2af   : > { %3511 = vst [vmem:[%s3494_s17] sm:$0xf] %v3510_v48  ;;  %3513 = vst [vmem:[%s3494_s17 + $0x8] sm:$0xf] %v3512_v52  ;;  %v3520_v35 = vld [vmem:[%s1274_s15 + $0x14] sm:$0xf] }
 0x2b0   : > { %3515 = vst [vmem:[%s3494_s17 + $0x10] sm:$0xf] %v3514_v53  ;;  %3517 = vst [vmem:[%s3494_s17 + $0x18] sm:$0xf] %v3516_v54  ;;  %v3522_v56 = vld [vmem:[%s1274_s15 + $0x18] sm:$0xf] }
 0x2b1   : > { %3519 = vst [vmem:[%s3494_s17 + $0x20] sm:$0xf] %v3518_v55  ;;  %v3524_v28 = vld [vmem:[%s1274_s15 + $0x1c] sm:$0xf]  ;;  %3521 = vst [vmem:[%s3494_s17 + $0x28] sm:$0xf] %v3520_v35 }
 0x2b2   : > { %3523 = vst [vmem:[%s3494_s17 + $0x30] sm:$0xf] %v3522_v56  ;;  %3525 = vst [vmem:[%s3494_s17 + $0x38] sm:$0xf] %v3524_v28  ;;  %v3526_v57 = vld [vmem:[%s1274_s15 + $0x20] sm:$0xf] }
 0x2b3   : > { %3527 = vst [vmem:[%s3494_s17 + $0x40] sm:$0xf] %v3526_v57 }
 0x2b4 PF: > { %p11_p11 = scmp.ge.s32.totalorder %s4509_s19, 4   ;;  %s5539_s15 = smov %s4459_s16 }
 0x2b5   : > { %s5540_s16 = smov %s4519_s22  ;;  %s5541_s17 = smov %s4509_s19 }
 0x2b6   :  { %13 = sbr.rel (!%p11_p11) target bundleno = 2 (0x2), region = 159 }

// kernel: encoder_32_forward.6
= control target key start
LH: loop header
LB: loop body
LE: loop exit
PB: predicated region body
PF: predicated region fallthrough
CT: control target
= control target key end

     0   :  { %s8345_s15 = smov 0   ;;  %s8347_s16 = smov 0   ;;  %s9775_s0 = inlined_call_operand.vmem [shape: bf16[8,4096], index: 0, kind: input, shape index: {}]   ;;  %s9776_s1 = inlined_call_operand.vmem [shape: bf16[4096,512], index: 1, kind: input, shape index: {}]   ;;  %s9777_s2 = inlined_call_operand.vmem [shape: f32[1,512], index: 2, kind: input, shape index: {}]   ;;  %s9778_s3 = inlined_call_operand.vmem [shape: f32[1,512], index: 3, kind: input, shape index: {}]   ;;  %s9779_s4 = inlined_call_operand.vmem [shape: bf16[8,512], index: 4, kind: output, shape index: {}]  }
   0x1   :  { %s8349_s17 = smov 0  }
   0x2 LB: > { %s7329_s18 = sadd.s32 4294967295, %s8318_s17   ;;  %s8362_s19 = sadd.s32 1, %s8318_s17   ;;  %s8318_s17 = sphi %s8349_s17, %s9782_s17   ;;  %s8314_s16 = sphi %s8347_s16, %s9781_s16   ;;  %s8310_s15 = sphi %s8345_s15, %s9780_s15  }
   0x3   : > { %s39_s20 = ssub.s32 %s8318_s17, %s8362_s19  ;;  %s42_s21 = sadd.s32 1, %s8314_s16 }
   0x4   : > { %p40_p0 = scmp.eq.s32.totalorder %s39_s20, 0  ;;  %p49_p1 = scmp.ne.s32.totalorder %s8314_s16, %s8310_s15 }
   0x5   : > { %p50_p2 = scmp.eq.s32.totalorder %s8318_s17, 0  ;;  %p7332_p4 = scmp.ge.s32.totalorder %s8318_s17, 4 }
   0x6   : > { %s8371_s22 = scalar_select %p40_p0, %s8314_s16, %s42_s21  }
   0x7   : > { %p51_p3 = por %p50_p2, %p49_p1  ;;  %156 = sbr.rel (%p7332_p4) target bundleno = 359 (0x167), region = 20 }
   0xe   : > { %159 = sbr.rel (!%p51_p3) target bundleno = 359 (0x167), region = 24  ;;  %s161_s23 = sand.u32 (%p51_p3), 1, %s8314_s16  }
   0xf   : > { %s7334_s24 = sshll.u32 (%p51_p3), %s8318_s17, 2  ;;  %s7333_s25 = sshll.u32 (%p51_p3), %s161_s23, 11 }
  0x10   : > { %s8379_s28 = scalar_lea.vmem (%p51_p3), %s9776_s1, %s7334_s24  ;;  %s8383_s29 = scalar_lea.vmem (%p51_p3), [#allocation2], %s7333_s25 }
  0x11   : > { %v181_v0 = vld [vmem:[%s8379_s28] sm:$0xf] (%p51_p3)  ;;  %v183_v1 = vld [vmem:[%s8379_s28 + $0x10] sm:$0xf] (%p51_p3) }
  0x12   : > { %182 = vst [vmem:[%s8383_s29] sm:$0xf] (%p51_p3), %v181_v0  ;;  %184 = vst [vmem:[%s8383_s29 + $0x4] sm:$0xf] (%p51_p3), %v183_v1  ;;  %v185_v2 = vld [vmem:[%s8379_s28 + $0x20] sm:$0xf] (%p51_p3) }
  0x13   : > { %v187_v3 = vld [vmem:[%s8379_s28 + $0x30] sm:$0xf] (%p51_p3)  ;;  %v189_v4 = vld [vmem:[%s8379_s28 + $0x40] sm:$0xf] (%p51_p3)  ;;  %186 = vst [vmem:[%s8383_s29 + $0x8] sm:$0xf] (%p51_p3), %v185_v2 }
  0x14   : > { %188 = vst [vmem:[%s8383_s29 + $0xc] sm:$0xf] (%p51_p3), %v187_v3  ;;  %190 = vst [vmem:[%s8383_s29 + $0x10] sm:$0xf] (%p51_p3), %v189_v4  ;;  %v191_v5 = vld [vmem:[%s8379_s28 + $0x50] sm:$0xf] (%p51_p3) }
  0x15   : > { %v193_v6 = vld [vmem:[%s8379_s28 + $0x60] sm:$0xf]  ;;  %v195_v7 = vld [vmem:[%s8379_s28 + $0x70] sm:$0xf]  ;;  %192 = vst [vmem:[%s8383_s29 + $0x14] sm:$0xf] %v191_v5 }
  0x16   : > { %194 = vst [vmem:[%s8383_s29 + $0x18] sm:$0xf] %v193_v6  ;;  %196 = vst [vmem:[%s8383_s29 + $0x1c] sm:$0xf] %v195_v7  ;;  %v197_v8 = vld [vmem:[%s8379_s28 + $0x80] sm:$0xf] }
  0x17   : > { %v199_v9 = vld [vmem:[%s8379_s28 + $0x90] sm:$0xf]  ;;  %v201_v10 = vld [vmem:[%s8379_s28 + $0xa0] sm:$0xf]  ;;  %198 = vst [vmem:[%s8383_s29 + $0x20] sm:$0xf] %v197_v8 }
  0x18   : > { %200 = vst [vmem:[%s8383_s29 + $0x24] sm:$0xf] %v199_v9  ;;  %202 = vst [vmem:[%s8383_s29 + $0x28] sm:$0xf] %v201_v10  ;;  %v203_v11 = vld [vmem:[%s8379_s28 + $0xb0] sm:$0xf] }
  0x19   : > { %v205_v12 = vld [vmem:[%s8379_s28 + $0xc0] sm:$0xf]  ;;  %v207_v13 = vld [vmem:[%s8379_s28 + $0xd0] sm:$0xf]  ;;  %204 = vst [vmem:[%s8383_s29 + $0x2c] sm:$0xf] %v203_v11 }
  0x1a   : > { %206 = vst [vmem:[%s8383_s29 + $0x30] sm:$0xf] %v205_v12  ;;  %208 = vst [vmem:[%s8383_s29 + $0x34] sm:$0xf] %v207_v13  ;;  %v209_v14 = vld [vmem:[%s8379_s28 + $0xe0] sm:$0xf] }
  0x1b   : > { %v211_v15 = vld [vmem:[%s8379_s28 + $0xf0] sm:$0xf]  ;;  %v213_v16 = vld [vmem:[%s8379_s28 + $0x100] sm:$0xf]  ;;  %210 = vst [vmem:[%s8383_s29 + $0x38] sm:$0xf] %v209_v14 }
  0x1c   : > { %212 = vst [vmem:[%s8383_s29 + $0x3c] sm:$0xf] %v211_v15  ;;  %214 = vst [vmem:[%s8383_s29 + $0x40] sm:$0xf] %v213_v16  ;;  %v215_v17 = vld [vmem:[%s8379_s28 + $0x110] sm:$0xf] }
  0x1d   : > { %v217_v18 = vld [vmem:[%s8379_s28 + $0x120] sm:$0xf]  ;;  %v219_v19 = vld [vmem:[%s8379_s28 + $0x130] sm:$0xf]  ;;  %216 = vst [vmem:[%s8383_s29 + $0x44] sm:$0xf] %v215_v17 }
  0x1e   : > { %218 = vst [vmem:[%s8383_s29 + $0x48] sm:$0xf] %v217_v18  ;;  %220 = vst [vmem:[%s8383_s29 + $0x4c] sm:$0xf] %v219_v19  ;;  %v221_v20 = vld [vmem:[%s8379_s28 + $0x140] sm:$0xf] }
  0x1f   : > { %v223_v21 = vld [vmem:[%s8379_s28 + $0x150] sm:$0xf]  ;;  %v225_v22 = vld [vmem:[%s8379_s28 + $0x160] sm:$0xf]  ;;  %222 = vst [vmem:[%s8383_s29 + $0x50] sm:$0xf] %v221_v20 }
  0x20   : > { %224 = vst [vmem:[%s8383_s29 + $0x54] sm:$0xf] %v223_v21  ;;  %226 = vst [vmem:[%s8383_s29 + $0x58] sm:$0xf] %v225_v22  ;;  %v227_v23 = vld [vmem:[%s8379_s28 + $0x170] sm:$0xf] }
  0x21   : > { %v229_v24 = vld [vmem:[%s8379_s28 + $0x180] sm:$0xf]  ;;  %v231_v25 = vld [vmem:[%s8379_s28 + $0x190] sm:$0xf]  ;;  %228 = vst [vmem:[%s8383_s29 + $0x5c] sm:$0xf] %v227_v23 }
  0x22   : > { %230 = vst [vmem:[%s8383_s29 + $0x60] sm:$0xf] %v229_v24  ;;  %232 = vst [vmem:[%s8383_s29 + $0x64] sm:$0xf] %v231_v25  ;;  %v233_v26 = vld [vmem:[%s8379_s28 + $0x1a0] sm:$0xf] }
  0x23   : > { %v235_v27 = vld [vmem:[%s8379_s28 + $0x1b0] sm:$0xf]  ;;  %v237_v28 = vld [vmem:[%s8379_s28 + $0x1c0] sm:$0xf]  ;;  %234 = vst [vmem:[%s8383_s29 + $0x68] sm:$0xf] %v233_v26 }
  0x24   : > { %236 = vst [vmem:[%s8383_s29 + $0x6c] sm:$0xf] %v235_v27  ;;  %238 = vst [vmem:[%s8383_s29 + $0x70] sm:$0xf] %v237_v28  ;;  %v239_v29 = vld [vmem:[%s8379_s28 + $0x1d0] sm:$0xf] }
  0x25   : > { %v241_v30 = vld [vmem:[%s8379_s28 + $0x1e0] sm:$0xf]  ;;  %v243_v31 = vld [vmem:[%s8379_s28 + $0x1f0] sm:$0xf]  ;;  %240 = vst [vmem:[%s8383_s29 + $0x74] sm:$0xf] %v239_v29 }
  0x26   : > { %242 = vst [vmem:[%s8383_s29 + $0x78] sm:$0xf] %v241_v30  ;;  %244 = vst [vmem:[%s8383_s29 + $0x7c] sm:$0xf] %v243_v31  ;;  %v245_v32 = vld [vmem:[%s8379_s28 + $0x200] sm:$0xf] }
  0x27   : > { %v247_v33 = vld [vmem:[%s8379_s28 + $0x210] sm:$0xf]  ;;  %v249_v34 = vld [vmem:[%s8379_s28 + $0x220] sm:$0xf]  ;;  %246 = vst [vmem:[%s8383_s29 + $0x80] sm:$0xf] %v245_v32 }
  0x28   : > { %248 = vst [vmem:[%s8383_s29 + $0x84] sm:$0xf] %v247_v33  ;;  %250 = vst [vmem:[%s8383_s29 + $0x88] sm:$0xf] %v249_v34  ;;  %v251_v35 = vld [vmem:[%s8379_s28 + $0x230] sm:$0xf] }
  0x29   : > { %v253_v36 = vld [vmem:[%s8379_s28 + $0x240] sm:$0xf]  ;;  %v255_v37 = vld [vmem:[%s8379_s28 + $0x250] sm:$0xf]  ;;  %252 = vst [vmem:[%s8383_s29 + $0x8c] sm:$0xf] %v251_v35 }
  0x2a   : > { %254 = vst [vmem:[%s8383_s29 + $0x90] sm:$0xf] %v253_v36  ;;  %256 = vst [vmem:[%s8383_s29 + $0x94] sm:$0xf] %v255_v37  ;;  %v257_v38 = vld [vmem:[%s8379_s28 + $0x260] sm:$0xf] }
  0x2b   : > { %v259_v39 = vld [vmem:[%s8379_s28 + $0x270] sm:$0xf]  ;;  %v261_v40 = vld [vmem:[%s8379_s28 + $0x280] sm:$0xf]  ;;  %258 = vst [vmem:[%s8383_s29 + $0x98] sm:$0xf] %v257_v38 }
  0x2c   : > { %260 = vst [vmem:[%s8383_s29 + $0x9c] sm:$0xf] %v259_v39  ;;  %262 = vst [vmem:[%s8383_s29 + $0xa0] sm:$0xf] %v261_v40  ;;  %v263_v41 = vld [vmem:[%s8379_s28 + $0x290] sm:$0xf] }
  0x2d   : > { %v265_v42 = vld [vmem:[%s8379_s28 + $0x2a0] sm:$0xf]  ;;  %v267_v43 = vld [vmem:[%s8379_s28 + $0x2b0] sm:$0xf]  ;;  %264 = vst [vmem:[%s8383_s29 + $0xa4] sm:$0xf] %v263_v41 }
  0x2e   : > { %266 = vst [vmem:[%s8383_s29 + $0xa8] sm:$0xf] %v265_v42  ;;  %268 = vst [vmem:[%s8383_s29 + $0xac] sm:$0xf] %v267_v43  ;;  %v269_v44 = vld [vmem:[%s8379_s28 + $0x2c0] sm:$0xf] }
  0x2f   : > { %v271_v45 = vld [vmem:[%s8379_s28 + $0x2d0] sm:$0xf]  ;;  %v273_v46 = vld [vmem:[%s8379_s28 + $0x2e0] sm:$0xf]  ;;  %270 = vst [vmem:[%s8383_s29 + $0xb0] sm:$0xf] %v269_v44 }
  0x30   : > { %272 = vst [vmem:[%s8383_s29 + $0xb4] sm:$0xf] %v271_v45  ;;  %274 = vst [vmem:[%s8383_s29 + $0xb8] sm:$0xf] %v273_v46  ;;  %v275_v47 = vld [vmem:[%s8379_s28 + $0x2f0] sm:$0xf] }
  0x31   : > { %v277_v48 = vld [vmem:[%s8379_s28 + $0x300] sm:$0xf]  ;;  %v279_v49 = vld [vmem:[%s8379_s28 + $0x310] sm:$0xf]  ;;  %276 = vst [vmem:[%s8383_s29 + $0xbc] sm:$0xf] %v275_v47 }
  0x32   : > { %278 = vst [vmem:[%s8383_s29 + $0xc0] sm:$0xf] %v277_v48  ;;  %280 = vst [vmem:[%s8383_s29 + $0xc4] sm:$0xf] %v279_v49  ;;  %v281_v50 = vld [vmem:[%s8379_s28 + $0x320] sm:$0xf] }
  0x33   : > { %v283_v51 = vld [vmem:[%s8379_s28 + $0x330] sm:$0xf]  ;;  %v285_v52 = vld [vmem:[%s8379_s28 + $0x340] sm:$0xf]  ;;  %282 = vst [vmem:[%s8383_s29 + $0xc8] sm:$0xf] %v281_v50 }
  0x34   : > { %284 = vst [vmem:[%s8383_s29 + $0xcc] sm:$0xf] %v283_v51  ;;  %286 = vst [vmem:[%s8383_s29 + $0xd0] sm:$0xf] %v285_v52  ;;  %v287_v53 = vld [vmem:[%s8379_s28 + $0x350] sm:$0xf] }
  0x35   : > { %v289_v54 = vld [vmem:[%s8379_s28 + $0x360] sm:$0xf]  ;;  %v291_v55 = vld [vmem:[%s8379_s28 + $0x370] sm:$0xf]  ;;  %288 = vst [vmem:[%s8383_s29 + $0xd4] sm:$0xf] %v287_v53 }
  0x36   : > { %290 = vst [vmem:[%s8383_s29 + $0xd8] sm:$0xf] %v289_v54  ;;  %292 = vst [vmem:[%s8383_s29 + $0xdc] sm:$0xf] %v291_v55  ;;  %v293_v56 = vld [vmem:[%s8379_s28 + $0x380] sm:$0xf] }
  0x37   : > { %v295_v57 = vld [vmem:[%s8379_s28 + $0x390] sm:$0xf]  ;;  %v297_v58 = vld [vmem:[%s8379_s28 + $0x3a0] sm:$0xf]  ;;  %294 = vst [vmem:[%s8383_s29 + $0xe0] sm:$0xf] %v293_v56 }
  0x38   : > { %296 = vst [vmem:[%s8383_s29 + $0xe4] sm:$0xf] %v295_v57  ;;  %298 = vst [vmem:[%s8383_s29 + $0xe8] sm:$0xf] %v297_v58  ;;  %v299_v59 = vld [vmem:[%s8379_s28 + $0x3b0] sm:$0xf] }
  0x39   : > { %v301_v60 = vld [vmem:[%s8379_s28 + $0x3c0] sm:$0xf]  ;;  %v303_v61 = vld [vmem:[%s8379_s28 + $0x3d0] sm:$0xf]  ;;  %300 = vst [vmem:[%s8383_s29 + $0xec] sm:$0xf] %v299_v59 }
  0x3a   : > { %302 = vst [vmem:[%s8383_s29 + $0xf0] sm:$0xf] %v301_v60  ;;  %304 = vst [vmem:[%s8383_s29 + $0xf4] sm:$0xf] %v303_v61  ;;  %v305_v62 = vld [vmem:[%s8379_s28 + $0x3e0] sm:$0xf] }
  0x3b   : > { %v307_v63 = vld [vmem:[%s8379_s28 + $0x3f0] sm:$0xf]  ;;  %v309_v0 = vld [vmem:[%s8379_s28 + $0x400] sm:$0xf]  ;;  %306 = vst [vmem:[%s8383_s29 + $0xf8] sm:$0xf] %v305_v62 }
  0x3c   : > { %308 = vst [vmem:[%s8383_s29 + $0xfc] sm:$0xf] %v307_v63  ;;  %310 = vst [vmem:[%s8383_s29 + $0x100] sm:$0xf] %v309_v0  ;;  %v311_v1 = vld [vmem:[%s8379_s28 + $0x410] sm:$0xf] }
  0x3d   : > { %v313_v2 = vld [vmem:[%s8379_s28 + $0x420] sm:$0xf]  ;;  %v315_v3 = vld [vmem:[%s8379_s28 + $0x430] sm:$0xf]  ;;  %312 = vst [vmem:[%s8383_s29 + $0x104] sm:$0xf] %v311_v1 }
  0x3e   : > { %314 = vst [vmem:[%s8383_s29 + $0x108] sm:$0xf] %v313_v2  ;;  %316 = vst [vmem:[%s8383_s29 + $0x10c] sm:$0xf] %v315_v3  ;;  %v317_v4 = vld [vmem:[%s8379_s28 + $0x440] sm:$0xf] }
  0x3f   : > { %v319_v5 = vld [vmem:[%s8379_s28 + $0x450] sm:$0xf]  ;;  %v321_v6 = vld [vmem:[%s8379_s28 + $0x460] sm:$0xf]  ;;  %318 = vst [vmem:[%s8383_s29 + $0x110] sm:$0xf] %v317_v4 }
  0x40   : > { %320 = vst [vmem:[%s8383_s29 + $0x114] sm:$0xf] %v319_v5  ;;  %322 = vst [vmem:[%s8383_s29 + $0x118] sm:$0xf] %v321_v6  ;;  %v323_v7 = vld [vmem:[%s8379_s28 + $0x470] sm:$0xf] }
  0x41   : > { %v325_v8 = vld [vmem:[%s8379_s28 + $0x480] sm:$0xf]  ;;  %v327_v9 = vld [vmem:[%s8379_s28 + $0x490] sm:$0xf]  ;;  %324 = vst [vmem:[%s8383_s29 + $0x11c] sm:$0xf] %v323_v7 }
  0x42   : > { %326 = vst [vmem:[%s8383_s29 + $0x120] sm:$0xf] %v325_v8  ;;  %328 = vst [vmem:[%s8383_s29 + $0x124] sm:$0xf] %v327_v9  ;;  %v329_v10 = vld [vmem:[%s8379_s28 + $0x4a0] sm:$0xf] }
  0x43   : > { %v331_v11 = vld [vmem:[%s8379_s28 + $0x4b0] sm:$0xf]  ;;  %v333_v12 = vld [vmem:[%s8379_s28 + $0x4c0] sm:$0xf]  ;;  %330 = vst [vmem:[%s8383_s29 + $0x128] sm:$0xf] %v329_v10 }
  0x44   : > { %332 = vst [vmem:[%s8383_s29 + $0x12c] sm:$0xf] %v331_v11  ;;  %334 = vst [vmem:[%s8383_s29 + $0x130] sm:$0xf] %v333_v12  ;;  %v335_v13 = vld [vmem:[%s8379_s28 + $0x4d0] sm:$0xf] }
  0x45   : > { %v337_v14 = vld [vmem:[%s8379_s28 + $0x4e0] sm:$0xf]  ;;  %v339_v15 = vld [vmem:[%s8379_s28 + $0x4f0] sm:$0xf]  ;;  %336 = vst [vmem:[%s8383_s29 + $0x134] sm:$0xf] %v335_v13 }
  0x46   : > { %338 = vst [vmem:[%s8383_s29 + $0x138] sm:$0xf] %v337_v14  ;;  %340 = vst [vmem:[%s8383_s29 + $0x13c] sm:$0xf] %v339_v15  ;;  %v341_v16 = vld [vmem:[%s8379_s28 + $0x500] sm:$0xf] }
  0x47   : > { %v343_v17 = vld [vmem:[%s8379_s28 + $0x510] sm:$0xf]  ;;  %v345_v18 = vld [vmem:[%s8379_s28 + $0x520] sm:$0xf]  ;;  %342 = vst [vmem:[%s8383_s29 + $0x140] sm:$0xf] %v341_v16 }
  0x48   : > { %344 = vst [vmem:[%s8383_s29 + $0x144] sm:$0xf] %v343_v17  ;;  %346 = vst [vmem:[%s8383_s29 + $0x148] sm:$0xf] %v345_v18  ;;  %v347_v19 = vld [vmem:[%s8379_s28 + $0x530] sm:$0xf] }
  0x49   : > { %v349_v20 = vld [vmem:[%s8379_s28 + $0x540] sm:$0xf]  ;;  %v351_v21 = vld [vmem:[%s8379_s28 + $0x550] sm:$0xf]  ;;  %348 = vst [vmem:[%s8383_s29 + $0x14c] sm:$0xf] %v347_v19 }
  0x4a   : > { %350 = vst [vmem:[%s8383_s29 + $0x150] sm:$0xf] %v349_v20  ;;  %352 = vst [vmem:[%s8383_s29 + $0x154] sm:$0xf] %v351_v21  ;;  %v353_v22 = vld [vmem:[%s8379_s28 + $0x560] sm:$0xf] }
  0x4b   : > { %v355_v23 = vld [vmem:[%s8379_s28 + $0x570] sm:$0xf]  ;;  %v357_v24 = vld [vmem:[%s8379_s28 + $0x580] sm:$0xf]  ;;  %354 = vst [vmem:[%s8383_s29 + $0x158] sm:$0xf] %v353_v22 }
  0x4c   : > { %356 = vst [vmem:[%s8383_s29 + $0x15c] sm:$0xf] %v355_v23  ;;  %358 = vst [vmem:[%s8383_s29 + $0x160] sm:$0xf] %v357_v24  ;;  %v359_v25 = vld [vmem:[%s8379_s28 + $0x590] sm:$0xf] }
  0x4d   : > { %v361_v26 = vld [vmem:[%s8379_s28 + $0x5a0] sm:$0xf]  ;;  %v363_v27 = vld [vmem:[%s8379_s28 + $0x5b0] sm:$0xf]  ;;  %360 = vst [vmem:[%s8383_s29 + $0x164] sm:$0xf] %v359_v25 }
  0x4e   : > { %362 = vst [vmem:[%s8383_s29 + $0x168] sm:$0xf] %v361_v26  ;;  %364 = vst [vmem:[%s8383_s29 + $0x16c] sm:$0xf] %v363_v27  ;;  %v365_v28 = vld [vmem:[%s8379_s28 + $0x5c0] sm:$0xf] }
  0x4f   : > { %v367_v29 = vld [vmem:[%s8379_s28 + $0x5d0] sm:$0xf]  ;;  %v369_v30 = vld [vmem:[%s8379_s28 + $0x5e0] sm:$0xf]  ;;  %366 = vst [vmem:[%s8383_s29 + $0x170] sm:$0xf] %v365_v28 }
  0x50   : > { %368 = vst [vmem:[%s8383_s29 + $0x174] sm:$0xf] %v367_v29  ;;  %370 = vst [vmem:[%s8383_s29 + $0x178] sm:$0xf] %v369_v30  ;;  %v371_v31 = vld [vmem:[%s8379_s28 + $0x5f0] sm:$0xf] }
  0x51   : > { %v373_v32 = vld [vmem:[%s8379_s28 + $0x600] sm:$0xf]  ;;  %v375_v33 = vld [vmem:[%s8379_s28 + $0x610] sm:$0xf]  ;;  %372 = vst [vmem:[%s8383_s29 + $0x17c] sm:$0xf] %v371_v31 }
  0x52   : > { %374 = vst [vmem:[%s8383_s29 + $0x180] sm:$0xf] %v373_v32  ;;  %376 = vst [vmem:[%s8383_s29 + $0x184] sm:$0xf] %v375_v33  ;;  %v377_v34 = vld [vmem:[%s8379_s28 + $0x620] sm:$0xf] }
  0x53   : > { %v379_v35 = vld [vmem:[%s8379_s28 + $0x630] sm:$0xf]  ;;  %v381_v36 = vld [vmem:[%s8379_s28 + $0x640] sm:$0xf]  ;;  %378 = vst [vmem:[%s8383_s29 + $0x188] sm:$0xf] %v377_v34 }
  0x54   : > { %380 = vst [vmem:[%s8383_s29 + $0x18c] sm:$0xf] %v379_v35  ;;  %382 = vst [vmem:[%s8383_s29 + $0x190] sm:$0xf] %v381_v36  ;;  %v383_v37 = vld [vmem:[%s8379_s28 + $0x650] sm:$0xf] }
  0x55   : > { %v385_v38 = vld [vmem:[%s8379_s28 + $0x660] sm:$0xf]  ;;  %v387_v39 = vld [vmem:[%s8379_s28 + $0x670] sm:$0xf]  ;;  %384 = vst [vmem:[%s8383_s29 + $0x194] sm:$0xf] %v383_v37 }
  0x56   : > { %386 = vst [vmem:[%s8383_s29 + $0x198] sm:$0xf] %v385_v38  ;;  %388 = vst [vmem:[%s8383_s29 + $0x19c] sm:$0xf] %v387_v39  ;;  %v389_v40 = vld [vmem:[%s8379_s28 + $0x680] sm:$0xf] }
  0x57   : > { %v391_v41 = vld [vmem:[%s8379_s28 + $0x690] sm:$0xf]  ;;  %v393_v42 = vld [vmem:[%s8379_s28 + $0x6a0] sm:$0xf]  ;;  %390 = vst [vmem:[%s8383_s29 + $0x1a0] sm:$0xf] %v389_v40 }
  0x58   : > { %392 = vst [vmem:[%s8383_s29 + $0x1a4] sm:$0xf] %v391_v41  ;;  %394 = vst [vmem:[%s8383_s29 + $0x1a8] sm:$0xf] %v393_v42  ;;  %v395_v43 = vld [vmem:[%s8379_s28 + $0x6b0] sm:$0xf] }
  0x59   : > { %v397_v44 = vld [vmem:[%s8379_s28 + $0x6c0] sm:$0xf]  ;;  %v399_v45 = vld [vmem:[%s8379_s28 + $0x6d0] sm:$0xf]  ;;  %396 = vst [vmem:[%s8383_s29 + $0x1ac] sm:$0xf] %v395_v43 }
  0x5a   : > { %398 = vst [vmem:[%s8383_s29 + $0x1b0] sm:$0xf] %v397_v44  ;;  %400 = vst [vmem:[%s8383_s29 + $0x1b4] sm:$0xf] %v399_v45  ;;  %v401_v46 = vld [vmem:[%s8379_s28 + $0x6e0] sm:$0xf] }
  0x5b   : > { %v403_v47 = vld [vmem:[%s8379_s28 + $0x6f0] sm:$0xf]  ;;  %v405_v48 = vld [vmem:[%s8379_s28 + $0x700] sm:$0xf]  ;;  %402 = vst [vmem:[%s8383_s29 + $0x1b8] sm:$0xf] %v401_v46 }
  0x5c   : > { %404 = vst [vmem:[%s8383_s29 + $0x1bc] sm:$0xf] %v403_v47  ;;  %406 = vst [vmem:[%s8383_s29 + $0x1c0] sm:$0xf] %v405_v48  ;;  %v407_v49 = vld [vmem:[%s8379_s28 + $0x710] sm:$0xf] }
  0x5d   : > { %v409_v50 = vld [vmem:[%s8379_s28 + $0x720] sm:$0xf]  ;;  %v411_v51 = vld [vmem:[%s8379_s28 + $0x730] sm:$0xf]  ;;  %408 = vst [vmem:[%s8383_s29 + $0x1c4] sm:$0xf] %v407_v49 }
  0x5e   : > { %410 = vst [vmem:[%s8383_s29 + $0x1c8] sm:$0xf] %v409_v50  ;;  %412 = vst [vmem:[%s8383_s29 + $0x1cc] sm:$0xf] %v411_v51  ;;  %v413_v52 = vld [vmem:[%s8379_s28 + $0x740] sm:$0xf] }
  0x5f   : > { %v415_v53 = vld [vmem:[%s8379_s28 + $0x750] sm:$0xf]  ;;  %v417_v54 = vld [vmem:[%s8379_s28 + $0x760] sm:$0xf]  ;;  %414 = vst [vmem:[%s8383_s29 + $0x1d0] sm:$0xf] %v413_v52 }
  0x60   : > { %416 = vst [vmem:[%s8383_s29 + $0x1d4] sm:$0xf] %v415_v53  ;;  %418 = vst [vmem:[%s8383_s29 + $0x1d8] sm:$0xf] %v417_v54  ;;  %v419_v55 = vld [vmem:[%s8379_s28 + $0x770] sm:$0xf] }
  0x61   : > { %v421_v56 = vld [vmem:[%s8379_s28 + $0x780] sm:$0xf]  ;;  %v423_v57 = vld [vmem:[%s8379_s28 + $0x790] sm:$0xf]  ;;  %420 = vst [vmem:[%s8383_s29 + $0x1dc] sm:$0xf] %v419_v55 }
  0x62   : > { %422 = vst [vmem:[%s8383_s29 + $0x1e0] sm:$0xf] %v421_v56  ;;  %424 = vst [vmem:[%s8383_s29 + $0x1e4] sm:$0xf] %v423_v57  ;;  %v425_v58 = vld [vmem:[%s8379_s28 + $0x7a0] sm:$0xf] }
  0x63   : > { %v427_v59 = vld [vmem:[%s8379_s28 + $0x7b0] sm:$0xf]  ;;  %v429_v60 = vld [vmem:[%s8379_s28 + $0x7c0] sm:$0xf]  ;;  %426 = vst [vmem:[%s8383_s29 + $0x1e8] sm:$0xf] %v425_v58 }
  0x64   : > { %428 = vst [vmem:[%s8383_s29 + $0x1ec] sm:$0xf] %v427_v59  ;;  %430 = vst [vmem:[%s8383_s29 + $0x1f0] sm:$0xf] %v429_v60  ;;  %v431_v61 = vld [vmem:[%s8379_s28 + $0x7d0] sm:$0xf] }
  0x65   : > { %v433_v62 = vld [vmem:[%s8379_s28 + $0x7e0] sm:$0xf]  ;;  %v435_v63 = vld [vmem:[%s8379_s28 + $0x7f0] sm:$0xf]  ;;  %432 = vst [vmem:[%s8383_s29 + $0x1f4] sm:$0xf] %v431_v61 }
  0x66   : > { %434 = vst [vmem:[%s8383_s29 + $0x1f8] sm:$0xf] %v433_v62  ;;  %436 = vst [vmem:[%s8383_s29 + $0x1fc] sm:$0xf] %v435_v63  ;;  %v437_v0 = vld [vmem:[%s8379_s28 + $0x800] sm:$0xf] }
  0x67   : > { %v439_v1 = vld [vmem:[%s8379_s28 + $0x810] sm:$0xf]  ;;  %v441_v2 = vld [vmem:[%s8379_s28 + $0x820] sm:$0xf]  ;;  %438 = vst [vmem:[%s8383_s29 + $0x200] sm:$0xf] %v437_v0 }
  0x68   : > { %440 = vst [vmem:[%s8383_s29 + $0x204] sm:$0xf] %v439_v1  ;;  %442 = vst [vmem:[%s8383_s29 + $0x208] sm:$0xf] %v441_v2  ;;  %v443_v3 = vld [vmem:[%s8379_s28 + $0x830] sm:$0xf] }
  0x69   : > { %v445_v4 = vld [vmem:[%s8379_s28 + $0x840] sm:$0xf]  ;;  %v447_v5 = vld [vmem:[%s8379_s28 + $0x850] sm:$0xf]  ;;  %444 = vst [vmem:[%s8383_s29 + $0x20c] sm:$0xf] %v443_v3 }
  0x6a   : > { %446 = vst [vmem:[%s8383_s29 + $0x210] sm:$0xf] %v445_v4  ;;  %448 = vst [vmem:[%s8383_s29 + $0x214] sm:$0xf] %v447_v5  ;;  %v449_v6 = vld [vmem:[%s8379_s28 + $0x860] sm:$0xf] }
  0x6b   : > { %v451_v7 = vld [vmem:[%s8379_s28 + $0x870] sm:$0xf]  ;;  %v453_v8 = vld [vmem:[%s8379_s28 + $0x880] sm:$0xf]  ;;  %450 = vst [vmem:[%s8383_s29 + $0x218] sm:$0xf] %v449_v6 }
  0x6c   : > { %452 = vst [vmem:[%s8383_s29 + $0x21c] sm:$0xf] %v451_v7  ;;  %454 = vst [vmem:[%s8383_s29 + $0x220] sm:$0xf] %v453_v8  ;;  %v455_v9 = vld [vmem:[%s8379_s28 + $0x890] sm:$0xf] }
  0x6d   : > { %v457_v10 = vld [vmem:[%s8379_s28 + $0x8a0] sm:$0xf]  ;;  %v459_v11 = vld [vmem:[%s8379_s28 + $0x8b0] sm:$0xf]  ;;  %456 = vst [vmem:[%s8383_s29 + $0x224] sm:$0xf] %v455_v9 }
  0x6e   : > { %458 = vst [vmem:[%s8383_s29 + $0x228] sm:$0xf] %v457_v10  ;;  %460 = vst [vmem:[%s8383_s29 + $0x22c] sm:$0xf] %v459_v11  ;;  %v461_v12 = vld [vmem:[%s8379_s28 + $0x8c0] sm:$0xf] }
  0x6f   : > { %v463_v13 = vld [vmem:[%s8379_s28 + $0x8d0] sm:$0xf]  ;;  %v465_v14 = vld [vmem:[%s8379_s28 + $0x8e0] sm:$0xf]  ;;  %462 = vst [vmem:[%s8383_s29 + $0x230] sm:$0xf] %v461_v12 }
  0x70   : > { %464 = vst [vmem:[%s8383_s29 + $0x234] sm:$0xf] %v463_v13  ;;  %466 = vst [vmem:[%s8383_s29 + $0x238] sm:$0xf] %v465_v14  ;;  %v467_v15 = vld [vmem:[%s8379_s28 + $0x8f0] sm:$0xf] }
  0x71   : > { %v469_v16 = vld [vmem:[%s8379_s28 + $0x900] sm:$0xf]  ;;  %v471_v17 = vld [vmem:[%s8379_s28 + $0x910] sm:$0xf]  ;;  %468 = vst [vmem:[%s8383_s29 + $0x23c] sm:$0xf] %v467_v15 }
  0x72   : > { %470 = vst [vmem:[%s8383_s29 + $0x240] sm:$0xf] %v469_v16  ;;  %472 = vst [vmem:[%s8383_s29 + $0x244] sm:$0xf] %v471_v17  ;;  %v473_v18 = vld [vmem:[%s8379_s28 + $0x920] sm:$0xf] }
  0x73   : > { %v475_v19 = vld [vmem:[%s8379_s28 + $0x930] sm:$0xf]  ;;  %v477_v20 = vld [vmem:[%s8379_s28 + $0x940] sm:$0xf]  ;;  %474 = vst [vmem:[%s8383_s29 + $0x248] sm:$0xf] %v473_v18 }
  0x74   : > { %476 = vst [vmem:[%s8383_s29 + $0x24c] sm:$0xf] %v475_v19  ;;  %478 = vst [vmem:[%s8383_s29 + $0x250] sm:$0xf] %v477_v20  ;;  %v479_v21 = vld [vmem:[%s8379_s28 + $0x950] sm:$0xf] }
  0x75   : > { %v481_v22 = vld [vmem:[%s8379_s28 + $0x960] sm:$0xf]  ;;  %v483_v23 = vld [vmem:[%s8379_s28 + $0x970] sm:$0xf]  ;;  %480 = vst [vmem:[%s8383_s29 + $0x254] sm:$0xf] %v479_v21 }
  0x76   : > { %482 = vst [vmem:[%s8383_s29 + $0x258] sm:$0xf] %v481_v22  ;;  %484 = vst [vmem:[%s8383_s29 + $0x25c] sm:$0xf] %v483_v23  ;;  %v485_v24 = vld [vmem:[%s8379_s28 + $0x980] sm:$0xf] }
  0x77   : > { %v487_v25 = vld [vmem:[%s8379_s28 + $0x990] sm:$0xf]  ;;  %v489_v26 = vld [vmem:[%s8379_s28 + $0x9a0] sm:$0xf]  ;;  %486 = vst [vmem:[%s8383_s29 + $0x260] sm:$0xf] %v485_v24 }
  0x78   : > { %488 = vst [vmem:[%s8383_s29 + $0x264] sm:$0xf] %v487_v25  ;;  %490 = vst [vmem:[%s8383_s29 + $0x268] sm:$0xf] %v489_v26  ;;  %v491_v27 = vld [vmem:[%s8379_s28 + $0x9b0] sm:$0xf] }
  0x79   : > { %v493_v28 = vld [vmem:[%s8379_s28 + $0x9c0] sm:$0xf]  ;;  %v495_v29 = vld [vmem:[%s8379_s28 + $0x9d0] sm:$0xf]  ;;  %492 = vst [vmem:[%s8383_s29 + $0x26c] sm:$0xf] %v491_v27 }
  0x7a   : > { %494 = vst [vmem:[%s8383_s29 + $0x270] sm:$0xf] %v493_v28  ;;  %496 = vst [vmem:[%s8383_s29 + $0x274] sm:$0xf] %v495_v29  ;;  %v497_v30 = vld [vmem:[%s8379_s28 + $0x9e0] sm:$0xf] }
  0x7b   : > { %v499_v31 = vld [vmem:[%s8379_s28 + $0x9f0] sm:$0xf]  ;;  %v501_v32 = vld [vmem:[%s8379_s28 + $0xa00] sm:$0xf]  ;;  %498 = vst [vmem:[%s8383_s29 + $0x278] sm:$0xf] %v497_v30 }
  0x7c   : > { %500 = vst [vmem:[%s8383_s29 + $0x27c] sm:$0xf] %v499_v31  ;;  %502 = vst [vmem:[%s8383_s29 + $0x280] sm:$0xf] %v501_v32  ;;  %v503_v33 = vld [vmem:[%s8379_s28 + $0xa10] sm:$0xf] }
  0x7d   : > { %v505_v34 = vld [vmem:[%s8379_s28 + $0xa20] sm:$0xf]  ;;  %v507_v35 = vld [vmem:[%s8379_s28 + $0xa30] sm:$0xf]  ;;  %504 = vst [vmem:[%s8383_s29 + $0x284] sm:$0xf] %v503_v33 }
  0x7e   : > { %506 = vst [vmem:[%s8383_s29 + $0x288] sm:$0xf] %v505_v34  ;;  %508 = vst [vmem:[%s8383_s29 + $0x28c] sm:$0xf] %v507_v35  ;;  %v509_v36 = vld [vmem:[%s8379_s28 + $0xa40] sm:$0xf] }
  0x7f   : > { %v511_v37 = vld [vmem:[%s8379_s28 + $0xa50] sm:$0xf]  ;;  %v513_v38 = vld [vmem:[%s8379_s28 + $0xa60] sm:$0xf]  ;;  %510 = vst [vmem:[%s8383_s29 + $0x290] sm:$0xf] %v509_v36 }
  0x80   : > { %512 = vst [vmem:[%s8383_s29 + $0x294] sm:$0xf] %v511_v37  ;;  %514 = vst [vmem:[%s8383_s29 + $0x298] sm:$0xf] %v513_v38  ;;  %v515_v39 = vld [vmem:[%s8379_s28 + $0xa70] sm:$0xf] }
  0x81   : > { %v517_v40 = vld [vmem:[%s8379_s28 + $0xa80] sm:$0xf]  ;;  %v519_v41 = vld [vmem:[%s8379_s28 + $0xa90] sm:$0xf]  ;;  %516 = vst [vmem:[%s8383_s29 + $0x29c] sm:$0xf] %v515_v39 }
  0x82   : > { %518 = vst [vmem:[%s8383_s29 + $0x2a0] sm:$0xf] %v517_v40  ;;  %520 = vst [vmem:[%s8383_s29 + $0x2a4] sm:$0xf] %v519_v41  ;;  %v521_v42 = vld [vmem:[%s8379_s28 + $0xaa0] sm:$0xf] }
  0x83   : > { %v523_v43 = vld [vmem:[%s8379_s28 + $0xab0] sm:$0xf]  ;;  %v525_v44 = vld [vmem:[%s8379_s28 + $0xac0] sm:$0xf]  ;;  %522 = vst [vmem:[%s8383_s29 + $0x2a8] sm:$0xf] %v521_v42 }
  0x84   : > { %524 = vst [vmem:[%s8383_s29 + $0x2ac] sm:$0xf] %v523_v43  ;;  %526 = vst [vmem:[%s8383_s29 + $0x2b0] sm:$0xf] %v525_v44  ;;  %v527_v45 = vld [vmem:[%s8379_s28 + $0xad0] sm:$0xf] }
  0x85   : > { %v529_v46 = vld [vmem:[%s8379_s28 + $0xae0] sm:$0xf]  ;;  %v531_v47 = vld [vmem:[%s8379_s28 + $0xaf0] sm:$0xf]  ;;  %528 = vst [vmem:[%s8383_s29 + $0x2b4] sm:$0xf] %v527_v45 }
  0x86   : > { %530 = vst [vmem:[%s8383_s29 + $0x2b8] sm:$0xf] %v529_v46  ;;  %532 = vst [vmem:[%s8383_s29 + $0x2bc] sm:$0xf] %v531_v47  ;;  %v533_v48 = vld [vmem:[%s8379_s28 + $0xb00] sm:$0xf] }
  0x87   : > { %v535_v49 = vld [vmem:[%s8379_s28 + $0xb10] sm:$0xf]  ;;  %v537_v50 = vld [vmem:[%s8379_s28 + $0xb20] sm:$0xf]  ;;  %534 = vst [vmem:[%s8383_s29 + $0x2c0] sm:$0xf] %v533_v48 }
  0x88   : > { %536 = vst [vmem:[%s8383_s29 + $0x2c4] sm:$0xf] %v535_v49  ;;  %538 = vst [vmem:[%s8383_s29 + $0x2c8] sm:$0xf] %v537_v50  ;;  %v539_v51 = vld [vmem:[%s8379_s28 + $0xb30] sm:$0xf] }
  0x89   : > { %v541_v52 = vld [vmem:[%s8379_s28 + $0xb40] sm:$0xf]  ;;  %v543_v53 = vld [vmem:[%s8379_s28 + $0xb50] sm:$0xf]  ;;  %540 = vst [vmem:[%s8383_s29 + $0x2cc] sm:$0xf] %v539_v51 }
  0x8a   : > { %542 = vst [vmem:[%s8383_s29 + $0x2d0] sm:$0xf] %v541_v52  ;;  %544 = vst [vmem:[%s8383_s29 + $0x2d4] sm:$0xf] %v543_v53  ;;  %v545_v54 = vld [vmem:[%s8379_s28 + $0xb60] sm:$0xf] }
  0x8b   : > { %v547_v55 = vld [vmem:[%s8379_s28 + $0xb70] sm:$0xf]  ;;  %v549_v56 = vld [vmem:[%s8379_s28 + $0xb80] sm:$0xf]  ;;  %546 = vst [vmem:[%s8383_s29 + $0x2d8] sm:$0xf] %v545_v54 }
  0x8c   : > { %548 = vst [vmem:[%s8383_s29 + $0x2dc] sm:$0xf] %v547_v55  ;;  %550 = vst [vmem:[%s8383_s29 + $0x2e0] sm:$0xf] %v549_v56  ;;  %v551_v57 = vld [vmem:[%s8379_s28 + $0xb90] sm:$0xf] }
  0x8d   : > { %v553_v58 = vld [vmem:[%s8379_s28 + $0xba0] sm:$0xf]  ;;  %v555_v59 = vld [vmem:[%s8379_s28 + $0xbb0] sm:$0xf]  ;;  %552 = vst [vmem:[%s8383_s29 + $0x2e4] sm:$0xf] %v551_v57 }
  0x8e   : > { %554 = vst [vmem:[%s8383_s29 + $0x2e8] sm:$0xf] %v553_v58  ;;  %556 = vst [vmem:[%s8383_s29 + $0x2ec] sm:$0xf] %v555_v59  ;;  %v557_v60 = vld [vmem:[%s8379_s28 + $0xbc0] sm:$0xf] }
  0x8f   : > { %v559_v61 = vld [vmem:[%s8379_s28 + $0xbd0] sm:$0xf]  ;;  %v561_v62 = vld [vmem:[%s8379_s28 + $0xbe0] sm:$0xf]  ;;  %558 = vst [vmem:[%s8383_s29 + $0x2f0] sm:$0xf] %v557_v60 }
  0x90   : > { %560 = vst [vmem:[%s8383_s29 + $0x2f4] sm:$0xf] %v559_v61  ;;  %562 = vst [vmem:[%s8383_s29 + $0x2f8] sm:$0xf] %v561_v62  ;;  %v563_v63 = vld [vmem:[%s8379_s28 + $0xbf0] sm:$0xf] }
  0x91   : > { %v565_v0 = vld [vmem:[%s8379_s28 + $0xc00] sm:$0xf]  ;;  %v567_v1 = vld [vmem:[%s8379_s28 + $0xc10] sm:$0xf]  ;;  %564 = vst [vmem:[%s8383_s29 + $0x2fc] sm:$0xf] %v563_v63 }
  0x92   : > { %566 = vst [vmem:[%s8383_s29 + $0x300] sm:$0xf] %v565_v0  ;;  %568 = vst [vmem:[%s8383_s29 + $0x304] sm:$0xf] %v567_v1  ;;  %v569_v2 = vld [vmem:[%s8379_s28 + $0xc20] sm:$0xf] }
  0x93   : > { %v571_v3 = vld [vmem:[%s8379_s28 + $0xc30] sm:$0xf]  ;;  %v573_v4 = vld [vmem:[%s8379_s28 + $0xc40] sm:$0xf]  ;;  %570 = vst [vmem:[%s8383_s29 + $0x308] sm:$0xf] %v569_v2 }
  0x94   : > { %572 = vst [vmem:[%s8383_s29 + $0x30c] sm:$0xf] %v571_v3  ;;  %574 = vst [vmem:[%s8383_s29 + $0x310] sm:$0xf] %v573_v4  ;;  %v575_v5 = vld [vmem:[%s8379_s28 + $0xc50] sm:$0xf] }
  0x95   : > { %v577_v6 = vld [vmem:[%s8379_s28 + $0xc60] sm:$0xf]  ;;  %v579_v7 = vld [vmem:[%s8379_s28 + $0xc70] sm:$0xf]  ;;  %576 = vst [vmem:[%s8383_s29 + $0x314] sm:$0xf] %v575_v5 }
  0x96   : > { %578 = vst [vmem:[%s8383_s29 + $0x318] sm:$0xf] %v577_v6  ;;  %580 = vst [vmem:[%s8383_s29 + $0x31c] sm:$0xf] %v579_v7  ;;  %v581_v8 = vld [vmem:[%s8379_s28 + $0xc80] sm:$0xf] }
  0x97   : > { %v583_v9 = vld [vmem:[%s8379_s28 + $0xc90] sm:$0xf]  ;;  %v585_v10 = vld [vmem:[%s8379_s28 + $0xca0] sm:$0xf]  ;;  %582 = vst [vmem:[%s8383_s29 + $0x320] sm:$0xf] %v581_v8 }
  0x98   : > { %584 = vst [vmem:[%s8383_s29 + $0x324] sm:$0xf] %v583_v9  ;;  %586 = vst [vmem:[%s8383_s29 + $0x328] sm:$0xf] %v585_v10  ;;  %v587_v11 = vld [vmem:[%s8379_s28 + $0xcb0] sm:$0xf] }
  0x99   : > { %v589_v12 = vld [vmem:[%s8379_s28 + $0xcc0] sm:$0xf]  ;;  %v591_v13 = vld [vmem:[%s8379_s28 + $0xcd0] sm:$0xf]  ;;  %588 = vst [vmem:[%s8383_s29 + $0x32c] sm:$0xf] %v587_v11 }
  0x9a   : > { %590 = vst [vmem:[%s8383_s29 + $0x330] sm:$0xf] %v589_v12  ;;  %592 = vst [vmem:[%s8383_s29 + $0x334] sm:$0xf] %v591_v13  ;;  %v593_v14 = vld [vmem:[%s8379_s28 + $0xce0] sm:$0xf] }
  0x9b   : > { %v595_v15 = vld [vmem:[%s8379_s28 + $0xcf0] sm:$0xf]  ;;  %v597_v16 = vld [vmem:[%s8379_s28 + $0xd00] sm:$0xf]  ;;  %594 = vst [vmem:[%s8383_s29 + $0x338] sm:$0xf] %v593_v14 }
  0x9c   : > { %596 = vst [vmem:[%s8383_s29 + $0x33c] sm:$0xf] %v595_v15  ;;  %598 = vst [vmem:[%s8383_s29 + $0x340] sm:$0xf] %v597_v16  ;;  %v599_v17 = vld [vmem:[%s8379_s28 + $0xd10] sm:$0xf] }
  0x9d   : > { %v601_v18 = vld [vmem:[%s8379_s28 + $0xd20] sm:$0xf]  ;;  %v603_v19 = vld [vmem:[%s8379_s28 + $0xd30] sm:$0xf]  ;;  %600 = vst [vmem:[%s8383_s29 + $0x344] sm:$0xf] %v599_v17 }
  0x9e   : > { %602 = vst [vmem:[%s8383_s29 + $0x348] sm:$0xf] %v601_v18  ;;  %604 = vst [vmem:[%s8383_s29 + $0x34c] sm:$0xf] %v603_v19  ;;  %v605_v20 = vld [vmem:[%s8379_s28 + $0xd40] sm:$0xf] }
  0x9f   : > { %v607_v21 = vld [vmem:[%s8379_s28 + $0xd50] sm:$0xf]  ;;  %v609_v22 = vld [vmem:[%s8379_s28 + $0xd60] sm:$0xf]  ;;  %606 = vst [vmem:[%s8383_s29 + $0x350] sm:$0xf] %v605_v20 }
  0xa0   : > { %608 = vst [vmem:[%s8383_s29 + $0x354] sm:$0xf] %v607_v21  ;;  %610 = vst [vmem:[%s8383_s29 + $0x358] sm:$0xf] %v609_v22  ;;  %v611_v23 = vld [vmem:[%s8379_s28 + $0xd70] sm:$0xf] }
  0xa1   : > { %v613_v24 = vld [vmem:[%s8379_s28 + $0xd80] sm:$0xf]  ;;  %v615_v25 = vld [vmem:[%s8379_s28 + $0xd90] sm:$0xf]  ;;  %612 = vst [vmem:[%s8383_s29 + $0x35c] sm:$0xf] %v611_v23 }
  0xa2   : > { %614 = vst [vmem:[%s8383_s29 + $0x360] sm:$0xf] %v613_v24  ;;  %616 = vst [vmem:[%s8383_s29 + $0x364] sm:$0xf] %v615_v25  ;;  %v617_v26 = vld [vmem:[%s8379_s28 + $0xda0] sm:$0xf] }
  0xa3   : > { %v619_v27 = vld [vmem:[%s8379_s28 + $0xdb0] sm:$0xf]  ;;  %v621_v28 = vld [vmem:[%s8379_s28 + $0xdc0] sm:$0xf]  ;;  %618 = vst [vmem:[%s8383_s29 + $0x368] sm:$0xf] %v617_v26 }
  0xa4   : > { %620 = vst [vmem:[%s8383_s29 + $0x36c] sm:$0xf] %v619_v27  ;;  %622 = vst [vmem:[%s8383_s29 + $0x370] sm:$0xf] %v621_v28  ;;  %v623_v29 = vld [vmem:[%s8379_s28 + $0xdd0] sm:$0xf] }
  0xa5   : > { %v625_v30 = vld [vmem:[%s8379_s28 + $0xde0] sm:$0xf]  ;;  %v627_v31 = vld [vmem:[%s8379_s28 + $0xdf0] sm:$0xf]  ;;  %624 = vst [vmem:[%s8383_s29 + $0x374] sm:$0xf] %v623_v29 }
  0xa6   : > { %626 = vst [vmem:[%s8383_s29 + $0x378] sm:$0xf] %v625_v30  ;;  %628 = vst [vmem:[%s8383_s29 + $0x37c] sm:$0xf] %v627_v31  ;;  %v629_v32 = vld [vmem:[%s8379_s28 + $0xe00] sm:$0xf] }
  0xa7   : > { %v631_v33 = vld [vmem:[%s8379_s28 + $0xe10] sm:$0xf]  ;;  %v633_v34 = vld [vmem:[%s8379_s28 + $0xe20] sm:$0xf]  ;;  %630 = vst [vmem:[%s8383_s29 + $0x380] sm:$0xf] %v629_v32 }
  0xa8   : > { %632 = vst [vmem:[%s8383_s29 + $0x384] sm:$0xf] %v631_v33  ;;  %634 = vst [vmem:[%s8383_s29 + $0x388] sm:$0xf] %v633_v34  ;;  %v635_v35 = vld [vmem:[%s8379_s28 + $0xe30] sm:$0xf] }
  0xa9   : > { %v637_v36 = vld [vmem:[%s8379_s28 + $0xe40] sm:$0xf]  ;;  %v639_v37 = vld [vmem:[%s8379_s28 + $0xe50] sm:$0xf]  ;;  %636 = vst [vmem:[%s8383_s29 + $0x38c] sm:$0xf] %v635_v35 }
  0xaa   : > { %638 = vst [vmem:[%s8383_s29 + $0x390] sm:$0xf] %v637_v36  ;;  %640 = vst [vmem:[%s8383_s29 + $0x394] sm:$0xf] %v639_v37  ;;  %v641_v38 = vld [vmem:[%s8379_s28 + $0xe60] sm:$0xf] }
  0xab   : > { %v643_v39 = vld [vmem:[%s8379_s28 + $0xe70] sm:$0xf]  ;;  %v645_v40 = vld [vmem:[%s8379_s28 + $0xe80] sm:$0xf]  ;;  %642 = vst [vmem:[%s8383_s29 + $0x398] sm:$0xf] %v641_v38 }
  0xac   : > { %644 = vst [vmem:[%s8383_s29 + $0x39c] sm:$0xf] %v643_v39  ;;  %646 = vst [vmem:[%s8383_s29 + $0x3a0] sm:$0xf] %v645_v40  ;;  %v647_v41 = vld [vmem:[%s8379_s28 + $0xe90] sm:$0xf] }
  0xad   : > { %v649_v42 = vld [vmem:[%s8379_s28 + $0xea0] sm:$0xf]  ;;  %v651_v43 = vld [vmem:[%s8379_s28 + $0xeb0] sm:$0xf]  ;;  %648 = vst [vmem:[%s8383_s29 + $0x3a4] sm:$0xf] %v647_v41 }
  0xae   : > { %650 = vst [vmem:[%s8383_s29 + $0x3a8] sm:$0xf] %v649_v42  ;;  %652 = vst [vmem:[%s8383_s29 + $0x3ac] sm:$0xf] %v651_v43  ;;  %v653_v44 = vld [vmem:[%s8379_s28 + $0xec0] sm:$0xf] }
  0xaf   : > { %v655_v45 = vld [vmem:[%s8379_s28 + $0xed0] sm:$0xf]  ;;  %v657_v46 = vld [vmem:[%s8379_s28 + $0xee0] sm:$0xf]  ;;  %654 = vst [vmem:[%s8383_s29 + $0x3b0] sm:$0xf] %v653_v44 }
  0xb0   : > { %656 = vst [vmem:[%s8383_s29 + $0x3b4] sm:$0xf] %v655_v45  ;;  %658 = vst [vmem:[%s8383_s29 + $0x3b8] sm:$0xf] %v657_v46  ;;  %v659_v47 = vld [vmem:[%s8379_s28 + $0xef0] sm:$0xf] }
  0xb1   : > { %v661_v48 = vld [vmem:[%s8379_s28 + $0xf00] sm:$0xf]  ;;  %v663_v49 = vld [vmem:[%s8379_s28 + $0xf10] sm:$0xf]  ;;  %660 = vst [vmem:[%s8383_s29 + $0x3bc] sm:$0xf] %v659_v47 }
  0xb2   : > { %662 = vst [vmem:[%s8383_s29 + $0x3c0] sm:$0xf] %v661_v48  ;;  %664 = vst [vmem:[%s8383_s29 + $0x3c4] sm:$0xf] %v663_v49  ;;  %v665_v50 = vld [vmem:[%s8379_s28 + $0xf20] sm:$0xf] }
  0xb3   : > { %v667_v51 = vld [vmem:[%s8379_s28 + $0xf30] sm:$0xf]  ;;  %v669_v52 = vld [vmem:[%s8379_s28 + $0xf40] sm:$0xf]  ;;  %666 = vst [vmem:[%s8383_s29 + $0x3c8] sm:$0xf] %v665_v50 }
  0xb4   : > { %668 = vst [vmem:[%s8383_s29 + $0x3cc] sm:$0xf] %v667_v51  ;;  %670 = vst [vmem:[%s8383_s29 + $0x3d0] sm:$0xf] %v669_v52  ;;  %v671_v53 = vld [vmem:[%s8379_s28 + $0xf50] sm:$0xf] }
  0xb5   : > { %v673_v54 = vld [vmem:[%s8379_s28 + $0xf60] sm:$0xf]  ;;  %v675_v55 = vld [vmem:[%s8379_s28 + $0xf70] sm:$0xf]  ;;  %672 = vst [vmem:[%s8383_s29 + $0x3d4] sm:$0xf] %v671_v53 }
  0xb6   : > { %674 = vst [vmem:[%s8383_s29 + $0x3d8] sm:$0xf] %v673_v54  ;;  %676 = vst [vmem:[%s8383_s29 + $0x3dc] sm:$0xf] %v675_v55  ;;  %v677_v56 = vld [vmem:[%s8379_s28 + $0xf80] sm:$0xf] }
  0xb7   : > { %v679_v57 = vld [vmem:[%s8379_s28 + $0xf90] sm:$0xf]  ;;  %v681_v58 = vld [vmem:[%s8379_s28 + $0xfa0] sm:$0xf]  ;;  %678 = vst [vmem:[%s8383_s29 + $0x3e0] sm:$0xf] %v677_v56 }
  0xb8   : > { %680 = vst [vmem:[%s8383_s29 + $0x3e4] sm:$0xf] %v679_v57  ;;  %682 = vst [vmem:[%s8383_s29 + $0x3e8] sm:$0xf] %v681_v58  ;;  %v683_v59 = vld [vmem:[%s8379_s28 + $0xfb0] sm:$0xf] }
  0xb9   : > { %v685_v60 = vld [vmem:[%s8379_s28 + $0xfc0] sm:$0xf]  ;;  %v687_v61 = vld [vmem:[%s8379_s28 + $0xfd0] sm:$0xf]  ;;  %684 = vst [vmem:[%s8383_s29 + $0x3ec] sm:$0xf] %v683_v59 }
  0xba   : > { %686 = vst [vmem:[%s8383_s29 + $0x3f0] sm:$0xf] %v685_v60  ;;  %688 = vst [vmem:[%s8383_s29 + $0x3f4] sm:$0xf] %v687_v61  ;;  %v689_v62 = vld [vmem:[%s8379_s28 + $0xfe0] sm:$0xf] }
  0xbb   : > { %v691_v63 = vld [vmem:[%s8379_s28 + $0xff0] sm:$0xf]  ;;  %v693_v0 = vld [vmem:[%s8379_s28 + $0x1000] sm:$0xf]  ;;  %690 = vst [vmem:[%s8383_s29 + $0x3f8] sm:$0xf] %v689_v62 }
  0xbc   : > { %692 = vst [vmem:[%s8383_s29 + $0x3fc] sm:$0xf] %v691_v63  ;;  %694 = vst [vmem:[%s8383_s29 + $0x400] sm:$0xf] %v693_v0  ;;  %v695_v1 = vld [vmem:[%s8379_s28 + $0x1010] sm:$0xf] }
  0xbd   : > { %v697_v2 = vld [vmem:[%s8379_s28 + $0x1020] sm:$0xf]  ;;  %v699_v3 = vld [vmem:[%s8379_s28 + $0x1030] sm:$0xf]  ;;  %696 = vst [vmem:[%s8383_s29 + $0x404] sm:$0xf] %v695_v1 }
  0xbe   : > { %698 = vst [vmem:[%s8383_s29 + $0x408] sm:$0xf] %v697_v2  ;;  %700 = vst [vmem:[%s8383_s29 + $0x40c] sm:$0xf] %v699_v3  ;;  %v701_v4 = vld [vmem:[%s8379_s28 + $0x1040] sm:$0xf] }
  0xbf   : > { %v703_v5 = vld [vmem:[%s8379_s28 + $0x1050] sm:$0xf]  ;;  %v705_v6 = vld [vmem:[%s8379_s28 + $0x1060] sm:$0xf]  ;;  %702 = vst [vmem:[%s8383_s29 + $0x410] sm:$0xf] %v701_v4 }
  0xc0   : > { %704 = vst [vmem:[%s8383_s29 + $0x414] sm:$0xf] %v703_v5  ;;  %706 = vst [vmem:[%s8383_s29 + $0x418] sm:$0xf] %v705_v6  ;;  %v707_v7 = vld [vmem:[%s8379_s28 + $0x1070] sm:$0xf] }
  0xc1   : > { %v709_v8 = vld [vmem:[%s8379_s28 + $0x1080] sm:$0xf]  ;;  %v711_v9 = vld [vmem:[%s8379_s28 + $0x1090] sm:$0xf]  ;;  %708 = vst [vmem:[%s8383_s29 + $0x41c] sm:$0xf] %v707_v7 }
  0xc2   : > { %710 = vst [vmem:[%s8383_s29 + $0x420] sm:$0xf] %v709_v8  ;;  %712 = vst [vmem:[%s8383_s29 + $0x424] sm:$0xf] %v711_v9  ;;  %v713_v10 = vld [vmem:[%s8379_s28 + $0x10a0] sm:$0xf] }
  0xc3   : > { %v715_v11 = vld [vmem:[%s8379_s28 + $0x10b0] sm:$0xf]  ;;  %v717_v12 = vld [vmem:[%s8379_s28 + $0x10c0] sm:$0xf]  ;;  %714 = vst [vmem:[%s8383_s29 + $0x428] sm:$0xf] %v713_v10 }
  0xc4   : > { %716 = vst [vmem:[%s8383_s29 + $0x42c] sm:$0xf] %v715_v11  ;;  %718 = vst [vmem:[%s8383_s29 + $0x430] sm:$0xf] %v717_v12  ;;  %v719_v13 = vld [vmem:[%s8379_s28 + $0x10d0] sm:$0xf] }
  0xc5   : > { %v721_v14 = vld [vmem:[%s8379_s28 + $0x10e0] sm:$0xf]  ;;  %v723_v15 = vld [vmem:[%s8379_s28 + $0x10f0] sm:$0xf]  ;;  %720 = vst [vmem:[%s8383_s29 + $0x434] sm:$0xf] %v719_v13 }
  0xc6   : > { %722 = vst [vmem:[%s8383_s29 + $0x438] sm:$0xf] %v721_v14  ;;  %724 = vst [vmem:[%s8383_s29 + $0x43c] sm:$0xf] %v723_v15  ;;  %v725_v16 = vld [vmem:[%s8379_s28 + $0x1100] sm:$0xf] }
  0xc7   : > { %v727_v17 = vld [vmem:[%s8379_s28 + $0x1110] sm:$0xf]  ;;  %v729_v18 = vld [vmem:[%s8379_s28 + $0x1120] sm:$0xf]  ;;  %726 = vst [vmem:[%s8383_s29 + $0x440] sm:$0xf] %v725_v16 }
  0xc8   : > { %728 = vst [vmem:[%s8383_s29 + $0x444] sm:$0xf] %v727_v17  ;;  %730 = vst [vmem:[%s8383_s29 + $0x448] sm:$0xf] %v729_v18  ;;  %v731_v19 = vld [vmem:[%s8379_s28 + $0x1130] sm:$0xf] }
  0xc9   : > { %v733_v20 = vld [vmem:[%s8379_s28 + $0x1140] sm:$0xf]  ;;  %v735_v21 = vld [vmem:[%s8379_s28 + $0x1150] sm:$0xf]  ;;  %732 = vst [vmem:[%s8383_s29 + $0x44c] sm:$0xf] %v731_v19 }
  0xca   : > { %734 = vst [vmem:[%s8383_s29 + $0x450] sm:$0xf] %v733_v20  ;;  %736 = vst [vmem:[%s8383_s29 + $0x454] sm:$0xf] %v735_v21  ;;  %v737_v22 = vld [vmem:[%s8379_s28 + $0x1160] sm:$0xf] }
  0xcb   : > { %v739_v23 = vld [vmem:[%s8379_s28 + $0x1170] sm:$0xf]  ;;  %v741_v24 = vld [vmem:[%s8379_s28 + $0x1180] sm:$0xf]  ;;  %738 = vst [vmem:[%s8383_s29 + $0x458] sm:$0xf] %v737_v22 }
  0xcc   : > { %740 = vst [vmem:[%s8383_s29 + $0x45c] sm:$0xf] %v739_v23  ;;  %742 = vst [vmem:[%s8383_s29 + $0x460] sm:$0xf] %v741_v24  ;;  %v743_v25 = vld [vmem:[%s8379_s28 + $0x1190] sm:$0xf] }
  0xcd   : > { %v745_v26 = vld [vmem:[%s8379_s28 + $0x11a0] sm:$0xf]  ;;  %v747_v27 = vld [vmem:[%s8379_s28 + $0x11b0] sm:$0xf]  ;;  %744 = vst [vmem:[%s8383_s29 + $0x464] sm:$0xf] %v743_v25 }
  0xce   : > { %746 = vst [vmem:[%s8383_s29 + $0x468] sm:$0xf] %v745_v26  ;;  %748 = vst [vmem:[%s8383_s29 + $0x46c] sm:$0xf] %v747_v27  ;;  %v749_v28 = vld [vmem:[%s8379_s28 + $0x11c0] sm:$0xf] }
  0xcf   : > { %v751_v29 = vld [vmem:[%s8379_s28 + $0x11d0] sm:$0xf]  ;;  %v753_v30 = vld [vmem:[%s8379_s28 + $0x11e0] sm:$0xf]  ;;  %750 = vst [vmem:[%s8383_s29 + $0x470] sm:$0xf] %v749_v28 }
  0xd0   : > { %752 = vst [vmem:[%s8383_s29 + $0x474] sm:$0xf] %v751_v29  ;;  %754 = vst [vmem:[%s8383_s29 + $0x478] sm:$0xf] %v753_v30  ;;  %v755_v31 = vld [vmem:[%s8379_s28 + $0x11f0] sm:$0xf] }
  0xd1   : > { %v757_v32 = vld [vmem:[%s8379_s28 + $0x1200] sm:$0xf]  ;;  %v759_v33 = vld [vmem:[%s8379_s28 + $0x1210] sm:$0xf]  ;;  %756 = vst [vmem:[%s8383_s29 + $0x47c] sm:$0xf] %v755_v31 }
  0xd2   : > { %758 = vst [vmem:[%s8383_s29 + $0x480] sm:$0xf] %v757_v32  ;;  %760 = vst [vmem:[%s8383_s29 + $0x484] sm:$0xf] %v759_v33  ;;  %v761_v34 = vld [vmem:[%s8379_s28 + $0x1220] sm:$0xf] }
  0xd3   : > { %v763_v35 = vld [vmem:[%s8379_s28 + $0x1230] sm:$0xf]  ;;  %v765_v36 = vld [vmem:[%s8379_s28 + $0x1240] sm:$0xf]  ;;  %762 = vst [vmem:[%s8383_s29 + $0x488] sm:$0xf] %v761_v34 }
  0xd4   : > { %764 = vst [vmem:[%s8383_s29 + $0x48c] sm:$0xf] %v763_v35  ;;  %766 = vst [vmem:[%s8383_s29 + $0x490] sm:$0xf] %v765_v36  ;;  %v767_v37 = vld [vmem:[%s8379_s28 + $0x1250] sm:$0xf] }
  0xd5   : > { %v769_v38 = vld [vmem:[%s8379_s28 + $0x1260] sm:$0xf]  ;;  %v771_v39 = vld [vmem:[%s8379_s28 + $0x1270] sm:$0xf]  ;;  %768 = vst [vmem:[%s8383_s29 + $0x494] sm:$0xf] %v767_v37 }
  0xd6   : > { %770 = vst [vmem:[%s8383_s29 + $0x498] sm:$0xf] %v769_v38  ;;  %772 = vst [vmem:[%s8383_s29 + $0x49c] sm:$0xf] %v771_v39  ;;  %v773_v40 = vld [vmem:[%s8379_s28 + $0x1280] sm:$0xf] }
  0xd7   : > { %v775_v41 = vld [vmem:[%s8379_s28 + $0x1290] sm:$0xf]  ;;  %v777_v42 = vld [vmem:[%s8379_s28 + $0x12a0] sm:$0xf]  ;;  %774 = vst [vmem:[%s8383_s29 + $0x4a0] sm:$0xf] %v773_v40 }
  0xd8   : > { %776 = vst [vmem:[%s8383_s29 + $0x4a4] sm:$0xf] %v775_v41  ;;  %778 = vst [vmem:[%s8383_s29 + $0x4a8] sm:$0xf] %v777_v42  ;;  %v779_v43 = vld [vmem:[%s8379_s28 + $0x12b0] sm:$0xf] }
  0xd9   : > { %v781_v44 = vld [vmem:[%s8379_s28 + $0x12c0] sm:$0xf]  ;;  %v783_v45 = vld [vmem:[%s8379_s28 + $0x12d0] sm:$0xf]  ;;  %780 = vst [vmem:[%s8383_s29 + $0x4ac] sm:$0xf] %v779_v43 }
  0xda   : > { %782 = vst [vmem:[%s8383_s29 + $0x4b0] sm:$0xf] %v781_v44  ;;  %784 = vst [vmem:[%s8383_s29 + $0x4b4] sm:$0xf] %v783_v45  ;;  %v785_v46 = vld [vmem:[%s8379_s28 + $0x12e0] sm:$0xf] }
  0xdb   : > { %v787_v47 = vld [vmem:[%s8379_s28 + $0x12f0] sm:$0xf]  ;;  %v789_v48 = vld [vmem:[%s8379_s28 + $0x1300] sm:$0xf]  ;;  %786 = vst [vmem:[%s8383_s29 + $0x4b8] sm:$0xf] %v785_v46 }
  0xdc   : > { %788 = vst [vmem:[%s8383_s29 + $0x4bc] sm:$0xf] %v787_v47  ;;  %790 = vst [vmem:[%s8383_s29 + $0x4c0] sm:$0xf] %v789_v48  ;;  %v791_v49 = vld [vmem:[%s8379_s28 + $0x1310] sm:$0xf] }
  0xdd   : > { %v793_v50 = vld [vmem:[%s8379_s28 + $0x1320] sm:$0xf]  ;;  %v795_v51 = vld [vmem:[%s8379_s28 + $0x1330] sm:$0xf]  ;;  %792 = vst [vmem:[%s8383_s29 + $0x4c4] sm:$0xf] %v791_v49 }
  0xde   : > { %794 = vst [vmem:[%s8383_s29 + $0x4c8] sm:$0xf] %v793_v50  ;;  %796 = vst [vmem:[%s8383_s29 + $0x4cc] sm:$0xf] %v795_v51  ;;  %v797_v52 = vld [vmem:[%s8379_s28 + $0x1340] sm:$0xf] }
  0xdf   : > { %v799_v53 = vld [vmem:[%s8379_s28 + $0x1350] sm:$0xf]  ;;  %v801_v54 = vld [vmem:[%s8379_s28 + $0x1360] sm:$0xf]  ;;  %798 = vst [vmem:[%s8383_s29 + $0x4d0] sm:$0xf] %v797_v52 }
  0xe0   : > { %800 = vst [vmem:[%s8383_s29 + $0x4d4] sm:$0xf] %v799_v53  ;;  %802 = vst [vmem:[%s8383_s29 + $0x4d8] sm:$0xf] %v801_v54  ;;  %v803_v55 = vld [vmem:[%s8379_s28 + $0x1370] sm:$0xf] }
  0xe1   : > { %v805_v56 = vld [vmem:[%s8379_s28 + $0x1380] sm:$0xf]  ;;  %v807_v57 = vld [vmem:[%s8379_s28 + $0x1390] sm:$0xf]  ;;  %804 = vst [vmem:[%s8383_s29 + $0x4dc] sm:$0xf] %v803_v55 }
  0xe2   : > { %806 = vst [vmem:[%s8383_s29 + $0x4e0] sm:$0xf] %v805_v56  ;;  %808 = vst [vmem:[%s8383_s29 + $0x4e4] sm:$0xf] %v807_v57  ;;  %v809_v58 = vld [vmem:[%s8379_s28 + $0x13a0] sm:$0xf] }
  0xe3   : > { %v811_v59 = vld [vmem:[%s8379_s28 + $0x13b0] sm:$0xf]  ;;  %v813_v60 = vld [vmem:[%s8379_s28 + $0x13c0] sm:$0xf]  ;;  %810 = vst [vmem:[%s8383_s29 + $0x4e8] sm:$0xf] %v809_v58 }
  0xe4   : > { %812 = vst [vmem:[%s8383_s29 + $0x4ec] sm:$0xf] %v811_v59  ;;  %814 = vst [vmem:[%s8383_s29 + $0x4f0] sm:$0xf] %v813_v60  ;;  %v815_v61 = vld [vmem:[%s8379_s28 + $0x13d0] sm:$0xf] }
  0xe5   : > { %v817_v62 = vld [vmem:[%s8379_s28 + $0x13e0] sm:$0xf]  ;;  %v819_v63 = vld [vmem:[%s8379_s28 + $0x13f0] sm:$0xf]  ;;  %816 = vst [vmem:[%s8383_s29 + $0x4f4] sm:$0xf] %v815_v61 }
  0xe6   : > { %818 = vst [vmem:[%s8383_s29 + $0x4f8] sm:$0xf] %v817_v62  ;;  %820 = vst [vmem:[%s8383_s29 + $0x4fc] sm:$0xf] %v819_v63  ;;  %v821_v0 = vld [vmem:[%s8379_s28 + $0x1400] sm:$0xf] }
  0xe7   : > { %v823_v1 = vld [vmem:[%s8379_s28 + $0x1410] sm:$0xf]  ;;  %v825_v2 = vld [vmem:[%s8379_s28 + $0x1420] sm:$0xf]  ;;  %822 = vst [vmem:[%s8383_s29 + $0x500] sm:$0xf] %v821_v0 }
  0xe8   : > { %824 = vst [vmem:[%s8383_s29 + $0x504] sm:$0xf] %v823_v1  ;;  %826 = vst [vmem:[%s8383_s29 + $0x508] sm:$0xf] %v825_v2  ;;  %v827_v3 = vld [vmem:[%s8379_s28 + $0x1430] sm:$0xf] }
  0xe9   : > { %v829_v4 = vld [vmem:[%s8379_s28 + $0x1440] sm:$0xf]  ;;  %v831_v5 = vld [vmem:[%s8379_s28 + $0x1450] sm:$0xf]  ;;  %828 = vst [vmem:[%s8383_s29 + $0x50c] sm:$0xf] %v827_v3 }
  0xea   : > { %830 = vst [vmem:[%s8383_s29 + $0x510] sm:$0xf] %v829_v4  ;;  %832 = vst [vmem:[%s8383_s29 + $0x514] sm:$0xf] %v831_v5  ;;  %v833_v6 = vld [vmem:[%s8379_s28 + $0x1460] sm:$0xf] }
  0xeb   : > { %v835_v7 = vld [vmem:[%s8379_s28 + $0x1470] sm:$0xf]  ;;  %v837_v8 = vld [vmem:[%s8379_s28 + $0x1480] sm:$0xf]  ;;  %834 = vst [vmem:[%s8383_s29 + $0x518] sm:$0xf] %v833_v6 }
  0xec   : > { %836 = vst [vmem:[%s8383_s29 + $0x51c] sm:$0xf] %v835_v7  ;;  %838 = vst [vmem:[%s8383_s29 + $0x520] sm:$0xf] %v837_v8  ;;  %v839_v9 = vld [vmem:[%s8379_s28 + $0x1490] sm:$0xf] }
  0xed   : > { %v841_v10 = vld [vmem:[%s8379_s28 + $0x14a0] sm:$0xf]  ;;  %v843_v11 = vld [vmem:[%s8379_s28 + $0x14b0] sm:$0xf]  ;;  %840 = vst [vmem:[%s8383_s29 + $0x524] sm:$0xf] %v839_v9 }
  0xee   : > { %842 = vst [vmem:[%s8383_s29 + $0x528] sm:$0xf] %v841_v10  ;;  %844 = vst [vmem:[%s8383_s29 + $0x52c] sm:$0xf] %v843_v11  ;;  %v845_v12 = vld [vmem:[%s8379_s28 + $0x14c0] sm:$0xf] }
  0xef   : > { %v847_v13 = vld [vmem:[%s8379_s28 + $0x14d0] sm:$0xf]  ;;  %v849_v14 = vld [vmem:[%s8379_s28 + $0x14e0] sm:$0xf]  ;;  %846 = vst [vmem:[%s8383_s29 + $0x530] sm:$0xf] %v845_v12 }
  0xf0   : > { %848 = vst [vmem:[%s8383_s29 + $0x534] sm:$0xf] %v847_v13  ;;  %850 = vst [vmem:[%s8383_s29 + $0x538] sm:$0xf] %v849_v14  ;;  %v851_v15 = vld [vmem:[%s8379_s28 + $0x14f0] sm:$0xf] }
  0xf1   : > { %v853_v16 = vld [vmem:[%s8379_s28 + $0x1500] sm:$0xf]  ;;  %v855_v17 = vld [vmem:[%s8379_s28 + $0x1510] sm:$0xf]  ;;  %852 = vst [vmem:[%s8383_s29 + $0x53c] sm:$0xf] %v851_v15 }
  0xf2   : > { %854 = vst [vmem:[%s8383_s29 + $0x540] sm:$0xf] %v853_v16  ;;  %856 = vst [vmem:[%s8383_s29 + $0x544] sm:$0xf] %v855_v17  ;;  %v857_v18 = vld [vmem:[%s8379_s28 + $0x1520] sm:$0xf] }
  0xf3   : > { %v859_v19 = vld [vmem:[%s8379_s28 + $0x1530] sm:$0xf]  ;;  %v861_v20 = vld [vmem:[%s8379_s28 + $0x1540] sm:$0xf]  ;;  %858 = vst [vmem:[%s8383_s29 + $0x548] sm:$0xf] %v857_v18 }
  0xf4   : > { %860 = vst [vmem:[%s8383_s29 + $0x54c] sm:$0xf] %v859_v19  ;;  %862 = vst [vmem:[%s8383_s29 + $0x550] sm:$0xf] %v861_v20  ;;  %v863_v21 = vld [vmem:[%s8379_s28 + $0x1550] sm:$0xf] }
  0xf5   : > { %v865_v22 = vld [vmem:[%s8379_s28 + $0x1560] sm:$0xf]  ;;  %v867_v23 = vld [vmem:[%s8379_s28 + $0x1570] sm:$0xf]  ;;  %864 = vst [vmem:[%s8383_s29 + $0x554] sm:$0xf] %v863_v21 }
  0xf6   : > { %866 = vst [vmem:[%s8383_s29 + $0x558] sm:$0xf] %v865_v22  ;;  %868 = vst [vmem:[%s8383_s29 + $0x55c] sm:$0xf] %v867_v23  ;;  %v869_v24 = vld [vmem:[%s8379_s28 + $0x1580] sm:$0xf] }
  0xf7   : > { %v871_v25 = vld [vmem:[%s8379_s28 + $0x1590] sm:$0xf]  ;;  %v873_v26 = vld [vmem:[%s8379_s28 + $0x15a0] sm:$0xf]  ;;  %870 = vst [vmem:[%s8383_s29 + $0x560] sm:$0xf] %v869_v24 }
  0xf8   : > { %872 = vst [vmem:[%s8383_s29 + $0x564] sm:$0xf] %v871_v25  ;;  %874 = vst [vmem:[%s8383_s29 + $0x568] sm:$0xf] %v873_v26  ;;  %v875_v27 = vld [vmem:[%s8379_s28 + $0x15b0] sm:$0xf] }
  0xf9   : > { %v877_v28 = vld [vmem:[%s8379_s28 + $0x15c0] sm:$0xf]  ;;  %v879_v29 = vld [vmem:[%s8379_s28 + $0x15d0] sm:$0xf]  ;;  %876 = vst [vmem:[%s8383_s29 + $0x56c] sm:$0xf] %v875_v27 }
  0xfa   : > { %878 = vst [vmem:[%s8383_s29 + $0x570] sm:$0xf] %v877_v28  ;;  %880 = vst [vmem:[%s8383_s29 + $0x574] sm:$0xf] %v879_v29  ;;  %v881_v30 = vld [vmem:[%s8379_s28 + $0x15e0] sm:$0xf] }
  0xfb   : > { %v883_v31 = vld [vmem:[%s8379_s28 + $0x15f0] sm:$0xf]  ;;  %v885_v32 = vld [vmem:[%s8379_s28 + $0x1600] sm:$0xf]  ;;  %882 = vst [vmem:[%s8383_s29 + $0x578] sm:$0xf] %v881_v30 }
  0xfc   : > { %884 = vst [vmem:[%s8383_s29 + $0x57c] sm:$0xf] %v883_v31  ;;  %886 = vst [vmem:[%s8383_s29 + $0x580] sm:$0xf] %v885_v32  ;;  %v887_v33 = vld [vmem:[%s8379_s28 + $0x1610] sm:$0xf] }
  0xfd   : > { %v889_v34 = vld [vmem:[%s8379_s28 + $0x1620] sm:$0xf]  ;;  %v891_v35 = vld [vmem:[%s8379_s28 + $0x1630] sm:$0xf]  ;;  %888 = vst [vmem:[%s8383_s29 + $0x584] sm:$0xf] %v887_v33 }
  0xfe   : > { %890 = vst [vmem:[%s8383_s29 + $0x588] sm:$0xf] %v889_v34  ;;  %892 = vst [vmem:[%s8383_s29 + $0x58c] sm:$0xf] %v891_v35  ;;  %v893_v36 = vld [vmem:[%s8379_s28 + $0x1640] sm:$0xf] }
  0xff   : > { %v895_v37 = vld [vmem:[%s8379_s28 + $0x1650] sm:$0xf]  ;;  %v897_v38 = vld [vmem:[%s8379_s28 + $0x1660] sm:$0xf]  ;;  %894 = vst [vmem:[%s8383_s29 + $0x590] sm:$0xf] %v893_v36 }
 0x100   : > { %896 = vst [vmem:[%s8383_s29 + $0x594] sm:$0xf] %v895_v37  ;;  %898 = vst [vmem:[%s8383_s29 + $0x598] sm:$0xf] %v897_v38  ;;  %v899_v39 = vld [vmem:[%s8379_s28 + $0x1670] sm:$0xf] }
 0x101   : > { %v901_v40 = vld [vmem:[%s8379_s28 + $0x1680] sm:$0xf]  ;;  %v903_v41 = vld [vmem:[%s8379_s28 + $0x1690] sm:$0xf]  ;;  %900 = vst [vmem:[%s8383_s29 + $0x59c] sm:$0xf] %v899_v39 }
 0x102   : > { %902 = vst [vmem:[%s8383_s29 + $0x5a0] sm:$0xf] %v901_v40  ;;  %904 = vst [vmem:[%s8383_s29 + $0x5a4] sm:$0xf] %v903_v41  ;;  %v905_v42 = vld [vmem:[%s8379_s28 + $0x16a0] sm:$0xf] }
 0x103   : > { %v907_v43 = vld [vmem:[%s8379_s28 + $0x16b0] sm:$0xf]  ;;  %v909_v44 = vld [vmem:[%s8379_s28 + $0x16c0] sm:$0xf]  ;;  %906 = vst [vmem:[%s8383_s29 + $0x5a8] sm:$0xf] %v905_v42 }
 0x104   : > { %908 = vst [vmem:[%s8383_s29 + $0x5ac] sm:$0xf] %v907_v43  ;;  %910 = vst [vmem:[%s8383_s29 + $0x5b0] sm:$0xf] %v909_v44  ;;  %v911_v45 = vld [vmem:[%s8379_s28 + $0x16d0] sm:$0xf] }
 0x105   : > { %v913_v46 = vld [vmem:[%s8379_s28 + $0x16e0] sm:$0xf]  ;;  %v915_v47 = vld [vmem:[%s8379_s28 + $0x16f0] sm:$0xf]  ;;  %912 = vst [vmem:[%s8383_s29 + $0x5b4] sm:$0xf] %v911_v45 }
 0x106   : > { %914 = vst [vmem:[%s8383_s29 + $0x5b8] sm:$0xf] %v913_v46  ;;  %916 = vst [vmem:[%s8383_s29 + $0x5bc] sm:$0xf] %v915_v47  ;;  %v917_v48 = vld [vmem:[%s8379_s28 + $0x1700] sm:$0xf] }
 0x107   : > { %v919_v49 = vld [vmem:[%s8379_s28 + $0x1710] sm:$0xf]  ;;  %v921_v50 = vld [vmem:[%s8379_s28 + $0x1720] sm:$0xf]  ;;  %918 = vst [vmem:[%s8383_s29 + $0x5c0] sm:$0xf] %v917_v48 }
 0x108   : > { %920 = vst [vmem:[%s8383_s29 + $0x5c4] sm:$0xf] %v919_v49  ;;  %922 = vst [vmem:[%s8383_s29 + $0x5c8] sm:$0xf] %v921_v50  ;;  %v923_v51 = vld [vmem:[%s8379_s28 + $0x1730] sm:$0xf] }
 0x109   : > { %v925_v52 = vld [vmem:[%s8379_s28 + $0x1740] sm:$0xf]  ;;  %v927_v53 = vld [vmem:[%s8379_s28 + $0x1750] sm:$0xf]  ;;  %924 = vst [vmem:[%s8383_s29 + $0x5cc] sm:$0xf] %v923_v51 }
 0x10a   : > { %926 = vst [vmem:[%s8383_s29 + $0x5d0] sm:$0xf] %v925_v52  ;;  %928 = vst [vmem:[%s8383_s29 + $0x5d4] sm:$0xf] %v927_v53  ;;  %v929_v54 = vld [vmem:[%s8379_s28 + $0x1760] sm:$0xf] }
 0x10b   : > { %v931_v55 = vld [vmem:[%s8379_s28 + $0x1770] sm:$0xf]  ;;  %v933_v56 = vld [vmem:[%s8379_s28 + $0x1780] sm:$0xf]  ;;  %930 = vst [vmem:[%s8383_s29 + $0x5d8] sm:$0xf] %v929_v54 }
 0x10c   : > { %932 = vst [vmem:[%s8383_s29 + $0x5dc] sm:$0xf] %v931_v55  ;;  %934 = vst [vmem:[%s8383_s29 + $0x5e0] sm:$0xf] %v933_v56  ;;  %v935_v57 = vld [vmem:[%s8379_s28 + $0x1790] sm:$0xf] }
 0x10d   : > { %v937_v58 = vld [vmem:[%s8379_s28 + $0x17a0] sm:$0xf]  ;;  %v939_v59 = vld [vmem:[%s8379_s28 + $0x17b0] sm:$0xf]  ;;  %936 = vst [vmem:[%s8383_s29 + $0x5e4] sm:$0xf] %v935_v57 }
 0x10e   : > { %938 = vst [vmem:[%s8383_s29 + $0x5e8] sm:$0xf] %v937_v58  ;;  %940 = vst [vmem:[%s8383_s29 + $0x5ec] sm:$0xf] %v939_v59  ;;  %v941_v60 = vld [vmem:[%s8379_s28 + $0x17c0] sm:$0xf] }
 0x10f   : > { %v943_v61 = vld [vmem:[%s8379_s28 + $0x17d0] sm:$0xf]  ;;  %v945_v62 = vld [vmem:[%s8379_s28 + $0x17e0] sm:$0xf]  ;;  %942 = vst [vmem:[%s8383_s29 + $0x5f0] sm:$0xf] %v941_v60 }
 0x110   : > { %944 = vst [vmem:[%s8383_s29 + $0x5f4] sm:$0xf] %v943_v61  ;;  %946 = vst [vmem:[%s8383_s29 + $0x5f8] sm:$0xf] %v945_v62  ;;  %v947_v63 = vld [vmem:[%s8379_s28 + $0x17f0] sm:$0xf] }
 0x111   : > { %v949_v0 = vld [vmem:[%s8379_s28 + $0x1800] sm:$0xf]  ;;  %v951_v1 = vld [vmem:[%s8379_s28 + $0x1810] sm:$0xf]  ;;  %948 = vst [vmem:[%s8383_s29 + $0x5fc] sm:$0xf] %v947_v63 }
 0x112   : > { %950 = vst [vmem:[%s8383_s29 + $0x600] sm:$0xf] %v949_v0  ;;  %952 = vst [vmem:[%s8383_s29 + $0x604] sm:$0xf] %v951_v1  ;;  %v953_v2 = vld [vmem:[%s8379_s28 + $0x1820] sm:$0xf] }
 0x113   : > { %v955_v3 = vld [vmem:[%s8379_s28 + $0x1830] sm:$0xf]  ;;  %v957_v4 = vld [vmem:[%s8379_s28 + $0x1840] sm:$0xf]  ;;  %954 = vst [vmem:[%s8383_s29 + $0x608] sm:$0xf] %v953_v2 }
 0x114   : > { %956 = vst [vmem:[%s8383_s29 + $0x60c] sm:$0xf] %v955_v3  ;;  %958 = vst [vmem:[%s8383_s29 + $0x610] sm:$0xf] %v957_v4  ;;  %v959_v5 = vld [vmem:[%s8379_s28 + $0x1850] sm:$0xf] }
 0x115   : > { %v961_v6 = vld [vmem:[%s8379_s28 + $0x1860] sm:$0xf]  ;;  %v963_v7 = vld [vmem:[%s8379_s28 + $0x1870] sm:$0xf]  ;;  %960 = vst [vmem:[%s8383_s29 + $0x614] sm:$0xf] %v959_v5 }
 0x116   : > { %962 = vst [vmem:[%s8383_s29 + $0x618] sm:$0xf] %v961_v6  ;;  %964 = vst [vmem:[%s8383_s29 + $0x61c] sm:$0xf] %v963_v7  ;;  %v965_v8 = vld [vmem:[%s8379_s28 + $0x1880] sm:$0xf] }
 0x117   : > { %v967_v9 = vld [vmem:[%s8379_s28 + $0x1890] sm:$0xf]  ;;  %v969_v10 = vld [vmem:[%s8379_s28 + $0x18a0] sm:$0xf]  ;;  %966 = vst [vmem:[%s8383_s29 + $0x620] sm:$0xf] %v965_v8 }
 0x118   : > { %968 = vst [vmem:[%s8383_s29 + $0x624] sm:$0xf] %v967_v9  ;;  %970 = vst [vmem:[%s8383_s29 + $0x628] sm:$0xf] %v969_v10  ;;  %v971_v11 = vld [vmem:[%s8379_s28 + $0x18b0] sm:$0xf] }
 0x119   : > { %v973_v12 = vld [vmem:[%s8379_s28 + $0x18c0] sm:$0xf]  ;;  %v975_v13 = vld [vmem:[%s8379_s28 + $0x18d0] sm:$0xf]  ;;  %972 = vst [vmem:[%s8383_s29 + $0x62c] sm:$0xf] %v971_v11 }
 0x11a   : > { %974 = vst [vmem:[%s8383_s29 + $0x630] sm:$0xf] %v973_v12  ;;  %976 = vst [vmem:[%s8383_s29 + $0x634] sm:$0xf] %v975_v13  ;;  %v977_v14 = vld [vmem:[%s8379_s28 + $0x18e0] sm:$0xf] }
 0x11b   : > { %v979_v15 = vld [vmem:[%s8379_s28 + $0x18f0] sm:$0xf]  ;;  %v981_v16 = vld [vmem:[%s8379_s28 + $0x1900] sm:$0xf]  ;;  %978 = vst [vmem:[%s8383_s29 + $0x638] sm:$0xf] %v977_v14 }
 0x11c   : > { %980 = vst [vmem:[%s8383_s29 + $0x63c] sm:$0xf] %v979_v15  ;;  %982 = vst [vmem:[%s8383_s29 + $0x640] sm:$0xf] %v981_v16  ;;  %v983_v17 = vld [vmem:[%s8379_s28 + $0x1910] sm:$0xf] }
 0x11d   : > { %v985_v18 = vld [vmem:[%s8379_s28 + $0x1920] sm:$0xf]  ;;  %v987_v19 = vld [vmem:[%s8379_s28 + $0x1930] sm:$0xf]  ;;  %984 = vst [vmem:[%s8383_s29 + $0x644] sm:$0xf] %v983_v17 }
 0x11e   : > { %986 = vst [vmem:[%s8383_s29 + $0x648] sm:$0xf] %v985_v18  ;;  %988 = vst [vmem:[%s8383_s29 + $0x64c] sm:$0xf] %v987_v19  ;;  %v989_v20 = vld [vmem:[%s8379_s28 + $0x1940] sm:$0xf] }
 0x11f   : > { %v991_v21 = vld [vmem:[%s8379_s28 + $0x1950] sm:$0xf]  ;;  %v993_v22 = vld [vmem:[%s8379_s28 + $0x1960] sm:$0xf]  ;;  %990 = vst [vmem:[%s8383_s29 + $0x650] sm:$0xf] %v989_v20 }
 0x120   : > { %992 = vst [vmem:[%s8383_s29 + $0x654] sm:$0xf] %v991_v21  ;;  %994 = vst [vmem:[%s8383_s29 + $0x658] sm:$0xf] %v993_v22  ;;  %v995_v23 = vld [vmem:[%s8379_s28 + $0x1970] sm:$0xf] }
 0x121   : > { %v997_v24 = vld [vmem:[%s8379_s28 + $0x1980] sm:$0xf]  ;;  %v999_v25 = vld [vmem:[%s8379_s28 + $0x1990] sm:$0xf]  ;;  %996 = vst [vmem:[%s8383_s29 + $0x65c] sm:$0xf] %v995_v23 }
 0x122   : > { %998 = vst [vmem:[%s8383_s29 + $0x660] sm:$0xf] %v997_v24  ;;  %1000 = vst [vmem:[%s8383_s29 + $0x664] sm:$0xf] %v999_v25  ;;  %v1001_v26 = vld [vmem:[%s8379_s28 + $0x19a0] sm:$0xf] }
 0x123   : > { %v1003_v27 = vld [vmem:[%s8379_s28 + $0x19b0] sm:$0xf]  ;;  %v1005_v28 = vld [vmem:[%s8379_s28 + $0x19c0] sm:$0xf]  ;;  %1002 = vst [vmem:[%s8383_s29 + $0x668] sm:$0xf] %v1001_v26 }
 0x124   : > { %1004 = vst [vmem:[%s8383_s29 + $0x66c] sm:$0xf] %v1003_v27  ;;  %1006 = vst [vmem:[%s8383_s29 + $0x670] sm:$0xf] %v1005_v28  ;;  %v1007_v29 = vld [vmem:[%s8379_s28 + $0x19d0] sm:$0xf] }
 0x125   : > { %v1009_v30 = vld [vmem:[%s8379_s28 + $0x19e0] sm:$0xf]  ;;  %v1011_v31 = vld [vmem:[%s8379_s28 + $0x19f0] sm:$0xf]  ;;  %1008 = vst [vmem:[%s8383_s29 + $0x674] sm:$0xf] %v1007_v29 }
 0x126   : > { %1010 = vst [vmem:[%s8383_s29 + $0x678] sm:$0xf] %v1009_v30  ;;  %1012 = vst [vmem:[%s8383_s29 + $0x67c] sm:$0xf] %v1011_v31  ;;  %v1013_v32 = vld [vmem:[%s8379_s28 + $0x1a00] sm:$0xf] }
 0x127   : > { %v1015_v33 = vld [vmem:[%s8379_s28 + $0x1a10] sm:$0xf]  ;;  %v1017_v34 = vld [vmem:[%s8379_s28 + $0x1a20] sm:$0xf]  ;;  %1014 = vst [vmem:[%s8383_s29 + $0x680] sm:$0xf] %v1013_v32 }
 0x128   : > { %1016 = vst [vmem:[%s8383_s29 + $0x684] sm:$0xf] %v1015_v33  ;;  %1018 = vst [vmem:[%s8383_s29 + $0x688] sm:$0xf] %v1017_v34  ;;  %v1019_v35 = vld [vmem:[%s8379_s28 + $0x1a30] sm:$0xf] }
 0x129   : > { %v1021_v36 = vld [vmem:[%s8379_s28 + $0x1a40] sm:$0xf]  ;;  %v1023_v37 = vld [vmem:[%s8379_s28 + $0x1a50] sm:$0xf]  ;;  %1020 = vst [vmem:[%s8383_s29 + $0x68c] sm:$0xf] %v1019_v35 }
 0x12a   : > { %1022 = vst [vmem:[%s8383_s29 + $0x690] sm:$0xf] %v1021_v36  ;;  %1024 = vst [vmem:[%s8383_s29 + $0x694] sm:$0xf] %v1023_v37  ;;  %v1025_v38 = vld [vmem:[%s8379_s28 + $0x1a60] sm:$0xf] }
 0x12b   : > { %v1027_v39 = vld [vmem:[%s8379_s28 + $0x1a70] sm:$0xf]  ;;  %v1029_v40 = vld [vmem:[%s8379_s28 + $0x1a80] sm:$0xf]  ;;  %1026 = vst [vmem:[%s8383_s29 + $0x698] sm:$0xf] %v1025_v38 }
 0x12c   : > { %1028 = vst [vmem:[%s8383_s29 + $0x69c] sm:$0xf] %v1027_v39  ;;  %1030 = vst [vmem:[%s8383_s29 + $0x6a0] sm:$0xf] %v1029_v40  ;;  %v1031_v41 = vld [vmem:[%s8379_s28 + $0x1a90] sm:$0xf] }
 0x12d   : > { %v1033_v42 = vld [vmem:[%s8379_s28 + $0x1aa0] sm:$0xf]  ;;  %v1035_v43 = vld [vmem:[%s8379_s28 + $0x1ab0] sm:$0xf]  ;;  %1032 = vst [vmem:[%s8383_s29 + $0x6a4] sm:$0xf] %v1031_v41 }
 0x12e   : > { %1034 = vst [vmem:[%s8383_s29 + $0x6a8] sm:$0xf] %v1033_v42  ;;  %1036 = vst [vmem:[%s8383_s29 + $0x6ac] sm:$0xf] %v1035_v43  ;;  %v1037_v44 = vld [vmem:[%s8379_s28 + $0x1ac0] sm:$0xf] }
 0x12f   : > { %v1039_v45 = vld [vmem:[%s8379_s28 + $0x1ad0] sm:$0xf]  ;;  %v1041_v46 = vld [vmem:[%s8379_s28 + $0x1ae0] sm:$0xf]  ;;  %1038 = vst [vmem:[%s8383_s29 + $0x6b0] sm:$0xf] %v1037_v44 }
 0x130   : > { %1040 = vst [vmem:[%s8383_s29 + $0x6b4] sm:$0xf] %v1039_v45  ;;  %1042 = vst [vmem:[%s8383_s29 + $0x6b8] sm:$0xf] %v1041_v46  ;;  %v1043_v47 = vld [vmem:[%s8379_s28 + $0x1af0] sm:$0xf] }
 0x131   : > { %v1045_v48 = vld [vmem:[%s8379_s28 + $0x1b00] sm:$0xf]  ;;  %v1047_v49 = vld [vmem:[%s8379_s28 + $0x1b10] sm:$0xf]  ;;  %1044 = vst [vmem:[%s8383_s29 + $0x6bc] sm:$0xf] %v1043_v47 }
 0x132   : > { %1046 = vst [vmem:[%s8383_s29 + $0x6c0] sm:$0xf] %v1045_v48  ;;  %1048 = vst [vmem:[%s8383_s29 + $0x6c4] sm:$0xf] %v1047_v49  ;;  %v1049_v50 = vld [vmem:[%s8379_s28 + $0x1b20] sm:$0xf] }
 0x133   : > { %v1051_v51 = vld [vmem:[%s8379_s28 + $0x1b30] sm:$0xf]  ;;  %v1053_v52 = vld [vmem:[%s8379_s28 + $0x1b40] sm:$0xf]  ;;  %1050 = vst [vmem:[%s8383_s29 + $0x6c8] sm:$0xf] %v1049_v50 }
 0x134   : > { %1052 = vst [vmem:[%s8383_s29 + $0x6cc] sm:$0xf] %v1051_v51  ;;  %1054 = vst [vmem:[%s8383_s29 + $0x6d0] sm:$0xf] %v1053_v52  ;;  %v1055_v53 = vld [vmem:[%s8379_s28 + $0x1b50] sm:$0xf] }
 0x135   : > { %v1057_v54 = vld [vmem:[%s8379_s28 + $0x1b60] sm:$0xf]  ;;  %v1059_v55 = vld [vmem:[%s8379_s28 + $0x1b70] sm:$0xf]  ;;  %1056 = vst [vmem:[%s8383_s29 + $0x6d4] sm:$0xf] %v1055_v53 }
 0x136   : > { %1058 = vst [vmem:[%s8383_s29 + $0x6d8] sm:$0xf] %v1057_v54  ;;  %1060 = vst [vmem:[%s8383_s29 + $0x6dc] sm:$0xf] %v1059_v55  ;;  %v1061_v56 = vld [vmem:[%s8379_s28 + $0x1b80] sm:$0xf] }
 0x137   : > { %v1063_v57 = vld [vmem:[%s8379_s28 + $0x1b90] sm:$0xf]  ;;  %v1065_v58 = vld [vmem:[%s8379_s28 + $0x1ba0] sm:$0xf]  ;;  %1062 = vst [vmem:[%s8383_s29 + $0x6e0] sm:$0xf] %v1061_v56 }
 0x138   : > { %1064 = vst [vmem:[%s8383_s29 + $0x6e4] sm:$0xf] %v1063_v57  ;;  %1066 = vst [vmem:[%s8383_s29 + $0x6e8] sm:$0xf] %v1065_v58  ;;  %v1067_v59 = vld [vmem:[%s8379_s28 + $0x1bb0] sm:$0xf] }
 0x139   : > { %v1069_v60 = vld [vmem:[%s8379_s28 + $0x1bc0] sm:$0xf]  ;;  %v1071_v61 = vld [vmem:[%s8379_s28 + $0x1bd0] sm:$0xf]  ;;  %1068 = vst [vmem:[%s8383_s29 + $0x6ec] sm:$0xf] %v1067_v59 }
 0x13a   : > { %1070 = vst [vmem:[%s8383_s29 + $0x6f0] sm:$0xf] %v1069_v60  ;;  %1072 = vst [vmem:[%s8383_s29 + $0x6f4] sm:$0xf] %v1071_v61  ;;  %v1073_v62 = vld [vmem:[%s8379_s28 + $0x1be0] sm:$0xf] }
 0x13b   : > { %v1075_v63 = vld [vmem:[%s8379_s28 + $0x1bf0] sm:$0xf]  ;;  %v1077_v0 = vld [vmem:[%s8379_s28 + $0x1c00] sm:$0xf]  ;;  %1074 = vst [vmem:[%s8383_s29 + $0x6f8] sm:$0xf] %v1073_v62 }
 0x13c   : > { %1076 = vst [vmem:[%s8383_s29 + $0x6fc] sm:$0xf] %v1075_v63  ;;  %1078 = vst [vmem:[%s8383_s29 + $0x700] sm:$0xf] %v1077_v0  ;;  %v1079_v1 = vld [vmem:[%s8379_s28 + $0x1c10] sm:$0xf] }
 0x13d   : > { %v1081_v2 = vld [vmem:[%s8379_s28 + $0x1c20] sm:$0xf]  ;;  %v1083_v3 = vld [vmem:[%s8379_s28 + $0x1c30] sm:$0xf]  ;;  %1080 = vst [vmem:[%s8383_s29 + $0x704] sm:$0xf] %v1079_v1 }
 0x13e   : > { %1082 = vst [vmem:[%s8383_s29 + $0x708] sm:$0xf] %v1081_v2  ;;  %1084 = vst [vmem:[%s8383_s29 + $0x70c] sm:$0xf] %v1083_v3  ;;  %v1085_v4 = vld [vmem:[%s8379_s28 + $0x1c40] sm:$0xf] }
 0x13f   : > { %v1087_v5 = vld [vmem:[%s8379_s28 + $0x1c50] sm:$0xf]  ;;  %v1089_v6 = vld [vmem:[%s8379_s28 + $0x1c60] sm:$0xf]  ;;  %1086 = vst [vmem:[%s8383_s29 + $0x710] sm:$0xf] %v1085_v4 }
 0x140   : > { %1088 = vst [vmem:[%s8383_s29 + $0x714] sm:$0xf] %v1087_v5  ;;  %1090 = vst [vmem:[%s8383_s29 + $0x718] sm:$0xf] %v1089_v6  ;;  %v1091_v7 = vld [vmem:[%s8379_s28 + $0x1c70] sm:$0xf] }
 0x141   : > { %v1093_v8 = vld [vmem:[%s8379_s28 + $0x1c80] sm:$0xf]  ;;  %v1095_v9 = vld [vmem:[%s8379_s28 + $0x1c90] sm:$0xf]  ;;  %1092 = vst [vmem:[%s8383_s29 + $0x71c] sm:$0xf] %v1091_v7 }
 0x142   : > { %1094 = vst [vmem:[%s8383_s29 + $0x720] sm:$0xf] %v1093_v8  ;;  %1096 = vst [vmem:[%s8383_s29 + $0x724] sm:$0xf] %v1095_v9  ;;  %v1097_v10 = vld [vmem:[%s8379_s28 + $0x1ca0] sm:$0xf] }
 0x143   : > { %v1099_v11 = vld [vmem:[%s8379_s28 + $0x1cb0] sm:$0xf]  ;;  %v1101_v12 = vld [vmem:[%s8379_s28 + $0x1cc0] sm:$0xf]  ;;  %1098 = vst [vmem:[%s8383_s29 + $0x728] sm:$0xf] %v1097_v10 }
 0x144   : > { %1100 = vst [vmem:[%s8383_s29 + $0x72c] sm:$0xf] %v1099_v11  ;;  %1102 = vst [vmem:[%s8383_s29 + $0x730] sm:$0xf] %v1101_v12  ;;  %v1103_v13 = vld [vmem:[%s8379_s28 + $0x1cd0] sm:$0xf] }
 0x145   : > { %v1105_v14 = vld [vmem:[%s8379_s28 + $0x1ce0] sm:$0xf]  ;;  %v1107_v15 = vld [vmem:[%s8379_s28 + $0x1cf0] sm:$0xf]  ;;  %1104 = vst [vmem:[%s8383_s29 + $0x734] sm:$0xf] %v1103_v13 }
 0x146   : > { %1106 = vst [vmem:[%s8383_s29 + $0x738] sm:$0xf] %v1105_v14  ;;  %1108 = vst [vmem:[%s8383_s29 + $0x73c] sm:$0xf] %v1107_v15  ;;  %v1109_v16 = vld [vmem:[%s8379_s28 + $0x1d00] sm:$0xf] }
 0x147   : > { %v1111_v17 = vld [vmem:[%s8379_s28 + $0x1d10] sm:$0xf]  ;;  %v1113_v18 = vld [vmem:[%s8379_s28 + $0x1d20] sm:$0xf]  ;;  %1110 = vst [vmem:[%s8383_s29 + $0x740] sm:$0xf] %v1109_v16 }
 0x148   : > { %1112 = vst [vmem:[%s8383_s29 + $0x744] sm:$0xf] %v1111_v17  ;;  %1114 = vst [vmem:[%s8383_s29 + $0x748] sm:$0xf] %v1113_v18  ;;  %v1115_v19 = vld [vmem:[%s8379_s28 + $0x1d30] sm:$0xf] }
 0x149   : > { %v1117_v20 = vld [vmem:[%s8379_s28 + $0x1d40] sm:$0xf]  ;;  %v1119_v21 = vld [vmem:[%s8379_s28 + $0x1d50] sm:$0xf]  ;;  %1116 = vst [vmem:[%s8383_s29 + $0x74c] sm:$0xf] %v1115_v19 }
 0x14a   : > { %1118 = vst [vmem:[%s8383_s29 + $0x750] sm:$0xf] %v1117_v20  ;;  %1120 = vst [vmem:[%s8383_s29 + $0x754] sm:$0xf] %v1119_v21  ;;  %v1121_v22 = vld [vmem:[%s8379_s28 + $0x1d60] sm:$0xf] }
 0x14b   : > { %v1123_v23 = vld [vmem:[%s8379_s28 + $0x1d70] sm:$0xf]  ;;  %v1125_v24 = vld [vmem:[%s8379_s28 + $0x1d80] sm:$0xf]  ;;  %1122 = vst [vmem:[%s8383_s29 + $0x758] sm:$0xf] %v1121_v22 }
 0x14c   : > { %1124 = vst [vmem:[%s8383_s29 + $0x75c] sm:$0xf] %v1123_v23  ;;  %1126 = vst [vmem:[%s8383_s29 + $0x760] sm:$0xf] %v1125_v24  ;;  %v1127_v25 = vld [vmem:[%s8379_s28 + $0x1d90] sm:$0xf] }
 0x14d   : > { %v1129_v26 = vld [vmem:[%s8379_s28 + $0x1da0] sm:$0xf]  ;;  %v1131_v27 = vld [vmem:[%s8379_s28 + $0x1db0] sm:$0xf]  ;;  %1128 = vst [vmem:[%s8383_s29 + $0x764] sm:$0xf] %v1127_v25 }
 0x14e   : > { %1130 = vst [vmem:[%s8383_s29 + $0x768] sm:$0xf] %v1129_v26  ;;  %1132 = vst [vmem:[%s8383_s29 + $0x76c] sm:$0xf] %v1131_v27  ;;  %v1133_v28 = vld [vmem:[%s8379_s28 + $0x1dc0] sm:$0xf] }
 0x14f   : > { %v1135_v29 = vld [vmem:[%s8379_s28 + $0x1dd0] sm:$0xf]  ;;  %v1137_v30 = vld [vmem:[%s8379_s28 + $0x1de0] sm:$0xf]  ;;  %1134 = vst [vmem:[%s8383_s29 + $0x770] sm:$0xf] %v1133_v28 }
 0x150   : > { %1136 = vst [vmem:[%s8383_s29 + $0x774] sm:$0xf] %v1135_v29  ;;  %1138 = vst [vmem:[%s8383_s29 + $0x778] sm:$0xf] %v1137_v30  ;;  %v1139_v31 = vld [vmem:[%s8379_s28 + $0x1df0] sm:$0xf] }
 0x151   : > { %v1141_v32 = vld [vmem:[%s8379_s28 + $0x1e00] sm:$0xf]  ;;  %v1143_v33 = vld [vmem:[%s8379_s28 + $0x1e10] sm:$0xf]  ;;  %1140 = vst [vmem:[%s8383_s29 + $0x77c] sm:$0xf] %v1139_v31 }
 0x152   : > { %1142 = vst [vmem:[%s8383_s29 + $0x780] sm:$0xf] %v1141_v32  ;;  %1144 = vst [vmem:[%s8383_s29 + $0x784] sm:$0xf] %v1143_v33  ;;  %v1145_v34 = vld [vmem:[%s8379_s28 + $0x1e20] sm:$0xf] }
 0x153   : > { %v1147_v35 = vld [vmem:[%s8379_s28 + $0x1e30] sm:$0xf]  ;;  %v1149_v36 = vld [vmem:[%s8379_s28 + $0x1e40] sm:$0xf]  ;;  %1146 = vst [vmem:[%s8383_s29 + $0x788] sm:$0xf] %v1145_v34 }
 0x154   : > { %1148 = vst [vmem:[%s8383_s29 + $0x78c] sm:$0xf] %v1147_v35  ;;  %1150 = vst [vmem:[%s8383_s29 + $0x790] sm:$0xf] %v1149_v36  ;;  %v1151_v37 = vld [vmem:[%s8379_s28 + $0x1e50] sm:$0xf] }
 0x155   : > { %v1153_v38 = vld [vmem:[%s8379_s28 + $0x1e60] sm:$0xf]  ;;  %v1155_v39 = vld [vmem:[%s8379_s28 + $0x1e70] sm:$0xf]  ;;  %1152 = vst [vmem:[%s8383_s29 + $0x794] sm:$0xf] %v1151_v37 }
 0x156   : > { %1154 = vst [vmem:[%s8383_s29 + $0x798] sm:$0xf] %v1153_v38  ;;  %1156 = vst [vmem:[%s8383_s29 + $0x79c] sm:$0xf] %v1155_v39  ;;  %v1157_v40 = vld [vmem:[%s8379_s28 + $0x1e80] sm:$0xf] }
 0x157   : > { %v1159_v41 = vld [vmem:[%s8379_s28 + $0x1e90] sm:$0xf]  ;;  %v1161_v42 = vld [vmem:[%s8379_s28 + $0x1ea0] sm:$0xf]  ;;  %1158 = vst [vmem:[%s8383_s29 + $0x7a0] sm:$0xf] %v1157_v40 }
 0x158   : > { %1160 = vst [vmem:[%s8383_s29 + $0x7a4] sm:$0xf] %v1159_v41  ;;  %1162 = vst [vmem:[%s8383_s29 + $0x7a8] sm:$0xf] %v1161_v42  ;;  %v1163_v43 = vld [vmem:[%s8379_s28 + $0x1eb0] sm:$0xf] }
 0x159   : > { %v1165_v44 = vld [vmem:[%s8379_s28 + $0x1ec0] sm:$0xf]  ;;  %v1167_v45 = vld [vmem:[%s8379_s28 + $0x1ed0] sm:$0xf]  ;;  %1164 = vst [vmem:[%s8383_s29 + $0x7ac] sm:$0xf] %v1163_v43 }
 0x15a   : > { %1166 = vst [vmem:[%s8383_s29 + $0x7b0] sm:$0xf] %v1165_v44  ;;  %1168 = vst [vmem:[%s8383_s29 + $0x7b4] sm:$0xf] %v1167_v45  ;;  %v1169_v46 = vld [vmem:[%s8379_s28 + $0x1ee0] sm:$0xf] }
 0x15b   : > { %v1171_v47 = vld [vmem:[%s8379_s28 + $0x1ef0] sm:$0xf]  ;;  %v1173_v48 = vld [vmem:[%s8379_s28 + $0x1f00] sm:$0xf]  ;;  %1170 = vst [vmem:[%s8383_s29 + $0x7b8] sm:$0xf] %v1169_v46 }
 0x15c   : > { %1172 = vst [vmem:[%s8383_s29 + $0x7bc] sm:$0xf] %v1171_v47  ;;  %1174 = vst [vmem:[%s8383_s29 + $0x7c0] sm:$0xf] %v1173_v48  ;;  %v1175_v49 = vld [vmem:[%s8379_s28 + $0x1f10] sm:$0xf] }
 0x15d   : > { %v1177_v50 = vld [vmem:[%s8379_s28 + $0x1f20] sm:$0xf]  ;;  %v1179_v51 = vld [vmem:[%s8379_s28 + $0x1f30] sm:$0xf]  ;;  %1176 = vst [vmem:[%s8383_s29 + $0x7c4] sm:$0xf] %v1175_v49 }
 0x15e   : > { %1178 = vst [vmem:[%s8383_s29 + $0x7c8] sm:$0xf] %v1177_v50  ;;  %1180 = vst [vmem:[%s8383_s29 + $0x7cc] sm:$0xf] %v1179_v51  ;;  %v1181_v52 = vld [vmem:[%s8379_s28 + $0x1f40] sm:$0xf] }
 0x15f   : > { %v1183_v53 = vld [vmem:[%s8379_s28 + $0x1f50] sm:$0xf]  ;;  %v1185_v54 = vld [vmem:[%s8379_s28 + $0x1f60] sm:$0xf]  ;;  %1182 = vst [vmem:[%s8383_s29 + $0x7d0] sm:$0xf] %v1181_v52 }
 0x160   : > { %1184 = vst [vmem:[%s8383_s29 + $0x7d4] sm:$0xf] %v1183_v53  ;;  %1186 = vst [vmem:[%s8383_s29 + $0x7d8] sm:$0xf] %v1185_v54  ;;  %v1187_v55 = vld [vmem:[%s8379_s28 + $0x1f70] sm:$0xf] }
 0x161   : > { %v1189_v56 = vld [vmem:[%s8379_s28 + $0x1f80] sm:$0xf]  ;;  %v1191_v57 = vld [vmem:[%s8379_s28 + $0x1f90] sm:$0xf]  ;;  %1188 = vst [vmem:[%s8383_s29 + $0x7dc] sm:$0xf] %v1187_v55 }
 0x162   : > { %1190 = vst [vmem:[%s8383_s29 + $0x7e0] sm:$0xf] %v1189_v56  ;;  %1192 = vst [vmem:[%s8383_s29 + $0x7e4] sm:$0xf] %v1191_v57  ;;  %v1193_v58 = vld [vmem:[%s8379_s28 + $0x1fa0] sm:$0xf] }
 0x163   : > { %v1195_v59 = vld [vmem:[%s8379_s28 + $0x1fb0] sm:$0xf]  ;;  %v1197_v60 = vld [vmem:[%s8379_s28 + $0x1fc0] sm:$0xf]  ;;  %1194 = vst [vmem:[%s8383_s29 + $0x7e8] sm:$0xf] %v1193_v58 }
 0x164   : > { %1196 = vst [vmem:[%s8383_s29 + $0x7ec] sm:$0xf] %v1195_v59  ;;  %1198 = vst [vmem:[%s8383_s29 + $0x7f0] sm:$0xf] %v1197_v60  ;;  %v1199_v61 = vld [vmem:[%s8379_s28 + $0x1fd0] sm:$0xf] }
 0x165   : > { %v1201_v62 = vld [vmem:[%s8379_s28 + $0x1fe0] sm:$0xf]  ;;  %v1203_v63 = vld [vmem:[%s8379_s28 + $0x1ff0] sm:$0xf]  ;;  %1200 = vst [vmem:[%s8383_s29 + $0x7f4] sm:$0xf] %v1199_v61 }
 0x166   : > { %1202 = vst [vmem:[%s8383_s29 + $0x7f8] sm:$0xf] %v1201_v62  ;;  %1204 = vst [vmem:[%s8383_s29 + $0x7fc] sm:$0xf] %v1203_v63 }
 0x167 PF: > { %p7335_p5 = scmp.ge.s32.totalorder %s8318_s17, 1  ;;  %p4340_p6 = scmp.lt.s32.totalorder %s8318_s17, 5 }
 0x169   : > { %p4341_p7 = pnand %p7335_p5, %p4340_p6 }
 0x16a   : > { %s4347_s30 = sand.u32 (!%p4341_p7), 1, %s8310_s15   ;;  %v9413_v0 = vld [vmem:[%s9775_s0] sm:$0xff] (!%p4341_p7)  ;;  %v9418_v1 = vld [vmem:[%s9775_s0 + $0x8] sm:$0xff] (!%p4341_p7)  ;;  %v9458_v33 = vld [vmem:[%s9775_s0 + $0x10] sm:$0xff] (!%p4341_p7)  ;;  %p4377_p8 = scmp.lt.s32.totalorder (!%p4341_p7), %s7329_s18, 3 }
 0x16b   : > { %4344 = sbr.rel (%p4341_p7) target bundleno = 900 (0x384), region = 84  ;;  %s7336_s9 = sshll.u32 (!%p4341_p7), %s4347_s30, 11  ;;  %v7339_v2 = vcombine.high (!%p4341_p7), %v9413_v0, %v9413_v0  ;;  %v7341_v3 = vcombine.high (!%p4341_p7), %v9418_v1, %v9418_v1  ;;  %v9464_v35 = vld [vmem:[%s9775_s0 + $0x18] sm:$0xff] (!%p4341_p7)  ;;  %v7338_v38 = vcombine.low (!%p4341_p7), %v9413_v0, %v9413_v0  ;;  %v7340_v39 = vcombine.low (!%p4341_p7), %v9418_v1, %v9418_v1 }
 0x16c   : > { %s9424_s10 = scalar_lea.vmem (!%p4341_p7), [#allocation2], %s7336_s9  ;;  %v7343_v42 = vcombine.high (!%p4341_p7), %v9458_v33, %v9458_v33  ;;  %v7345_v44 = vcombine.high (!%p4341_p7), %v9464_v35, %v9464_v35 }
 0x16d   : > { %v8006_v4 = vld [vmem:[%s9424_s10 + $0x40] sm:$0xff] (!%p4341_p7)   ;;  %6596 = vmatprep.mubr.bf16.mxu0 (!%p4341_p7), %v7339_v2  ;;  %6636 = vmatprep.mubr.bf16.mxu1 (!%p4341_p7), %v7341_v3  ;;  %v8010_v8 = vld [vmem:[%s9424_s10 + $0x48] sm:$0xff] (!%p4341_p7)   ;;  %v8014_v12 = vld [vmem:[%s9424_s10 + $0x50] sm:$0xff] (!%p4341_p7)  }
 0x16e   : > { %v8007_v5 = vld [vmem:[%s9424_s10 + $0xc0] sm:$0xff] (!%p4341_p7)   ;;  %7630 = vmatprep.subr.bf16.mxu0 (!%p4341_p7), %v8006_v4  ;;  %v8011_v9 = vld [vmem:[%s9424_s10 + $0xc8] sm:$0xff] (!%p4341_p7)   ;;  %v8015_v13 = vld [vmem:[%s9424_s10 + $0xd0] sm:$0xff] (!%p4341_p7)  }
 0x16f   : > { %v8008_v6 = vld [vmem:[%s9424_s10] sm:$0xff] (!%p4341_p7)   ;;  %7652 = vmatprep.subr.bf16.mxu1 (!%p4341_p7), %v8007_v5  ;;  %v8012_v10 = vld [vmem:[%s9424_s10 + $0x8] sm:$0xff] (!%p4341_p7)   ;;  %v8016_v14 = vld [vmem:[%s9424_s10 + $0x10] sm:$0xff] (!%p4341_p7)  }
 0x170   : > { %v8009_v7 = vld [vmem:[%s9424_s10 + $0x80] sm:$0xff] (!%p4341_p7)   ;;  %7631 = vmatpush3.bf16.msra.mxu0 (!%p4341_p7), %v8008_v6  ;;  %v8013_v11 = vld [vmem:[%s9424_s10 + $0x88] sm:$0xff] (!%p4341_p7)   ;;  %v8017_v15 = vld [vmem:[%s9424_s10 + $0x90] sm:$0xff] (!%p4341_p7)  }
 0x171   : > { %7653 = vmatpush3.bf16.msra.mxu1 (!%p4341_p7), %v8009_v7  ;;  %7632 = vmatprep.subr.bf16.mxu0 (!%p4341_p7), %v8010_v8  ;;  %v8018_v16 = vld [vmem:[%s9424_s10 + $0x58] sm:$0xff] (!%p4341_p7)   ;;  %v8022_v20 = vld [vmem:[%s9424_s10 + $0x60] sm:$0xff] (!%p4341_p7)   ;;  %v8026_v24 = vld [vmem:[%s9424_s10 + $0x68] sm:$0xff] (!%p4341_p7)  }
 0x172   : > { %7654 = vmatprep.subr.bf16.mxu1 %v8011_v9  ;;  %v8019_v17 = vld [vmem:[%s9424_s10 + $0xd8] sm:$0xff]   ;;  %v8023_v21 = vld [vmem:[%s9424_s10 + $0xe0] sm:$0xff]   ;;  %v8027_v25 = vld [vmem:[%s9424_s10 + $0xe8] sm:$0xff]   ;;  %s9784_s18 = smov (!%p4377_p8, %s7329_s18), 3 }
 0x173   : > { %v8020_v18 = vld [vmem:[%s9424_s10 + $0x18] sm:$0xff]   ;;  %v8024_v22 = vld [vmem:[%s9424_s10 + $0x20] sm:$0xff]   ;;  %v8028_v26 = vld [vmem:[%s9424_s10 + $0x28] sm:$0xff]   ;;  %s4379_s25 = scalar_lea.vmem %s9777_s2, %s9784_s18  ;;  %s4382_s28 = scalar_lea.vmem %s9778_s3, %s9784_s18 }
 0x174   : > { %7633 = vmatpush3.bf16.msra.mxu0 %v8012_v10  ;;  %v8021_v19 = vld [vmem:[%s9424_s10 + $0x98] sm:$0xff]   ;;  %v8025_v23 = vld [vmem:[%s9424_s10 + $0xa0] sm:$0xff]   ;;  %v8029_v27 = vld [vmem:[%s9424_s10 + $0xa8] sm:$0xff]   ;;  %s7337_s29 = sshll.u32 %s9784_s18, 2 }
 0x175   : > { %7655 = vmatpush3.bf16.msra.mxu1 %v8013_v11  ;;  %7634 = vmatprep.subr.bf16.mxu0 %v8014_v12  ;;  %v8030_v28 = vld [vmem:[%s9424_s10 + $0x70] sm:$0xff]   ;;  %v8034_v32 = vld [vmem:[%s9424_s10 + $0x78] sm:$0xff]   ;;  %v8042_v40 = vld [vmem:[%s9424_s10 + $0x140] sm:$0xff]   ;;  %v7342_v12 = vcombine.low %v9458_v33, %v9458_v33  ;;  %s4386_s5 = scalar_lea.vmem %s9779_s4, %s7337_s29 }
 0x176   : > { %7656 = vmatprep.subr.bf16.mxu1 %v8015_v13  ;;  %v8031_v29 = vld [vmem:[%s9424_s10 + $0xf0] sm:$0xff]   ;;  %v8035_v34 = vld [vmem:[%s9424_s10 + $0xf8] sm:$0xff]   ;;  %v8043_v41 = vld [vmem:[%s9424_s10 + $0x1c0] sm:$0xff]   ;;  %v7344_v13 = vcombine.low %v9464_v35, %v9464_v35 }
 0x177   : > { %v8032_v30 = vld [vmem:[%s9424_s10 + $0x30] sm:$0xff]   ;;  %v8036_v36 = vld [vmem:[%s9424_s10 + $0x38] sm:$0xff]   ;;  %v8044_v43 = vld [vmem:[%s9424_s10 + $0x100] sm:$0xff]  }
 0x178   : > { %7635 = vmatpush3.bf16.msra.mxu0 %v8016_v14  ;;  %v8033_v31 = vld [vmem:[%s9424_s10 + $0xb0] sm:$0xff]   ;;  %v8037_v37 = vld [vmem:[%s9424_s10 + $0xb8] sm:$0xff]   ;;  %v8045_v45 = vld [vmem:[%s9424_s10 + $0x180] sm:$0xff]  }
 0x179   : > { %7657 = vmatpush3.bf16.msra.mxu1 %v8017_v15  ;;  %7636 = vmatprep.subr.bf16.mxu0 %v8018_v16  ;;  %v8046_v46 = vld [vmem:[%s9424_s10 + $0x148] sm:$0xff]   ;;  %v8050_v50 = vld [vmem:[%s9424_s10 + $0x150] sm:$0xff]   ;;  %v8054_v54 = vld [vmem:[%s9424_s10 + $0x158] sm:$0xff]  }
 0x17a   : > { %7658 = vmatprep.subr.bf16.mxu1 %v8019_v17  ;;  %v8047_v47 = vld [vmem:[%s9424_s10 + $0x1c8] sm:$0xff]   ;;  %v8051_v51 = vld [vmem:[%s9424_s10 + $0x1d0] sm:$0xff]   ;;  %v8055_v55 = vld [vmem:[%s9424_s10 + $0x1d8] sm:$0xff]  }
 0x17b   : > { %v8048_v48 = vld [vmem:[%s9424_s10 + $0x108] sm:$0xff]   ;;  %v8052_v52 = vld [vmem:[%s9424_s10 + $0x110] sm:$0xff]   ;;  %v8056_v56 = vld [vmem:[%s9424_s10 + $0x118] sm:$0xff]  }
 0x17c   : > { %7637 = vmatpush3.bf16.msra.mxu0 %v8020_v18  ;;  %v8049_v49 = vld [vmem:[%s9424_s10 + $0x188] sm:$0xff]   ;;  %v8053_v53 = vld [vmem:[%s9424_s10 + $0x190] sm:$0xff]   ;;  %v8057_v57 = vld [vmem:[%s9424_s10 + $0x198] sm:$0xff]  }
 0x17d   : > { %7659 = vmatpush3.bf16.msra.mxu1 %v8021_v19  ;;  %7638 = vmatprep.subr.bf16.mxu0 %v8022_v20  ;;  %v8058_v58 = vld [vmem:[%s9424_s10 + $0x160] sm:$0xff]   ;;  %v8062_v62 = vld [vmem:[%s9424_s10 + $0x168] sm:$0xff]   ;;  %v8066_v2 = vld [vmem:[%s9424_s10 + $0x170] sm:$0xff]  }
 0x17e   : > { %7660 = vmatprep.subr.bf16.mxu1 %v8023_v21  ;;  %v8059_v59 = vld [vmem:[%s9424_s10 + $0x1e0] sm:$0xff]   ;;  %v8063_v63 = vld [vmem:[%s9424_s10 + $0x1e8] sm:$0xff]   ;;  %v8067_v3 = vld [vmem:[%s9424_s10 + $0x1f0] sm:$0xff]  }
 0x17f   : > { %v8060_v60 = vld [vmem:[%s9424_s10 + $0x120] sm:$0xff]   ;;  %v8064_v0 = vld [vmem:[%s9424_s10 + $0x128] sm:$0xff]   ;;  %v8068_v4 = vld [vmem:[%s9424_s10 + $0x130] sm:$0xff]  }
 0x180   : > { %7639 = vmatpush3.bf16.msra.mxu0 %v8024_v22  ;;  %v8061_v61 = vld [vmem:[%s9424_s10 + $0x1a0] sm:$0xff]   ;;  %v8065_v1 = vld [vmem:[%s9424_s10 + $0x1a8] sm:$0xff]   ;;  %v8069_v5 = vld [vmem:[%s9424_s10 + $0x1b0] sm:$0xff]  }
 0x181   : > { %7661 = vmatpush3.bf16.msra.mxu1 %v8025_v23  ;;  %7640 = vmatprep.subr.bf16.mxu0 %v8026_v24  ;;  %v8070_v6 = vld [vmem:[%s9424_s10 + $0x178] sm:$0xff]   ;;  %v9508_v7 = vld [vmem:[%s9775_s0 + $0x20] sm:$0xff]  ;;  %v9514_v9 = vld [vmem:[%s9775_s0 + $0x28] sm:$0xff] }
 0x182   : > { %7662 = vmatprep.subr.bf16.mxu1 %v8027_v25  ;;  %v8071_v8 = vld [vmem:[%s9424_s10 + $0x1f8] sm:$0xff]   ;;  %v8078_v14 = vld [vmem:[%s9424_s10 + $0x240] sm:$0xff]   ;;  %v7347_v16 = vcombine.high %v9508_v7, %v9508_v7  ;;  %v7349_v18 = vcombine.high %v9514_v9, %v9514_v9  ;;  %v8082_v20 = vld [vmem:[%s9424_s10 + $0x248] sm:$0xff]  }
 0x183   : > { %v8072_v10 = vld [vmem:[%s9424_s10 + $0x138] sm:$0xff]   ;;  %v8079_v15 = vld [vmem:[%s9424_s10 + $0x2c0] sm:$0xff]   ;;  %v8083_v21 = vld [vmem:[%s9424_s10 + $0x2c8] sm:$0xff]  }
 0x184   : > { %7641 = vmatpush3.bf16.msra.mxu0 %v8028_v26  ;;  %v8073_v11 = vld [vmem:[%s9424_s10 + $0x1b8] sm:$0xff]   ;;  %v8080_v17 = vld [vmem:[%s9424_s10 + $0x200] sm:$0xff]   ;;  %v8084_v22 = vld [vmem:[%s9424_s10 + $0x208] sm:$0xff]  }
 0x185   : > { %7663 = vmatpush3.bf16.msra.mxu1 %v8029_v27  ;;  %7642 = vmatprep.subr.bf16.mxu0 %v8030_v28  ;;  %v8081_v19 = vld [vmem:[%s9424_s10 + $0x280] sm:$0xff]   ;;  %v8085_v23 = vld [vmem:[%s9424_s10 + $0x288] sm:$0xff]   ;;  %v8086_v24 = vld [vmem:[%s9424_s10 + $0x250] sm:$0xff]  }
 0x186   : > { %7664 = vmatprep.subr.bf16.mxu1 %v8031_v29  ;;  %v8087_v25 = vld [vmem:[%s9424_s10 + $0x2d0] sm:$0xff]   ;;  %v8090_v28 = vld [vmem:[%s9424_s10 + $0x258] sm:$0xff]   ;;  %v8095_v33 = vld [vmem:[%s9424_s10 + $0x2e0] sm:$0xff]  }
 0x187   : > { %v8088_v26 = vld [vmem:[%s9424_s10 + $0x210] sm:$0xff]   ;;  %v8091_v29 = vld [vmem:[%s9424_s10 + $0x2d8] sm:$0xff]   ;;  %v8097_v35 = vld [vmem:[%s9424_s10 + $0x2a0] sm:$0xff]  }
 0x188   : > { %7643 = vmatpush3.bf16.msra.mxu0 %v8032_v30  ;;  %v8089_v27 = vld [vmem:[%s9424_s10 + $0x290] sm:$0xff]   ;;  %v8092_v30 = vld [vmem:[%s9424_s10 + $0x218] sm:$0xff]  }
 0x189   : > { %7665 = vmatpush3.bf16.msra.mxu1 %v8033_v31  ;;  %7644 = vmatprep.subr.bf16.mxu0 %v8034_v32  ;;  %v8093_v31 = vld [vmem:[%s9424_s10 + $0x298] sm:$0xff]   ;;  %v8094_v32 = vld [vmem:[%s9424_s10 + $0x260] sm:$0xff]  }
 0x18a   : > { %7666 = vmatprep.subr.bf16.mxu1 %v8035_v34  ;;  %v8096_v34 = vld [vmem:[%s9424_s10 + $0x220] sm:$0xff]  }
 0x18c   : > { %7645 = vmatpush3.bf16.msra.mxu0 %v8036_v36  ;;  %v8098_v36 = vld [vmem:[%s9424_s10 + $0x268] sm:$0xff]  }
 0x18d   : > { %7667 = vmatpush3.bf16.msra.mxu1 %v8037_v37  ;;  %7674 = vmatprep.subr.bf16.mxu0 %v8042_v40  ;;  %v8099_v37 = vld [vmem:[%s9424_s10 + $0x2e8] sm:$0xff]   ;;  %v8102_v40 = vld [vmem:[%s9424_s10 + $0x270] sm:$0xff]  }
 0x18e   : > { %7696 = vmatprep.subr.bf16.mxu1 %v8043_v41  ;;  %v8103_v41 = vld [vmem:[%s9424_s10 + $0x2f0] sm:$0xff]  }
 0x18f   : > { %6597 = vmatmul.mubr.bf16.vlgmr.msra.gmra.mrb[0].mxu0 %v7338_v38  ;;  %v8100_v38 = vld [vmem:[%s9424_s10 + $0x228] sm:$0xff]  }
 0x190   : > { %6637 = vmatmul.mubr.bf16.vlgmr.msra.gmra.mrb[0].mxu1 %v7340_v39  ;;  %7675 = vmatpush3.bf16.msra.mxu0 %v8044_v43  ;;  %v8101_v39 = vld [vmem:[%s9424_s10 + $0x2a8] sm:$0xff]   ;;  %v8105_v43 = vld [vmem:[%s9424_s10 + $0x2b0] sm:$0xff]  }
 0x191   : > { %7697 = vmatpush3.bf16.msra.mxu1 %v8045_v45  ;;  %6676 = vmatprep.mubr.bf16.mxu0 %v7343_v42  ;;  %v8104_v42 = vld [vmem:[%s9424_s10 + $0x230] sm:$0xff]   ;;  %v8107_v45 = vld [vmem:[%s9424_s10 + $0x2f8] sm:$0xff]  }
 0x192   : > { %7676 = vmatprep.subr.bf16.mxu0 %v8046_v46  ;;  %6716 = vmatprep.mubr.bf16.mxu1 %v7345_v44  ;;  %v8106_v44 = vld [vmem:[%s9424_s10 + $0x278] sm:$0xff]  }
 0x193   : > { %7698 = vmatprep.subr.bf16.mxu1 %v8047_v47  ;;  %v8108_v46 = vld [vmem:[%s9424_s10 + $0x238] sm:$0xff]  }
 0x194   : > { %7677 = vmatpush3.bf16.msra.mxu0 %v8048_v48  ;;  %v8109_v47 = vld [vmem:[%s9424_s10 + $0x2b8] sm:$0xff]   ;;  %v7346_v48 = vcombine.low %v9508_v7, %v9508_v7  ;;  %v8135_v7 = vld [vmem:[%s9424_s10 + $0x3e8] sm:$0xff]  }
 0x195   : > { %7699 = vmatpush3.bf16.msra.mxu1 %v8049_v49  ;;  %7678 = vmatprep.subr.bf16.mxu0 %v8050_v50  ;;  %v7348_v49 = vcombine.low %v9514_v9, %v9514_v9  ;;  %v8114_v50 = vld [vmem:[%s9424_s10 + $0x340] sm:$0xff]   ;;  %v8137_v9 = vld [vmem:[%s9424_s10 + $0x3a8] sm:$0xff]  }
 0x196   : > { %7700 = vmatprep.subr.bf16.mxu1 %v8051_v51  ;;  %v8115_v51 = vld [vmem:[%s9424_s10 + $0x3c0] sm:$0xff]  }
 0x198   : > { %7679 = vmatpush3.bf16.msra.mxu0 %v8052_v52  ;;  %v8116_v52 = vld [vmem:[%s9424_s10 + $0x300] sm:$0xff]  }
 0x199   : > { %7701 = vmatpush3.bf16.msra.mxu1 %v8053_v53  ;;  %7680 = vmatprep.subr.bf16.mxu0 %v8054_v54  ;;  %v8117_v53 = vld [vmem:[%s9424_s10 + $0x380] sm:$0xff]   ;;  %v8118_v54 = vld [vmem:[%s9424_s10 + $0x348] sm:$0xff]  }
 0x19a   : > { %7702 = vmatprep.subr.bf16.mxu1 %v8055_v55  ;;  %v8119_v55 = vld [vmem:[%s9424_s10 + $0x3c8] sm:$0xff]  }
 0x19c   : > { %7681 = vmatpush3.bf16.msra.mxu0 %v8056_v56  ;;  %v8120_v56 = vld [vmem:[%s9424_s10 + $0x308] sm:$0xff]  }
 0x19d   : > { %7703 = vmatpush3.bf16.msra.mxu1 %v8057_v57  ;;  %7682 = vmatprep.subr.bf16.mxu0 %v8058_v58  ;;  %v8121_v57 = vld [vmem:[%s9424_s10 + $0x388] sm:$0xff]   ;;  %v8122_v58 = vld [vmem:[%s9424_s10 + $0x350] sm:$0xff]  }
 0x19e   : > { %7704 = vmatprep.subr.bf16.mxu1 %v8059_v59  ;;  %v8123_v59 = vld [vmem:[%s9424_s10 + $0x3d0] sm:$0xff]  }
 0x1a0   : > { %7683 = vmatpush3.bf16.msra.mxu0 %v8060_v60  ;;  %v8124_v60 = vld [vmem:[%s9424_s10 + $0x310] sm:$0xff]  }
 0x1a1   : > { %7705 = vmatpush3.bf16.msra.mxu1 %v8061_v61  ;;  %7684 = vmatprep.subr.bf16.mxu0 %v8062_v62  ;;  %v8125_v61 = vld [vmem:[%s9424_s10 + $0x390] sm:$0xff]   ;;  %v8126_v62 = vld [vmem:[%s9424_s10 + $0x358] sm:$0xff]  }
 0x1a2   : > { %7706 = vmatprep.subr.bf16.mxu1 %v8063_v63  ;;  %v8127_v63 = vld [vmem:[%s9424_s10 + $0x3d8] sm:$0xff]  }
 0x1a4   : > { %7685 = vmatpush3.bf16.msra.mxu0 %v8064_v0  ;;  %v8128_v0 = vld [vmem:[%s9424_s10 + $0x318] sm:$0xff]  }
 0x1a5   : > { %7707 = vmatpush3.bf16.msra.mxu1 %v8065_v1  ;;  %7686 = vmatprep.subr.bf16.mxu0 %v8066_v2  ;;  %v8129_v1 = vld [vmem:[%s9424_s10 + $0x398] sm:$0xff]   ;;  %v8130_v2 = vld [vmem:[%s9424_s10 + $0x360] sm:$0xff]  }
 0x1a6   : > { %7708 = vmatprep.subr.bf16.mxu1 %v8067_v3  ;;  %v8131_v3 = vld [vmem:[%s9424_s10 + $0x3e0] sm:$0xff]  }
 0x1a8   : > { %7687 = vmatpush3.bf16.msra.mxu0 %v8068_v4  ;;  %v8132_v4 = vld [vmem:[%s9424_s10 + $0x320] sm:$0xff]  }
 0x1a9   : > { %7709 = vmatpush3.bf16.msra.mxu1 %v8069_v5  ;;  %7688 = vmatprep.subr.bf16.mxu0 %v8070_v6  ;;  %v8133_v5 = vld [vmem:[%s9424_s10 + $0x3a0] sm:$0xff]   ;;  %v8134_v6 = vld [vmem:[%s9424_s10 + $0x368] sm:$0xff]  }
 0x1aa   : > { %7710 = vmatprep.subr.bf16.mxu1 %v8071_v8  ;;  %v8136_v8 = vld [vmem:[%s9424_s10 + $0x328] sm:$0xff]  }
 0x1ac   : > { %7689 = vmatpush3.bf16.msra.mxu0 %v8072_v10  ;;  %v8138_v10 = vld [vmem:[%s9424_s10 + $0x370] sm:$0xff]  }
 0x1ad   : > { %7711 = vmatpush3.bf16.msra.mxu1 %v8073_v11  ;;  %7718 = vmatprep.subr.bf16.mxu0 %v8078_v14  ;;  %v8139_v11 = vld [vmem:[%s9424_s10 + $0x3f0] sm:$0xff]   ;;  %v8142_v14 = vld [vmem:[%s9424_s10 + $0x378] sm:$0xff]  }
 0x1ae   : > { %7740 = vmatprep.subr.bf16.mxu1 %v8079_v15  ;;  %v8143_v15 = vld [vmem:[%s9424_s10 + $0x3f8] sm:$0xff]  }
 0x1af   : > { %6677 = vmatmul.mubr.bf16.vlgmr.msra.gmra.mrb[4].mxu0 %v7342_v12  ;;  %v8140_v12 = vld [vmem:[%s9424_s10 + $0x330] sm:$0xff]  }
 0x1b0   : > { %6717 = vmatmul.mubr.bf16.vlgmr.msra.gmra.mrb[4].mxu1 %v7344_v13  ;;  %7719 = vmatpush3.bf16.msra.mxu0 %v8080_v17  ;;  %v8141_v13 = vld [vmem:[%s9424_s10 + $0x3b0] sm:$0xff]   ;;  %v8145_v17 = vld [vmem:[%s9424_s10 + $0x3b8] sm:$0xff]  }
 0x1b1   : > { %7741 = vmatpush3.bf16.msra.mxu1 %v8081_v19  ;;  %6756 = vmatprep.mubr.bf16.mxu0 %v7347_v16  ;;  %v8144_v16 = vld [vmem:[%s9424_s10 + $0x338] sm:$0xff]  }
 0x1b2   : > { %7720 = vmatprep.subr.bf16.mxu0 %v8082_v20  ;;  %6796 = vmatprep.mubr.bf16.mxu1 %v7349_v18  ;;  %v4394_v18 = vld [vmem:[%s9775_s0 + $0x30] sm:$0xff]  ;;  %v4395_v19 = vld [vmem:[%s9775_s0 + $0x38] sm:$0xff] }
 0x1b3   : > { %7742 = vmatprep.subr.bf16.mxu1 %v8083_v21  ;;  %v7350_v20 = vcombine.low %v4394_v18, %v4394_v18  ;;  %v7351_v21 = vcombine.high %v4394_v18, %v4394_v18  ;;  %v8206_v18 = vld [vmem:[%s9424_s10 + $0x568] sm:$0xff]  }
 0x1b4   : > { %7721 = vmatpush3.bf16.msra.mxu0 %v8084_v22  ;;  %v7352_v22 = vcombine.low %v4395_v19, %v4395_v19 }
 0x1b5   : > { %7743 = vmatpush3.bf16.msra.mxu1 %v8085_v23  ;;  %7722 = vmatprep.subr.bf16.mxu0 %v8086_v24  ;;  %v7353_v23 = vcombine.high %v4395_v19, %v4395_v19  ;;  %v8150_v24 = vld [vmem:[%s9424_s10 + $0x440] sm:$0xff]   ;;  %v8207_v19 = vld [vmem:[%s9424_s10 + $0x5e8] sm:$0xff]  }
 0x1b6   : > { %7744 = vmatprep.subr.bf16.mxu1 %v8087_v25  ;;  %v8151_v25 = vld [vmem:[%s9424_s10 + $0x4c0] sm:$0xff]  }
 0x1b8   : > { %7723 = vmatpush3.bf16.msra.mxu0 %v8088_v26  ;;  %v8152_v26 = vld [vmem:[%s9424_s10 + $0x400] sm:$0xff]  }
 0x1b9   : > { %7745 = vmatpush3.bf16.msra.mxu1 %v8089_v27  ;;  %7724 = vmatprep.subr.bf16.mxu0 %v8090_v28  ;;  %v8153_v27 = vld [vmem:[%s9424_s10 + $0x480] sm:$0xff]   ;;  %v8154_v28 = vld [vmem:[%s9424_s10 + $0x448] sm:$0xff]  }
 0x1ba   : > { %7746 = vmatprep.subr.bf16.mxu1 %v8091_v29  ;;  %v8155_v29 = vld [vmem:[%s9424_s10 + $0x4c8] sm:$0xff]  }
 0x1bc   : > { %7725 = vmatpush3.bf16.msra.mxu0 %v8092_v30  ;;  %v8156_v30 = vld [vmem:[%s9424_s10 + $0x408] sm:$0xff]  }
 0x1bd   : > { %7747 = vmatpush3.bf16.msra.mxu1 %v8093_v31  ;;  %7726 = vmatprep.subr.bf16.mxu0 %v8094_v32  ;;  %v8157_v31 = vld [vmem:[%s9424_s10 + $0x488] sm:$0xff]   ;;  %v8158_v32 = vld [vmem:[%s9424_s10 + $0x450] sm:$0xff]  }
 0x1be   : > { %7748 = vmatprep.subr.bf16.mxu1 %v8095_v33  ;;  %v8159_v33 = vld [vmem:[%s9424_s10 + $0x4d0] sm:$0xff]  }
 0x1c0   : > { %7727 = vmatpush3.bf16.msra.mxu0 %v8096_v34  ;;  %v8160_v34 = vld [vmem:[%s9424_s10 + $0x410] sm:$0xff]  }
 0x1c1   : > { %7749 = vmatpush3.bf16.msra.mxu1 %v8097_v35  ;;  %7728 = vmatprep.subr.bf16.mxu0 %v8098_v36  ;;  %v8161_v35 = vld [vmem:[%s9424_s10 + $0x490] sm:$0xff]   ;;  %v8162_v36 = vld [vmem:[%s9424_s10 + $0x458] sm:$0xff]  }
 0x1c2   : > { %7750 = vmatprep.subr.bf16.mxu1 %v8099_v37  ;;  %v8163_v37 = vld [vmem:[%s9424_s10 + $0x4d8] sm:$0xff]  }
 0x1c4   : > { %7729 = vmatpush3.bf16.msra.mxu0 %v8100_v38  ;;  %v8164_v38 = vld [vmem:[%s9424_s10 + $0x418] sm:$0xff]  }
 0x1c5   : > { %7751 = vmatpush3.bf16.msra.mxu1 %v8101_v39  ;;  %7730 = vmatprep.subr.bf16.mxu0 %v8102_v40  ;;  %v8165_v39 = vld [vmem:[%s9424_s10 + $0x498] sm:$0xff]   ;;  %v8166_v40 = vld [vmem:[%s9424_s10 + $0x460] sm:$0xff]  }
 0x1c6   : > { %7752 = vmatprep.subr.bf16.mxu1 %v8103_v41  ;;  %v8167_v41 = vld [vmem:[%s9424_s10 + $0x4e0] sm:$0xff]  }
 0x1c8   : > { %7731 = vmatpush3.bf16.msra.mxu0 %v8104_v42  ;;  %v8168_v42 = vld [vmem:[%s9424_s10 + $0x420] sm:$0xff]  }
 0x1c9   : > { %7753 = vmatpush3.bf16.msra.mxu1 %v8105_v43  ;;  %7732 = vmatprep.subr.bf16.mxu0 %v8106_v44  ;;  %v8169_v43 = vld [vmem:[%s9424_s10 + $0x4a0] sm:$0xff]   ;;  %v8170_v44 = vld [vmem:[%s9424_s10 + $0x468] sm:$0xff]  }
 0x1ca   : > { %7754 = vmatprep.subr.bf16.mxu1 %v8107_v45  ;;  %v8171_v45 = vld [vmem:[%s9424_s10 + $0x4e8] sm:$0xff]  }
 0x1cc   : > { %7733 = vmatpush3.bf16.msra.mxu0 %v8108_v46  ;;  %v8172_v46 = vld [vmem:[%s9424_s10 + $0x428] sm:$0xff]  }
 0x1cd   : > { %7755 = vmatpush3.bf16.msra.mxu1 %v8109_v47  ;;  %7762 = vmatprep.subr.bf16.mxu0 %v8114_v50  ;;  %v8173_v47 = vld [vmem:[%s9424_s10 + $0x4a8] sm:$0xff]   ;;  %v8176_v50 = vld [vmem:[%s9424_s10 + $0x430] sm:$0xff]  }
 0x1ce   : > { %7784 = vmatprep.subr.bf16.mxu1 %v8115_v51  ;;  %v8177_v51 = vld [vmem:[%s9424_s10 + $0x4b0] sm:$0xff]  }
 0x1cf   : > { %6757 = vmatmul.mubr.bf16.vlgmr.msra.gmra.mrb[8].mxu0 %v7346_v48  ;;  %v8174_v48 = vld [vmem:[%s9424_s10 + $0x470] sm:$0xff]  }
 0x1d0   : > { %6797 = vmatmul.mubr.bf16.vlgmr.msra.gmra.mrb[8].mxu1 %v7348_v49  ;;  %7763 = vmatpush3.bf16.msra.mxu0 %v8116_v52  ;;  %v8175_v49 = vld [vmem:[%s9424_s10 + $0x4f0] sm:$0xff]   ;;  %v8178_v52 = vld [vmem:[%s9424_s10 + $0x478] sm:$0xff]  }
 0x1d1   : > { %7785 = vmatpush3.bf16.msra.mxu1 %v8117_v53  ;;  %7764 = vmatprep.subr.bf16.mxu0 %v8118_v54  ;;  %v8179_v53 = vld [vmem:[%s9424_s10 + $0x4f8] sm:$0xff]  }
 0x1d2   : > { %7786 = vmatprep.subr.bf16.mxu1 %v8119_v55  ;;  %6836 = vmatprep.mubr.bf16.mxu0 %v7351_v21  ;;  %v8180_v54 = vld [vmem:[%s9424_s10 + $0x438] sm:$0xff]   ;;  %v8209_v21 = vld [vmem:[%s9424_s10 + $0x5a8] sm:$0xff]  }
 0x1d3   : > { %6876 = vmatprep.mubr.bf16.mxu1 %v7353_v23  ;;  %v8181_v55 = vld [vmem:[%s9424_s10 + $0x4b8] sm:$0xff]   ;;  %v8211_v23 = vld [vmem:[%s9424_s10 + $0x5f0] sm:$0xff]  }
 0x1d4   : > { %7765 = vmatpush3.bf16.msra.mxu0 %v8120_v56  ;;  %v4396_v56 = vld [vmem:[%s9775_s0 + $0x40] sm:$0xff] }
 0x1d5   : > { %7787 = vmatpush3.bf16.msra.mxu1 %v8121_v57  ;;  %7766 = vmatprep.subr.bf16.mxu0 %v8122_v58  ;;  %v7354_v57 = vcombine.low %v4396_v56, %v4396_v56  ;;  %v7355_v58 = vcombine.high %v4396_v56, %v4396_v56  ;;  %v8242_v56 = vld [vmem:[%s9424_s10 + $0x668] sm:$0xff]  }
 0x1d6   : > { %7788 = vmatprep.subr.bf16.mxu1 %v8123_v59  ;;  %v4397_v59 = vld [vmem:[%s9775_s0 + $0x48] sm:$0xff] }
 0x1d8   : > { %7767 = vmatpush3.bf16.msra.mxu0 %v8124_v60  ;;  %v7356_v60 = vcombine.low %v4397_v59, %v4397_v59 }
 0x1d9   : > { %7789 = vmatpush3.bf16.msra.mxu1 %v8125_v61  ;;  %7768 = vmatprep.subr.bf16.mxu0 %v8126_v62  ;;  %v7357_v61 = vcombine.high %v4397_v59, %v4397_v59  ;;  %v8186_v62 = vld [vmem:[%s9424_s10 + $0x540] sm:$0xff]   ;;  %v8245_v59 = vld [vmem:[%s9424_s10 + $0x6a8] sm:$0xff]  }
 0x1da   : > { %7790 = vmatprep.subr.bf16.mxu1 %v8127_v63  ;;  %v8187_v63 = vld [vmem:[%s9424_s10 + $0x5c0] sm:$0xff]  }
 0x1dc   : > { %7769 = vmatpush3.bf16.msra.mxu0 %v8128_v0  ;;  %v8188_v0 = vld [vmem:[%s9424_s10 + $0x500] sm:$0xff]  }
 0x1dd   : > { %7791 = vmatpush3.bf16.msra.mxu1 %v8129_v1  ;;  %7770 = vmatprep.subr.bf16.mxu0 %v8130_v2  ;;  %v8189_v1 = vld [vmem:[%s9424_s10 + $0x580] sm:$0xff]   ;;  %v8190_v2 = vld [vmem:[%s9424_s10 + $0x548] sm:$0xff]  }
 0x1de   : > { %7792 = vmatprep.subr.bf16.mxu1 %v8131_v3  ;;  %v8191_v3 = vld [vmem:[%s9424_s10 + $0x5c8] sm:$0xff]  }
 0x1e0   : > { %7771 = vmatpush3.bf16.msra.mxu0 %v8132_v4  ;;  %v8192_v4 = vld [vmem:[%s9424_s10 + $0x508] sm:$0xff]  }
 0x1e1   : > { %7793 = vmatpush3.bf16.msra.mxu1 %v8133_v5  ;;  %7772 = vmatprep.subr.bf16.mxu0 %v8134_v6  ;;  %v8193_v5 = vld [vmem:[%s9424_s10 + $0x588] sm:$0xff]   ;;  %v8194_v6 = vld [vmem:[%s9424_s10 + $0x550] sm:$0xff]  }
 0x1e2   : > { %7794 = vmatprep.subr.bf16.mxu1 %v8135_v7  ;;  %v8195_v7 = vld [vmem:[%s9424_s10 + $0x5d0] sm:$0xff]  }
 0x1e4   : > { %7773 = vmatpush3.bf16.msra.mxu0 %v8136_v8  ;;  %v8196_v8 = vld [vmem:[%s9424_s10 + $0x510] sm:$0xff]  }
 0x1e5   : > { %7795 = vmatpush3.bf16.msra.mxu1 %v8137_v9  ;;  %7774 = vmatprep.subr.bf16.mxu0 %v8138_v10  ;;  %v8197_v9 = vld [vmem:[%s9424_s10 + $0x590] sm:$0xff]   ;;  %v8198_v10 = vld [vmem:[%s9424_s10 + $0x558] sm:$0xff]  }
 0x1e6   : > { %7796 = vmatprep.subr.bf16.mxu1 %v8139_v11  ;;  %v8199_v11 = vld [vmem:[%s9424_s10 + $0x5d8] sm:$0xff]  }
 0x1e8   : > { %7775 = vmatpush3.bf16.msra.mxu0 %v8140_v12  ;;  %v8200_v12 = vld [vmem:[%s9424_s10 + $0x518] sm:$0xff]  }
 0x1e9   : > { %7797 = vmatpush3.bf16.msra.mxu1 %v8141_v13  ;;  %7776 = vmatprep.subr.bf16.mxu0 %v8142_v14  ;;  %v8201_v13 = vld [vmem:[%s9424_s10 + $0x598] sm:$0xff]   ;;  %v8202_v14 = vld [vmem:[%s9424_s10 + $0x560] sm:$0xff]  }
 0x1ea   : > { %7798 = vmatprep.subr.bf16.mxu1 %v8143_v15  ;;  %v8203_v15 = vld [vmem:[%s9424_s10 + $0x5e0] sm:$0xff]  }
 0x1ec   : > { %7777 = vmatpush3.bf16.msra.mxu0 %v8144_v16  ;;  %v8204_v16 = vld [vmem:[%s9424_s10 + $0x520] sm:$0xff]  }
 0x1ed   : > { %7799 = vmatpush3.bf16.msra.mxu1 %v8145_v17  ;;  %7806 = vmatprep.subr.bf16.mxu0 %v8150_v24  ;;  %v8205_v17 = vld [vmem:[%s9424_s10 + $0x5a0] sm:$0xff]   ;;  %v8212_v24 = vld [vmem:[%s9424_s10 + $0x530] sm:$0xff]  }
 0x1ee   : > { %7828 = vmatprep.subr.bf16.mxu1 %v8151_v25  ;;  %v8213_v25 = vld [vmem:[%s9424_s10 + $0x5b0] sm:$0xff]  }
 0x1ef   : > { %6837 = vmatmul.mubr.bf16.vlgmr.msra.gmra.mrb[12].mxu0 %v7350_v20  ;;  %v8208_v20 = vld [vmem:[%s9424_s10 + $0x528] sm:$0xff]  }
 0x1f0   : > { %6877 = vmatmul.mubr.bf16.vlgmr.msra.gmra.mrb[12].mxu1 %v7352_v22  ;;  %7807 = vmatpush3.bf16.msra.mxu0 %v8152_v26  ;;  %v8210_v22 = vld [vmem:[%s9424_s10 + $0x570] sm:$0xff]   ;;  %v8214_v26 = vld [vmem:[%s9424_s10 + $0x578] sm:$0xff]  }
 0x1f1   : > { %7829 = vmatpush3.bf16.msra.mxu1 %v8153_v27  ;;  %7808 = vmatprep.subr.bf16.mxu0 %v8154_v28  ;;  %v8215_v27 = vld [vmem:[%s9424_s10 + $0x5f8] sm:$0xff]  }
 0x1f2   : > { %7830 = vmatprep.subr.bf16.mxu1 %v8155_v29  ;;  %6916 = vmatprep.mubr.bf16.mxu0 %v7355_v58  ;;  %v8216_v28 = vld [vmem:[%s9424_s10 + $0x538] sm:$0xff]   ;;  %v8244_v58 = vld [vmem:[%s9424_s10 + $0x628] sm:$0xff]  }
 0x1f3   : > { %6956 = vmatprep.mubr.bf16.mxu1 %v7357_v61  ;;  %v8217_v29 = vld [vmem:[%s9424_s10 + $0x5b8] sm:$0xff]   ;;  %v8247_v61 = vld [vmem:[%s9424_s10 + $0x6f0] sm:$0xff]  }
 0x1f4   : > { %7809 = vmatpush3.bf16.msra.mxu0 %v8156_v30  ;;  %v4398_v30 = vld [vmem:[%s9775_s0 + $0x50] sm:$0xff] }
 0x1f5   : > { %7831 = vmatpush3.bf16.msra.mxu1 %v8157_v31  ;;  %7810 = vmatprep.subr.bf16.mxu0 %v8158_v32  ;;  %v4399_v31 = vld [vmem:[%s9775_s0 + $0x58] sm:$0xff]  ;;  %v7358_v32 = vcombine.low %v4398_v30, %v4398_v30 }
 0x1f6   : > { %7832 = vmatprep.subr.bf16.mxu1 %v8159_v33  ;;  %v7359_v33 = vcombine.high %v4398_v30, %v4398_v30 }
 0x1f8   : > { %7811 = vmatpush3.bf16.msra.mxu0 %v8160_v34  ;;  %v7360_v34 = vcombine.low %v4399_v31, %v4399_v31 }
 0x1f9   : > { %7833 = vmatpush3.bf16.msra.mxu1 %v8161_v35  ;;  %7812 = vmatprep.subr.bf16.mxu0 %v8162_v36  ;;  %v7361_v35 = vcombine.high %v4399_v31, %v4399_v31  ;;  %v8222_v36 = vld [vmem:[%s9424_s10 + $0x640] sm:$0xff]  }
 0x1fa   : > { %7834 = vmatprep.subr.bf16.mxu1 %v8163_v37  ;;  %v8223_v37 = vld [vmem:[%s9424_s10 + $0x6c0] sm:$0xff]  }
 0x1fc   : > { %7813 = vmatpush3.bf16.msra.mxu0 %v8164_v38  ;;  %v8224_v38 = vld [vmem:[%s9424_s10 + $0x600] sm:$0xff]  }
 0x1fd   : > { %7835 = vmatpush3.bf16.msra.mxu1 %v8165_v39  ;;  %7814 = vmatprep.subr.bf16.mxu0 %v8166_v40  ;;  %v8225_v39 = vld [vmem:[%s9424_s10 + $0x680] sm:$0xff]   ;;  %v8226_v40 = vld [vmem:[%s9424_s10 + $0x648] sm:$0xff]  }
 0x1fe   : > { %7836 = vmatprep.subr.bf16.mxu1 %v8167_v41  ;;  %v8227_v41 = vld [vmem:[%s9424_s10 + $0x6c8] sm:$0xff]  }
 0x200   : > { %7815 = vmatpush3.bf16.msra.mxu0 %v8168_v42  ;;  %v8228_v42 = vld [vmem:[%s9424_s10 + $0x608] sm:$0xff]  }
 0x201   : > { %7837 = vmatpush3.bf16.msra.mxu1 %v8169_v43  ;;  %7816 = vmatprep.subr.bf16.mxu0 %v8170_v44  ;;  %v8229_v43 = vld [vmem:[%s9424_s10 + $0x688] sm:$0xff]   ;;  %v8230_v44 = vld [vmem:[%s9424_s10 + $0x650] sm:$0xff]  }
 0x202   : > { %7838 = vmatprep.subr.bf16.mxu1 %v8171_v45  ;;  %v8231_v45 = vld [vmem:[%s9424_s10 + $0x6d0] sm:$0xff]  }
 0x204   : > { %7817 = vmatpush3.bf16.msra.mxu0 %v8172_v46  ;;  %v8232_v46 = vld [vmem:[%s9424_s10 + $0x610] sm:$0xff]  }
 0x205   : > { %7839 = vmatpush3.bf16.msra.mxu1 %v8173_v47  ;;  %7818 = vmatprep.subr.bf16.mxu0 %v8174_v48  ;;  %v8233_v47 = vld [vmem:[%s9424_s10 + $0x690] sm:$0xff]   ;;  %v8234_v48 = vld [vmem:[%s9424_s10 + $0x658] sm:$0xff]  }
 0x206   : > { %7840 = vmatprep.subr.bf16.mxu1 %v8175_v49  ;;  %v8235_v49 = vld [vmem:[%s9424_s10 + $0x6d8] sm:$0xff]  }
 0x208   : > { %7819 = vmatpush3.bf16.msra.mxu0 %v8176_v50  ;;  %v8236_v50 = vld [vmem:[%s9424_s10 + $0x618] sm:$0xff]  }
 0x209   : > { %7841 = vmatpush3.bf16.msra.mxu1 %v8177_v51  ;;  %7820 = vmatprep.subr.bf16.mxu0 %v8178_v52  ;;  %v8237_v51 = vld [vmem:[%s9424_s10 + $0x698] sm:$0xff]   ;;  %v8238_v52 = vld [vmem:[%s9424_s10 + $0x660] sm:$0xff]  }
 0x20a   : > { %7842 = vmatprep.subr.bf16.mxu1 %v8179_v53  ;;  %v8239_v53 = vld [vmem:[%s9424_s10 + $0x6e0] sm:$0xff]  }
 0x20c   : > { %7821 = vmatpush3.bf16.msra.mxu0 %v8180_v54  ;;  %v8240_v54 = vld [vmem:[%s9424_s10 + $0x620] sm:$0xff]  }
 0x20d   : > { %7843 = vmatpush3.bf16.msra.mxu1 %v8181_v55  ;;  %7850 = vmatprep.subr.bf16.mxu0 %v8186_v62  ;;  %v8241_v55 = vld [vmem:[%s9424_s10 + $0x6a0] sm:$0xff]   ;;  %v8248_v62 = vld [vmem:[%s9424_s10 + $0x630] sm:$0xff]  }
 0x20e   : > { %7872 = vmatprep.subr.bf16.mxu1 %v8187_v63  ;;  %v8249_v63 = vld [vmem:[%s9424_s10 + $0x6b0] sm:$0xff]  }
 0x20f   : > { %6917 = vmatmul.mubr.bf16.vlgmr.msra.gmra.mrb[16].mxu0 %v7354_v57  ;;  %v8243_v57 = vld [vmem:[%s9424_s10 + $0x6e8] sm:$0xff]  }
 0x210   : > { %6957 = vmatmul.mubr.bf16.vlgmr.msra.gmra.mrb[16].mxu1 %v7356_v60  ;;  %7851 = vmatpush3.bf16.msra.mxu0 %v8188_v0  ;;  %v8246_v60 = vld [vmem:[%s9424_s10 + $0x670] sm:$0xff]   ;;  %v8250_v0 = vld [vmem:[%s9424_s10 + $0x678] sm:$0xff]  }
 0x211   : > { %7873 = vmatpush3.bf16.msra.mxu1 %v8189_v1  ;;  %7852 = vmatprep.subr.bf16.mxu0 %v8190_v2  ;;  %v8251_v1 = vld [vmem:[%s9424_s10 + $0x6f8] sm:$0xff]  }
 0x212   : > { %7874 = vmatprep.subr.bf16.mxu1 %v8191_v3  ;;  %6996 = vmatprep.mubr.bf16.mxu0 %v7359_v33  ;;  %v8252_v2 = vld [vmem:[%s9424_s10 + $0x638] sm:$0xff]   ;;  %v8278_v33 = vld [vmem:[%s9424_s10 + $0x768] sm:$0xff]  }
 0x213   : > { %7036 = vmatprep.mubr.bf16.mxu1 %v7361_v35  ;;  %v8253_v3 = vld [vmem:[%s9424_s10 + $0x6b8] sm:$0xff]  }
 0x214   : > { %7853 = vmatpush3.bf16.msra.mxu0 %v8192_v4  ;;  %v4400_v4 = vld [vmem:[%s9775_s0 + $0x60] sm:$0xff] }
 0x215   : > { %7875 = vmatpush3.bf16.msra.mxu1 %v8193_v5  ;;  %7854 = vmatprep.subr.bf16.mxu0 %v8194_v6  ;;  %v4401_v5 = vld [vmem:[%s9775_s0 + $0x68] sm:$0xff]  ;;  %v7362_v6 = vcombine.low %v4400_v4, %v4400_v4 }
 0x216   : > { %7876 = vmatprep.subr.bf16.mxu1 %v8195_v7  ;;  %v7363_v7 = vcombine.high %v4400_v4, %v4400_v4 }
 0x218   : > { %7855 = vmatpush3.bf16.msra.mxu0 %v8196_v8  ;;  %v7364_v8 = vcombine.low %v4401_v5, %v4401_v5 }
 0x219   : > { %7877 = vmatpush3.bf16.msra.mxu1 %v8197_v9  ;;  %7856 = vmatprep.subr.bf16.mxu0 %v8198_v10  ;;  %v8258_v9 = vld [vmem:[%s9424_s10 + $0x740] sm:$0xff]   ;;  %v7365_v10 = vcombine.high %v4401_v5, %v4401_v5 }
 0x21a   : > { %7878 = vmatprep.subr.bf16.mxu1 %v8199_v11  ;;  %v8259_v11 = vld [vmem:[%s9424_s10 + $0x7c0] sm:$0xff]  }
 0x21c   : > { %7857 = vmatpush3.bf16.msra.mxu0 %v8200_v12  ;;  %v8260_v12 = vld [vmem:[%s9424_s10 + $0x700] sm:$0xff]  }
 0x21d   : > { %7879 = vmatpush3.bf16.msra.mxu1 %v8201_v13  ;;  %7858 = vmatprep.subr.bf16.mxu0 %v8202_v14  ;;  %v8261_v13 = vld [vmem:[%s9424_s10 + $0x780] sm:$0xff]   ;;  %v8262_v14 = vld [vmem:[%s9424_s10 + $0x748] sm:$0xff]  }
 0x21e   : > { %7880 = vmatprep.subr.bf16.mxu1 %v8203_v15  ;;  %v8263_v15 = vld [vmem:[%s9424_s10 + $0x7c8] sm:$0xff]  }
 0x220   : > { %7859 = vmatpush3.bf16.msra.mxu0 %v8204_v16  ;;  %v8264_v16 = vld [vmem:[%s9424_s10 + $0x708] sm:$0xff]  }
 0x221   : > { %7881 = vmatpush3.bf16.msra.mxu1 %v8205_v17  ;;  %7860 = vmatprep.subr.bf16.mxu0 %v8206_v18  ;;  %v8265_v17 = vld [vmem:[%s9424_s10 + $0x788] sm:$0xff]   ;;  %v8266_v18 = vld [vmem:[%s9424_s10 + $0x750] sm:$0xff]  }
 0x222   : > { %7882 = vmatprep.subr.bf16.mxu1 %v8207_v19  ;;  %v8267_v19 = vld [vmem:[%s9424_s10 + $0x7d0] sm:$0xff]  }
 0x224   : > { %7861 = vmatpush3.bf16.msra.mxu0 %v8208_v20  ;;  %v8268_v20 = vld [vmem:[%s9424_s10 + $0x710] sm:$0xff]  }
 0x225   : > { %7883 = vmatpush3.bf16.msra.mxu1 %v8209_v21  ;;  %7862 = vmatprep.subr.bf16.mxu0 %v8210_v22  ;;  %v8269_v21 = vld [vmem:[%s9424_s10 + $0x790] sm:$0xff]   ;;  %v8270_v22 = vld [vmem:[%s9424_s10 + $0x758] sm:$0xff]  }
 0x226   : > { %7884 = vmatprep.subr.bf16.mxu1 %v8211_v23  ;;  %v8271_v23 = vld [vmem:[%s9424_s10 + $0x7d8] sm:$0xff]  }
 0x228   : > { %7863 = vmatpush3.bf16.msra.mxu0 %v8212_v24  ;;  %v8272_v24 = vld [vmem:[%s9424_s10 + $0x718] sm:$0xff]  }
 0x229   : > { %7885 = vmatpush3.bf16.msra.mxu1 %v8213_v25  ;;  %7864 = vmatprep.subr.bf16.mxu0 %v8214_v26  ;;  %v8273_v25 = vld [vmem:[%s9424_s10 + $0x798] sm:$0xff]   ;;  %v8274_v26 = vld [vmem:[%s9424_s10 + $0x760] sm:$0xff]  }
 0x22a   : > { %7886 = vmatprep.subr.bf16.mxu1 %v8215_v27  ;;  %v8275_v27 = vld [vmem:[%s9424_s10 + $0x7e0] sm:$0xff]  }
 0x22c   : > { %7865 = vmatpush3.bf16.msra.mxu0 %v8216_v28  ;;  %v8276_v28 = vld [vmem:[%s9424_s10 + $0x720] sm:$0xff]  }
 0x22d   : > { %7887 = vmatpush3.bf16.msra.mxu1 %v8217_v29  ;;  %7894 = vmatprep.subr.bf16.mxu0 %v8222_v36  ;;  %v8277_v29 = vld [vmem:[%s9424_s10 + $0x7a0] sm:$0xff]  }
 0x22e   : > { %7916 = vmatprep.subr.bf16.mxu1 %v8223_v37 }
 0x22f   : > { %6997 = vmatmul.mubr.bf16.vlgmr.msra.gmra.mrb[20].mxu0 %v7358_v32 }
 0x230   : > { %7037 = vmatmul.mubr.bf16.vlgmr.msra.gmra.mrb[20].mxu1 %v7360_v34  ;;  %7895 = vmatpush3.bf16.msra.mxu0 %v8224_v38  ;;  %v8279_v34 = vld [vmem:[%s9424_s10 + $0x7e8] sm:$0xff]  }
 0x231   : > { %7917 = vmatpush3.bf16.msra.mxu1 %v8225_v39  ;;  %7896 = vmatprep.subr.bf16.mxu0 %v8226_v40  ;;  %v8280_v40 = vld [vmem:[%s9424_s10 + $0x728] sm:$0xff]  }
 0x232   : > { %7918 = vmatprep.subr.bf16.mxu1 %v8227_v41  ;;  %7076 = vmatprep.mubr.bf16.mxu0 %v7363_v7  ;;  %v8281_v41 = vld [vmem:[%s9424_s10 + $0x7a8] sm:$0xff]  }
 0x233   : > { %7116 = vmatprep.mubr.bf16.mxu1 %v7365_v10 }
 0x234   : > { %7897 = vmatpush3.bf16.msra.mxu0 %v8228_v42 }
 0x235   : > { %7919 = vmatpush3.bf16.msra.mxu1 %v8229_v43  ;;  %7898 = vmatprep.subr.bf16.mxu0 %v8230_v44 }
 0x236   : > { %7920 = vmatprep.subr.bf16.mxu1 %v8231_v45  ;;  %v8282_v45 = vld [vmem:[%s9424_s10 + $0x770] sm:$0xff]  }
 0x238   : > { %7899 = vmatpush3.bf16.msra.mxu0 %v8232_v46  ;;  %v8283_v46 = vld [vmem:[%s9424_s10 + $0x7f0] sm:$0xff]  }
 0x239   : > { %7921 = vmatpush3.bf16.msra.mxu1 %v8233_v47  ;;  %7900 = vmatprep.subr.bf16.mxu0 %v8234_v48  ;;  %v8284_v47 = vld [vmem:[%s9424_s10 + $0x730] sm:$0xff]  }
 0x23a   : > { %7922 = vmatprep.subr.bf16.mxu1 %v8235_v49  ;;  %v8285_v48 = vld [vmem:[%s9424_s10 + $0x7b0] sm:$0xff]   ;;  %v8286_v49 = vld [vmem:[%s9424_s10 + $0x778] sm:$0xff]  }
 0x23c   : > { %7901 = vmatpush3.bf16.msra.mxu0 %v8236_v50  ;;  %v8287_v50 = vld [vmem:[%s9424_s10 + $0x7f8] sm:$0xff]  }
 0x23d   : > { %7923 = vmatpush3.bf16.msra.mxu1 %v8237_v51  ;;  %7902 = vmatprep.subr.bf16.mxu0 %v8238_v52  ;;  %v8288_v51 = vld [vmem:[%s9424_s10 + $0x738] sm:$0xff]  }
 0x23e   : > { %7924 = vmatprep.subr.bf16.mxu1 %v8239_v53  ;;  %v8289_v52 = vld [vmem:[%s9424_s10 + $0x7b8] sm:$0xff]   ;;  %v4402_v53 = vld [vmem:[%s9775_s0 + $0x70] sm:$0xff] }
 0x240   : > { %7903 = vmatpush3.bf16.msra.mxu0 %v8240_v54  ;;  %v4403_v54 = vld [vmem:[%s9775_s0 + $0x78] sm:$0xff] }
 0x241   : > { %7925 = vmatpush3.bf16.msra.mxu1 %v8241_v55  ;;  %7904 = vmatprep.subr.bf16.mxu0 %v8242_v56  ;;  %v7366_v55 = vcombine.low %v4402_v53, %v4402_v53  ;;  %v7367_v56 = vcombine.high %v4402_v53, %v4402_v53 }
 0x242   : > { %7926 = vmatprep.subr.bf16.mxu1 %v8243_v57  ;;  %v7368_v57 = vcombine.low %v4403_v54, %v4403_v54 }
 0x244   : > { %7905 = vmatpush3.bf16.msra.mxu0 %v8244_v58  ;;  %v7369_v58 = vcombine.high %v4403_v54, %v4403_v54 }
 0x245   : > { %7927 = vmatpush3.bf16.msra.mxu1 %v8245_v59  ;;  %7906 = vmatprep.subr.bf16.mxu0 %v8246_v60 }
 0x246   : > { %7928 = vmatprep.subr.bf16.mxu1 %v8247_v61 }
 0x248   : > { %7907 = vmatpush3.bf16.msra.mxu0 %v8248_v62 }
 0x249   : > { %7929 = vmatpush3.bf16.msra.mxu1 %v8249_v63  ;;  %7908 = vmatprep.subr.bf16.mxu0 %v8250_v0 }
 0x24a   : > { %7930 = vmatprep.subr.bf16.mxu1 %v8251_v1 }
 0x24c   : > { %7909 = vmatpush3.bf16.msra.mxu0 %v8252_v2 }
 0x24d   : > { %7931 = vmatpush3.bf16.msra.mxu1 %v8253_v3  ;;  %7938 = vmatprep.subr.bf16.mxu0 %v8258_v9 }
 0x24e   : > { %7960 = vmatprep.subr.bf16.mxu1 %v8259_v11 }
 0x24f   : > { %7077 = vmatmul.mubr.bf16.vlgmr.msra.gmra.mrb[24].mxu0 %v7362_v6 }
 0x250   : > { %7117 = vmatmul.mubr.bf16.vlgmr.msra.gmra.mrb[24].mxu1 %v7364_v8  ;;  %7939 = vmatpush3.bf16.msra.mxu0 %v8260_v12 }
 0x251   : > { %7961 = vmatpush3.bf16.msra.mxu1 %v8261_v13  ;;  %7940 = vmatprep.subr.bf16.mxu0 %v8262_v14 }
 0x252   : > { %7962 = vmatprep.subr.bf16.mxu1 %v8263_v15  ;;  %7156 = vmatprep.mubr.bf16.mxu0 %v7367_v56 }
 0x253   : > { %7196 = vmatprep.mubr.bf16.mxu1 %v7369_v58 }
 0x254   : > { %7941 = vmatpush3.bf16.msra.mxu0 %v8264_v16 }
 0x255   : > { %7963 = vmatpush3.bf16.msra.mxu1 %v8265_v17  ;;  %7942 = vmatprep.subr.bf16.mxu0 %v8266_v18 }
 0x256   : > { %7964 = vmatprep.subr.bf16.mxu1 %v8267_v19 }
 0x258   : > { %7943 = vmatpush3.bf16.msra.mxu0 %v8268_v20 }
 0x259   : > { %7965 = vmatpush3.bf16.msra.mxu1 %v8269_v21  ;;  %7944 = vmatprep.subr.bf16.mxu0 %v8270_v22 }
 0x25a   : > { %7966 = vmatprep.subr.bf16.mxu1 %v8271_v23 }
 0x25c   : > { %7945 = vmatpush3.bf16.msra.mxu0 %v8272_v24 }
 0x25d   : > { %7967 = vmatpush3.bf16.msra.mxu1 %v8273_v25  ;;  %7946 = vmatprep.subr.bf16.mxu0 %v8274_v26 }
 0x25e   : > { %7968 = vmatprep.subr.bf16.mxu1 %v8275_v27 }
 0x260   : > { %7947 = vmatpush3.bf16.msra.mxu0 %v8276_v28 }
 0x261   : > { %7969 = vmatpush3.bf16.msra.mxu1 %v8277_v29  ;;  %7948 = vmatprep.subr.bf16.mxu0 %v8278_v33 }
 0x262   : > { %v7646_v30 = vpop.f32.mrb[0].mxu0  ;;  %7970 = vmatprep.subr.bf16.mxu1 %v8279_v34 }
 0x263   : > { %v7668_v31 = vpop.f32.mrb[0].mxu1  ;;  %v7647_v32 = vpop.f32.mrb[1].mxu0 }
 0x264   : > { %v7648_v35 = vadd.f32 %v7647_v32, %v7646_v30  ;;  %v7669_v36 = vpop.f32.mrb[1].mxu1  ;;  %v7649_v37 = vpop.f32.mrb[2].mxu0  ;;  %7949 = vmatpush3.bf16.msra.mxu0 %v8280_v40 }
 0x265   : > { %v7670_v38 = vadd.f32 %v7669_v36, %v7668_v31  ;;  %v7671_v39 = vpop.f32.mrb[2].mxu1  ;;  %v7650_v42 = vpop.f32.mrb[3].mxu0  ;;  %7971 = vmatpush3.bf16.msra.mxu1 %v8281_v41  ;;  %7950 = vmatprep.subr.bf16.mxu0 %v8282_v45 }
 0x266   : > { %v7672_v44 = vpop.f32.mrb[3].mxu1  ;;  %7972 = vmatprep.subr.bf16.mxu1 %v8283_v46 }
 0x267   : > { %v6639_v43 = vadd.f32 %v7670_v38, %v7648_v35 }
 0x268   : > { %7951 = vmatpush3.bf16.msra.mxu0 %v8284_v47 }
 0x269   : > { %7973 = vmatpush3.bf16.msra.mxu1 %v8285_v48  ;;  %7952 = vmatprep.subr.bf16.mxu0 %v8286_v49 }
 0x26a   : > { %7974 = vmatprep.subr.bf16.mxu1 %v8287_v50 }
 0x26c   : > { %7953 = vmatpush3.bf16.msra.mxu0 %v8288_v51 }
 0x26d   : > { %7975 = vmatpush3.bf16.msra.mxu1 %v8289_v52 }
 0x26f   : > { %7157 = vmatmul.mubr.bf16.vlgmr.msra.gmra.mrb[28].mxu0 %v7366_v55 }
 0x270   : > { %7197 = vmatmul.mubr.bf16.vlgmr.msra.gmra.mrb[28].mxu1 %v7368_v57 }
 0x282   : > { %v7690_v59 = vpop.f32.mrb[4].mxu0 }
 0x283   : > { %v7712_v60 = vpop.f32.mrb[4].mxu1  ;;  %v7691_v61 = vpop.f32.mrb[5].mxu0 }
 0x284   : > { %v7692_v62 = vadd.f32 %v7691_v61, %v7690_v59  ;;  %v7713_v63 = vpop.f32.mrb[5].mxu1  ;;  %v7693_v0 = vpop.f32.mrb[6].mxu0 }
 0x285   : > { %v7714_v1 = vadd.f32 %v7713_v63, %v7712_v60  ;;  %v7715_v2 = vpop.f32.mrb[6].mxu1  ;;  %v7694_v3 = vpop.f32.mrb[7].mxu0 }
 0x286   : > { %v6679_v4 = vadd.f32 %v7692_v62, %v6639_v43  ;;  %v7716_v5 = vpop.f32.mrb[7].mxu1 }
 0x288   : > { %v6719_v6 = vadd.f32 %v7714_v1, %v6679_v4 }
 0x2a2   : > { %v7734_v7 = vpop.f32.mrb[8].mxu0 }
 0x2a3   : > { %v7756_v8 = vpop.f32.mrb[8].mxu1  ;;  %v7735_v9 = vpop.f32.mrb[9].mxu0 }
 0x2a4   : > { %v7736_v10 = vadd.f32 %v7735_v9, %v7734_v7  ;;  %v7757_v11 = vpop.f32.mrb[9].mxu1  ;;  %v7737_v12 = vpop.f32.mrb[10].mxu0 }
 0x2a5   : > { %v7758_v13 = vadd.f32 %v7757_v11, %v7756_v8  ;;  %v7759_v14 = vpop.f32.mrb[10].mxu1  ;;  %v7738_v15 = vpop.f32.mrb[11].mxu0 }
 0x2a6   : > { %v6759_v16 = vadd.f32 %v7736_v10, %v6719_v6  ;;  %v7760_v17 = vpop.f32.mrb[11].mxu1 }
 0x2a8   : > { %v6799_v18 = vadd.f32 %v7758_v13, %v6759_v16 }
 0x2c2   : > { %v7778_v19 = vpop.f32.mrb[12].mxu0 }
 0x2c3   : > { %v7800_v20 = vpop.f32.mrb[12].mxu1  ;;  %v7779_v21 = vpop.f32.mrb[13].mxu0 }
 0x2c4   : > { %v7801_v22 = vpop.f32.mrb[13].mxu1  ;;  %v7780_v23 = vadd.f32 %v7779_v21, %v7778_v19  ;;  %v7781_v25 = vpop.f32.mrb[14].mxu0 }
 0x2c5   : > { %v7802_v24 = vadd.f32 %v7801_v22, %v7800_v20  ;;  %v7803_v26 = vpop.f32.mrb[14].mxu1  ;;  %v7782_v27 = vpop.f32.mrb[15].mxu0 }
 0x2c6   : > { %v7804_v28 = vpop.f32.mrb[15].mxu1  ;;  %v6839_v29 = vadd.f32 %v7780_v23, %v6799_v18 }
 0x2c8   : > { %v6879_v30 = vadd.f32 %v7802_v24, %v6839_v29 }
 0x2e2   : > { %v7822_v31 = vpop.f32.mrb[16].mxu0 }
 0x2e3   : > { %v7844_v32 = vpop.f32.mrb[16].mxu1  ;;  %v7823_v33 = vpop.f32.mrb[17].mxu0 }
 0x2e4   : > { %v7845_v34 = vpop.f32.mrb[17].mxu1  ;;  %v7824_v35 = vadd.f32 %v7823_v33, %v7822_v31  ;;  %v7825_v37 = vpop.f32.mrb[18].mxu0  ;;  %v7626_v33 = vld [vmem:[%s4379_s25] ss:$0 sm:$0xff] }
 0x2e5   : > { %v7846_v36 = vadd.f32 %v7845_v34, %v7844_v32  ;;  %v7847_v38 = vpop.f32.mrb[18].mxu1  ;;  %v7826_v39 = vpop.f32.mrb[19].mxu0 }
 0x2e6   : > { %v7848_v40 = vpop.f32.mrb[19].mxu1  ;;  %v6919_v41 = vadd.f32 %v7824_v35, %v6879_v30  ;;  %v7627_v35 = vld [vmem:[%s4382_s28] ss:$0 sm:$0xff] }
 0x2e8   : > { %v6959_v42 = vadd.f32 %v7846_v36, %v6919_v41 }
 0x302   : > { %v7866_v43 = vpop.f32.mrb[20].mxu0 }
 0x303   : > { %v7888_v44 = vpop.f32.mrb[20].mxu1  ;;  %v7867_v45 = vpop.f32.mrb[21].mxu0 }
 0x304   : > { %v7868_v46 = vadd.f32 %v7867_v45, %v7866_v43  ;;  %v7889_v47 = vpop.f32.mrb[21].mxu1  ;;  %v7869_v48 = vpop.f32.mrb[22].mxu0 }
 0x305   : > { %v7890_v49 = vadd.f32 %v7889_v47, %v7888_v44  ;;  %v7891_v50 = vpop.f32.mrb[22].mxu1  ;;  %v7870_v51 = vpop.f32.mrb[23].mxu0 }
 0x306   : > { %v6999_v52 = vadd.f32 %v7868_v46, %v6959_v42  ;;  %v7892_v53 = vpop.f32.mrb[23].mxu1 }
 0x308   : > { %v7039_v54 = vadd.f32 %v7890_v49, %v6999_v52 }
 0x322   : > { %v7910_v55 = vpop.f32.mrb[24].mxu0 }
 0x323   : > { %v7932_v56 = vpop.f32.mrb[24].mxu1  ;;  %v7911_v57 = vpop.f32.mrb[25].mxu0 }
 0x324   : > { %v7912_v58 = vadd.f32 %v7911_v57, %v7910_v55  ;;  %v7933_v59 = vpop.f32.mrb[25].mxu1  ;;  %v7913_v60 = vpop.f32.mrb[26].mxu0 }
 0x325   : > { %v7934_v61 = vadd.f32 %v7933_v59, %v7932_v56  ;;  %v7935_v62 = vpop.f32.mrb[26].mxu1  ;;  %v7914_v63 = vpop.f32.mrb[27].mxu0 }
 0x326   : > { %v7079_v0 = vadd.f32 %v7912_v58, %v7039_v54  ;;  %v7936_v1 = vpop.f32.mrb[27].mxu1 }
 0x328   : > { %v7119_v2 = vadd.f32 %v7934_v61, %v7079_v0 }
 0x342   : > { %v7954_v3 = vpop.f32.mrb[28].mxu0 }
 0x343   : > { %v7976_v4 = vpop.f32.mrb[28].mxu1  ;;  %v7955_v5 = vpop.f32.mrb[29].mxu0 }
 0x344   : > { %v7956_v6 = vadd.f32 %v7955_v5, %v7954_v3  ;;  %v7977_v7 = vpop.f32.mrb[29].mxu1  ;;  %v7957_v8 = vpop.f32.mrb[30].mxu0 }
 0x345   : > { %v7978_v9 = vadd.f32 %v7977_v7, %v7976_v4  ;;  %v7979_v10 = vpop.f32.mrb[30].mxu1  ;;  %v7958_v11 = vpop.f32.mrb[31].mxu0 }
 0x346   : > { %v7159_v12 = vadd.f32 %v7956_v6, %v7119_v2  ;;  %v7980_v13 = vpop.f32.mrb[31].mxu1 }
 0x348   : > { %v7199_v14 = vadd.f32 %v7978_v9, %v7159_v12 }
 0x34a   : > { %v7204_v15 = vrot.slane %v7199_v14, 4 }
 0x34c   : > { %v7205_v16 = vadd.f32 %v7204_v15, %v7199_v14 }
 0x34e   : > { %v7206_v17 = vrot.slane %v7205_v16, 2 }
 0x350   : > { %v7207_v18 = vadd.f32 %v7206_v17, %v7205_v16 }
 0x352   : > { %v7208_v19 = vrot.slane %v7207_v18, 1 }
 0x354   : > { %v7209_v20 = vadd.f32 %v7208_v19, %v7207_v18 }
 0x356   : > { %v7211_v21 = vmul.f32 0.125, %v7209_v20 }
 0x358   : > { %v7212_v22 = vsub.f32 %v7199_v14, %v7211_v21 }
 0x35a   : > { %v7213_v23 = vmul.f32 %v7212_v22, %v7212_v22 }
 0x35c   : > { %v7214_v24 = vrot.slane %v7213_v23, 4 }
 0x35e   : > { %v7215_v25 = vadd.f32 %v7214_v24, %v7213_v23 }
 0x360   : > { %v7216_v26 = vrot.slane %v7215_v25, 2 }
 0x362   : > { %v7217_v27 = vadd.f32 %v7216_v26, %v7215_v25 }
 0x364   : > { %v7218_v28 = vrot.slane %v7217_v27, 1 }
 0x366   : > { %v7219_v29 = vadd.f32 %v7218_v28, %v7217_v27 }
 0x368   : > { %v7220_v30 = vmul.f32 0.125, %v7219_v29 }
 0x36a   : > { %v7221_v31 = vadd.f32 1e-05, %v7220_v30 }
 0x36c   : > { %8294 = vrsqrt.f32 %v7221_v31 }
 0x376   : > { %v8295_v32 = vpop.eup %8294 }
 0x377   : > { %v7223_v34 = vmul.f32 %v8295_v32, %v7212_v22 }
 0x379   : > { %v7231_v36 = vmul.f32 %v7626_v33, %v7223_v34 }
 0x37b   : > { %v7239_v37 = vadd.f32 %v7627_v35, %v7231_v36 }
 0x37d   : > { %v7240_v38 = vmul.f32 0.2, %v7239_v37 }
 0x37f   : > { %v7241_v39 = vmax.f32 %v7239_v37, %v7240_v38 }
 0x381   : > { %v7242_v40 = vpack.c.bf16 %v7241_v39, %v7241_v39 }
 0x383   : > { %7243 = vst [vmem:[%s4386_s5] sm:$0xf] %v7242_v40 }
 0x384 PF: > { %p11_p9 = scmp.ge.s32.totalorder %s8362_s19, 6   ;;  %s9780_s15 = smov %s8314_s16 }
 0x385   : > { %s9781_s16 = smov %s8371_s22  ;;  %s9782_s17 = smov %s8362_s19 }
 0x386   :  { %13 = sbr.rel (!%p11_p9) target bundleno = 2 (0x2), region = 133 }

// kernel: encoder_32_forward.7
= control target key start
LH: loop header
LB: loop body
LE: loop exit
PB: predicated region body
PF: predicated region fallthrough
CT: control target
= control target key end

     0   :  { %v1073_v28 = vlaneseq  ;;  %v7690_v36 = vmov 1966171168   ;;  %s9420_s0 = inlined_call_operand.vmem [shape: bf16[2,8192], index: 0, kind: input, shape index: {}]   ;;  %s9421_s1 = inlined_call_operand.vmem [shape: bf16[8192,32], index: 1, kind: input, shape index: {}]   ;;  %s9422_s2 = inlined_call_operand.vmem [shape: f32[1,32], index: 2, kind: input, shape index: {}]   ;;  %s9423_s3 = inlined_call_operand.vmem [shape: f32[1,32], index: 3, kind: input, shape index: {}]   ;;  %s9424_s4 = inlined_call_operand.vmem [shape: f32[1,32], index: 4, kind: input, shape index: {}]   ;;  %s9425_s5 = inlined_call_operand.hbm [shape: f32[2,32], index: 5, kind: output, shape index: {}]  }
   0x1   :  { %v7144_v0 = vld [vmem:[%s9421_s1 + $0x40] sm:$0xff]   ;;  %v7148_v4 = vld [vmem:[%s9421_s1 + $0x48] sm:$0xff]   ;;  %v7152_v8 = vld [vmem:[%s9421_s1 + $0x50] sm:$0xff]   ;;  %v1071_v37 = vunpack.c.l.s4 %v7690_v36 }
   0x2   :  { %v7145_v1 = vld [vmem:[%s9421_s1 + $0xc0] sm:$0xff]   ;;  %6438 = vmatprep.subr.bf16.mxu0 %v7144_v0  ;;  %v7149_v5 = vld [vmem:[%s9421_s1 + $0xc8] sm:$0xff]   ;;  %v7153_v9 = vld [vmem:[%s9421_s1 + $0xd0] sm:$0xff]   ;;  %v1074_v33 = vshrl.u32 %v1073_v28, 7 }
   0x3   :  { %v7146_v2 = vld [vmem:[%s9421_s1] sm:$0xff]   ;;  %6460 = vmatprep.subr.bf16.mxu1 %v7145_v1  ;;  %v7150_v6 = vld [vmem:[%s9421_s1 + $0x8] sm:$0xff]   ;;  %v7154_v10 = vld [vmem:[%s9421_s1 + $0x10] sm:$0xff]   ;;  %v1072_v40 = vunpack.c.0.s8 %v1071_v37 }
   0x4   :  { %v7147_v3 = vld [vmem:[%s9421_s1 + $0x80] sm:$0xff]   ;;  %6439 = vmatpush3.bf16.msra.mxu0 %v7146_v2  ;;  %v7151_v7 = vld [vmem:[%s9421_s1 + $0x88] sm:$0xff]   ;;  %v7155_v11 = vld [vmem:[%s9421_s1 + $0x90] sm:$0xff]  }
   0x5   :  { %6461 = vmatpush3.bf16.msra.mxu1 %v7147_v3  ;;  %6440 = vmatprep.subr.bf16.mxu0 %v7148_v4  ;;  %v7156_v12 = vld [vmem:[%s9421_s1 + $0x58] sm:$0xff]   ;;  %v7160_v16 = vld [vmem:[%s9421_s1 + $0x60] sm:$0xff]   ;;  %v7164_v20 = vld [vmem:[%s9421_s1 + $0x68] sm:$0xff]   ;;  %v7827_v41 = vsub.s32 %v1072_v40, %v1074_v33 }
   0x6   :  { %6462 = vmatprep.subr.bf16.mxu1 %v7149_v5  ;;  %v7157_v13 = vld [vmem:[%s9421_s1 + $0xd8] sm:$0xff]   ;;  %v7161_v17 = vld [vmem:[%s9421_s1 + $0xe0] sm:$0xff]   ;;  %v7165_v21 = vld [vmem:[%s9421_s1 + $0xe8] sm:$0xff]  }
   0x7   :  { %v7158_v14 = vld [vmem:[%s9421_s1 + $0x18] sm:$0xff]   ;;  %v7162_v18 = vld [vmem:[%s9421_s1 + $0x20] sm:$0xff]   ;;  %v7166_v22 = vld [vmem:[%s9421_s1 + $0x28] sm:$0xff]  }
   0x8   :  { %6441 = vmatpush3.bf16.msra.mxu0 %v7150_v6  ;;  %v7159_v15 = vld [vmem:[%s9421_s1 + $0x98] sm:$0xff]   ;;  %v7163_v19 = vld [vmem:[%s9421_s1 + $0xa0] sm:$0xff]   ;;  %v7167_v23 = vld [vmem:[%s9421_s1 + $0xa8] sm:$0xff]  }
   0x9   :  { %6463 = vmatpush3.bf16.msra.mxu1 %v7151_v7  ;;  %6442 = vmatprep.subr.bf16.mxu0 %v7152_v8  ;;  %v7168_v24 = vld [vmem:[%s9421_s1 + $0x70] sm:$0xff]   ;;  %v7172_v29 = vld [vmem:[%s9421_s1 + $0x78] sm:$0xff]   ;;  %v22_v34 = vld [vmem:[%s9420_s0] sm:$0xff] }
   0xa   :  { %6464 = vmatprep.subr.bf16.mxu1 %v7153_v9  ;;  %v7169_v25 = vld [vmem:[%s9421_s1 + $0xf0] sm:$0xff]   ;;  %v7173_v30 = vld [vmem:[%s9421_s1 + $0xf8] sm:$0xff]   ;;  %v7177_v35 = vld [vmem:[%s9421_s1 + $0x140] sm:$0xff]   ;;  %v1069_v39 = vcombine.high %v22_v34, %v22_v34  ;;  %v1076_v42 = vrot.slane %v22_v34, %v7827_v41 }
   0xb   :  { %v7170_v26 = vld [vmem:[%s9421_s1 + $0x30] sm:$0xff]   ;;  %v7174_v31 = vld [vmem:[%s9421_s1 + $0x38] sm:$0xff]   ;;  %v7178_v38 = vld [vmem:[%s9421_s1 + $0x1c0] sm:$0xff]  }
   0xc   :  { %6443 = vmatpush3.bf16.msra.mxu0 %v7154_v10  ;;  %v7171_v27 = vld [vmem:[%s9421_s1 + $0xb0] sm:$0xff]   ;;  %v7175_v32 = vld [vmem:[%s9421_s1 + $0xb8] sm:$0xff]   ;;  %v7831_v43 = vrot.slane %v1069_v39, %v7827_v41  ;;  %v1084_v44 = vcombine.high %v1076_v42, %v1076_v42  ;;  %v1092_v45 = vrot.slane %v1076_v42, %v7827_v41  ;;  %v7179_v47 = vld [vmem:[%s9421_s1 + $0x100] sm:$0xff]  }
   0xd   :  { %6465 = vmatpush3.bf16.msra.mxu1 %v7155_v11  ;;  %6444 = vmatprep.subr.bf16.mxu0 %v7156_v12  ;;  %v7180_v49 = vld [vmem:[%s9421_s1 + $0x180] sm:$0xff]   ;;  %v7181_v52 = vld [vmem:[%s9421_s1 + $0x148] sm:$0xff]   ;;  %v7185_v58 = vld [vmem:[%s9421_s1 + $0x150] sm:$0xff]  }
   0xe   :  { %6466 = vmatprep.subr.bf16.mxu1 %v7157_v13  ;;  %v1085_v46 = vcombine.high %v7831_v43, %v7831_v43  ;;  %v1106_v48 = vrot.slane %v1084_v44, %v7827_v41  ;;  %v1114_v51 = vcombine.high %v1092_v45, %v1092_v45  ;;  %v7182_v54 = vld [vmem:[%s9421_s1 + $0x1c8] sm:$0xff]   ;;  %v7186_v59 = vld [vmem:[%s9421_s1 + $0x1d0] sm:$0xff]   ;;  %v7189_v62 = vld [vmem:[%s9421_s1 + $0x158] sm:$0xff]  }
   0xf   :  { %v7183_v55 = vld [vmem:[%s9421_s1 + $0x108] sm:$0xff]   ;;  %v7187_v60 = vld [vmem:[%s9421_s1 + $0x110] sm:$0xff]   ;;  %v7190_v63 = vld [vmem:[%s9421_s1 + $0x1d8] sm:$0xff]  }
  0x10   :  { %6445 = vmatpush3.bf16.msra.mxu0 %v7158_v14  ;;  %v1113_v50 = vrot.slane %v1085_v46, %v7827_v41  ;;  %4629 = vmatprep.mubr.bf16.mxu0 %v1106_v48  ;;  %v1116_v53 = vcombine.high %v1106_v48, %v1106_v48  ;;  %v7184_v57 = vld [vmem:[%s9421_s1 + $0x188] sm:$0xff]   ;;  %v7188_v61 = vld [vmem:[%s9421_s1 + $0x190] sm:$0xff]   ;;  %v7191_v0 = vld [vmem:[%s9421_s1 + $0x118] sm:$0xff]  }
  0x11   :  { %6467 = vmatpush3.bf16.msra.mxu1 %v7159_v15  ;;  %6446 = vmatprep.subr.bf16.mxu0 %v7160_v16  ;;  %v7192_v1 = vld [vmem:[%s9421_s1 + $0x198] sm:$0xff]   ;;  %v7193_v2 = vld [vmem:[%s9421_s1 + $0x160] sm:$0xff]   ;;  %v7197_v6 = vld [vmem:[%s9421_s1 + $0x168] sm:$0xff]  }
  0x12   :  { %6468 = vmatprep.subr.bf16.mxu1 %v7161_v17  ;;  %v1117_v56 = vcombine.high %v1113_v50, %v1113_v50  ;;  %4669 = vmatprep.mubr.bf16.mxu1 %v1116_v53  ;;  %v7194_v3 = vld [vmem:[%s9421_s1 + $0x1e0] sm:$0xff]   ;;  %v7198_v7 = vld [vmem:[%s9421_s1 + $0x1e8] sm:$0xff]   ;;  %v7201_v10 = vld [vmem:[%s9421_s1 + $0x170] sm:$0xff]  }
  0x13   :  { %v7195_v4 = vld [vmem:[%s9421_s1 + $0x120] sm:$0xff]   ;;  %v7199_v8 = vld [vmem:[%s9421_s1 + $0x128] sm:$0xff]   ;;  %v7202_v11 = vld [vmem:[%s9421_s1 + $0x1f0] sm:$0xff]  }
  0x14   :  { %6447 = vmatpush3.bf16.msra.mxu0 %v7162_v18  ;;  %v7196_v5 = vld [vmem:[%s9421_s1 + $0x1a0] sm:$0xff]   ;;  %v7200_v9 = vld [vmem:[%s9421_s1 + $0x1a8] sm:$0xff]   ;;  %v7203_v12 = vld [vmem:[%s9421_s1 + $0x130] sm:$0xff]   ;;  %v1099_v18 = vrot.slane %v7831_v43, %v7827_v41 }
  0x15   :  { %6469 = vmatpush3.bf16.msra.mxu1 %v7163_v19  ;;  %6448 = vmatprep.subr.bf16.mxu0 %v7164_v20  ;;  %v7204_v13 = vld [vmem:[%s9421_s1 + $0x1b0] sm:$0xff]   ;;  %v7205_v14 = vld [vmem:[%s9421_s1 + $0x178] sm:$0xff]   ;;  %v7209_v19 = vld [vmem:[%s9421_s1 + $0x240] sm:$0xff]  }
  0x16   :  { %6470 = vmatprep.subr.bf16.mxu1 %v7165_v21  ;;  %v7206_v15 = vld [vmem:[%s9421_s1 + $0x1f8] sm:$0xff]   ;;  %v7210_v20 = vld [vmem:[%s9421_s1 + $0x2c0] sm:$0xff]   ;;  %v7217_v28 = vld [vmem:[%s9421_s1 + $0x250] sm:$0xff]  }
  0x17   :  { %v7207_v16 = vld [vmem:[%s9421_s1 + $0x138] sm:$0xff]   ;;  %v7211_v21 = vld [vmem:[%s9421_s1 + $0x200] sm:$0xff]   ;;  %v7229_v40 = vld [vmem:[%s9421_s1 + $0x268] sm:$0xff]  }
  0x18   :  { %6449 = vmatpush3.bf16.msra.mxu0 %v7166_v22  ;;  %v7208_v17 = vld [vmem:[%s9421_s1 + $0x1b8] sm:$0xff]   ;;  %v7212_v22 = vld [vmem:[%s9421_s1 + $0x280] sm:$0xff]   ;;  %v7230_v42 = vld [vmem:[%s9421_s1 + $0x2e8] sm:$0xff]  }
  0x19   :  { %6471 = vmatpush3.bf16.msra.mxu1 %v7167_v23  ;;  %6450 = vmatprep.subr.bf16.mxu0 %v7168_v24  ;;  %v1115_v23 = vcombine.high %v1099_v18, %v1099_v18  ;;  %v7213_v24 = vld [vmem:[%s9421_s1 + $0x248] sm:$0xff]   ;;  %v7222_v33 = vld [vmem:[%s9421_s1 + $0x2d8] sm:$0xff]   ;;  %v7225_v36 = vld [vmem:[%s9421_s1 + $0x260] sm:$0xff]  }
  0x1a   :  { %6472 = vmatprep.subr.bf16.mxu1 %v7169_v25  ;;  %v7214_v25 = vld [vmem:[%s9421_s1 + $0x2c8] sm:$0xff]   ;;  %v7223_v34 = vld [vmem:[%s9421_s1 + $0x218] sm:$0xff]   ;;  %v7226_v37 = vld [vmem:[%s9421_s1 + $0x2e0] sm:$0xff]  }
  0x1b   :  { %v7228_v39 = vld [vmem:[%s9421_s1 + $0x2a0] sm:$0xff]   ;;  %v7231_v43 = vld [vmem:[%s9421_s1 + $0x228] sm:$0xff]  }
  0x1c   :  { %6451 = vmatpush3.bf16.msra.mxu0 %v7170_v26  ;;  %v7215_v26 = vld [vmem:[%s9421_s1 + $0x208] sm:$0xff]  }
  0x1d   :  { %6473 = vmatpush3.bf16.msra.mxu1 %v7171_v27  ;;  %6452 = vmatprep.subr.bf16.mxu0 %v7172_v29  ;;  %v7216_v27 = vld [vmem:[%s9421_s1 + $0x288] sm:$0xff]   ;;  %v7218_v29 = vld [vmem:[%s9421_s1 + $0x2d0] sm:$0xff]  }
  0x1e   :  { %6474 = vmatprep.subr.bf16.mxu1 %v7173_v30  ;;  %v7219_v30 = vld [vmem:[%s9421_s1 + $0x210] sm:$0xff]   ;;  %v7232_v44 = vld [vmem:[%s9421_s1 + $0x2a8] sm:$0xff]  }
  0x1f   :  { %v23_v46 = vld [vmem:[%s9420_s0 + $0x8] sm:$0xff] }
  0x20   :  { %6453 = vmatpush3.bf16.msra.mxu0 %v7174_v31  ;;  %v7220_v31 = vld [vmem:[%s9421_s1 + $0x290] sm:$0xff]   ;;  %v1125_v48 = vrot.slane %v23_v46, %v7827_v41 }
  0x21   :  { %6475 = vmatpush3.bf16.msra.mxu1 %v7175_v32  ;;  %6482 = vmatprep.subr.bf16.mxu0 %v7177_v35  ;;  %v7221_v32 = vld [vmem:[%s9421_s1 + $0x258] sm:$0xff]  }
  0x22   :  { %6504 = vmatprep.subr.bf16.mxu1 %v7178_v38  ;;  %v7224_v35 = vld [vmem:[%s9421_s1 + $0x298] sm:$0xff]   ;;  %v7227_v38 = vld [vmem:[%s9421_s1 + $0x220] sm:$0xff]  }
  0x23   :  { %4630 = vmatmul.mubr.bf16.vlgmr.msra.gmra.mrb[0].mxu0 %v1092_v45  ;;  %v7233_v45 = vld [vmem:[%s9421_s1 + $0x270] sm:$0xff]  }
  0x24   :  { %6483 = vmatpush3.bf16.msra.mxu0 %v7179_v47  ;;  %4670 = vmatmul.mubr.bf16.vlgmr.msra.gmra.mrb[0].mxu1 %v1114_v51  ;;  %v7234_v47 = vld [vmem:[%s9421_s1 + $0x2f0] sm:$0xff]  }
  0x25   :  { %6484 = vmatprep.subr.bf16.mxu0 %v7181_v52  ;;  %6505 = vmatpush3.bf16.msra.mxu1 %v7180_v49  ;;  %v1118_v49 = vcombine.high %v23_v46, %v23_v46  ;;  %v7236_v51 = vld [vmem:[%s9421_s1 + $0x2b0] sm:$0xff]   ;;  %v1133_v52 = vcombine.high %v1125_v48, %v1125_v48 }
  0x26   :  { %4709 = vmatprep.mubr.bf16.mxu0 %v1113_v50  ;;  %6506 = vmatprep.subr.bf16.mxu1 %v7182_v54  ;;  %v7235_v50 = vld [vmem:[%s9421_s1 + $0x230] sm:$0xff]   ;;  %v7237_v54 = vld [vmem:[%s9421_s1 + $0x278] sm:$0xff]  }
  0x27   :  { %4749 = vmatprep.mubr.bf16.mxu1 %v1117_v56  ;;  %v8019_v53 = vrot.slane %v1118_v49, %v7827_v41  ;;  %v1155_v56 = vrot.slane %v1133_v52, %v7827_v41  ;;  %v7284_v46 = vld [vmem:[%s9421_s1 + $0x410] sm:$0xff]   ;;  %v7287_v49 = vld [vmem:[%s9421_s1 + $0x4d8] sm:$0xff]   ;;  %v7290_v52 = vld [vmem:[%s9421_s1 + $0x460] sm:$0xff]  }
  0x28   :  { %6485 = vmatpush3.bf16.msra.mxu0 %v7183_v55  ;;  %v7238_v55 = vld [vmem:[%s9421_s1 + $0x2f8] sm:$0xff]  }
  0x29   :  { %6486 = vmatprep.subr.bf16.mxu0 %v7185_v58  ;;  %6507 = vmatpush3.bf16.msra.mxu1 %v7184_v57  ;;  %v1134_v57 = vcombine.high %v8019_v53, %v8019_v53  ;;  %v7239_v58 = vld [vmem:[%s9421_s1 + $0x238] sm:$0xff]  }
  0x2a   :  { %6508 = vmatprep.subr.bf16.mxu1 %v7186_v59  ;;  %v7240_v59 = vld [vmem:[%s9421_s1 + $0x2b8] sm:$0xff]  }
  0x2c   :  { %6487 = vmatpush3.bf16.msra.mxu0 %v7187_v60  ;;  %v1165_v60 = vcombine.high %v1155_v56, %v1155_v56 }
  0x2d   :  { %6488 = vmatprep.subr.bf16.mxu0 %v7189_v62  ;;  %6509 = vmatpush3.bf16.msra.mxu1 %v7188_v61  ;;  %v1141_v61 = vrot.slane %v1125_v48, %v7827_v41  ;;  %v7241_v62 = vld [vmem:[%s9421_s1 + $0x340] sm:$0xff]   ;;  %v7286_v48 = vld [vmem:[%s9421_s1 + $0x458] sm:$0xff]  }
  0x2e   :  { %6510 = vmatprep.subr.bf16.mxu1 %v7190_v63  ;;  %v7242_v63 = vld [vmem:[%s9421_s1 + $0x3c0] sm:$0xff]  }
  0x30   :  { %6489 = vmatpush3.bf16.msra.mxu0 %v7191_v0  ;;  %v1162_v0 = vrot.slane %v1134_v57, %v7827_v41  ;;  %v7295_v57 = vld [vmem:[%s9421_s1 + $0x4e8] sm:$0xff]  }
  0x31   :  { %6490 = vmatprep.subr.bf16.mxu0 %v7193_v2  ;;  %6511 = vmatpush3.bf16.msra.mxu1 %v7192_v1  ;;  %v7243_v1 = vld [vmem:[%s9421_s1 + $0x300] sm:$0xff]  }
  0x32   :  { %6512 = vmatprep.subr.bf16.mxu1 %v7194_v3  ;;  %v7244_v2 = vld [vmem:[%s9421_s1 + $0x380] sm:$0xff]   ;;  %v1163_v3 = vcombine.high %v1141_v61, %v1141_v61 }
  0x34   :  { %6491 = vmatpush3.bf16.msra.mxu0 %v7195_v4  ;;  %v7245_v4 = vld [vmem:[%s9421_s1 + $0x348] sm:$0xff]  }
  0x35   :  { %6492 = vmatprep.subr.bf16.mxu0 %v7197_v6  ;;  %6513 = vmatpush3.bf16.msra.mxu1 %v7196_v5  ;;  %v7246_v5 = vld [vmem:[%s9421_s1 + $0x3c8] sm:$0xff]   ;;  %v1166_v6 = vcombine.high %v1162_v0, %v1162_v0 }
  0x36   :  { %6514 = vmatprep.subr.bf16.mxu1 %v7198_v7  ;;  %v7247_v7 = vld [vmem:[%s9421_s1 + $0x308] sm:$0xff]  }
  0x38   :  { %6493 = vmatpush3.bf16.msra.mxu0 %v7199_v8  ;;  %v7248_v8 = vld [vmem:[%s9421_s1 + $0x388] sm:$0xff]  }
  0x39   :  { %6494 = vmatprep.subr.bf16.mxu0 %v7201_v10  ;;  %6515 = vmatpush3.bf16.msra.mxu1 %v7200_v9  ;;  %v7249_v9 = vld [vmem:[%s9421_s1 + $0x350] sm:$0xff]  }
  0x3a   :  { %6516 = vmatprep.subr.bf16.mxu1 %v7202_v11  ;;  %v7250_v10 = vld [vmem:[%s9421_s1 + $0x3d0] sm:$0xff]  }
  0x3b   :  { %v7251_v11 = vld [vmem:[%s9421_s1 + $0x310] sm:$0xff]  }
  0x3c   :  { %6495 = vmatpush3.bf16.msra.mxu0 %v7203_v12  ;;  %v7252_v12 = vld [vmem:[%s9421_s1 + $0x390] sm:$0xff]  }
  0x3d   :  { %6496 = vmatprep.subr.bf16.mxu0 %v7205_v14  ;;  %6517 = vmatpush3.bf16.msra.mxu1 %v7204_v13  ;;  %v7253_v13 = vld [vmem:[%s9421_s1 + $0x358] sm:$0xff]  }
  0x3e   :  { %6518 = vmatprep.subr.bf16.mxu1 %v7206_v15  ;;  %v7254_v14 = vld [vmem:[%s9421_s1 + $0x3d8] sm:$0xff]  }
  0x3f   :  { %v7255_v15 = vld [vmem:[%s9421_s1 + $0x318] sm:$0xff]  }
  0x40   :  { %6497 = vmatpush3.bf16.msra.mxu0 %v7207_v16  ;;  %v7256_v16 = vld [vmem:[%s9421_s1 + $0x398] sm:$0xff]  }
  0x41   :  { %6526 = vmatprep.subr.bf16.mxu0 %v7209_v19  ;;  %6519 = vmatpush3.bf16.msra.mxu1 %v7208_v17  ;;  %v7257_v17 = vld [vmem:[%s9421_s1 + $0x360] sm:$0xff]  }
  0x42   :  { %6548 = vmatprep.subr.bf16.mxu1 %v7210_v20  ;;  %v7259_v19 = vld [vmem:[%s9421_s1 + $0x320] sm:$0xff]  }
  0x43   :  { %4710 = vmatmul.mubr.bf16.vlgmr.msra.gmra.mrb[4].mxu0 %v1099_v18  ;;  %v7258_v18 = vld [vmem:[%s9421_s1 + $0x3e0] sm:$0xff]  }
  0x44   :  { %6527 = vmatpush3.bf16.msra.mxu0 %v7211_v21  ;;  %4750 = vmatmul.mubr.bf16.vlgmr.msra.gmra.mrb[4].mxu1 %v1115_v23  ;;  %v7260_v20 = vld [vmem:[%s9421_s1 + $0x3a0] sm:$0xff]   ;;  %v7261_v21 = vld [vmem:[%s9421_s1 + $0x368] sm:$0xff]  }
  0x45   :  { %6528 = vmatprep.subr.bf16.mxu0 %v7213_v24  ;;  %6549 = vmatpush3.bf16.msra.mxu1 %v7212_v22  ;;  %v7262_v22 = vld [vmem:[%s9421_s1 + $0x3e8] sm:$0xff]  }
  0x46   :  { %6550 = vmatprep.subr.bf16.mxu1 %v7214_v25  ;;  %4789 = vmatprep.mubr.bf16.mxu0 %v1155_v56  ;;  %v7263_v23 = vld [vmem:[%s9421_s1 + $0x328] sm:$0xff]   ;;  %v7265_v25 = vld [vmem:[%s9421_s1 + $0x370] sm:$0xff]  }
  0x47   :  { %4829 = vmatprep.mubr.bf16.mxu1 %v1165_v60  ;;  %v7264_v24 = vld [vmem:[%s9421_s1 + $0x3a8] sm:$0xff]   ;;  %v7298_v60 = vld [vmem:[%s9421_s1 + $0x470] sm:$0xff]  }
  0x48   :  { %6529 = vmatpush3.bf16.msra.mxu0 %v7215_v26  ;;  %v7266_v26 = vld [vmem:[%s9421_s1 + $0x3f0] sm:$0xff]   ;;  %v7294_v56 = vld [vmem:[%s9421_s1 + $0x468] sm:$0xff]  }
  0x49   :  { %6530 = vmatprep.subr.bf16.mxu0 %v7217_v28  ;;  %6551 = vmatpush3.bf16.msra.mxu1 %v7216_v27  ;;  %v7267_v27 = vld [vmem:[%s9421_s1 + $0x330] sm:$0xff]  }
  0x4a   :  { %6552 = vmatprep.subr.bf16.mxu1 %v7218_v29  ;;  %v7268_v28 = vld [vmem:[%s9421_s1 + $0x3b0] sm:$0xff]   ;;  %v7269_v29 = vld [vmem:[%s9421_s1 + $0x378] sm:$0xff]  }
  0x4c   :  { %6531 = vmatpush3.bf16.msra.mxu0 %v7219_v30  ;;  %v7270_v30 = vld [vmem:[%s9421_s1 + $0x3f8] sm:$0xff]  }
  0x4d   :  { %6532 = vmatprep.subr.bf16.mxu0 %v7221_v32  ;;  %6553 = vmatpush3.bf16.msra.mxu1 %v7220_v31  ;;  %v7271_v31 = vld [vmem:[%s9421_s1 + $0x338] sm:$0xff]  }
  0x4e   :  { %6554 = vmatprep.subr.bf16.mxu1 %v7222_v33  ;;  %v7272_v32 = vld [vmem:[%s9421_s1 + $0x3b8] sm:$0xff]   ;;  %v1148_v33 = vrot.slane %v8019_v53, %v7827_v41  ;;  %v7291_v53 = vld [vmem:[%s9421_s1 + $0x4e0] sm:$0xff]  }
  0x50   :  { %6533 = vmatpush3.bf16.msra.mxu0 %v7223_v34  ;;  %v7274_v34 = vld [vmem:[%s9421_s1 + $0x440] sm:$0xff]  }
  0x51   :  { %6534 = vmatprep.subr.bf16.mxu0 %v7225_v36  ;;  %6555 = vmatpush3.bf16.msra.mxu1 %v7224_v35  ;;  %v7275_v35 = vld [vmem:[%s9421_s1 + $0x4c0] sm:$0xff]  }
  0x52   :  { %6556 = vmatprep.subr.bf16.mxu1 %v7226_v37  ;;  %v7276_v36 = vld [vmem:[%s9421_s1 + $0x400] sm:$0xff]  }
  0x53   :  { %v7277_v37 = vld [vmem:[%s9421_s1 + $0x480] sm:$0xff]  }
  0x54   :  { %6535 = vmatpush3.bf16.msra.mxu0 %v7227_v38  ;;  %v1164_v38 = vcombine.high %v1148_v33, %v1148_v33 }
  0x55   :  { %6536 = vmatprep.subr.bf16.mxu0 %v7229_v40  ;;  %6557 = vmatpush3.bf16.msra.mxu1 %v7228_v39  ;;  %v7278_v39 = vld [vmem:[%s9421_s1 + $0x448] sm:$0xff]  }
  0x56   :  { %6558 = vmatprep.subr.bf16.mxu1 %v7230_v42  ;;  %v7279_v40 = vld [vmem:[%s9421_s1 + $0x4c8] sm:$0xff]  }
  0x57   :  { %v7280_v42 = vld [vmem:[%s9421_s1 + $0x408] sm:$0xff]  }
  0x58   :  { %6537 = vmatpush3.bf16.msra.mxu0 %v7231_v43  ;;  %v7281_v43 = vld [vmem:[%s9421_s1 + $0x488] sm:$0xff]  }
  0x59   :  { %6538 = vmatprep.subr.bf16.mxu0 %v7233_v45  ;;  %6559 = vmatpush3.bf16.msra.mxu1 %v7232_v44  ;;  %v7282_v44 = vld [vmem:[%s9421_s1 + $0x450] sm:$0xff]  }
  0x5a   :  { %6560 = vmatprep.subr.bf16.mxu1 %v7234_v47  ;;  %v7283_v45 = vld [vmem:[%s9421_s1 + $0x4d0] sm:$0xff]  }
  0x5b   :  { %v7285_v47 = vld [vmem:[%s9421_s1 + $0x490] sm:$0xff]  }
  0x5c   :  { %6539 = vmatpush3.bf16.msra.mxu0 %v7235_v50  ;;  %v7288_v50 = vld [vmem:[%s9421_s1 + $0x418] sm:$0xff]  }
  0x5d   :  { %6540 = vmatprep.subr.bf16.mxu0 %v7237_v54  ;;  %6561 = vmatpush3.bf16.msra.mxu1 %v7236_v51  ;;  %v7289_v51 = vld [vmem:[%s9421_s1 + $0x498] sm:$0xff]   ;;  %v7292_v54 = vld [vmem:[%s9421_s1 + $0x420] sm:$0xff]  }
  0x5e   :  { %6562 = vmatprep.subr.bf16.mxu1 %v7238_v55  ;;  %v7293_v55 = vld [vmem:[%s9421_s1 + $0x4a0] sm:$0xff]  }
  0x60   :  { %6541 = vmatpush3.bf16.msra.mxu0 %v7239_v58  ;;  %v7296_v58 = vld [vmem:[%s9421_s1 + $0x428] sm:$0xff]  }
  0x61   :  { %6570 = vmatprep.subr.bf16.mxu0 %v7241_v62  ;;  %6563 = vmatpush3.bf16.msra.mxu1 %v7240_v59  ;;  %v7297_v59 = vld [vmem:[%s9421_s1 + $0x4a8] sm:$0xff]   ;;  %v7299_v62 = vld [vmem:[%s9421_s1 + $0x4f0] sm:$0xff]  }
  0x62   :  { %6592 = vmatprep.subr.bf16.mxu1 %v7242_v63 }
  0x63   :  { %4790 = vmatmul.mubr.bf16.vlgmr.msra.gmra.mrb[8].mxu0 %v1141_v61  ;;  %v24_v61 = vld [vmem:[%s9420_s0 + $0x10] sm:$0xff] }
  0x64   :  { %6571 = vmatpush3.bf16.msra.mxu0 %v7243_v1  ;;  %4869 = vmatprep.mubr.bf16.mxu0 %v1162_v0  ;;  %v1174_v63 = vrot.slane %v24_v61, %v7827_v41  ;;  %v1167_v0 = vcombine.high %v24_v61, %v24_v61  ;;  %v7300_v1 = vld [vmem:[%s9421_s1 + $0x430] sm:$0xff]  }
  0x65   :  { %4830 = vmatmul.mubr.bf16.vlgmr.msra.gmra.mrb[8].mxu1 %v1163_v3  ;;  %6572 = vmatprep.subr.bf16.mxu0 %v7245_v4  ;;  %v7349_v61 = vld [vmem:[%s9421_s1 + $0x610] sm:$0xff]  }
  0x66   :  { %6593 = vmatpush3.bf16.msra.mxu1 %v7244_v2  ;;  %4909 = vmatprep.mubr.bf16.mxu1 %v1166_v6  ;;  %v7301_v2 = vld [vmem:[%s9421_s1 + $0x4b0] sm:$0xff]   ;;  %v1182_v3 = vcombine.high %v1174_v63, %v1174_v63  ;;  %v8225_v4 = vrot.slane %v1167_v0, %v7827_v41  ;;  %v7303_v6 = vld [vmem:[%s9421_s1 + $0x4f8] sm:$0xff]  }
  0x67   :  { %6594 = vmatprep.subr.bf16.mxu1 %v7246_v5  ;;  %v7302_v5 = vld [vmem:[%s9421_s1 + $0x478] sm:$0xff]  }
  0x68   :  { %6573 = vmatpush3.bf16.msra.mxu0 %v7247_v7  ;;  %v1204_v7 = vrot.slane %v1182_v3, %v7827_v41  ;;  %v7352_v0 = vld [vmem:[%s9421_s1 + $0x6d8] sm:$0xff]   ;;  %v7355_v3 = vld [vmem:[%s9421_s1 + $0x660] sm:$0xff]  }
  0x69   :  { %6574 = vmatprep.subr.bf16.mxu0 %v7249_v9  ;;  %v7304_v9 = vld [vmem:[%s9421_s1 + $0x438] sm:$0xff]  }
  0x6a   :  { %6595 = vmatpush3.bf16.msra.mxu1 %v7248_v8  ;;  %v1183_v8 = vcombine.high %v8225_v4, %v8225_v4 }
  0x6b   :  { %6596 = vmatprep.subr.bf16.mxu1 %v7250_v10  ;;  %v7305_v10 = vld [vmem:[%s9421_s1 + $0x4b8] sm:$0xff]  }
  0x6c   :  { %6575 = vmatpush3.bf16.msra.mxu0 %v7251_v11  ;;  %v1214_v11 = vcombine.high %v1204_v7, %v1204_v7 }
  0x6d   :  { %6576 = vmatprep.subr.bf16.mxu0 %v7253_v13  ;;  %v7306_v13 = vld [vmem:[%s9421_s1 + $0x540] sm:$0xff]  }
  0x6e   :  { %6597 = vmatpush3.bf16.msra.mxu1 %v7252_v12  ;;  %v1190_v12 = vrot.slane %v1174_v63, %v7827_v41  ;;  %v7351_v63 = vld [vmem:[%s9421_s1 + $0x658] sm:$0xff]  }
  0x6f   :  { %6598 = vmatprep.subr.bf16.mxu1 %v7254_v14  ;;  %v7307_v14 = vld [vmem:[%s9421_s1 + $0x5c0] sm:$0xff]  }
  0x70   :  { %6577 = vmatpush3.bf16.msra.mxu0 %v7255_v15  ;;  %v1211_v15 = vrot.slane %v1183_v8, %v7827_v41  ;;  %v7360_v8 = vld [vmem:[%s9421_s1 + $0x6e8] sm:$0xff]  }
  0x71   :  { %6578 = vmatprep.subr.bf16.mxu0 %v7257_v17  ;;  %v7309_v17 = vld [vmem:[%s9421_s1 + $0x580] sm:$0xff]  }
  0x72   :  { %6599 = vmatpush3.bf16.msra.mxu1 %v7256_v16  ;;  %v7308_v16 = vld [vmem:[%s9421_s1 + $0x500] sm:$0xff]  }
  0x73   :  { %6600 = vmatprep.subr.bf16.mxu1 %v7258_v18  ;;  %v1212_v18 = vcombine.high %v1190_v12, %v1190_v12 }
  0x74   :  { %6579 = vmatpush3.bf16.msra.mxu0 %v7259_v19  ;;  %v7310_v19 = vld [vmem:[%s9421_s1 + $0x548] sm:$0xff]  }
  0x75   :  { %6580 = vmatprep.subr.bf16.mxu0 %v7261_v21  ;;  %v1215_v21 = vcombine.high %v1211_v15, %v1211_v15 }
  0x76   :  { %6601 = vmatpush3.bf16.msra.mxu1 %v7260_v20  ;;  %v7311_v20 = vld [vmem:[%s9421_s1 + $0x5c8] sm:$0xff]  }
  0x77   :  { %6602 = vmatprep.subr.bf16.mxu1 %v7262_v22  ;;  %v7312_v22 = vld [vmem:[%s9421_s1 + $0x508] sm:$0xff]  }
  0x78   :  { %6581 = vmatpush3.bf16.msra.mxu0 %v7263_v23  ;;  %v7313_v23 = vld [vmem:[%s9421_s1 + $0x588] sm:$0xff]  }
  0x79   :  { %6582 = vmatprep.subr.bf16.mxu0 %v7265_v25  ;;  %v7315_v25 = vld [vmem:[%s9421_s1 + $0x5d0] sm:$0xff]  }
  0x7a   :  { %6603 = vmatpush3.bf16.msra.mxu1 %v7264_v24  ;;  %v7314_v24 = vld [vmem:[%s9421_s1 + $0x550] sm:$0xff]  }
  0x7b   :  { %6604 = vmatprep.subr.bf16.mxu1 %v7266_v26  ;;  %v7316_v26 = vld [vmem:[%s9421_s1 + $0x510] sm:$0xff]  }
  0x7c   :  { %6583 = vmatpush3.bf16.msra.mxu0 %v7267_v27  ;;  %v7317_v27 = vld [vmem:[%s9421_s1 + $0x590] sm:$0xff]  }
  0x7d   :  { %6584 = vmatprep.subr.bf16.mxu0 %v7269_v29  ;;  %v7319_v29 = vld [vmem:[%s9421_s1 + $0x5d8] sm:$0xff]  }
  0x7e   :  { %6605 = vmatpush3.bf16.msra.mxu1 %v7268_v28  ;;  %v7318_v28 = vld [vmem:[%s9421_s1 + $0x558] sm:$0xff]  }
  0x7f   :  { %6606 = vmatprep.subr.bf16.mxu1 %v7270_v30  ;;  %v7320_v30 = vld [vmem:[%s9421_s1 + $0x518] sm:$0xff]  }
  0x80   :  { %6585 = vmatpush3.bf16.msra.mxu0 %v7271_v31  ;;  %v7321_v31 = vld [vmem:[%s9421_s1 + $0x598] sm:$0xff]  }
  0x81   :  { %6614 = vmatprep.subr.bf16.mxu0 %v7274_v34  ;;  %v7324_v34 = vld [vmem:[%s9421_s1 + $0x520] sm:$0xff]  }
  0x82   :  { %6607 = vmatpush3.bf16.msra.mxu1 %v7272_v32  ;;  %v7322_v32 = vld [vmem:[%s9421_s1 + $0x560] sm:$0xff]  }
  0x83   :  { %4870 = vmatmul.mubr.bf16.vlgmr.msra.gmra.mrb[12].mxu0 %v1148_v33  ;;  %6636 = vmatprep.subr.bf16.mxu1 %v7275_v35  ;;  %v7323_v33 = vld [vmem:[%s9421_s1 + $0x5e0] sm:$0xff]  }
  0x84   :  { %6615 = vmatpush3.bf16.msra.mxu0 %v7276_v36  ;;  %4949 = vmatprep.mubr.bf16.mxu0 %v1204_v7  ;;  %v7325_v35 = vld [vmem:[%s9421_s1 + $0x5a0] sm:$0xff]   ;;  %v7326_v36 = vld [vmem:[%s9421_s1 + $0x568] sm:$0xff]  }
  0x85   :  { %4910 = vmatmul.mubr.bf16.vlgmr.msra.gmra.mrb[12].mxu1 %v1164_v38  ;;  %6616 = vmatprep.subr.bf16.mxu0 %v7278_v39  ;;  %v7328_v38 = vld [vmem:[%s9421_s1 + $0x528] sm:$0xff]  }
  0x86   :  { %6637 = vmatpush3.bf16.msra.mxu1 %v7277_v37  ;;  %4989 = vmatprep.mubr.bf16.mxu1 %v1214_v11  ;;  %v7327_v37 = vld [vmem:[%s9421_s1 + $0x5e8] sm:$0xff]   ;;  %v7363_v11 = vld [vmem:[%s9421_s1 + $0x670] sm:$0xff]  }
  0x87   :  { %6638 = vmatprep.subr.bf16.mxu1 %v7279_v40  ;;  %v7329_v39 = vld [vmem:[%s9421_s1 + $0x5a8] sm:$0xff]   ;;  %v7330_v40 = vld [vmem:[%s9421_s1 + $0x570] sm:$0xff]  }
  0x88   :  { %6617 = vmatpush3.bf16.msra.mxu0 %v7280_v42  ;;  %v7331_v42 = vld [vmem:[%s9421_s1 + $0x5f0] sm:$0xff]   ;;  %v7359_v7 = vld [vmem:[%s9421_s1 + $0x668] sm:$0xff]  }
  0x89   :  { %6618 = vmatprep.subr.bf16.mxu0 %v7282_v44  ;;  %v7333_v44 = vld [vmem:[%s9421_s1 + $0x5b0] sm:$0xff]  }
  0x8a   :  { %6639 = vmatpush3.bf16.msra.mxu1 %v7281_v43  ;;  %v7332_v43 = vld [vmem:[%s9421_s1 + $0x530] sm:$0xff]  }
  0x8b   :  { %6640 = vmatprep.subr.bf16.mxu1 %v7283_v45  ;;  %v7334_v45 = vld [vmem:[%s9421_s1 + $0x578] sm:$0xff]  }
  0x8c   :  { %6619 = vmatpush3.bf16.msra.mxu0 %v7284_v46  ;;  %v7335_v46 = vld [vmem:[%s9421_s1 + $0x5f8] sm:$0xff]  }
  0x8d   :  { %6620 = vmatprep.subr.bf16.mxu0 %v7286_v48  ;;  %v7337_v48 = vld [vmem:[%s9421_s1 + $0x5b8] sm:$0xff]  }
  0x8e   :  { %6641 = vmatpush3.bf16.msra.mxu1 %v7285_v47  ;;  %v7336_v47 = vld [vmem:[%s9421_s1 + $0x538] sm:$0xff]  }
  0x8f   :  { %6642 = vmatprep.subr.bf16.mxu1 %v7287_v49  ;;  %v1197_v49 = vrot.slane %v8225_v4, %v7827_v41  ;;  %v7356_v4 = vld [vmem:[%s9421_s1 + $0x6e0] sm:$0xff]  }
  0x90   :  { %6621 = vmatpush3.bf16.msra.mxu0 %v7288_v50  ;;  %v7339_v50 = vld [vmem:[%s9421_s1 + $0x640] sm:$0xff]  }
  0x91   :  { %6622 = vmatprep.subr.bf16.mxu0 %v7290_v52  ;;  %v7341_v52 = vld [vmem:[%s9421_s1 + $0x600] sm:$0xff]  }
  0x92   :  { %6643 = vmatpush3.bf16.msra.mxu1 %v7289_v51  ;;  %v7340_v51 = vld [vmem:[%s9421_s1 + $0x6c0] sm:$0xff]  }
  0x93   :  { %6644 = vmatprep.subr.bf16.mxu1 %v7291_v53  ;;  %v7342_v53 = vld [vmem:[%s9421_s1 + $0x680] sm:$0xff]  }
  0x94   :  { %6623 = vmatpush3.bf16.msra.mxu0 %v7292_v54  ;;  %v1213_v54 = vcombine.high %v1197_v49, %v1197_v49 }
  0x95   :  { %6624 = vmatprep.subr.bf16.mxu0 %v7294_v56  ;;  %v7344_v56 = vld [vmem:[%s9421_s1 + $0x6c8] sm:$0xff]  }
  0x96   :  { %6645 = vmatpush3.bf16.msra.mxu1 %v7293_v55  ;;  %v7343_v55 = vld [vmem:[%s9421_s1 + $0x648] sm:$0xff]  }
  0x97   :  { %6646 = vmatprep.subr.bf16.mxu1 %v7295_v57  ;;  %v7345_v57 = vld [vmem:[%s9421_s1 + $0x608] sm:$0xff]  }
  0x98   :  { %6625 = vmatpush3.bf16.msra.mxu0 %v7296_v58  ;;  %v7346_v58 = vld [vmem:[%s9421_s1 + $0x688] sm:$0xff]  }
  0x99   :  { %6626 = vmatprep.subr.bf16.mxu0 %v7298_v60  ;;  %v7348_v60 = vld [vmem:[%s9421_s1 + $0x6d0] sm:$0xff]  }
  0x9a   :  { %6647 = vmatpush3.bf16.msra.mxu1 %v7297_v59  ;;  %v7347_v59 = vld [vmem:[%s9421_s1 + $0x650] sm:$0xff]  }
  0x9b   :  { %6648 = vmatprep.subr.bf16.mxu1 %v7299_v62  ;;  %v7350_v62 = vld [vmem:[%s9421_s1 + $0x690] sm:$0xff]  }
  0x9c   :  { %6627 = vmatpush3.bf16.msra.mxu0 %v7300_v1  ;;  %v7353_v1 = vld [vmem:[%s9421_s1 + $0x618] sm:$0xff]  }
  0x9d   :  { %6628 = vmatprep.subr.bf16.mxu0 %v7302_v5  ;;  %v7357_v5 = vld [vmem:[%s9421_s1 + $0x620] sm:$0xff]  }
  0x9e   :  { %6649 = vmatpush3.bf16.msra.mxu1 %v7301_v2  ;;  %v7354_v2 = vld [vmem:[%s9421_s1 + $0x698] sm:$0xff]  }
  0x9f   :  { %6650 = vmatprep.subr.bf16.mxu1 %v7303_v6  ;;  %v7358_v6 = vld [vmem:[%s9421_s1 + $0x6a0] sm:$0xff]  }
  0xa0   :  { %6629 = vmatpush3.bf16.msra.mxu0 %v7304_v9  ;;  %v7361_v9 = vld [vmem:[%s9421_s1 + $0x628] sm:$0xff]  }
  0xa1   :  { %6658 = vmatprep.subr.bf16.mxu0 %v7306_v13  ;;  %v7364_v13 = vld [vmem:[%s9421_s1 + $0x6f0] sm:$0xff]  }
  0xa2   :  { %6651 = vmatpush3.bf16.msra.mxu1 %v7305_v10  ;;  %v7362_v10 = vld [vmem:[%s9421_s1 + $0x6a8] sm:$0xff]  }
  0xa3   :  { %4950 = vmatmul.mubr.bf16.vlgmr.msra.gmra.mrb[16].mxu0 %v1190_v12  ;;  %6680 = vmatprep.subr.bf16.mxu1 %v7307_v14  ;;  %v25_v12 = vld [vmem:[%s9420_s0 + $0x18] sm:$0xff] }
  0xa4   :  { %6659 = vmatpush3.bf16.msra.mxu0 %v7308_v16  ;;  %5029 = vmatprep.mubr.bf16.mxu0 %v1211_v15  ;;  %v1223_v14 = vrot.slane %v25_v12, %v7827_v41  ;;  %v1216_v15 = vcombine.high %v25_v12, %v25_v12  ;;  %v7365_v16 = vld [vmem:[%s9421_s1 + $0x630] sm:$0xff]   ;;  %v7402_v12 = vld [vmem:[%s9421_s1 + $0x7b8] sm:$0xff]  }
  0xa5   :  { %4990 = vmatmul.mubr.bf16.vlgmr.msra.gmra.mrb[16].mxu1 %v1212_v18  ;;  %6660 = vmatprep.subr.bf16.mxu0 %v7310_v19 }
  0xa6   :  { %6681 = vmatpush3.bf16.msra.mxu1 %v7309_v17  ;;  %5069 = vmatprep.mubr.bf16.mxu1 %v1215_v21  ;;  %v7367_v17 = vld [vmem:[%s9421_s1 + $0x678] sm:$0xff]   ;;  %v1231_v18 = vcombine.high %v1223_v14, %v1223_v14  ;;  %v8431_v19 = vrot.slane %v1216_v15, %v7827_v41  ;;  %v7405_v15 = vld [vmem:[%s9421_s1 + $0x8c0] sm:$0xff]  }
  0xa7   :  { %6682 = vmatprep.subr.bf16.mxu1 %v7311_v20  ;;  %v7366_v20 = vld [vmem:[%s9421_s1 + $0x6b0] sm:$0xff]   ;;  %v7368_v21 = vld [vmem:[%s9421_s1 + $0x6f8] sm:$0xff]  }
  0xa8   :  { %6661 = vmatpush3.bf16.msra.mxu0 %v7312_v22  ;;  %v1253_v22 = vrot.slane %v1231_v18, %v7827_v41 }
  0xa9   :  { %6662 = vmatprep.subr.bf16.mxu0 %v7314_v24  ;;  %v7369_v24 = vld [vmem:[%s9421_s1 + $0x638] sm:$0xff]  }
  0xaa   :  { %6683 = vmatpush3.bf16.msra.mxu1 %v7313_v23  ;;  %v1232_v23 = vcombine.high %v8431_v19, %v8431_v19 }
  0xab   :  { %6684 = vmatprep.subr.bf16.mxu1 %v7315_v25  ;;  %v1263_v25 = vcombine.high %v1253_v22, %v1253_v22 }
  0xac   :  { %6663 = vmatpush3.bf16.msra.mxu0 %v7316_v26  ;;  %v1239_v26 = vrot.slane %v1223_v14, %v7827_v41  ;;  %v7404_v14 = vld [vmem:[%s9421_s1 + $0x840] sm:$0xff]  }
  0xad   :  { %6664 = vmatprep.subr.bf16.mxu0 %v7318_v28  ;;  %v7370_v28 = vld [vmem:[%s9421_s1 + $0x6b8] sm:$0xff]  }
  0xae   :  { %6685 = vmatpush3.bf16.msra.mxu1 %v7317_v27  ;;  %v7371_v27 = vld [vmem:[%s9421_s1 + $0x740] sm:$0xff]  }
  0xaf   :  { %6686 = vmatprep.subr.bf16.mxu1 %v7319_v29  ;;  %v1260_v29 = vrot.slane %v1232_v23, %v7827_v41  ;;  %v7412_v23 = vld [vmem:[%s9421_s1 + $0x850] sm:$0xff]  }
  0xb0   :  { %6665 = vmatpush3.bf16.msra.mxu0 %v7320_v30  ;;  %v7372_v30 = vld [vmem:[%s9421_s1 + $0x7c0] sm:$0xff]  }
  0xb1   :  { %6666 = vmatprep.subr.bf16.mxu0 %v7322_v32  ;;  %v1261_v32 = vcombine.high %v1239_v26, %v1239_v26 }
  0xb2   :  { %6687 = vmatpush3.bf16.msra.mxu1 %v7321_v31  ;;  %v7373_v31 = vld [vmem:[%s9421_s1 + $0x700] sm:$0xff]  }
  0xb3   :  { %6688 = vmatprep.subr.bf16.mxu1 %v7323_v33  ;;  %v7375_v33 = vld [vmem:[%s9421_s1 + $0x748] sm:$0xff]  }
  0xb4   :  { %6667 = vmatpush3.bf16.msra.mxu0 %v7324_v34  ;;  %v7374_v34 = vld [vmem:[%s9421_s1 + $0x780] sm:$0xff]  }
  0xb5   :  { %6668 = vmatprep.subr.bf16.mxu0 %v7326_v36  ;;  %v7376_v36 = vld [vmem:[%s9421_s1 + $0x7c8] sm:$0xff]  }
  0xb6   :  { %6689 = vmatpush3.bf16.msra.mxu1 %v7325_v35  ;;  %v1264_v35 = vcombine.high %v1260_v29, %v1260_v29 }
  0xb7   :  { %6690 = vmatprep.subr.bf16.mxu1 %v7327_v37  ;;  %v7377_v37 = vld [vmem:[%s9421_s1 + $0x708] sm:$0xff]  }
  0xb8   :  { %6669 = vmatpush3.bf16.msra.mxu0 %v7328_v38  ;;  %v7379_v38 = vld [vmem:[%s9421_s1 + $0x750] sm:$0xff]  }
  0xb9   :  { %6670 = vmatprep.subr.bf16.mxu0 %v7330_v40  ;;  %v7380_v40 = vld [vmem:[%s9421_s1 + $0x7d0] sm:$0xff]  }
  0xba   :  { %6691 = vmatpush3.bf16.msra.mxu1 %v7329_v39  ;;  %v7378_v39 = vld [vmem:[%s9421_s1 + $0x788] sm:$0xff]  }
  0xbb   :  { %6692 = vmatprep.subr.bf16.mxu1 %v7331_v42  ;;  %v7381_v42 = vld [vmem:[%s9421_s1 + $0x710] sm:$0xff]  }
  0xbc   :  { %6671 = vmatpush3.bf16.msra.mxu0 %v7332_v43  ;;  %v7383_v43 = vld [vmem:[%s9421_s1 + $0x758] sm:$0xff]  }
  0xbd   :  { %6672 = vmatprep.subr.bf16.mxu0 %v7334_v45  ;;  %v7384_v45 = vld [vmem:[%s9421_s1 + $0x7d8] sm:$0xff]  }
  0xbe   :  { %6693 = vmatpush3.bf16.msra.mxu1 %v7333_v44  ;;  %v7382_v44 = vld [vmem:[%s9421_s1 + $0x790] sm:$0xff]  }
  0xbf   :  { %6694 = vmatprep.subr.bf16.mxu1 %v7335_v46  ;;  %v7385_v46 = vld [vmem:[%s9421_s1 + $0x718] sm:$0xff]  }
  0xc0   :  { %6673 = vmatpush3.bf16.msra.mxu0 %v7336_v47  ;;  %v7386_v47 = vld [vmem:[%s9421_s1 + $0x798] sm:$0xff]  }
  0xc1   :  { %6702 = vmatprep.subr.bf16.mxu0 %v7339_v50  ;;  %v7389_v50 = vld [vmem:[%s9421_s1 + $0x720] sm:$0xff]  }
  0xc2   :  { %6695 = vmatpush3.bf16.msra.mxu1 %v7337_v48  ;;  %v7387_v48 = vld [vmem:[%s9421_s1 + $0x760] sm:$0xff]  }
  0xc3   :  { %5030 = vmatmul.mubr.bf16.vlgmr.msra.gmra.mrb[20].mxu0 %v1197_v49  ;;  %6724 = vmatprep.subr.bf16.mxu1 %v7340_v51  ;;  %v7388_v49 = vld [vmem:[%s9421_s1 + $0x7e0] sm:$0xff]  }
  0xc4   :  { %6703 = vmatpush3.bf16.msra.mxu0 %v7341_v52  ;;  %5109 = vmatprep.mubr.bf16.mxu0 %v1253_v22  ;;  %v7390_v51 = vld [vmem:[%s9421_s1 + $0x7a0] sm:$0xff]   ;;  %v7391_v52 = vld [vmem:[%s9421_s1 + $0x768] sm:$0xff]  }
  0xc5   :  { %5070 = vmatmul.mubr.bf16.vlgmr.msra.gmra.mrb[20].mxu1 %v1213_v54  ;;  %6704 = vmatprep.subr.bf16.mxu0 %v7343_v55  ;;  %v7393_v54 = vld [vmem:[%s9421_s1 + $0x728] sm:$0xff]  }
  0xc6   :  { %6725 = vmatpush3.bf16.msra.mxu1 %v7342_v53  ;;  %5149 = vmatprep.mubr.bf16.mxu1 %v1263_v25  ;;  %v7392_v53 = vld [vmem:[%s9421_s1 + $0x7e8] sm:$0xff]   ;;  %v7414_v25 = vld [vmem:[%s9421_s1 + $0x810] sm:$0xff]  }
  0xc7   :  { %6726 = vmatprep.subr.bf16.mxu1 %v7344_v56  ;;  %v7394_v55 = vld [vmem:[%s9421_s1 + $0x7a8] sm:$0xff]   ;;  %v5923_v56 = vld [vmem:[%s9422_s2] ss:$0 sm:$0xff] }
  0xc8   :  { %6705 = vmatpush3.bf16.msra.mxu0 %v7345_v57  ;;  %v7395_v57 = vld [vmem:[%s9421_s1 + $0x770] sm:$0xff]   ;;  %v7411_v22 = vld [vmem:[%s9421_s1 + $0x888] sm:$0xff]  }
  0xc9   :  { %6706 = vmatprep.subr.bf16.mxu0 %v7347_v59  ;;  %v7396_v59 = vld [vmem:[%s9421_s1 + $0x7f0] sm:$0xff]  }
  0xca   :  { %6727 = vmatpush3.bf16.msra.mxu1 %v7346_v58 }
  0xcb   :  { %6728 = vmatprep.subr.bf16.mxu1 %v7348_v60 }
  0xcc   :  { %6707 = vmatpush3.bf16.msra.mxu0 %v7349_v61  ;;  %v7397_v61 = vld [vmem:[%s9421_s1 + $0x730] sm:$0xff]  }
  0xcd   :  { %6708 = vmatprep.subr.bf16.mxu0 %v7351_v63 }
  0xce   :  { %6729 = vmatpush3.bf16.msra.mxu1 %v7350_v62 }
  0xcf   :  { %6730 = vmatprep.subr.bf16.mxu1 %v7352_v0 }
  0xd0   :  { %6709 = vmatpush3.bf16.msra.mxu0 %v7353_v1  ;;  %v7398_v1 = vld [vmem:[%s9421_s1 + $0x7b0] sm:$0xff]  }
  0xd1   :  { %6710 = vmatprep.subr.bf16.mxu0 %v7355_v3 }
  0xd2   :  { %6731 = vmatpush3.bf16.msra.mxu1 %v7354_v2  ;;  %v7399_v2 = vld [vmem:[%s9421_s1 + $0x778] sm:$0xff]  }
  0xd3   :  { %6732 = vmatprep.subr.bf16.mxu1 %v7356_v4 }
  0xd4   :  { %6711 = vmatpush3.bf16.msra.mxu0 %v7357_v5 }
  0xd5   :  { %6712 = vmatprep.subr.bf16.mxu0 %v7359_v7 }
  0xd6   :  { %6733 = vmatpush3.bf16.msra.mxu1 %v7358_v6 }
  0xd7   :  { %6734 = vmatprep.subr.bf16.mxu1 %v7360_v8  ;;  %v7400_v8 = vld [vmem:[%s9421_s1 + $0x7f8] sm:$0xff]  }
  0xd8   :  { %6713 = vmatpush3.bf16.msra.mxu0 %v7361_v9 }
  0xd9   :  { %6714 = vmatprep.subr.bf16.mxu0 %v7363_v11 }
  0xda   :  { %6735 = vmatpush3.bf16.msra.mxu1 %v7362_v10  ;;  %v7401_v10 = vld [vmem:[%s9421_s1 + $0x738] sm:$0xff]  }
  0xdb   :  { %6736 = vmatprep.subr.bf16.mxu1 %v7364_v13  ;;  %v1246_v13 = vrot.slane %v8431_v19, %v7827_v41  ;;  %v7408_v19 = vld [vmem:[%s9421_s1 + $0x848] sm:$0xff]  }
  0xdc   :  { %6715 = vmatpush3.bf16.msra.mxu0 %v7365_v16  ;;  %v7406_v16 = vld [vmem:[%s9421_s1 + $0x800] sm:$0xff]  }
  0xdd   :  { %6716 = vmatprep.subr.bf16.mxu0 %v7367_v17  ;;  %v7407_v17 = vld [vmem:[%s9421_s1 + $0x880] sm:$0xff]   ;;  %v1262_v18 = vcombine.high %v1246_v13, %v1246_v13 }
  0xde   :  { %6737 = vmatpush3.bf16.msra.mxu1 %v7366_v20  ;;  %v7409_v20 = vld [vmem:[%s9421_s1 + $0x8c8] sm:$0xff]  }
  0xdf   :  { %6738 = vmatprep.subr.bf16.mxu1 %v7368_v21  ;;  %v7410_v21 = vld [vmem:[%s9421_s1 + $0x808] sm:$0xff]  }
  0xe0   :  { %6717 = vmatpush3.bf16.msra.mxu0 %v7369_v24  ;;  %v7413_v24 = vld [vmem:[%s9421_s1 + $0x8d0] sm:$0xff]  }
  0xe1   :  { %6746 = vmatprep.subr.bf16.mxu0 %v7371_v27  ;;  %v7416_v27 = vld [vmem:[%s9421_s1 + $0x858] sm:$0xff]  }
  0xe2   :  { %6739 = vmatpush3.bf16.msra.mxu1 %v7370_v28  ;;  %v7417_v28 = vld [vmem:[%s9421_s1 + $0x8d8] sm:$0xff]  }
  0xe3   :  { %5110 = vmatmul.mubr.bf16.vlgmr.msra.gmra.mrb[24].mxu0 %v1239_v26  ;;  %6768 = vmatprep.subr.bf16.mxu1 %v7372_v30  ;;  %v7415_v26 = vld [vmem:[%s9421_s1 + $0x890] sm:$0xff]   ;;  %v7419_v30 = vld [vmem:[%s9421_s1 + $0x898] sm:$0xff]  }
  0xe4   :  { %6747 = vmatpush3.bf16.msra.mxu0 %v7373_v31  ;;  %5189 = vmatprep.mubr.bf16.mxu0 %v1260_v29  ;;  %v7418_v29 = vld [vmem:[%s9421_s1 + $0x818] sm:$0xff]   ;;  %v7420_v31 = vld [vmem:[%s9421_s1 + $0x860] sm:$0xff]  }
  0xe5   :  { %5150 = vmatmul.mubr.bf16.vlgmr.msra.gmra.mrb[24].mxu1 %v1261_v32  ;;  %6748 = vmatprep.subr.bf16.mxu0 %v7375_v33  ;;  %v7421_v32 = vld [vmem:[%s9421_s1 + $0x8e0] sm:$0xff]  }
  0xe6   :  { %6769 = vmatpush3.bf16.msra.mxu1 %v7374_v34  ;;  %5229 = vmatprep.mubr.bf16.mxu1 %v1264_v35  ;;  %v7422_v33 = vld [vmem:[%s9421_s1 + $0x820] sm:$0xff]   ;;  %v7424_v35 = vld [vmem:[%s9421_s1 + $0x868] sm:$0xff]  }
  0xe7   :  { %6770 = vmatprep.subr.bf16.mxu1 %v7376_v36  ;;  %v7423_v34 = vld [vmem:[%s9421_s1 + $0x8a0] sm:$0xff]   ;;  %v7425_v36 = vld [vmem:[%s9421_s1 + $0x8e8] sm:$0xff]  }
  0xe8   :  { %6749 = vmatpush3.bf16.msra.mxu0 %v7377_v37  ;;  %v7426_v37 = vld [vmem:[%s9421_s1 + $0x828] sm:$0xff]  }
  0xe9   :  { %6750 = vmatprep.subr.bf16.mxu0 %v7379_v38  ;;  %v7427_v38 = vld [vmem:[%s9421_s1 + $0x8a8] sm:$0xff]  }
  0xea   :  { %6771 = vmatpush3.bf16.msra.mxu1 %v7378_v39  ;;  %v7428_v39 = vld [vmem:[%s9421_s1 + $0x870] sm:$0xff]  }
  0xeb   :  { %6772 = vmatprep.subr.bf16.mxu1 %v7380_v40  ;;  %v7429_v40 = vld [vmem:[%s9421_s1 + $0x8f0] sm:$0xff]  }
  0xec   :  { %6751 = vmatpush3.bf16.msra.mxu0 %v7381_v42 }
  0xed   :  { %6752 = vmatprep.subr.bf16.mxu0 %v7383_v43  ;;  %v7430_v43 = vld [vmem:[%s9421_s1 + $0x830] sm:$0xff]  }
  0xee   :  { %6773 = vmatpush3.bf16.msra.mxu1 %v7382_v44 }
  0xef   :  { %6774 = vmatprep.subr.bf16.mxu1 %v7384_v45  ;;  %v26_v45 = vld [vmem:[%s9420_s0 + $0x20] sm:$0xff] }
  0xf0   :  { %6753 = vmatpush3.bf16.msra.mxu0 %v7385_v46 }
  0xf1   :  { %6754 = vmatprep.subr.bf16.mxu0 %v7387_v48 }
  0xf2   :  { %6775 = vmatpush3.bf16.msra.mxu1 %v7386_v47 }
  0xf3   :  { %6776 = vmatprep.subr.bf16.mxu1 %v7388_v49  ;;  %v7431_v49 = vld [vmem:[%s9421_s1 + $0x8b0] sm:$0xff]  }
  0xf4   :  { %6755 = vmatpush3.bf16.msra.mxu0 %v7389_v50  ;;  %v7432_v50 = vld [vmem:[%s9421_s1 + $0x878] sm:$0xff]  }
  0xf5   :  { %6756 = vmatprep.subr.bf16.mxu0 %v7391_v52  ;;  %v1265_v52 = vcombine.high %v26_v45, %v26_v45 }
  0xf6   :  { %6777 = vmatpush3.bf16.msra.mxu1 %v7390_v51  ;;  %v6454_v58 = vpop.f32.mrb[0].mxu0  ;;  %v1272_v51 = vrot.slane %v26_v45, %v7827_v41 }
  0xf7   :  { %v6455_v60 = vpop.f32.mrb[1].mxu0  ;;  %6778 = vmatprep.subr.bf16.mxu1 %v7392_v53  ;;  %v6476_v62 = vpop.f32.mrb[0].mxu1 }
  0xf8   :  { %v6456_v63 = vadd.f32 %v6455_v60, %v6454_v58  ;;  %v6457_v0 = vpop.f32.mrb[2].mxu0  ;;  %6757 = vmatpush3.bf16.msra.mxu0 %v7393_v54  ;;  %v6477_v3 = vpop.f32.mrb[1].mxu1  ;;  %v7433_v58 = vld [vmem:[%s9421_s1 + $0x8f8] sm:$0xff]  }
  0xf9   :  { %v6458_v4 = vpop.f32.mrb[3].mxu0  ;;  %6758 = vmatprep.subr.bf16.mxu0 %v7395_v57  ;;  %v6478_v6 = vadd.f32 %v6477_v3, %v6476_v62  ;;  %v6479_v7 = vpop.f32.mrb[2].mxu1  ;;  %v8652_v62 = vrot.slane %v1265_v52, %v7827_v41  ;;  %v7435_v0 = vld [vmem:[%s9421_s1 + $0x8b8] sm:$0xff]   ;;  %v7436_v3 = vld [vmem:[%s9421_s1 + $0x940] sm:$0xff]  }
  0xfa   :  { %v4632_v5 = vadd.f32 %v6456_v63, %v5923_v56  ;;  %6779 = vmatpush3.bf16.msra.mxu1 %v7394_v55  ;;  %v6480_v9 = vpop.f32.mrb[3].mxu1  ;;  %v7438_v7 = vld [vmem:[%s9421_s1 + $0x900] sm:$0xff]   ;;  %v7467_v52 = vld [vmem:[%s9421_s1 + $0x9b8] sm:$0xff]  }
  0xfb   :  { %6780 = vmatprep.subr.bf16.mxu1 %v7396_v59  ;;  %v1280_v59 = vcombine.high %v1272_v51, %v1272_v51  ;;  %v1281_v4 = vcombine.high %v8652_v62, %v8652_v62  ;;  %v7439_v9 = vld [vmem:[%s9421_s1 + $0x980] sm:$0xff]  }
  0xfc   :  { %v8546_v11 = vadd.f32 %v6478_v6, %v4632_v5  ;;  %6759 = vmatpush3.bf16.msra.mxu0 %v7397_v61  ;;  %v7434_v61 = vld [vmem:[%s9421_s1 + $0x838] sm:$0xff]   ;;  %v7437_v6 = vld [vmem:[%s9421_s1 + $0x9c0] sm:$0xff]  }
  0xfd   :  { %6760 = vmatprep.subr.bf16.mxu0 %v7399_v2  ;;  %v1288_v2 = vrot.slane %v1272_v51, %v7827_v41 }
  0xfe   :  { %6781 = vmatpush3.bf16.msra.mxu1 %v7398_v1  ;;  %v1302_v1 = vrot.slane %v1280_v59, %v7827_v41  ;;  %v7473_v59 = vld [vmem:[%s9421_s1 + $0xa48] sm:$0xff]  }
  0xff   :  { %6782 = vmatprep.subr.bf16.mxu1 %v7400_v8  ;;  %v1309_v8 = vrot.slane %v1281_v4, %v7827_v41  ;;  %v7482_v4 = vld [vmem:[%s9421_s1 + $0xad8] sm:$0xff]  }
 0x100   :  { %6761 = vmatpush3.bf16.msra.mxu0 %v7401_v10  ;;  %v1312_v5 = vcombine.high %v1302_v1, %v1302_v1  ;;  %v1310_v10 = vcombine.high %v1288_v2, %v1288_v2 }
 0x101   :  { %6790 = vmatprep.subr.bf16.mxu0 %v7404_v14  ;;  %v7442_v14 = vld [vmem:[%s9421_s1 + $0x908] sm:$0xff]  }
 0x102   :  { %6783 = vmatpush3.bf16.msra.mxu1 %v7402_v12  ;;  %v7441_v12 = vld [vmem:[%s9421_s1 + $0x9c8] sm:$0xff]  }
 0x103   :  { %5190 = vmatmul.mubr.bf16.vlgmr.msra.gmra.mrb[28].mxu0 %v1246_v13  ;;  %6812 = vmatprep.subr.bf16.mxu1 %v7405_v15  ;;  %v1313_v13 = vcombine.high %v1309_v8, %v1309_v8  ;;  %v7443_v15 = vld [vmem:[%s9421_s1 + $0x988] sm:$0xff]  }
 0x104   :  { %6791 = vmatpush3.bf16.msra.mxu0 %v7406_v16  ;;  %5269 = vmatprep.mubr.bf16.mxu0 %v1302_v1  ;;  %v7444_v16 = vld [vmem:[%s9421_s1 + $0x950] sm:$0xff]  }
 0x105   :  { %5230 = vmatmul.mubr.bf16.vlgmr.msra.gmra.mrb[28].mxu1 %v1262_v18  ;;  %6792 = vmatprep.subr.bf16.mxu0 %v7408_v19  ;;  %v7446_v18 = vld [vmem:[%s9421_s1 + $0x910] sm:$0xff]  }
 0x106   :  { %6813 = vmatpush3.bf16.msra.mxu1 %v7407_v17  ;;  %5309 = vmatprep.mubr.bf16.mxu1 %v1312_v5  ;;  %v7445_v17 = vld [vmem:[%s9421_s1 + $0x9d0] sm:$0xff]   ;;  %v7483_v5 = vld [vmem:[%s9421_s1 + $0xa18] sm:$0xff]  }
 0x107   :  { %6814 = vmatprep.subr.bf16.mxu1 %v7409_v20  ;;  %v7447_v19 = vld [vmem:[%s9421_s1 + $0x990] sm:$0xff]   ;;  %v7448_v20 = vld [vmem:[%s9421_s1 + $0x958] sm:$0xff]  }
 0x108   :  { %6793 = vmatpush3.bf16.msra.mxu0 %v7410_v21  ;;  %v7449_v21 = vld [vmem:[%s9421_s1 + $0x9d8] sm:$0xff]   ;;  %v7479_v1 = vld [vmem:[%s9421_s1 + $0xa10] sm:$0xff]  }
 0x109   :  { %6794 = vmatprep.subr.bf16.mxu0 %v7412_v23  ;;  %v7451_v23 = vld [vmem:[%s9421_s1 + $0x998] sm:$0xff]  }
 0x10a   :  { %6815 = vmatpush3.bf16.msra.mxu1 %v7411_v22  ;;  %v7450_v22 = vld [vmem:[%s9421_s1 + $0x918] sm:$0xff]  }
 0x10b   :  { %6816 = vmatprep.subr.bf16.mxu1 %v7413_v24  ;;  %v7452_v24 = vld [vmem:[%s9421_s1 + $0x960] sm:$0xff]  }
 0x10c   :  { %6795 = vmatpush3.bf16.msra.mxu0 %v7414_v25  ;;  %v7453_v25 = vld [vmem:[%s9421_s1 + $0x9e0] sm:$0xff]  }
 0x10d   :  { %6796 = vmatprep.subr.bf16.mxu0 %v7416_v27  ;;  %v7455_v27 = vld [vmem:[%s9421_s1 + $0x9a0] sm:$0xff]  }
 0x10e   :  { %6817 = vmatpush3.bf16.msra.mxu1 %v7415_v26  ;;  %v7454_v26 = vld [vmem:[%s9421_s1 + $0x920] sm:$0xff]  }
 0x10f   :  { %6818 = vmatprep.subr.bf16.mxu1 %v7417_v28  ;;  %v7456_v28 = vld [vmem:[%s9421_s1 + $0x968] sm:$0xff]  }
 0x110   :  { %6797 = vmatpush3.bf16.msra.mxu0 %v7418_v29  ;;  %v7457_v29 = vld [vmem:[%s9421_s1 + $0x9e8] sm:$0xff]  }
 0x111   :  { %6798 = vmatprep.subr.bf16.mxu0 %v7420_v31  ;;  %v7459_v31 = vld [vmem:[%s9421_s1 + $0x9a8] sm:$0xff]  }
 0x112   :  { %6819 = vmatpush3.bf16.msra.mxu1 %v7419_v30  ;;  %v7458_v30 = vld [vmem:[%s9421_s1 + $0x928] sm:$0xff]  }
 0x113   :  { %6820 = vmatprep.subr.bf16.mxu1 %v7421_v32  ;;  %v7460_v32 = vld [vmem:[%s9421_s1 + $0x970] sm:$0xff]  }
 0x114   :  { %6799 = vmatpush3.bf16.msra.mxu0 %v7422_v33 }
 0x115   :  { %6800 = vmatprep.subr.bf16.mxu0 %v7424_v35 }
 0x116   :  { %6821 = vmatpush3.bf16.msra.mxu1 %v7423_v34  ;;  %v6498_v42 = vpop.f32.mrb[4].mxu0  ;;  %v7461_v34 = vld [vmem:[%s9421_s1 + $0x9f0] sm:$0xff]  }
 0x117   :  { %v6499_v44 = vpop.f32.mrb[5].mxu0  ;;  %6822 = vmatprep.subr.bf16.mxu1 %v7425_v36  ;;  %v6520_v46 = vpop.f32.mrb[4].mxu1  ;;  %v7462_v36 = vld [vmem:[%s9421_s1 + $0x930] sm:$0xff]  }
 0x118   :  { %v6500_v47 = vadd.f32 %v6499_v44, %v6498_v42  ;;  %v6501_v48 = vpop.f32.mrb[6].mxu0  ;;  %6801 = vmatpush3.bf16.msra.mxu0 %v7426_v37  ;;  %v6521_v53 = vpop.f32.mrb[5].mxu1  ;;  %v7464_v42 = vld [vmem:[%s9421_s1 + $0x978] sm:$0xff]  }
 0x119   :  { %v6502_v54 = vpop.f32.mrb[7].mxu0  ;;  %6802 = vmatprep.subr.bf16.mxu0 %v7428_v39  ;;  %v6522_v56 = vadd.f32 %v6521_v53, %v6520_v46  ;;  %v6523_v57 = vpop.f32.mrb[6].mxu1  ;;  %v7465_v48 = vld [vmem:[%s9421_s1 + $0x9f8] sm:$0xff]   ;;  %v1295_v53 = vrot.slane %v8652_v62, %v7827_v41  ;;  %v7476_v62 = vld [vmem:[%s9421_s1 + $0xa88] sm:$0xff]  }
 0x11a   :  { %v4712_v55 = vadd.f32 %v6500_v47, %v8546_v11  ;;  %6823 = vmatpush3.bf16.msra.mxu1 %v7427_v38  ;;  %v6524_v60 = vpop.f32.mrb[7].mxu1  ;;  %v7440_v11 = vld [vmem:[%s9421_s1 + $0x948] sm:$0xff]   ;;  %v7469_v54 = vld [vmem:[%s9421_s1 + $0xa40] sm:$0xff]  }
 0x11b   :  { %6824 = vmatprep.subr.bf16.mxu1 %v7429_v40  ;;  %v7463_v40 = vld [vmem:[%s9421_s1 + $0x9b0] sm:$0xff]   ;;  %v7472_v57 = vld [vmem:[%s9421_s1 + $0xa80] sm:$0xff]   ;;  %v7474_v60 = vld [vmem:[%s9421_s1 + $0xac8] sm:$0xff]  }
 0x11c   :  { %v8654_v63 = vadd.f32 %v6522_v56, %v4712_v55  ;;  %6803 = vmatpush3.bf16.msra.mxu0 %v7430_v43  ;;  %v7470_v55 = vld [vmem:[%s9421_s1 + $0xac0] sm:$0xff]  }
 0x11d   :  { %6804 = vmatprep.subr.bf16.mxu0 %v7432_v50  ;;  %v7466_v50 = vld [vmem:[%s9421_s1 + $0x938] sm:$0xff]   ;;  %v7471_v56 = vld [vmem:[%s9421_s1 + $0xa00] sm:$0xff]  }
 0x11e   :  { %6825 = vmatpush3.bf16.msra.mxu1 %v7431_v49 }
 0x11f   :  { %6826 = vmatprep.subr.bf16.mxu1 %v7433_v58  ;;  %v1311_v58 = vcombine.high %v1295_v53, %v1295_v53 }
 0x120   :  { %6805 = vmatpush3.bf16.msra.mxu0 %v7434_v61  ;;  %v7475_v61 = vld [vmem:[%s9421_s1 + $0xa08] sm:$0xff]  }
 0x121   :  { %6834 = vmatprep.subr.bf16.mxu0 %v7436_v3  ;;  %v7481_v3 = vld [vmem:[%s9421_s1 + $0xa58] sm:$0xff]  }
 0x122   :  { %6827 = vmatpush3.bf16.msra.mxu1 %v7435_v0  ;;  %v7478_v0 = vld [vmem:[%s9421_s1 + $0xad0] sm:$0xff]  }
 0x123   :  { %5270 = vmatmul.mubr.bf16.vlgmr.msra.gmra.mrb[32].mxu0 %v1288_v2  ;;  %6856 = vmatprep.subr.bf16.mxu1 %v7437_v6  ;;  %v7480_v2 = vld [vmem:[%s9421_s1 + $0xa90] sm:$0xff]   ;;  %v7484_v6 = vld [vmem:[%s9421_s1 + $0xa98] sm:$0xff]  }
 0x124   :  { %6835 = vmatpush3.bf16.msra.mxu0 %v7438_v7  ;;  %5349 = vmatprep.mubr.bf16.mxu0 %v1309_v8  ;;  %v7485_v7 = vld [vmem:[%s9421_s1 + $0xa60] sm:$0xff]  }
 0x125   :  { %5310 = vmatmul.mubr.bf16.vlgmr.msra.gmra.mrb[32].mxu1 %v1310_v10  ;;  %6836 = vmatprep.subr.bf16.mxu0 %v7440_v11  ;;  %v7486_v8 = vld [vmem:[%s9421_s1 + $0xae0] sm:$0xff]   ;;  %v7489_v11 = vld [vmem:[%s9421_s1 + $0xa68] sm:$0xff]  }
 0x126   :  { %6857 = vmatpush3.bf16.msra.mxu1 %v7439_v9  ;;  %5389 = vmatprep.mubr.bf16.mxu1 %v1313_v13  ;;  %v7487_v9 = vld [vmem:[%s9421_s1 + $0xa20] sm:$0xff]   ;;  %v7491_v13 = vld [vmem:[%s9421_s1 + $0xa28] sm:$0xff]  }
 0x127   :  { %6858 = vmatprep.subr.bf16.mxu1 %v7441_v12  ;;  %v7488_v10 = vld [vmem:[%s9421_s1 + $0xaa0] sm:$0xff]   ;;  %v7490_v12 = vld [vmem:[%s9421_s1 + $0xae8] sm:$0xff]  }
 0x128   :  { %6837 = vmatpush3.bf16.msra.mxu0 %v7442_v14  ;;  %v7492_v14 = vld [vmem:[%s9421_s1 + $0xaa8] sm:$0xff]  }
 0x129   :  { %6838 = vmatprep.subr.bf16.mxu0 %v7444_v16 }
 0x12a   :  { %6859 = vmatpush3.bf16.msra.mxu1 %v7443_v15  ;;  %v7493_v15 = vld [vmem:[%s9421_s1 + $0xa70] sm:$0xff]  }
 0x12b   :  { %6860 = vmatprep.subr.bf16.mxu1 %v7445_v17  ;;  %v7494_v17 = vld [vmem:[%s9421_s1 + $0xaf0] sm:$0xff]  }
 0x12c   :  { %6839 = vmatpush3.bf16.msra.mxu0 %v7446_v18 }
 0x12d   :  { %6840 = vmatprep.subr.bf16.mxu0 %v7448_v20 }
 0x12e   :  { %6861 = vmatpush3.bf16.msra.mxu1 %v7447_v19  ;;  %v7495_v19 = vld [vmem:[%s9421_s1 + $0xa30] sm:$0xff]  }
 0x12f   :  { %6862 = vmatprep.subr.bf16.mxu1 %v7449_v21 }
 0x130   :  { %6841 = vmatpush3.bf16.msra.mxu0 %v7450_v22 }
 0x131   :  { %6842 = vmatprep.subr.bf16.mxu0 %v7452_v24  ;;  %v7497_v24 = vld [vmem:[%s9421_s1 + $0xa78] sm:$0xff]  }
 0x132   :  { %6863 = vmatpush3.bf16.msra.mxu1 %v7451_v23  ;;  %v7496_v23 = vld [vmem:[%s9421_s1 + $0xab0] sm:$0xff]  }
 0x133   :  { %6864 = vmatprep.subr.bf16.mxu1 %v7453_v25  ;;  %v27_v25 = vld [vmem:[%s9420_s0 + $0x28] sm:$0xff] }
 0x134   :  { %6843 = vmatpush3.bf16.msra.mxu0 %v7454_v26 }
 0x135   :  { %6844 = vmatprep.subr.bf16.mxu0 %v7456_v28  ;;  %v1321_v28 = vrot.slane %v27_v25, %v7827_v41 }
 0x136   :  { %6865 = vmatpush3.bf16.msra.mxu1 %v7455_v27  ;;  %v6542_v33 = vpop.f32.mrb[8].mxu0 }
 0x137   :  { %v6543_v35 = vpop.f32.mrb[9].mxu0  ;;  %6866 = vmatprep.subr.bf16.mxu1 %v7457_v29  ;;  %v1314_v29 = vcombine.high %v27_v25, %v27_v25  ;;  %v7531_v25 = vld [vmem:[%s9421_s1 + $0xb38] sm:$0xff]  }
 0x138   :  { %v6564_v37 = vpop.f32.mrb[8].mxu1  ;;  %v6544_v38 = vadd.f32 %v6543_v35, %v6542_v33  ;;  %v6545_v39 = vpop.f32.mrb[10].mxu0  ;;  %6845 = vmatpush3.bf16.msra.mxu0 %v7458_v30  ;;  %v7498_v33 = vld [vmem:[%s9421_s1 + $0xaf8] sm:$0xff]  }
 0x139   :  { %v6565_v43 = vpop.f32.mrb[9].mxu1  ;;  %v6546_v44 = vpop.f32.mrb[11].mxu0  ;;  %6846 = vmatprep.subr.bf16.mxu0 %v7460_v32  ;;  %v7499_v35 = vld [vmem:[%s9421_s1 + $0xa38] sm:$0xff]  }
 0x13a   :  { %v4792_v45 = vadd.f32 %v6544_v38, %v8654_v63  ;;  %v6566_v46 = vadd.f32 %v6565_v43, %v6564_v37  ;;  %v6567_v47 = vpop.f32.mrb[10].mxu1  ;;  %6867 = vmatpush3.bf16.msra.mxu1 %v7459_v31  ;;  %v7477_v63 = vld [vmem:[%s9421_s1 + $0xa50] sm:$0xff]   ;;  %v8864_v37 = vrot.slane %v1314_v29, %v7827_v41  ;;  %v7500_v39 = vld [vmem:[%s9421_s1 + $0xab8] sm:$0xff]   ;;  %v7501_v43 = vld [vmem:[%s9421_s1 + $0xb40] sm:$0xff]  }
 0x13b   :  { %v6568_v49 = vpop.f32.mrb[11].mxu1  ;;  %6868 = vmatprep.subr.bf16.mxu1 %v7461_v34  ;;  %v7503_v47 = vld [vmem:[%s9421_s1 + $0xb00] sm:$0xff]  }
 0x13c   :  { %v8758_v51 = vadd.f32 %v6566_v46, %v4792_v45  ;;  %6847 = vmatpush3.bf16.msra.mxu0 %v7462_v36  ;;  %v1329_v36 = vcombine.high %v1321_v28, %v1321_v28  ;;  %v1330_v44 = vcombine.high %v8864_v37, %v8864_v37  ;;  %v7502_v45 = vld [vmem:[%s9421_s1 + $0xbc0] sm:$0xff]  }
 0x13d   :  { %6848 = vmatprep.subr.bf16.mxu0 %v7464_v42  ;;  %v1337_v42 = vrot.slane %v1321_v28, %v7827_v41  ;;  %v7504_v49 = vld [vmem:[%s9421_s1 + $0xb80] sm:$0xff]   ;;  %v1344_v28 = vrot.slane %v8864_v37, %v7827_v41  ;;  %v7541_v37 = vld [vmem:[%s9421_s1 + $0xc88] sm:$0xff]  }
 0x13e   :  { %6869 = vmatpush3.bf16.msra.mxu1 %v7463_v40  ;;  %v1351_v40 = vrot.slane %v1329_v36, %v7827_v41  ;;  %v7534_v29 = vld [vmem:[%s9421_s1 + $0xc40] sm:$0xff]   ;;  %v7540_v36 = vld [vmem:[%s9421_s1 + $0xc08] sm:$0xff]  }
 0x13f   :  { %6870 = vmatprep.subr.bf16.mxu1 %v7465_v48  ;;  %v1358_v48 = vrot.slane %v1330_v44, %v7827_v41  ;;  %v7547_v44 = vld [vmem:[%s9421_s1 + $0xcd8] sm:$0xff]  }
 0x140   :  { %6849 = vmatpush3.bf16.msra.mxu0 %v7466_v50  ;;  %v1361_v46 = vcombine.high %v1351_v40, %v1351_v40  ;;  %v1359_v50 = vcombine.high %v1337_v42, %v1337_v42 }
 0x141   :  { %6878 = vmatprep.subr.bf16.mxu0 %v7469_v54  ;;  %v7507_v54 = vld [vmem:[%s9421_s1 + $0xb08] sm:$0xff]  }
 0x142   :  { %6871 = vmatpush3.bf16.msra.mxu1 %v7467_v52  ;;  %v7506_v52 = vld [vmem:[%s9421_s1 + $0xbc8] sm:$0xff]  }
 0x143   :  { %5350 = vmatmul.mubr.bf16.vlgmr.msra.gmra.mrb[36].mxu0 %v1295_v53  ;;  %6900 = vmatprep.subr.bf16.mxu1 %v7470_v55  ;;  %v1362_v53 = vcombine.high %v1358_v48, %v1358_v48  ;;  %v7508_v55 = vld [vmem:[%s9421_s1 + $0xb88] sm:$0xff]  }
 0x144   :  { %6879 = vmatpush3.bf16.msra.mxu0 %v7471_v56  ;;  %5429 = vmatprep.mubr.bf16.mxu0 %v1351_v40  ;;  %v7509_v56 = vld [vmem:[%s9421_s1 + $0xb50] sm:$0xff]  }
 0x145   :  { %5390 = vmatmul.mubr.bf16.vlgmr.msra.gmra.mrb[36].mxu1 %v1311_v58  ;;  %6880 = vmatprep.subr.bf16.mxu0 %v7473_v59  ;;  %v7511_v58 = vld [vmem:[%s9421_s1 + $0xb10] sm:$0xff]  }
 0x146   :  { %6901 = vmatpush3.bf16.msra.mxu1 %v7472_v57  ;;  %5469 = vmatprep.mubr.bf16.mxu1 %v1361_v46  ;;  %v7510_v57 = vld [vmem:[%s9421_s1 + $0xbd0] sm:$0xff]   ;;  %v7549_v46 = vld [vmem:[%s9421_s1 + $0xc98] sm:$0xff]  }
 0x147   :  { %6902 = vmatprep.subr.bf16.mxu1 %v7474_v60  ;;  %v7512_v59 = vld [vmem:[%s9421_s1 + $0xb90] sm:$0xff]   ;;  %v7513_v60 = vld [vmem:[%s9421_s1 + $0xb58] sm:$0xff]  }
 0x148   :  { %6881 = vmatpush3.bf16.msra.mxu0 %v7475_v61  ;;  %v7514_v61 = vld [vmem:[%s9421_s1 + $0xbd8] sm:$0xff]   ;;  %v7544_v40 = vld [vmem:[%s9421_s1 + $0xc10] sm:$0xff]  }
 0x149   :  { %6882 = vmatprep.subr.bf16.mxu0 %v7477_v63  ;;  %v7516_v63 = vld [vmem:[%s9421_s1 + $0xb98] sm:$0xff]  }
 0x14a   :  { %6903 = vmatpush3.bf16.msra.mxu1 %v7476_v62  ;;  %v7515_v62 = vld [vmem:[%s9421_s1 + $0xb18] sm:$0xff]  }
 0x14b   :  { %6904 = vmatprep.subr.bf16.mxu1 %v7478_v0  ;;  %v7517_v0 = vld [vmem:[%s9421_s1 + $0xb60] sm:$0xff]  }
 0x14c   :  { %6883 = vmatpush3.bf16.msra.mxu0 %v7479_v1  ;;  %v7518_v1 = vld [vmem:[%s9421_s1 + $0xbe0] sm:$0xff]  }
 0x14d   :  { %6884 = vmatprep.subr.bf16.mxu0 %v7481_v3  ;;  %v7520_v3 = vld [vmem:[%s9421_s1 + $0xba0] sm:$0xff]  }
 0x14e   :  { %6905 = vmatpush3.bf16.msra.mxu1 %v7480_v2  ;;  %v7519_v2 = vld [vmem:[%s9421_s1 + $0xb20] sm:$0xff]  }
 0x14f   :  { %6906 = vmatprep.subr.bf16.mxu1 %v7482_v4  ;;  %v7521_v4 = vld [vmem:[%s9421_s1 + $0xb68] sm:$0xff]  }
 0x150   :  { %6885 = vmatpush3.bf16.msra.mxu0 %v7483_v5  ;;  %v7522_v5 = vld [vmem:[%s9421_s1 + $0xbe8] sm:$0xff]  }
 0x151   :  { %6886 = vmatprep.subr.bf16.mxu0 %v7485_v7  ;;  %v7524_v7 = vld [vmem:[%s9421_s1 + $0xba8] sm:$0xff]  }
 0x152   :  { %6907 = vmatpush3.bf16.msra.mxu1 %v7484_v6  ;;  %v7523_v6 = vld [vmem:[%s9421_s1 + $0xb28] sm:$0xff]  }
 0x153   :  { %6908 = vmatprep.subr.bf16.mxu1 %v7486_v8  ;;  %v7525_v8 = vld [vmem:[%s9421_s1 + $0xb70] sm:$0xff]  }
 0x154   :  { %6887 = vmatpush3.bf16.msra.mxu0 %v7487_v9 }
 0x155   :  { %6888 = vmatprep.subr.bf16.mxu0 %v7489_v11 }
 0x156   :  { %6909 = vmatpush3.bf16.msra.mxu1 %v7488_v10  ;;  %v6586_v16 = vpop.f32.mrb[12].mxu0  ;;  %v7526_v10 = vld [vmem:[%s9421_s1 + $0xbf0] sm:$0xff]  }
 0x157   :  { %v6587_v18 = vpop.f32.mrb[13].mxu0  ;;  %6910 = vmatprep.subr.bf16.mxu1 %v7490_v12  ;;  %v7527_v12 = vld [vmem:[%s9421_s1 + $0xb30] sm:$0xff]  }
 0x158   :  { %v6608_v20 = vpop.f32.mrb[12].mxu1  ;;  %v6588_v21 = vadd.f32 %v6587_v18, %v6586_v16  ;;  %v6589_v22 = vpop.f32.mrb[14].mxu0  ;;  %6889 = vmatpush3.bf16.msra.mxu0 %v7491_v13  ;;  %v7528_v16 = vld [vmem:[%s9421_s1 + $0xbb0] sm:$0xff]  }
 0x159   :  { %v6609_v26 = vpop.f32.mrb[13].mxu1  ;;  %v6590_v27 = vpop.f32.mrb[15].mxu0  ;;  %6890 = vmatprep.subr.bf16.mxu0 %v7493_v15 }
 0x15a   :  { %v4872_v30 = vadd.f32 %v6588_v21, %v8758_v51  ;;  %v6610_v31 = vadd.f32 %v6609_v26, %v6608_v20  ;;  %v6611_v32 = vpop.f32.mrb[14].mxu1  ;;  %6911 = vmatpush3.bf16.msra.mxu1 %v7492_v14  ;;  %v7505_v51 = vld [vmem:[%s9421_s1 + $0xb48] sm:$0xff]   ;;  %v7532_v27 = vld [vmem:[%s9421_s1 + $0xbb8] sm:$0xff]  }
 0x15b   :  { %v6612_v34 = vpop.f32.mrb[15].mxu1  ;;  %6912 = vmatprep.subr.bf16.mxu1 %v7494_v17  ;;  %v7529_v17 = vld [vmem:[%s9421_s1 + $0xb78] sm:$0xff]   ;;  %v7537_v32 = vld [vmem:[%s9421_s1 + $0xc80] sm:$0xff]  }
 0x15c   :  { %v8866_v38 = vadd.f32 %v6610_v31, %v4872_v30  ;;  %6891 = vmatpush3.bf16.msra.mxu0 %v7495_v19  ;;  %v7535_v30 = vld [vmem:[%s9421_s1 + $0xcc0] sm:$0xff]   ;;  %v7538_v34 = vld [vmem:[%s9421_s1 + $0xc48] sm:$0xff]  }
 0x15d   :  { %6892 = vmatprep.subr.bf16.mxu0 %v7497_v24  ;;  %v7536_v31 = vld [vmem:[%s9421_s1 + $0xc00] sm:$0xff]  }
 0x15e   :  { %6913 = vmatpush3.bf16.msra.mxu1 %v7496_v23  ;;  %v7530_v23 = vld [vmem:[%s9421_s1 + $0xbf8] sm:$0xff]  }
 0x15f   :  { %6914 = vmatprep.subr.bf16.mxu1 %v7498_v33  ;;  %v1360_v33 = vcombine.high %v1344_v28, %v1344_v28 }
 0x160   :  { %6893 = vmatpush3.bf16.msra.mxu0 %v7499_v35  ;;  %v7539_v35 = vld [vmem:[%s9421_s1 + $0xcc8] sm:$0xff]  }
 0x161   :  { %6922 = vmatprep.subr.bf16.mxu0 %v7501_v43  ;;  %v7546_v43 = vld [vmem:[%s9421_s1 + $0xc58] sm:$0xff]  }
 0x162   :  { %6915 = vmatpush3.bf16.msra.mxu1 %v7500_v39  ;;  %v7543_v39 = vld [vmem:[%s9421_s1 + $0xcd0] sm:$0xff]  }
 0x163   :  { %5430 = vmatmul.mubr.bf16.vlgmr.msra.gmra.mrb[40].mxu0 %v1337_v42  ;;  %6944 = vmatprep.subr.bf16.mxu1 %v7502_v45  ;;  %v7545_v42 = vld [vmem:[%s9421_s1 + $0xc90] sm:$0xff]   ;;  %v7548_v45 = vld [vmem:[%s9421_s1 + $0xc18] sm:$0xff]  }
 0x164   :  { %6923 = vmatpush3.bf16.msra.mxu0 %v7503_v47  ;;  %5509 = vmatprep.mubr.bf16.mxu0 %v1358_v48  ;;  %v7550_v47 = vld [vmem:[%s9421_s1 + $0xc60] sm:$0xff]  }
 0x165   :  { %5470 = vmatmul.mubr.bf16.vlgmr.msra.gmra.mrb[40].mxu1 %v1359_v50  ;;  %6924 = vmatprep.subr.bf16.mxu0 %v7505_v51  ;;  %v7551_v48 = vld [vmem:[%s9421_s1 + $0xce0] sm:$0xff]   ;;  %v7554_v51 = vld [vmem:[%s9421_s1 + $0xc68] sm:$0xff]  }
 0x166   :  { %6945 = vmatpush3.bf16.msra.mxu1 %v7504_v49  ;;  %5549 = vmatprep.mubr.bf16.mxu1 %v1362_v53  ;;  %v7552_v49 = vld [vmem:[%s9421_s1 + $0xc20] sm:$0xff]   ;;  %v7556_v53 = vld [vmem:[%s9421_s1 + $0xc28] sm:$0xff]  }
 0x167   :  { %6946 = vmatprep.subr.bf16.mxu1 %v7506_v52  ;;  %v7553_v50 = vld [vmem:[%s9421_s1 + $0xca0] sm:$0xff]   ;;  %v7555_v52 = vld [vmem:[%s9421_s1 + $0xce8] sm:$0xff]  }
 0x168   :  { %6925 = vmatpush3.bf16.msra.mxu0 %v7507_v54  ;;  %v7557_v54 = vld [vmem:[%s9421_s1 + $0xca8] sm:$0xff]  }
 0x169   :  { %6926 = vmatprep.subr.bf16.mxu0 %v7509_v56 }
 0x16a   :  { %6947 = vmatpush3.bf16.msra.mxu1 %v7508_v55  ;;  %v7558_v55 = vld [vmem:[%s9421_s1 + $0xc70] sm:$0xff]  }
 0x16b   :  { %6948 = vmatprep.subr.bf16.mxu1 %v7510_v57  ;;  %v7559_v57 = vld [vmem:[%s9421_s1 + $0xcf0] sm:$0xff]  }
 0x16c   :  { %6927 = vmatpush3.bf16.msra.mxu0 %v7511_v58 }
 0x16d   :  { %6928 = vmatprep.subr.bf16.mxu0 %v7513_v60 }
 0x16e   :  { %6949 = vmatpush3.bf16.msra.mxu1 %v7512_v59  ;;  %v7560_v59 = vld [vmem:[%s9421_s1 + $0xc30] sm:$0xff]  }
 0x16f   :  { %6950 = vmatprep.subr.bf16.mxu1 %v7514_v61 }
 0x170   :  { %6929 = vmatpush3.bf16.msra.mxu0 %v7515_v62 }
 0x171   :  { %6930 = vmatprep.subr.bf16.mxu0 %v7517_v0 }
 0x172   :  { %6951 = vmatpush3.bf16.msra.mxu1 %v7516_v63  ;;  %v7561_v63 = vld [vmem:[%s9421_s1 + $0xcb0] sm:$0xff]  }
 0x173   :  { %6952 = vmatprep.subr.bf16.mxu1 %v7518_v1 }
 0x174   :  { %6931 = vmatpush3.bf16.msra.mxu0 %v7519_v2  ;;  %v7562_v2 = vld [vmem:[%s9421_s1 + $0xc78] sm:$0xff]  }
 0x175   :  { %6932 = vmatprep.subr.bf16.mxu0 %v7521_v4 }
 0x176   :  { %6953 = vmatpush3.bf16.msra.mxu1 %v7520_v3  ;;  %v6630_v9 = vpop.f32.mrb[16].mxu0  ;;  %v28_v3 = vld [vmem:[%s9420_s0 + $0x30] sm:$0xff] }
 0x177   :  { %v6631_v11 = vpop.f32.mrb[17].mxu0  ;;  %6954 = vmatprep.subr.bf16.mxu1 %v7522_v5 }
 0x178   :  { %v6652_v13 = vpop.f32.mrb[16].mxu1  ;;  %v6632_v14 = vadd.f32 %v6631_v11, %v6630_v9  ;;  %v6633_v15 = vpop.f32.mrb[18].mxu0  ;;  %6933 = vmatpush3.bf16.msra.mxu0 %v7523_v6  ;;  %v1363_v9 = vcombine.high %v28_v3, %v28_v3  ;;  %v7564_v11 = vld [vmem:[%s9421_s1 + $0xc38] sm:$0xff]  }
 0x179   :  { %v6653_v18 = vpop.f32.mrb[17].mxu1  ;;  %v6634_v19 = vpop.f32.mrb[19].mxu0  ;;  %6934 = vmatprep.subr.bf16.mxu0 %v7525_v8  ;;  %v1370_v8 = vrot.slane %v28_v3, %v7827_v41  ;;  %v7597_v3 = vld [vmem:[%s9421_s1 + $0xdb8] sm:$0xff]  }
 0x17a   :  { %v4952_v20 = vadd.f32 %v6632_v14, %v8866_v38  ;;  %v6654_v21 = vadd.f32 %v6653_v18, %v6652_v13  ;;  %v6655_v22 = vpop.f32.mrb[18].mxu1  ;;  %6955 = vmatpush3.bf16.msra.mxu1 %v7524_v7  ;;  %v7542_v38 = vld [vmem:[%s9421_s1 + $0xc50] sm:$0xff]   ;;  %v7563_v7 = vld [vmem:[%s9421_s1 + $0xcf8] sm:$0xff]   ;;  %v9081_v15 = vrot.slane %v1363_v9, %v7827_v41  ;;  %v7567_v19 = vld [vmem:[%s9421_s1 + $0xdc0] sm:$0xff]  }
 0x17b   :  { %v6656_v24 = vpop.f32.mrb[19].mxu1  ;;  %6956 = vmatprep.subr.bf16.mxu1 %v7526_v10  ;;  %v7565_v13 = vld [vmem:[%s9421_s1 + $0xcb8] sm:$0xff]   ;;  %v1378_v14 = vcombine.high %v1370_v8, %v1370_v8 }
 0x17c   :  { %v8970_v26 = vadd.f32 %v6654_v21, %v4952_v20  ;;  %6935 = vmatpush3.bf16.msra.mxu0 %v7527_v12  ;;  %v1379_v20 = vcombine.high %v9081_v15, %v9081_v15  ;;  %v7568_v21 = vld [vmem:[%s9421_s1 + $0xd00] sm:$0xff]  }
 0x17d   :  { %6936 = vmatprep.subr.bf16.mxu0 %v7529_v17  ;;  %v7566_v17 = vld [vmem:[%s9421_s1 + $0xd40] sm:$0xff]   ;;  %v1400_v18 = vrot.slane %v1378_v14, %v7827_v41  ;;  %v7607_v14 = vld [vmem:[%s9421_s1 + $0xe50] sm:$0xff]  }
 0x17e   :  { %6957 = vmatpush3.bf16.msra.mxu1 %v7528_v16  ;;  %v1386_v16 = vrot.slane %v1370_v8, %v7827_v41  ;;  %v1407_v24 = vrot.slane %v1379_v20, %v7827_v41  ;;  %v7602_v8 = vld [vmem:[%s9421_s1 + $0xe80] sm:$0xff]   ;;  %v7613_v20 = vld [vmem:[%s9421_s1 + $0xe18] sm:$0xff]  }
 0x17f   :  { %6958 = vmatprep.subr.bf16.mxu1 %v7530_v23  ;;  %v1410_v22 = vcombine.high %v1400_v18, %v1400_v18  ;;  %v7569_v23 = vld [vmem:[%s9421_s1 + $0xd80] sm:$0xff]  }
 0x180   :  { %6937 = vmatpush3.bf16.msra.mxu0 %v7531_v25  ;;  %v1408_v25 = vcombine.high %v1386_v16, %v1386_v16 }
 0x181   :  { %6966 = vmatprep.subr.bf16.mxu0 %v7534_v29  ;;  %v7572_v29 = vld [vmem:[%s9421_s1 + $0xd08] sm:$0xff]  }
 0x182   :  { %6959 = vmatpush3.bf16.msra.mxu1 %v7532_v27  ;;  %v7571_v27 = vld [vmem:[%s9421_s1 + $0xdc8] sm:$0xff]  }
 0x183   :  { %5510 = vmatmul.mubr.bf16.vlgmr.msra.gmra.mrb[44].mxu0 %v1344_v28  ;;  %6988 = vmatprep.subr.bf16.mxu1 %v7535_v30  ;;  %v1411_v28 = vcombine.high %v1407_v24, %v1407_v24  ;;  %v7573_v30 = vld [vmem:[%s9421_s1 + $0xd88] sm:$0xff]  }
 0x184   :  { %6967 = vmatpush3.bf16.msra.mxu0 %v7536_v31  ;;  %5589 = vmatprep.mubr.bf16.mxu0 %v1400_v18  ;;  %v7574_v31 = vld [vmem:[%s9421_s1 + $0xd50] sm:$0xff]   ;;  %v7611_v18 = vld [vmem:[%s9421_s1 + $0xe58] sm:$0xff]  }
 0x185   :  { %5550 = vmatmul.mubr.bf16.vlgmr.msra.gmra.mrb[44].mxu1 %v1360_v33  ;;  %6968 = vmatprep.subr.bf16.mxu0 %v7538_v34  ;;  %v7576_v33 = vld [vmem:[%s9421_s1 + $0xd10] sm:$0xff]  }
 0x186   :  { %6989 = vmatpush3.bf16.msra.mxu1 %v7537_v32  ;;  %5629 = vmatprep.mubr.bf16.mxu1 %v1410_v22  ;;  %v7575_v32 = vld [vmem:[%s9421_s1 + $0xdd0] sm:$0xff]   ;;  %v7615_v22 = vld [vmem:[%s9421_s1 + $0xe60] sm:$0xff]  }
 0x187   :  { %6990 = vmatprep.subr.bf16.mxu1 %v7539_v35  ;;  %v7577_v34 = vld [vmem:[%s9421_s1 + $0xd90] sm:$0xff]   ;;  %v7578_v35 = vld [vmem:[%s9421_s1 + $0xd58] sm:$0xff]  }
 0x188   :  { %6969 = vmatpush3.bf16.msra.mxu0 %v7540_v36  ;;  %v7579_v36 = vld [vmem:[%s9421_s1 + $0xdd8] sm:$0xff]  }
 0x189   :  { %6970 = vmatprep.subr.bf16.mxu0 %v7542_v38  ;;  %v7581_v38 = vld [vmem:[%s9421_s1 + $0xd98] sm:$0xff]  }
 0x18a   :  { %6991 = vmatpush3.bf16.msra.mxu1 %v7541_v37  ;;  %v7580_v37 = vld [vmem:[%s9421_s1 + $0xd18] sm:$0xff]  }
 0x18b   :  { %6992 = vmatprep.subr.bf16.mxu1 %v7543_v39  ;;  %v7582_v39 = vld [vmem:[%s9421_s1 + $0xd60] sm:$0xff]  }
 0x18c   :  { %6971 = vmatpush3.bf16.msra.mxu0 %v7544_v40  ;;  %v7583_v40 = vld [vmem:[%s9421_s1 + $0xde0] sm:$0xff]  }
 0x18d   :  { %6972 = vmatprep.subr.bf16.mxu0 %v7546_v43  ;;  %v7585_v43 = vld [vmem:[%s9421_s1 + $0xda0] sm:$0xff]  }
 0x18e   :  { %6993 = vmatpush3.bf16.msra.mxu1 %v7545_v42  ;;  %v7584_v42 = vld [vmem:[%s9421_s1 + $0xd20] sm:$0xff]  }
 0x18f   :  { %6994 = vmatprep.subr.bf16.mxu1 %v7547_v44  ;;  %v7586_v44 = vld [vmem:[%s9421_s1 + $0xd68] sm:$0xff]  }
 0x190   :  { %6973 = vmatpush3.bf16.msra.mxu0 %v7548_v45  ;;  %v7587_v45 = vld [vmem:[%s9421_s1 + $0xde8] sm:$0xff]  }
 0x191   :  { %6974 = vmatprep.subr.bf16.mxu0 %v7550_v47  ;;  %v7589_v47 = vld [vmem:[%s9421_s1 + $0xda8] sm:$0xff]  }
 0x192   :  { %6995 = vmatpush3.bf16.msra.mxu1 %v7549_v46  ;;  %v7588_v46 = vld [vmem:[%s9421_s1 + $0xd28] sm:$0xff]  }
 0x193   :  { %6996 = vmatprep.subr.bf16.mxu1 %v7551_v48  ;;  %v7590_v48 = vld [vmem:[%s9421_s1 + $0xd70] sm:$0xff]  }
 0x194   :  { %6975 = vmatpush3.bf16.msra.mxu0 %v7552_v49 }
 0x195   :  { %6976 = vmatprep.subr.bf16.mxu0 %v7554_v51 }
 0x196   :  { %6997 = vmatpush3.bf16.msra.mxu1 %v7553_v50  ;;  %v6674_v56 = vpop.f32.mrb[20].mxu0  ;;  %v7591_v50 = vld [vmem:[%s9421_s1 + $0xdf0] sm:$0xff]  }
 0x197   :  { %v6675_v58 = vpop.f32.mrb[21].mxu0  ;;  %6998 = vmatprep.subr.bf16.mxu1 %v7555_v52  ;;  %v7592_v52 = vld [vmem:[%s9421_s1 + $0xd30] sm:$0xff]  }
 0x198   :  { %v6696_v60 = vpop.f32.mrb[20].mxu1  ;;  %v6676_v61 = vadd.f32 %v6675_v58, %v6674_v56  ;;  %v6677_v62 = vpop.f32.mrb[22].mxu0  ;;  %6977 = vmatpush3.bf16.msra.mxu0 %v7556_v53  ;;  %v7593_v56 = vld [vmem:[%s9421_s1 + $0xdb0] sm:$0xff]  }
 0x199   :  { %v6697_v0 = vpop.f32.mrb[21].mxu1  ;;  %v6678_v1 = vpop.f32.mrb[23].mxu0  ;;  %6978 = vmatprep.subr.bf16.mxu0 %v7558_v55 }
 0x19a   :  { %v5032_v4 = vadd.f32 %v6676_v61, %v8970_v26  ;;  %v6698_v5 = vadd.f32 %v6697_v0, %v6696_v60  ;;  %v6699_v6 = vpop.f32.mrb[22].mxu1  ;;  %6999 = vmatpush3.bf16.msra.mxu1 %v7557_v54  ;;  %v7570_v26 = vld [vmem:[%s9421_s1 + $0xd48] sm:$0xff]   ;;  %v7596_v1 = vld [vmem:[%s9421_s1 + $0xd38] sm:$0xff]  }
 0x19b   :  { %v6700_v10 = vpop.f32.mrb[23].mxu1  ;;  %7000 = vmatprep.subr.bf16.mxu1 %v7559_v57  ;;  %v7594_v57 = vld [vmem:[%s9421_s1 + $0xd78] sm:$0xff]   ;;  %v7600_v6 = vld [vmem:[%s9421_s1 + $0xec0] sm:$0xff]  }
 0x19c   :  { %v9075_v12 = vadd.f32 %v6698_v5, %v5032_v4  ;;  %6979 = vmatpush3.bf16.msra.mxu0 %v7560_v59  ;;  %v1393_v4 = vrot.slane %v9081_v15, %v7827_v41  ;;  %v7599_v5 = vld [vmem:[%s9421_s1 + $0xe40] sm:$0xff]   ;;  %v7603_v10 = vld [vmem:[%s9421_s1 + $0xe48] sm:$0xff]   ;;  %v7608_v15 = vld [vmem:[%s9421_s1 + $0xed0] sm:$0xff]  }
 0x19d   :  { %6980 = vmatprep.subr.bf16.mxu0 %v7562_v2 }
 0x19e   :  { %7001 = vmatpush3.bf16.msra.mxu1 %v7561_v63  ;;  %v7595_v63 = vld [vmem:[%s9421_s1 + $0xdf8] sm:$0xff]   ;;  %v1409_v9 = vcombine.high %v1393_v4, %v1393_v4 }
 0x19f   :  { %7002 = vmatprep.subr.bf16.mxu1 %v7563_v7  ;;  %v7601_v7 = vld [vmem:[%s9421_s1 + $0xe00] sm:$0xff]  }
 0x1a0   :  { %6981 = vmatpush3.bf16.msra.mxu0 %v7564_v11  ;;  %v7604_v11 = vld [vmem:[%s9421_s1 + $0xec8] sm:$0xff]  }
 0x1a1   :  { %7010 = vmatprep.subr.bf16.mxu0 %v7566_v17  ;;  %v7610_v17 = vld [vmem:[%s9421_s1 + $0xe90] sm:$0xff]  }
 0x1a2   :  { %7003 = vmatpush3.bf16.msra.mxu1 %v7565_v13  ;;  %v7606_v13 = vld [vmem:[%s9421_s1 + $0xe88] sm:$0xff]  }
 0x1a3   :  { %5590 = vmatmul.mubr.bf16.vlgmr.msra.gmra.mrb[48].mxu0 %v1386_v16  ;;  %7032 = vmatprep.subr.bf16.mxu1 %v7567_v19  ;;  %v7609_v16 = vld [vmem:[%s9421_s1 + $0xe10] sm:$0xff]   ;;  %v7612_v19 = vld [vmem:[%s9421_s1 + $0xed8] sm:$0xff]  }
 0x1a4   :  { %7011 = vmatpush3.bf16.msra.mxu0 %v7568_v21  ;;  %5669 = vmatprep.mubr.bf16.mxu0 %v1407_v24  ;;  %v7614_v21 = vld [vmem:[%s9421_s1 + $0xe98] sm:$0xff]   ;;  %v7617_v24 = vld [vmem:[%s9421_s1 + $0xe20] sm:$0xff]  }
 0x1a5   :  { %5630 = vmatmul.mubr.bf16.vlgmr.msra.gmra.mrb[48].mxu1 %v1408_v25  ;;  %7012 = vmatprep.subr.bf16.mxu0 %v7570_v26  ;;  %v7618_v25 = vld [vmem:[%s9421_s1 + $0xea0] sm:$0xff]   ;;  %v7619_v26 = vld [vmem:[%s9421_s1 + $0xe68] sm:$0xff]  }
 0x1a6   :  { %7033 = vmatpush3.bf16.msra.mxu1 %v7569_v23  ;;  %5709 = vmatprep.mubr.bf16.mxu1 %v1411_v28  ;;  %v7616_v23 = vld [vmem:[%s9421_s1 + $0xee0] sm:$0xff]   ;;  %v7621_v28 = vld [vmem:[%s9421_s1 + $0xe28] sm:$0xff]  }
 0x1a7   :  { %7034 = vmatprep.subr.bf16.mxu1 %v7571_v27  ;;  %v7620_v27 = vld [vmem:[%s9421_s1 + $0xee8] sm:$0xff]  }
 0x1a8   :  { %7013 = vmatpush3.bf16.msra.mxu0 %v7572_v29  ;;  %v7622_v29 = vld [vmem:[%s9421_s1 + $0xea8] sm:$0xff]  }
 0x1a9   :  { %7014 = vmatprep.subr.bf16.mxu0 %v7574_v31 }
 0x1aa   :  { %7035 = vmatpush3.bf16.msra.mxu1 %v7573_v30  ;;  %v7623_v30 = vld [vmem:[%s9421_s1 + $0xe70] sm:$0xff]  }
 0x1ab   :  { %7036 = vmatprep.subr.bf16.mxu1 %v7575_v32  ;;  %v7624_v32 = vld [vmem:[%s9421_s1 + $0xef0] sm:$0xff]  }
 0x1ac   :  { %7015 = vmatpush3.bf16.msra.mxu0 %v7576_v33 }
 0x1ad   :  { %7016 = vmatprep.subr.bf16.mxu0 %v7578_v35 }
 0x1ae   :  { %7037 = vmatpush3.bf16.msra.mxu1 %v7577_v34  ;;  %v7625_v34 = vld [vmem:[%s9421_s1 + $0xe30] sm:$0xff]  }
 0x1af   :  { %7038 = vmatprep.subr.bf16.mxu1 %v7579_v36 }
 0x1b0   :  { %7017 = vmatpush3.bf16.msra.mxu0 %v7580_v37 }
 0x1b1   :  { %7018 = vmatprep.subr.bf16.mxu0 %v7582_v39 }
 0x1b2   :  { %7039 = vmatpush3.bf16.msra.mxu1 %v7581_v38 }
 0x1b3   :  { %7040 = vmatprep.subr.bf16.mxu1 %v7583_v40  ;;  %v7626_v40 = vld [vmem:[%s9421_s1 + $0xeb0] sm:$0xff]  }
 0x1b4   :  { %7019 = vmatpush3.bf16.msra.mxu0 %v7584_v42  ;;  %v7627_v42 = vld [vmem:[%s9421_s1 + $0xe78] sm:$0xff]  }
 0x1b5   :  { %7020 = vmatprep.subr.bf16.mxu0 %v7586_v44 }
 0x1b6   :  { %7041 = vmatpush3.bf16.msra.mxu1 %v7585_v43  ;;  %v6718_v49 = vpop.f32.mrb[24].mxu0 }
 0x1b7   :  { %v6719_v51 = vpop.f32.mrb[25].mxu0  ;;  %7042 = vmatprep.subr.bf16.mxu1 %v7587_v45 }
 0x1b8   :  { %v6740_v53 = vpop.f32.mrb[24].mxu1  ;;  %v6720_v54 = vadd.f32 %v6719_v51, %v6718_v49  ;;  %v6721_v55 = vpop.f32.mrb[26].mxu0  ;;  %7021 = vmatpush3.bf16.msra.mxu0 %v7588_v46  ;;  %v29_v46 = vld [vmem:[%s9420_s0 + $0x38] sm:$0xff] }
 0x1b9   :  { %v6741_v58 = vpop.f32.mrb[25].mxu1  ;;  %v6722_v59 = vpop.f32.mrb[27].mxu0  ;;  %7022 = vmatprep.subr.bf16.mxu0 %v7590_v48  ;;  %v7628_v48 = vld [vmem:[%s9421_s1 + $0xef8] sm:$0xff]   ;;  %v1419_v49 = vrot.slane %v29_v46, %v7827_v41  ;;  %v7631_v55 = vld [vmem:[%s9421_s1 + $0xf40] sm:$0xff]  }
 0x1ba   :  { %v5112_v60 = vadd.f32 %v6720_v54, %v9075_v12  ;;  %v6742_v61 = vadd.f32 %v6741_v58, %v6740_v53  ;;  %v6743_v62 = vpop.f32.mrb[26].mxu1  ;;  %7043 = vmatpush3.bf16.msra.mxu1 %v7589_v47  ;;  %v7605_v12 = vld [vmem:[%s9421_s1 + $0xe08] sm:$0xff]   ;;  %v7632_v59 = vld [vmem:[%s9421_s1 + $0xfc0] sm:$0xff]  }
 0x1bb   :  { %v6744_v0 = vpop.f32.mrb[27].mxu1  ;;  %7044 = vmatprep.subr.bf16.mxu1 %v7591_v50  ;;  %v1412_v50 = vcombine.high %v29_v46, %v29_v46  ;;  %v1427_v53 = vcombine.high %v1419_v49, %v1419_v49  ;;  %v1435_v54 = vrot.slane %v1419_v49, %v7827_v41 }
 0x1bc   :  { %v9182_v2 = vadd.f32 %v6742_v61, %v5112_v60  ;;  %7023 = vmatpush3.bf16.msra.mxu0 %v7592_v52  ;;  %v7629_v52 = vld [vmem:[%s9421_s1 + $0xe38] sm:$0xff]   ;;  %v7633_v61 = vld [vmem:[%s9421_s1 + $0xf00] sm:$0xff]   ;;  %v7635_v0 = vld [vmem:[%s9421_s1 + $0xf48] sm:$0xff]  }
 0x1bd   :  { %7024 = vmatprep.subr.bf16.mxu0 %v7594_v57  ;;  %v7630_v57 = vld [vmem:[%s9421_s1 + $0xeb8] sm:$0xff]   ;;  %v1449_v58 = vrot.slane %v1427_v53, %v7827_v41 }
 0x1be   :  { %7045 = vmatpush3.bf16.msra.mxu1 %v7593_v56  ;;  %v9294_v56 = vrot.slane %v1412_v50, %v7827_v41 }
 0x1bf   :  { %7046 = vmatprep.subr.bf16.mxu1 %v7595_v63  ;;  %v1459_v62 = vcombine.high %v1449_v58, %v1449_v58  ;;  %v1457_v63 = vcombine.high %v1435_v54, %v1435_v54 }
 0x1c0   :  { %7025 = vmatpush3.bf16.msra.mxu0 %v7596_v1  ;;  %v1428_v60 = vcombine.high %v9294_v56, %v9294_v56 }
 0x1c1   :  { %7054 = vmatprep.subr.bf16.mxu0 %v7599_v5  ;;  %v7637_v5 = vld [vmem:[%s9421_s1 + $0xf08] sm:$0xff]  }
 0x1c2   :  { %7047 = vmatpush3.bf16.msra.mxu1 %v7597_v3  ;;  %v1456_v1 = vrot.slane %v1428_v60, %v7827_v41  ;;  %v7636_v3 = vld [vmem:[%s9421_s1 + $0xfc8] sm:$0xff]  }
 0x1c3   :  { %5670 = vmatmul.mubr.bf16.vlgmr.msra.gmra.mrb[52].mxu0 %v1393_v4  ;;  %7076 = vmatprep.subr.bf16.mxu1 %v7600_v6  ;;  %v7639_v6 = vld [vmem:[%s9421_s1 + $0xf50] sm:$0xff]  }
 0x1c4   :  { %7055 = vmatpush3.bf16.msra.mxu0 %v7601_v7  ;;  %5749 = vmatprep.mubr.bf16.mxu0 %v1449_v58  ;;  %v1460_v4 = vcombine.high %v1456_v1, %v1456_v1  ;;  %v7638_v7 = vld [vmem:[%s9421_s1 + $0xf88] sm:$0xff]  }
 0x1c5   :  { %5710 = vmatmul.mubr.bf16.vlgmr.msra.gmra.mrb[52].mxu1 %v1409_v9  ;;  %7056 = vmatprep.subr.bf16.mxu0 %v7603_v10  ;;  %v7641_v9 = vld [vmem:[%s9421_s1 + $0xf10] sm:$0xff]   ;;  %v7643_v10 = vld [vmem:[%s9421_s1 + $0xf58] sm:$0xff]  }
 0x1c6   :  { %7077 = vmatpush3.bf16.msra.mxu1 %v7602_v8  ;;  %5789 = vmatprep.mubr.bf16.mxu1 %v1459_v62  ;;  %v7640_v8 = vld [vmem:[%s9421_s1 + $0xfd0] sm:$0xff]  }
 0x1c7   :  { %7078 = vmatprep.subr.bf16.mxu1 %v7604_v11  ;;  %v7642_v11 = vld [vmem:[%s9421_s1 + $0xf90] sm:$0xff]  }
 0x1c8   :  { %7057 = vmatpush3.bf16.msra.mxu0 %v7605_v12  ;;  %v7644_v12 = vld [vmem:[%s9421_s1 + $0xfd8] sm:$0xff]  }
 0x1c9   :  { %7058 = vmatprep.subr.bf16.mxu0 %v7607_v14  ;;  %v7647_v14 = vld [vmem:[%s9421_s1 + $0xf60] sm:$0xff]  }
 0x1ca   :  { %7079 = vmatpush3.bf16.msra.mxu1 %v7606_v13  ;;  %v7645_v13 = vld [vmem:[%s9421_s1 + $0xf18] sm:$0xff]  }
 0x1cb   :  { %7080 = vmatprep.subr.bf16.mxu1 %v7608_v15  ;;  %v7646_v15 = vld [vmem:[%s9421_s1 + $0xf98] sm:$0xff]  }
 0x1cc   :  { %7059 = vmatpush3.bf16.msra.mxu0 %v7609_v16  ;;  %v7648_v16 = vld [vmem:[%s9421_s1 + $0xfe0] sm:$0xff]  }
 0x1cd   :  { %7060 = vmatprep.subr.bf16.mxu0 %v7611_v18  ;;  %v7651_v18 = vld [vmem:[%s9421_s1 + $0xf68] sm:$0xff]  }
 0x1ce   :  { %7081 = vmatpush3.bf16.msra.mxu1 %v7610_v17  ;;  %v7649_v17 = vld [vmem:[%s9421_s1 + $0xf20] sm:$0xff]  }
 0x1cf   :  { %7082 = vmatprep.subr.bf16.mxu1 %v7612_v19  ;;  %v7650_v19 = vld [vmem:[%s9421_s1 + $0xfa0] sm:$0xff]  }
 0x1d0   :  { %7061 = vmatpush3.bf16.msra.mxu0 %v7613_v20  ;;  %v7652_v20 = vld [vmem:[%s9421_s1 + $0xfe8] sm:$0xff]  }
 0x1d1   :  { %7062 = vmatprep.subr.bf16.mxu0 %v7615_v22  ;;  %v7655_v22 = vld [vmem:[%s9421_s1 + $0xf70] sm:$0xff]  }
 0x1d2   :  { %7083 = vmatpush3.bf16.msra.mxu1 %v7614_v21  ;;  %v7653_v21 = vld [vmem:[%s9421_s1 + $0xf28] sm:$0xff]  }
 0x1d3   :  { %7084 = vmatprep.subr.bf16.mxu1 %v7616_v23 }
 0x1d4   :  { %7063 = vmatpush3.bf16.msra.mxu0 %v7617_v24  ;;  %v7654_v24 = vld [vmem:[%s9421_s1 + $0xfa8] sm:$0xff]  }
 0x1d5   :  { %7064 = vmatprep.subr.bf16.mxu0 %v7619_v26  ;;  %v7656_v26 = vld [vmem:[%s9421_s1 + $0xff0] sm:$0xff]  }
 0x1d6   :  { %7085 = vmatpush3.bf16.msra.mxu1 %v7618_v25  ;;  %v6762_v31 = vpop.f32.mrb[28].mxu0 }
 0x1d7   :  { %v6763_v33 = vpop.f32.mrb[29].mxu0  ;;  %7086 = vmatprep.subr.bf16.mxu1 %v7620_v27 }
 0x1d8   :  { %v6784_v35 = vpop.f32.mrb[28].mxu1  ;;  %v6764_v36 = vadd.f32 %v6763_v33, %v6762_v31  ;;  %v6765_v37 = vpop.f32.mrb[30].mxu0  ;;  %7065 = vmatpush3.bf16.msra.mxu0 %v7621_v28  ;;  %v7659_v31 = vld [vmem:[%s9421_s1 + $0xf78] sm:$0xff]  }
 0x1d9   :  { %v6785_v38 = vpop.f32.mrb[29].mxu1  ;;  %v6766_v39 = vpop.f32.mrb[31].mxu0  ;;  %7066 = vmatprep.subr.bf16.mxu0 %v7623_v30  ;;  %v7657_v30 = vld [vmem:[%s9421_s1 + $0xf30] sm:$0xff]  }
 0x1da   :  { %v5192_v43 = vadd.f32 %v6764_v36, %v9182_v2  ;;  %v6786_v44 = vadd.f32 %v6785_v38, %v6784_v35  ;;  %v6787_v45 = vpop.f32.mrb[30].mxu1  ;;  %7087 = vmatpush3.bf16.msra.mxu1 %v7622_v29  ;;  %v7634_v2 = vld [vmem:[%s9421_s1 + $0xf80] sm:$0xff]   ;;  %v7658_v37 = vld [vmem:[%s9421_s1 + $0xfb0] sm:$0xff]   ;;  %v7660_v39 = vld [vmem:[%s9421_s1 + $0xff8] sm:$0xff]  }
 0x1db   :  { %v6788_v47 = vpop.f32.mrb[31].mxu1  ;;  %7088 = vmatprep.subr.bf16.mxu1 %v7624_v32 }
 0x1dc   :  { %v9284_v51 = vadd.f32 %v6786_v44, %v5192_v43  ;;  %7067 = vmatpush3.bf16.msra.mxu0 %v7625_v34 }
 0x1dd   :  { %7068 = vmatprep.subr.bf16.mxu0 %v7627_v42 }
 0x1de   :  { %7089 = vmatpush3.bf16.msra.mxu1 %v7626_v40 }
 0x1df   :  { %7090 = vmatprep.subr.bf16.mxu1 %v7628_v48 }
 0x1e0   :  { %7069 = vmatpush3.bf16.msra.mxu0 %v7629_v52 }
 0x1e1   :  { %7098 = vmatprep.subr.bf16.mxu0 %v7631_v55 }
 0x1e2   :  { %7091 = vmatpush3.bf16.msra.mxu1 %v7630_v57 }
 0x1e3   :  { %5750 = vmatmul.mubr.bf16.vlgmr.msra.gmra.mrb[56].mxu0 %v1435_v54  ;;  %7120 = vmatprep.subr.bf16.mxu1 %v7632_v59 }
 0x1e4   :  { %7099 = vmatpush3.bf16.msra.mxu0 %v7633_v61  ;;  %5829 = vmatprep.mubr.bf16.mxu0 %v1456_v1 }
 0x1e5   :  { %5790 = vmatmul.mubr.bf16.vlgmr.msra.gmra.mrb[56].mxu1 %v1457_v63  ;;  %7100 = vmatprep.subr.bf16.mxu0 %v7635_v0 }
 0x1e6   :  { %7121 = vmatpush3.bf16.msra.mxu1 %v7634_v2  ;;  %5869 = vmatprep.mubr.bf16.mxu1 %v1460_v4 }
 0x1e7   :  { %7122 = vmatprep.subr.bf16.mxu1 %v7636_v3 }
 0x1e8   :  { %7101 = vmatpush3.bf16.msra.mxu0 %v7637_v5 }
 0x1e9   :  { %7102 = vmatprep.subr.bf16.mxu0 %v7639_v6 }
 0x1ea   :  { %7123 = vmatpush3.bf16.msra.mxu1 %v7638_v7 }
 0x1eb   :  { %7124 = vmatprep.subr.bf16.mxu1 %v7640_v8 }
 0x1ec   :  { %7103 = vmatpush3.bf16.msra.mxu0 %v7641_v9 }
 0x1ed   :  { %7104 = vmatprep.subr.bf16.mxu0 %v7643_v10 }
 0x1ee   :  { %7125 = vmatpush3.bf16.msra.mxu1 %v7642_v11 }
 0x1ef   :  { %7126 = vmatprep.subr.bf16.mxu1 %v7644_v12 }
 0x1f0   :  { %7105 = vmatpush3.bf16.msra.mxu0 %v7645_v13 }
 0x1f1   :  { %7106 = vmatprep.subr.bf16.mxu0 %v7647_v14 }
 0x1f2   :  { %7127 = vmatpush3.bf16.msra.mxu1 %v7646_v15 }
 0x1f3   :  { %7128 = vmatprep.subr.bf16.mxu1 %v7648_v16 }
 0x1f4   :  { %7107 = vmatpush3.bf16.msra.mxu0 %v7649_v17 }
 0x1f5   :  { %7108 = vmatprep.subr.bf16.mxu0 %v7651_v18 }
 0x1f6   :  { %7129 = vmatpush3.bf16.msra.mxu1 %v7650_v19  ;;  %v6806_v23 = vpop.f32.mrb[32].mxu0 }
 0x1f7   :  { %v6807_v25 = vpop.f32.mrb[33].mxu0  ;;  %7130 = vmatprep.subr.bf16.mxu1 %v7652_v20 }
 0x1f8   :  { %v6828_v27 = vpop.f32.mrb[32].mxu1  ;;  %v6808_v28 = vadd.f32 %v6807_v25, %v6806_v23  ;;  %v6809_v29 = vpop.f32.mrb[34].mxu0  ;;  %7109 = vmatpush3.bf16.msra.mxu0 %v7653_v21 }
 0x1f9   :  { %v6829_v32 = vpop.f32.mrb[33].mxu1  ;;  %v6810_v33 = vpop.f32.mrb[35].mxu0  ;;  %7110 = vmatprep.subr.bf16.mxu0 %v7655_v22 }
 0x1fa   :  { %v5272_v34 = vadd.f32 %v6808_v28, %v9284_v51  ;;  %v6830_v35 = vadd.f32 %v6829_v32, %v6828_v27  ;;  %v6831_v36 = vpop.f32.mrb[34].mxu1  ;;  %7131 = vmatpush3.bf16.msra.mxu1 %v7654_v24 }
 0x1fb   :  { %v6832_v38 = vpop.f32.mrb[35].mxu1  ;;  %7132 = vmatprep.subr.bf16.mxu1 %v7656_v26 }
 0x1fc   :  { %10 = vsyncpa [#allocation3], 0  ;;  %v5312_v40 = vadd.f32 %v6830_v35, %v5272_v34  ;;  %7111 = vmatpush3.bf16.msra.mxu0 %v7657_v30  ;;  %v7661_v42 = vld [vmem:[%s9421_s1 + $0xf38] sm:$0xff]   ;;  %v1442_v43 = vrot.slane %v9294_v56, %v7827_v41  ;;  %vm5877_vm0 = vcmask 254976   ;;  %s7691_s14 = smov [#allocation2]  }
 0x1fd   :  { %7112 = vmatprep.subr.bf16.mxu0 %v7659_v31  ;;  %v7662_v44 = vld [vmem:[%s9421_s1 + $0xfb8] sm:$0xff]   ;;  %s5915_s15 = sshll.u32 %s7691_s14, 4  ;;  %s5916_s15 = int_to_ptr.vmem [resolvable:$true] %s5915_s15 }
 0x1fe   :  { %7133 = vmatpush3.bf16.msra.mxu1 %v7658_v37  ;;  %v1458_v45 = vcombine.high %v1442_v43, %v1442_v43  ;;  %s7666_s16 = scalar_lea.vmem %s5916_s15, 32  ;;  %p7671_p1 = scmp.lt.s32.totalorder %s5916_s15, %s5916_s15 }
 0x1ff   :  { %7134 = vmatprep.subr.bf16.mxu1 %v7660_v39  ;;  %p7667_p0 = scmp.ne.s32.totalorder %s5916_s15, %s7666_s16  ;;  %p7672_p2 = scmp.lt.s32.totalorder %s7666_s16, %s7666_s16 }
 0x200   :  { %7113 = vmatpush3.bf16.msra.mxu0 %v7661_v42 }
 0x201   :  { %p7673_p3 = por %p7672_p2, %p7671_p1 }
 0x202   :  { %7135 = vmatpush3.bf16.msra.mxu1 %v7662_v44 }
 0x203   :  { %5830 = vmatmul.mubr.bf16.vlgmr.msra.gmra.mrb[60].mxu0 %v1442_v43  ;;  %p7674_p4 = pnand %p7673_p3, %p7667_p0 }
 0x205   :  { %5870 = vmatmul.mubr.bf16.vlgmr.msra.gmra.mrb[60].mxu1 %v1458_v45 }
 0x216   :  { %v6850_v46 = vpop.f32.mrb[36].mxu0 }
 0x217   :  { %v6851_v47 = vpop.f32.mrb[37].mxu0 }
 0x218   :  { %v6872_v48 = vpop.f32.mrb[36].mxu1  ;;  %v6852_v49 = vadd.f32 %v6851_v47, %v6850_v46  ;;  %v6853_v50 = vpop.f32.mrb[38].mxu0 }
 0x219   :  { %v6873_v51 = vpop.f32.mrb[37].mxu1  ;;  %v6854_v52 = vpop.f32.mrb[39].mxu0 }
 0x21a   :  { %v5352_v53 = vadd.f32 %v6852_v49, %v5312_v40  ;;  %v6874_v41 = vadd.f32 %v6873_v51, %v6872_v48  ;;  %v6875_v54 = vpop.f32.mrb[38].mxu1 }
 0x21b   :  { %v6876_v55 = vpop.f32.mrb[39].mxu1 }
 0x21c   :  { %v5392_v56 = vadd.f32 %v6874_v41, %v5352_v53 }
 0x236   :  { %v6894_v57 = vpop.f32.mrb[40].mxu0 }
 0x237   :  { %v6895_v58 = vpop.f32.mrb[41].mxu0 }
 0x238   :  { %v6916_v59 = vpop.f32.mrb[40].mxu1  ;;  %v6896_v60 = vadd.f32 %v6895_v58, %v6894_v57  ;;  %v6897_v61 = vpop.f32.mrb[42].mxu0 }
 0x239   :  { %v6917_v62 = vpop.f32.mrb[41].mxu1  ;;  %v6898_v63 = vpop.f32.mrb[43].mxu0 }
 0x23a   :  { %v5432_v0 = vadd.f32 %v6896_v60, %v5392_v56  ;;  %v6918_v1 = vadd.f32 %v6917_v62, %v6916_v59  ;;  %v6919_v2 = vpop.f32.mrb[42].mxu1 }
 0x23b   :  { %v6920_v3 = vpop.f32.mrb[43].mxu1 }
 0x23c   :  { %v5472_v4 = vadd.f32 %v6918_v1, %v5432_v0 }
 0x256   :  { %v6938_v5 = vpop.f32.mrb[44].mxu0 }
 0x257   :  { %v6939_v6 = vpop.f32.mrb[45].mxu0 }
 0x258   :  { %v6960_v7 = vpop.f32.mrb[44].mxu1  ;;  %v6940_v8 = vadd.f32 %v6939_v6, %v6938_v5  ;;  %v6941_v9 = vpop.f32.mrb[46].mxu0 }
 0x259   :  { %v6961_v10 = vpop.f32.mrb[45].mxu1  ;;  %v6942_v11 = vpop.f32.mrb[47].mxu0 }
 0x25a   :  { %v5512_v12 = vadd.f32 %v6940_v8, %v5472_v4  ;;  %v6962_v13 = vadd.f32 %v6961_v10, %v6960_v7  ;;  %v6963_v14 = vpop.f32.mrb[46].mxu1  ;;  %v6436_v11 = vld [vmem:[%s9423_s3] ss:$0 sm:$0xff] }
 0x25b   :  { %v6964_v15 = vpop.f32.mrb[47].mxu1 }
 0x25c   :  { %v5552_v16 = vadd.f32 %v6962_v13, %v5512_v12  ;;  %v6437_v13 = vld [vmem:[%s9424_s4] ss:$0 sm:$0xff] }
 0x276   :  { %v6982_v17 = vpop.f32.mrb[48].mxu0 }
 0x277   :  { %v6983_v18 = vpop.f32.mrb[49].mxu0 }
 0x278   :  { %v7004_v19 = vpop.f32.mrb[48].mxu1  ;;  %v6984_v20 = vadd.f32 %v6983_v18, %v6982_v17  ;;  %v6985_v21 = vpop.f32.mrb[50].mxu0 }
 0x279   :  { %v7005_v22 = vpop.f32.mrb[49].mxu1  ;;  %v6986_v23 = vpop.f32.mrb[51].mxu0 }
 0x27a   :  { %v5592_v24 = vadd.f32 %v6984_v20, %v5552_v16  ;;  %v7006_v25 = vadd.f32 %v7005_v22, %v7004_v19  ;;  %v7007_v26 = vpop.f32.mrb[50].mxu1 }
 0x27b   :  { %v7008_v27 = vpop.f32.mrb[51].mxu1 }
 0x27c   :  { %v5632_v28 = vadd.f32 %v7006_v25, %v5592_v24 }
 0x296   :  { %v7026_v29 = vpop.f32.mrb[52].mxu0 }
 0x297   :  { %v7027_v30 = vpop.f32.mrb[53].mxu0 }
 0x298   :  { %v7048_v31 = vpop.f32.mrb[52].mxu1  ;;  %v7028_v32 = vadd.f32 %v7027_v30, %v7026_v29  ;;  %v7029_v33 = vpop.f32.mrb[54].mxu0 }
 0x299   :  { %v7049_v34 = vpop.f32.mrb[53].mxu1  ;;  %v7030_v35 = vpop.f32.mrb[55].mxu0 }
 0x29a   :  { %v5672_v36 = vadd.f32 %v7028_v32, %v5632_v28  ;;  %v7050_v37 = vadd.f32 %v7049_v34, %v7048_v31  ;;  %v7051_v38 = vpop.f32.mrb[54].mxu1 }
 0x29b   :  { %v7052_v39 = vpop.f32.mrb[55].mxu1 }
 0x29c   :  { %v5712_v40 = vadd.f32 %v7050_v37, %v5672_v36 }
 0x2b6   :  { %v7070_v42 = vpop.f32.mrb[56].mxu0 }
 0x2b7   :  { %v7071_v43 = vpop.f32.mrb[57].mxu0 }
 0x2b8   :  { %v7092_v44 = vpop.f32.mrb[56].mxu1  ;;  %v7072_v45 = vadd.f32 %v7071_v43, %v7070_v42  ;;  %v7073_v46 = vpop.f32.mrb[58].mxu0 }
 0x2b9   :  { %v7093_v47 = vpop.f32.mrb[57].mxu1  ;;  %v7074_v48 = vpop.f32.mrb[59].mxu0 }
 0x2ba   :  { %v5752_v49 = vadd.f32 %v7072_v45, %v5712_v40  ;;  %v7094_v50 = vadd.f32 %v7093_v47, %v7092_v44  ;;  %v7095_v51 = vpop.f32.mrb[58].mxu1 }
 0x2bb   :  { %v7096_v52 = vpop.f32.mrb[59].mxu1 }
 0x2bc   :  { %v5792_v53 = vadd.f32 %v7094_v50, %v5752_v49 }
 0x2d6   :  { %v7114_v41 = vpop.f32.mrb[60].mxu0 }
 0x2d7   :  { %v7115_v54 = vpop.f32.mrb[61].mxu0 }
 0x2d8   :  { %v7136_v55 = vpop.f32.mrb[60].mxu1  ;;  %v7116_v56 = vadd.f32 %v7115_v54, %v7114_v41  ;;  %v7117_v57 = vpop.f32.mrb[62].mxu0 }
 0x2d9   :  { %v7137_v58 = vpop.f32.mrb[61].mxu1  ;;  %v7118_v59 = vpop.f32.mrb[63].mxu0 }
 0x2da   :  { %v5832_v60 = vadd.f32 %v7116_v56, %v5792_v53  ;;  %v7138_v61 = vadd.f32 %v7137_v58, %v7136_v55  ;;  %v7139_v62 = vpop.f32.mrb[62].mxu1 }
 0x2db   :  { %v7140_v63 = vpop.f32.mrb[63].mxu1 }
 0x2dc   :  { %v5872_v0 = vadd.f32 %v7138_v61, %v5832_v60 }
 0x2de   :  { %v5878_v1 = vsel %vm5877_vm0, %v5872_v0, 0.0 }
 0x2df   :  { %5879 = vadd.xlane.f32.xlu0 %v5878_v1 }
 0x36c   :  { %v5880_v2 = vpop.xlane.xlu0 %5879 }
 0x36d   :  { %v5882_v3 = vmul.f32 0.03125, %v5880_v2 }
 0x36f   :  { %v5883_v4 = vsub.f32 %v5872_v0, %v5882_v3 }
 0x371   :  { %v5884_v5 = vmul.f32 %v5883_v4, %v5883_v4 }
 0x373   :  { %v5885_v6 = vsel %vm5877_vm0, %v5884_v5, 0.0 }
 0x374   :  { %5886 = vadd.xlane.f32.xlu0 %v5885_v6 }
 0x401   :  { %v5887_v7 = vpop.xlane.xlu0 %5886 }
 0x402   :  { %v5888_v8 = vmul.f32 0.03125, %v5887_v7 }
 0x404   :  { %v5889_v9 = vadd.f32 1e-05, %v5888_v8 }
 0x406   :  { %7664 = vrsqrt.f32 %v5889_v9 }
 0x410   :  { %v7665_v10 = vpop.eup %7664 }
 0x411   :  { %v5891_v12 = vmul.f32 %v7665_v10, %v5883_v4 }
 0x413   :  { %v5899_v14 = vmul.f32 %v6436_v11, %v5891_v12 }
 0x415   :  { %v5907_v15 = vadd.f32 %v6437_v13, %v5899_v14 }
 0x417   :  { %5908 = vst.msk [vmem:[#allocation2] sm:$0x3] %vm5877_vm0, %v5907_v15 }
 0x418   :  { %7677 = shalt.err (!%p7674_p4)
}
 0x419   :  { %s7678_s18 = scalar_lea.hbm %s9425_s5, 32 }
 0x41a   :  { %p7679_p5 = scmp.ne.s32.totalorder %s9425_s5, %s7678_s18  ;;  %p7682_p6 = scmp.lt.u32.totalorder %s7678_s18, %s9425_s5 }
 0x41c   :  { %p7684_p7 = pnand %p7682_p6, %p7679_p5 }
 0x41e   :  { %7687 = shalt.err (!%p7684_p7)
}
 0x41f   :  { %5918 = dma.vmem_to_hbm [thread:$0]  %s5916_s15, 32, %s9425_s5, [#allocation3]  }
 0x420   :  { %7688 = dma.done.wait [#allocation3], 32  }
 0x421   :  { %7689 = vsyncadd [#allocation3], 4294967264 }
 0x422   :  { %5922 = vsyncpa [#allocation3], 1 }

</bundles_post_ra>
